<compile_context>
chip_gen: v7x
topology: tpu7x:2x2x1
jax: 0.10.0
libtpu: 0.0.40
codegen_flags: <defaults>
</compile_context>

<pallas_src>
import math
from functools import partial

import jax
import jax.numpy as jnp
from jax.experimental import pallas as pl
from jax.experimental.pallas import tpu as pltpu


# ------------------------------ small helpers ------------------------------

def _round_up(x, m):
    return ((x + m - 1) // m) * m


def _divisor_tile(dim, preferred, quantum):
    """Largest multiple of `quantum` <= preferred dividing `dim`; falls back to
    the full dim (always a legal block).  All padded dims here are multiples of
    128, so the fallback never produces a huge tile."""
    if dim <= preferred:
        return dim
    t = (preferred // quantum) * quantum
    while t >= quantum:
        if dim % t == 0:
            return t
        t -= quantum
    return dim


def _cparams(dims):
    # No vmem_limit override: per-kernel working sets are a few MiB, well under
    # the default scoped limits; a 64 MiB blanket limit equals v7x physical VMEM.
    return pltpu.CompilerParams(dimension_semantics=dims)


def _erf_approx(x):
    # Abramowitz & Stegun 7.1.26 (max abs err ~1.5e-7): exact-GELU fidelity
    # using only exp / mul / add (guaranteed to lower in Mosaic).
    p = 0.3275911
    a1, a2, a3, a4, a5 = 0.254829592, -0.284496736, 1.421413741, -1.453152027, 1.061405429
    ax = jnp.abs(x)
    t = 1.0 / (1.0 + p * ax)
    poly = ((((a5 * t + a4) * t + a3) * t + a2) * t + a1) * t
    y = 1.0 - poly * jnp.exp(-ax * ax)
    return jnp.where(x >= 0, y, -y)


def _gelu_exact(x):
    # PyTorch activation='gelu' (approximate='none'): 0.5*x*(1+erf(x/sqrt(2)))
    return 0.5 * x * (1.0 + _erf_approx(x * (1.0 / math.sqrt(2.0))))


def _ln_body(x, g, b, eps):
    mu = jnp.mean(x, axis=-1, keepdims=True)
    var = jnp.mean(jnp.square(x - mu), axis=-1, keepdims=True)
    return (x - mu) * jax.lax.rsqrt(var + eps) * g + b


def _rep_lanes(stat, width):
    """Broadcast a lane-replicated (rows, 128) f32 statistic to (rows, width)."""
    if width == stat.shape[-1]:
        return stat
    if width % 128 == 0:
        return jnp.tile(stat, (1, width // 128))
    return stat[:, :1]                      # fallback: single lane broadcast


# --------------------- generic tiled matmul (+bias/+act) ---------------------

def matmul_bias_kernel(x_ref, w_ref, b_ref, o_ref, acc_ref, *, activation):
    k = pl.program_id(2)

    @pl.when(k == 0)
    def _():
        acc_ref[...] = jnp.zeros(acc_ref.shape, acc_ref.dtype)

    acc_ref[...] += jnp.dot(x_ref[...], w_ref[...],
                            preferred_element_type=jnp.float32)

    @pl.when(k == pl.num_programs(2) - 1)
    def _():
        acc = acc_ref[...] + b_ref[...]
        if activation == "gelu":
            acc = _gelu_exact(acc)
        o_ref[...] = acc.astype(o_ref.dtype)


def matmul_nobias_kernel(x_ref, w_ref, o_ref, acc_ref, *, activation):
    k = pl.program_id(2)

    @pl.when(k == 0)
    def _():
        acc_ref[...] = jnp.zeros(acc_ref.shape, acc_ref.dtype)

    acc_ref[...] += jnp.dot(x_ref[...], w_ref[...],
                            preferred_element_type=jnp.float32)

    @pl.when(k == pl.num_programs(2) - 1)
    def _():
        acc = acc_ref[...]
        if activation == "gelu":
            acc = _gelu_exact(acc)
        o_ref[...] = acc.astype(o_ref.dtype)


def matmul(x, w, bias=None, activation=None, out_dtype=jnp.bfloat16,
           tm=512, tn=512, tk=512):
    """x:(M,K) bf16, w:(K,N) bf16, bias:(1,N) f32 or None -> (M,N) out_dtype.
    TM=512 clears the v7x weight-stream crossover; raise to 768-1024 on v6e."""
    M, K = x.shape
    K2, N = w.shape
    assert K == K2
    TM = _divisor_tile(M, tm, 8)
    TN = _divisor_tile(N, tn, 128)
    TK = _divisor_tile(K, tk, 128)
    grid = (M // TM, N // TN, K // TK)

    x_spec = pl.BlockSpec((TM, TK), lambda i, j, k: (i, k))
    w_spec = pl.BlockSpec((TK, TN), lambda i, j, k: (k, j))
    o_spec = pl.BlockSpec((TM, TN), lambda i, j, k: (i, j))

    if bias is not None:
        kern = partial(matmul_bias_kernel, activation=activation)
        in_specs = [x_spec, w_spec, pl.BlockSpec((1, TN), lambda i, j, k: (0, j))]
        args = (x, w, bias)
    else:
        kern = partial(matmul_nobias_kernel, activation=activation)
        in_specs = [x_spec, w_spec]
        args = (x, w)

    return pl.pallas_call(
        kern,
        out_shape=jax.ShapeDtypeStruct((M, N), out_dtype),
        grid_spec=pltpu.PrefetchScalarGridSpec(
            num_scalar_prefetch=0, grid=grid,
            in_specs=in_specs, out_specs=o_spec,
            scratch_shapes=[pltpu.VMEM((TM, TN), jnp.float32)]),
        compiler_params=_cparams(("parallel", "parallel", "arbitrary")),
    )(*args)


# ------------- matmul with fused bias + residual-add + LayerNorm -------------
# Used for the W_O and W2 projections (N == d_model, full-width output tile),
# replacing the standalone add+LayerNorm passes of the previous version.

def matmul_res_ln_kernel(x_ref, w_ref, b_ref, r_ref, g_ref, be_ref, o_ref,
                         acc_ref, *, eps):
    k = pl.program_id(1)

    @pl.when(k == 0)
    def _():
        acc_ref[...] = jnp.zeros(acc_ref.shape, acc_ref.dtype)

    acc_ref[...] += jnp.dot(x_ref[...], w_ref[...],
                            preferred_element_type=jnp.float32)

    @pl.when(k == pl.num_programs(1) - 1)
    def _():
        y = acc_ref[...] + b_ref[...] + r_ref[...].astype(jnp.float32)
        y = _ln_body(y, g_ref[...], be_ref[...], eps)
        o_ref[...] = y.astype(o_ref.dtype)


def matmul_residual_ln(x, w, bias, residual, gamma, beta,
                       out_dtype=jnp.bfloat16, tm=512, tk=512, eps=1e-5):
    M, K = x.shape
    K2, D = w.shape
    assert K == K2 and residual.shape == (M, D)
    TM = _divisor_tile(M, tm, 8)
    TK = _divisor_tile(K, tk, 128)
    grid = (M // TM, K // TK)

    return pl.pallas_call(
        partial(matmul_res_ln_kernel, eps=eps),
        out_shape=jax.ShapeDtypeStruct((M, D), out_dtype),
        grid_spec=pltpu.PrefetchScalarGridSpec(
            num_scalar_prefetch=0, grid=grid,
            in_specs=[
                pl.BlockSpec((TM, TK), lambda i, k: (i, k)),
                pl.BlockSpec((TK, D), lambda i, k: (k, 0)),
                pl.BlockSpec((1, D), lambda i, k: (0, 0)),
                pl.BlockSpec((TM, D), lambda i, k: (i, 0)),   # residual (fetched once per i)
                pl.BlockSpec((1, D), lambda i, k: (0, 0)),
                pl.BlockSpec((1, D), lambda i, k: (0, 0)),
            ],
            out_specs=pl.BlockSpec((TM, D), lambda i, k: (i, 0)),
            scratch_shapes=[pltpu.VMEM((TM, D), jnp.float32)]),
        compiler_params=_cparams(("parallel", "arbitrary")),
    )(x, w, bias, residual, gamma, beta)


# --------------------------- flash attention kernel ---------------------------
# Inputs are per-head, lane-dense slices of the packed QKV slab (M, 3*H*hdp):
# no XLA-side head transposes.  The 1/sqrt(hd) scale is baked into W_q.

def flash_attn_kernel(q_ref, k_ref, v_ref, o_ref, m_sc, l_sc, acc_sc):
    ki = pl.program_id(3)
    hdp = acc_sc.shape[-1]

    @pl.when(ki == 0)
    def _():
        m_sc[...] = jnp.full(m_sc.shape, -jnp.inf, dtype=m_sc.dtype)
        l_sc[...] = jnp.zeros(l_sc.shape, l_sc.dtype)
        acc_sc[...] = jnp.zeros(acc_sc.shape, acc_sc.dtype)

    # (TQ, hdp) x (TK, hdp) contracted on hdp -> (TQ, TK), f32 on the MXU.
    s = jax.lax.dot_general(q_ref[...], k_ref[...],
                            (((1,), (1,)), ((), ())),
                            preferred_element_type=jnp.float32)
    tk = s.shape[-1]

    m_prev = m_sc[...]                                       # (TQ,128) lane-replicated
    m_cur = jnp.max(s, axis=-1, keepdims=True)               # (TQ,1)
    m_next = jnp.maximum(m_prev, m_cur)                      # (TQ,128)
    alpha = jnp.exp(m_prev - m_next)                         # (TQ,128)

    p = jnp.exp(s - _rep_lanes(m_next, tk))                  # (TQ,TK)

    l_sc[...] = alpha * l_sc[...] + jnp.sum(p, axis=-1, keepdims=True)
    acc_sc[...] = _rep_lanes(alpha, hdp) * acc_sc[...] + jnp.dot(
        p.astype(v_ref.dtype), v_ref[...], preferred_element_type=jnp.float32)
    m_sc[...] = m_next

    @pl.when(ki == pl.num_programs(3) - 1)
    def _():
        inv_l = pl.reciprocal(l_sc[...], approx=True)        # EUP slot, not VALU
        o_ref[...] = (acc_sc[...] * _rep_lanes(inv_l, hdp)).astype(o_ref.dtype)


def flash_attention(qkv, B, S, H, hdp, tq=256, tkv=512):
    """qkv: (B*S, 3*H*hdp) bf16, packed [Q_h | K_h | V_h] (each hdp wide, head-major).
    Returns context in (B*S, H*hdp) layout (consumed directly by padded W_O)."""
    M, W = qkv.shape
    assert M == B * S and W == 3 * H * hdp
    TQ = _divisor_tile(S, tq, 8)
    TK = _divisor_tile(S, tkv, 8)
    nq, nk = S // TQ, S // TK
    grid = (B, H, nq, nk)

    q_spec = pl.BlockSpec((TQ, hdp), lambda b, h, qi, ki: (b * nq + qi, h))
    k_spec = pl.BlockSpec((TK, hdp), lambda b, h, qi, ki: (b * nk + ki, H + h))
    v_spec = pl.BlockSpec((TK, hdp), lambda b, h, qi, ki: (b * nk + ki, 2 * H + h))
    o_spec = pl.BlockSpec((TQ, hdp), lambda b, h, qi, ki: (b * nq + qi, h))

    return pl.pallas_call(
        flash_attn_kernel,
        out_shape=jax.ShapeDtypeStruct((M, H * hdp), qkv.dtype),
        grid_spec=pltpu.PrefetchScalarGridSpec(
            num_scalar_prefetch=0, grid=grid,
            in_specs=[q_spec, k_spec, v_spec],
            out_specs=o_spec,
            scratch_shapes=[
                pltpu.VMEM((TQ, 128), jnp.float32),    # running max, lane-replicated
                pltpu.VMEM((TQ, 128), jnp.float32),    # running denom, lane-replicated
                pltpu.VMEM((TQ, hdp), jnp.float32),    # running numerator
            ]),
        compiler_params=_cparams(("parallel", "parallel", "parallel", "arbitrary")),
    )(qkv, qkv, qkv)


# ------------------------------ final LayerNorm ------------------------------

def ln_kernel(x_ref, g_ref, b_ref, o_ref, *, eps):
    y = _ln_body(x_ref[...].astype(jnp.float32), g_ref[...], b_ref[...], eps)
    o_ref[...] = y.astype(o_ref.dtype)


def layer_norm(x, g, b, tm=1024, eps=1e-5):
    M, D = x.shape
    TM = _divisor_tile(M, tm, 8)
    row_spec = pl.BlockSpec((TM, D), lambda i: (i, 0))
    vec_spec = pl.BlockSpec((1, D), lambda i: (0, 0))
    return pl.pallas_call(
        partial(ln_kernel, eps=eps),
        out_shape=jax.ShapeDtypeStruct((M, D), x.dtype),
        grid_spec=pltpu.PrefetchScalarGridSpec(
            num_scalar_prefetch=0, grid=(M // TM,),
            in_specs=[row_spec, vec_spec, vec_spec],
            out_specs=row_spec),
        compiler_params=_cparams(("parallel",)),
    )(x, g, b)


# ------------------------------- model glue -------------------------------

def encoder_layer(x, lp, B, S, H, hdp):
    """x: (B*S, D) bf16 -> (B*S, D) bf16.  Post-norm TransformerEncoderLayer."""
    # Fused QKV projection into the padded per-head layout (M, 3*H*hdp).
    qkv = matmul(x, lp['w_qkv'], lp['b_qkv'])
    # Attention straight from the slab; context stays in (M, H*hdp).
    ctx = flash_attention(qkv, B, S, H, hdp)
    # W_O + residual(x) + LayerNorm fused in one pass.
    x1 = matmul_residual_ln(ctx, lp['w_o'], lp['b_o'], x, lp['ln1_g'], lp['ln1_b'])
    # FFN: exact GELU fused into the first matmul epilogue.
    h = matmul(x1, lp['w1'], lp['b1'], activation='gelu')
    # W2 + residual(x1) + LayerNorm fused.
    return matmul_residual_ln(h, lp['w2'], lp['b2'], x1, lp['ln2_g'], lp['ln2_b'])


def transformer_lm_forward(idx, kparams, cfg):
    B, S = idx.shape
    D, V, H = cfg['d_model'], cfg['vocab_size'], cfg['n_heads']
    hdp = _round_up(D // H, 128)

    x = jnp.take(kparams['token_emb'], idx, axis=0)          # (B,S,D) f32 gather
    x = x + kparams['pe'][:S][None, :, :]                    # positional encoding
    x = x.reshape(B * S, D).astype(jnp.bfloat16)             # bf16 MXU inputs

    for lp in kparams['layers']:
        x = encoder_layer(x, lp, B, S, H, hdp)

    xn = layer_norm(x, kparams['ln_f_g'], kparams['ln_f_b'])
    # LM head: no bias, f32 logits to match the PyTorch reference.
    # (On v5e, bf16 logits would halve the dominant output-write stream.)
    logits = matmul(xn, kparams['w_head'], bias=None, out_dtype=jnp.float32)
    if logits.shape[1] != V:                                  # drop vocab padding
        logits = logits[:, :V]
    return logits.reshape(B, S, V)


# --------------------------- parameter construction ---------------------------

def make_positional_encoding(max_len, d_model):
    assert d_model % 2 == 0
    position = jnp.arange(max_len, dtype=jnp.float32)[:, None]
    div_term = jnp.exp(jnp.arange(0, d_model, 2, dtype=jnp.float32)
                       * (-math.log(10000.0) / d_model))
    pe = jnp.zeros((max_len, d_model), dtype=jnp.float32)
    pe = pe.at[:, 0::2].set(jnp.sin(position * div_term))
    pe = pe.at[:, 1::2].set(jnp.cos(position * div_term))
    return pe


def init_params(key, cfg):
    """Standard (PyTorch-like) layout, f32.  A real checkpoint would map the
    same way: in_proj_weight.T -> w_qkv, out_proj.weight.T -> w_o, etc."""
    V, D, Dff = cfg['vocab_size'], cfg['d_model'], cfg['d_ff']
    L, H = cfg['num_layers'], cfg['n_heads']
    assert D % H == 0 and D % 128 == 0
    std = 0.02
    keys = iter(jax.random.split(key, 4 + 12 * L))

    def nrm(shape, s=std):
        return s * jax.random.normal(next(keys), shape, dtype=jnp.float32)

    token_emb = nrm((V, D)).at[cfg['pad_token_id']].set(0.0)  # padding_idx row = 0
    layers = []
    for _ in range(L):
        layers.append(dict(
            w_qkv=nrm((D, 3 * D)), b_qkv=nrm((3 * D,), 0.01),
            w_o=nrm((D, D)), b_o=nrm((D,), 0.01),
            ln1_g=1.0 + nrm((D,), 0.01), ln1_b=nrm((D,), 0.01),
            w1=nrm((D, Dff)), b1=nrm((Dff,), 0.01),
            w2=nrm((Dff, D)), b2=nrm((D,), 0.01),
            ln2_g=1.0 + nrm((D,), 0.01), ln2_b=nrm((D,), 0.01)))
    ln_f_g = 1.0 + nrm((D,), 0.01)
    ln_f_b = nrm((D,), 0.01)
    w_head = nrm((D, V))
    return dict(token_emb=token_emb, pe=make_positional_encoding(cfg['max_seq_len'], D),
                layers=layers, ln_f_g=ln_f_g, ln_f_b=ln_f_b, w_head=w_head)


def pack_params(p, cfg):
    """Convert to kernel layout: per-head dim zero-padded to 128 (lane-dense
    attention blocks), 1/sqrt(hd) baked into W_q/b_q, d_ff and vocab padded to
    multiples of 128, weights bf16, biases/LN params f32 rows."""
    D, H = cfg['d_model'], cfg['n_heads']
    hd = D // H
    hdp = _round_up(hd, 128)
    Dff, Dffp = cfg['d_ff'], _round_up(cfg['d_ff'], 128)
    V, Vp = cfg['vocab_size'], _round_up(cfg['vocab_size'], 128)
    scale = 1.0 / math.sqrt(hd)

    def pad_axis(a, axis, new):
        pad = [(0, 0)] * a.ndim
        pad[axis] = (0, new - a.shape[axis])
        return jnp.pad(a, pad)

    layers = []
    for lp in p['layers']:
        w_qkv = lp['w_qkv'].reshape(D, 3, H, hd)
        w_qkv = w_qkv.at[:, 0].multiply(scale)                # bake attention scale
        w_qkv = pad_axis(w_qkv, 3, hdp).reshape(D, 3 * H * hdp)
        b_qkv = lp['b_qkv'].reshape(3, H, hd)
        b_qkv = b_qkv.at[0].multiply(scale)
        b_qkv = pad_axis(b_qkv, 2, hdp).reshape(1, 3 * H * hdp)
        w_o = pad_axis(lp['w_o'].reshape(H, hd, D), 1, hdp).reshape(H * hdp, D)
        w1 = pad_axis(lp['w1'], 1, Dffp)
        b1 = pad_axis(lp['b1'], 0, Dffp).reshape(1, Dffp)
        w2 = pad_axis(lp['w2'], 0, Dffp)
        layers.append(dict(
            w_qkv=w_qkv.astype(jnp.bfloat16), b_qkv=b_qkv.astype(jnp.float32),
            w_o=w_o.astype(jnp.bfloat16), b_o=lp['b_o'].reshape(1, D).astype(jnp.float32),
            ln1_g=lp['ln1_g'].reshape(1, D).astype(jnp.float32),
            ln1_b=lp['ln1_b'].reshape(1, D).astype(jnp.float32),
            w1=w1.astype(jnp.bfloat16), b1=b1.astype(jnp.float32),
            w2=w2.astype(jnp.bfloat16), b2=lp['b2'].reshape(1, D).astype(jnp.float32),
            ln2_g=lp['ln2_g'].reshape(1, D).astype(jnp.float32),
            ln2_b=lp['ln2_b'].reshape(1, D).astype(jnp.float32)))
    return dict(
        token_emb=p['token_emb'], pe=p['pe'], layers=layers,
        ln_f_g=p['ln_f_g'].reshape(1, D).astype(jnp.float32),
        ln_f_b=p['ln_f_b'].reshape(1, D).astype(jnp.float32),
        w_head=pad_axis(p['w_head'], 1, Vp).astype(jnp.bfloat16))


# --------------------------- pure-JAX f32 reference ---------------------------

def reference_forward(idx, p, cfg):
    D, H = cfg['d_model'], cfg['n_heads']
    hd = D // H
    B, S = idx.shape

    def ln(x, g, b, eps=1e-5):
        mu = x.mean(-1, keepdims=True)
        var = ((x - mu) ** 2).mean(-1, keepdims=True)
        return (x - mu) / jnp.sqrt(var + eps) * g + b

    x = p['token_emb'][idx] + p['pe'][:S][None]
    for lp in p['layers']:
        qkv = x @ lp['w_qkv'] + lp['b_qkv']
        q, k, v = jnp.split(qkv, 3, axis=-1)
        q = q.reshape(B, S, H, hd).transpose(0, 2, 1, 3)
        k = k.reshape(B, S, H, hd).transpose(0, 2, 1, 3)
        v = v.reshape(B, S, H, hd).transpose(0, 2, 1, 3)
        s = (q @ jnp.swapaxes(k, -1, -2)) / math.sqrt(hd)
        ctx = (jax.nn.softmax(s, axis=-1) @ v).transpose(0, 2, 1, 3).reshape(B, S, D)
        x = ln(x + ctx @ lp['w_o'] + lp['b_o'], lp['ln1_g'], lp['ln1_b'])
        h = x @ lp['w1'] + lp['b1']
        h = 0.5 * h * (1.0 + jax.lax.erf(h / math.sqrt(2.0)))   # exact GELU
        x = ln(x + h @ lp['w2'] + lp['b2'], lp['ln2_g'], lp['ln2_b'])
    x = ln(x, p['ln_f_g'], p['ln_f_b'])
    return x @ p['w_head']


# --------------------------------- main ---------------------------------

if __name__ == "__main__":
    cfg = dict(vocab_size=256, max_seq_len=128, d_model=128, n_heads=4,
               num_layers=2, d_ff=256, dropout=0.1, pad_token_id=0)

    key = jax.random.PRNGKey(0)
    k_param, k_idx = jax.random.split(key)
    params = init_params(k_param, cfg)        # PyTorch-like layout, f32
    kparams = pack_params(params, cfg)        # padded / bf16 kernel layout

    B, S = 2, 128
    idx = jax.random.randint(k_idx, (B, S), 0, cfg['vocab_size'], dtype=jnp.int32)

    fwd = jax.jit(lambda i, p: transformer_lm_forward(i, p, cfg))
    logits = jax.block_until_ready(fwd(idx, kparams))

    assert logits.shape == (B, S, cfg['vocab_size']), logits.shape
    assert bool(jnp.all(jnp.isfinite(logits)))

    # Loose-tolerance check against the f32 reference (bf16 activations +
    # approx reciprocal in the softmax denominator).
    ref = reference_forward(idx, params, cfg)
    err = float(jnp.max(jnp.abs(logits - ref)))
    tol = 0.05 * (1.0 + float(jnp.max(jnp.abs(ref))))
    assert err <= tol, f"mismatch vs reference: max_abs_err={err}, tol={tol}"

    # TODO(synk): generate() (temperature / top-k / top-p multinomial sampling)
    # is host-side decoding logic and is intentionally not implemented as a kernel.
    print("KERNEL_OK")
</pallas_src>

<mosaic_0001>
module attributes {stable_mosaic.version = 11 : i64} {
  func.func @matmul_bias_kernel(%arg0: i32, %arg1: i32, %arg2: i32, %arg3: memref<256x128xbf16, #tpu.memory_space<vmem>>, %arg4: memref<128x512xbf16, #tpu.memory_space<vmem>>, %arg5: memref<1x512xf32, #tpu.memory_space<vmem>>, %arg6: memref<256x512xbf16, #tpu.memory_space<vmem>>, %arg7: memref<256x512xf32, #tpu.memory_space<vmem>>) attributes {dimension_semantics = [#tpu.dimension_semantics<parallel>, #tpu.dimension_semantics<parallel>, #tpu.dimension_semantics<arbitrary>], iteration_bounds = array<i64: 1, 3, 1>, scalar_prefetch = 0 : i64, scratch_operands = 1 : i64, tpu.core_type = #tpu.core_type<tc>, window_params = [{transform_indices = @transform_0, window_bounds = array<i64: 256, 128>}, {transform_indices = @transform_1, window_bounds = array<i64: 128, 512>}, {transform_indices = @transform_2, window_bounds = array<i64: 1, 512>}, {transform_indices = @transform_3, window_bounds = array<i64: 256, 512>}]} {
    %c0_i32 = arith.constant 0 : i32
    %0 = arith.cmpi eq, %arg2, %c0_i32 : i32
    %1 = arith.extui %0 : i1 to i32
    %c0_i32_0 = arith.constant 0 : i32
    %2 = arith.cmpi ne, %1, %c0_i32_0 : i32
    scf.if %2 {
      %cst_10 = arith.constant 0.000000e+00 : f32
      %12 = vector.broadcast %cst_10 : f32 to vector<256x512xf32>
      %c0_11 = arith.constant 0 : index
      %c0_12 = arith.constant 0 : index
      %13 = vector.load %arg7[%c0_11, %c0_12] : memref<256x512xf32, #tpu.memory_space<vmem>>, vector<256x512xf32>
      tpu.vector_store %arg7[%c0_11, %c0_12], %12 {strides = array<i32>} : memref<256x512xf32, #tpu.memory_space<vmem>>, vector<256x512xf32>,
    } else {
    }
    %c0 = arith.constant 0 : index
    %c0_1 = arith.constant 0 : index
    %3 = vector.load %arg7[%c0, %c0_1] : memref<256x512xf32, #tpu.memory_space<vmem>>, vector<256x512xf32>
    %c0_2 = arith.constant 0 : index
    %c0_3 = arith.constant 0 : index
    %4 = vector.load %arg3[%c0_2, %c0_3] : memref<256x128xbf16, #tpu.memory_space<vmem>>, vector<256x128xbf16>
    %c0_4 = arith.constant 0 : index
    %c0_5 = arith.constant 0 : index
    %5 = vector.load %arg4[%c0_4, %c0_5] : memref<128x512xbf16, #tpu.memory_space<vmem>>, vector<128x512xbf16>
    %cst = arith.constant dense<0.000000e+00> : vector<256x512xf32>
    %6 = tpu.matmul %4, %5, %cst {dimension_numbers = #tpu.dot_dimension_numbers<[1], [0], [0], [1], [0, 0, 1, 1], [], []>} : vector<256x128xbf16>, vector<128x512xbf16>, vector<256x512xf32> -> vector<256x512xf32>
    %7 = arith.addf %3, %6 : vector<256x512xf32>
    %c0_6 = arith.constant 0 : index
    %c0_7 = arith.constant 0 : index
    %8 = vector.load %arg7[%c0_6, %c0_7] : memref<256x512xf32, #tpu.memory_space<vmem>>, vector<256x512xf32>
    tpu.vector_store %arg7[%c0_6, %c0_7], %7 {strides = array<i32>} : memref<256x512xf32, #tpu.memory_space<vmem>>, vector<256x512xf32>,
    %c0_i32_8 = arith.constant 0 : i32
    %9 = arith.cmpi eq, %arg2, %c0_i32_8 : i32
    %10 = arith.extui %9 : i1 to i32
    %c0_i32_9 = arith.constant 0 : i32
    %11 = arith.cmpi ne, %10, %c0_i32_9 : i32
    scf.if %11 {
      %c0_10 = arith.constant 0 : index
      %c0_11 = arith.constant 0 : index
      %12 = vector.load %arg7[%c0_10, %c0_11] : memref<256x512xf32, #tpu.memory_space<vmem>>, vector<256x512xf32>
      %c0_12 = arith.constant 0 : index
      %c0_13 = arith.constant 0 : index
      %13 = vector.load %arg5[%c0_12, %c0_13] : memref<1x512xf32, #tpu.memory_space<vmem>>, vector<1x512xf32>
      %14 = vector.broadcast %13 : vector<1x512xf32> to vector<256x512xf32>
      %15 = arith.addf %12, %14 : vector<256x512xf32>
      %16 = arith.truncf %15 : vector<256x512xf32> to vector<256x512xbf16>
      %c0_14 = arith.constant 0 : index
      %c0_15 = arith.constant 0 : index
      %17 = vector.load %arg6[%c0_14, %c0_15] : memref<256x512xbf16, #tpu.memory_space<vmem>>, vector<256x512xbf16>
      tpu.vector_store %arg6[%c0_14, %c0_15], %16 {strides = array<i32>} : memref<256x512xbf16, #tpu.memory_space<vmem>>, vector<256x512xbf16>,
    } else {
    }
    return
  }
  func.func @transform_0(%arg0: i32, %arg1: i32, %arg2: i32) -> (i32, i32) {
    %c0_i32 = arith.constant 0 : i32
    return %arg0, %arg2 : i32, i32
  }
  func.func @transform_1(%arg0: i32, %arg1: i32, %arg2: i32) -> (i32, i32) {
    %c0_i32 = arith.constant 0 : i32
    return %arg2, %arg1 : i32, i32
  }
  func.func @transform_2(%arg0: i32, %arg1: i32, %arg2: i32) -> (i32, i32) {
    %c0_i32 = arith.constant 0 : i32
    %c0_i32_0 = arith.constant 0 : i32
    return %c0_i32, %arg1 : i32, i32
  }
  func.func @transform_3(%arg0: i32, %arg1: i32, %arg2: i32) -> (i32, i32) {
    %c0_i32 = arith.constant 0 : i32
    return %arg0, %arg1 : i32, i32
  }
}

module attributes {stable_mosaic.version = 11 : i64} {
  func.func @flash_attn_kernel(%arg0: i32, %arg1: i32, %arg2: i32, %arg3: i32, %arg4: memref<128x128xbf16, #tpu.memory_space<vmem>>, %arg5: memref<128x128xbf16, #tpu.memory_space<vmem>>, %arg6: memref<128x128xbf16, #tpu.memory_space<vmem>>, %arg7: memref<128x128xbf16, #tpu.memory_space<vmem>>, %arg8: memref<128x128xf32, #tpu.memory_space<vmem>>, %arg9: memref<128x128xf32, #tpu.memory_space<vmem>>, %arg10: memref<128x128xf32, #tpu.memory_space<vmem>>) attributes {dimension_semantics = [#tpu.dimension_semantics<parallel>, #tpu.dimension_semantics<parallel>, #tpu.dimension_semantics<parallel>, #tpu.dimension_semantics<arbitrary>], iteration_bounds = array<i64: 2, 4, 1, 1>, scalar_prefetch = 0 : i64, scratch_operands = 3 : i64, tpu.core_type = #tpu.core_type<tc>, window_params = [{transform_indices = @transform_0, window_bounds = array<i64: 128, 128>}, {transform_indices = @transform_1, window_bounds = array<i64: 128, 128>}, {transform_indices = @transform_2, window_bounds = array<i64: 128, 128>}, {transform_indices = @transform_3, window_bounds = array<i64: 128, 128>}]} {
    %c0_i32 = arith.constant 0 : i32
    %0 = arith.cmpi eq, %arg3, %c0_i32 : i32
    %1 = arith.extui %0 : i1 to i32
    %c0_i32_0 = arith.constant 0 : i32
    %2 = arith.cmpi ne, %1, %c0_i32_0 : i32
    scf.if %2 {
      %cst_23 = arith.constant 0xFF800000 : f32
      %33 = vector.broadcast %cst_23 : f32 to vector<128x128xf32>
      %c0_24 = arith.constant 0 : index
      %c0_25 = arith.constant 0 : index
      %34 = vector.load %arg8[%c0_24, %c0_25] : memref<128x128xf32, #tpu.memory_space<vmem>>, vector<128x128xf32>
      tpu.vector_store %arg8[%c0_24, %c0_25], %33 {strides = array<i32>} : memref<128x128xf32, #tpu.memory_space<vmem>>, vector<128x128xf32>,
      %cst_26 = arith.constant 0.000000e+00 : f32
      %35 = vector.broadcast %cst_26 : f32 to vector<128x128xf32>
      %c0_27 = arith.constant 0 : index
      %c0_28 = arith.constant 0 : index
      %36 = vector.load %arg9[%c0_27, %c0_28] : memref<128x128xf32, #tpu.memory_space<vmem>>, vector<128x128xf32>
      tpu.vector_store %arg9[%c0_27, %c0_28], %35 {strides = array<i32>} : memref<128x128xf32, #tpu.memory_space<vmem>>, vector<128x128xf32>,
      %cst_29 = arith.constant 0.000000e+00 : f32
      %37 = vector.broadcast %cst_29 : f32 to vector<128x128xf32>
      %c0_30 = arith.constant 0 : index
      %c0_31 = arith.constant 0 : index
      %38 = vector.load %arg10[%c0_30, %c0_31] : memref<128x128xf32, #tpu.memory_space<vmem>>, vector<128x128xf32>
      tpu.vector_store %arg10[%c0_30, %c0_31], %37 {strides = array<i32>} : memref<128x128xf32, #tpu.memory_space<vmem>>, vector<128x128xf32>,
    } else {
    }
    %c0 = arith.constant 0 : index
    %c0_1 = arith.constant 0 : index
    %3 = vector.load %arg4[%c0, %c0_1] : memref<128x128xbf16, #tpu.memory_space<vmem>>, vector<128x128xbf16>
    %c0_2 = arith.constant 0 : index
    %c0_3 = arith.constant 0 : index
    %4 = vector.load %arg5[%c0_2, %c0_3] : memref<128x128xbf16, #tpu.memory_space<vmem>>, vector<128x128xbf16>
    %cst = arith.constant dense<0.000000e+00> : vector<128x128xf32>
    %5 = tpu.matmul %3, %4, %cst {dimension_numbers = #tpu.dot_dimension_numbers<[1], [1], [0], [0], [0, 0, 1, 0], [], []>} : vector<128x128xbf16>, vector<128x128xbf16>, vector<128x128xf32> -> vector<128x128xf32>
    %c0_4 = arith.constant 0 : index
    %c0_5 = arith.constant 0 : index
    %6 = vector.load %arg8[%c0_4, %c0_5] : memref<128x128xf32, #tpu.memory_space<vmem>>, vector<128x128xf32>
    %cst_6 = arith.constant dense<0xFF800000> : vector<128xf32>
    %7 = vector.multi_reduction <maximumf>, %5, %cst_6 [1] : vector<128x128xf32> to vector<128xf32>
    %8 = vector.shape_cast %7 : vector<128xf32> to vector<128x1xf32>
    %9 = vector.broadcast %8 : vector<128x1xf32> to vector<128x128xf32>
    %10 = arith.maximumf %6, %9 : vector<128x128xf32>
    %11 = arith.subf %6, %10 : vector<128x128xf32>
    %12 = math.exp %11 : vector<128x128xf32>
    %13 = arith.subf %5, %10 : vector<128x128xf32>
    %14 = math.exp %13 : vector<128x128xf32>
    %c0_7 = arith.constant 0 : index
    %c0_8 = arith.constant 0 : index
    %15 = vector.load %arg9[%c0_7, %c0_8] : memref<128x128xf32, #tpu.memory_space<vmem>>, vector<128x128xf32>
    %16 = arith.mulf %12, %15 : vector<128x128xf32>
    %cst_9 = arith.constant dense<0.000000e+00> : vector<128xf32>
    %17 = vector.multi_reduction <add>, %14, %cst_9 [1] : vector<128x128xf32> to vector<128xf32>
    %18 = vector.shape_cast %17 : vector<128xf32> to vector<128x1xf32>
    %19 = vector.broadcast %18 : vector<128x1xf32> to vector<128x128xf32>
    %20 = arith.addf %16, %19 : vector<128x128xf32>
    %c0_10 = arith.constant 0 : index
    %c0_11 = arith.constant 0 : index
    %21 = vector.load %arg9[%c0_10, %c0_11] : memref<128x128xf32, #tpu.memory_space<vmem>>, vector<128x128xf32>
    tpu.vector_store %arg9[%c0_10, %c0_11], %20 {strides = array<i32>} : memref<128x128xf32, #tpu.memory_space<vmem>>, vector<128x128xf32>,
    %c0_12 = arith.constant 0 : index
    %c0_13 = arith.constant 0 : index
    %22 = vector.load %arg10[%c0_12, %c0_13] : memref<128x128xf32, #tpu.memory_space<vmem>>, vector<128x128xf32>
    %23 = arith.mulf %12, %22 : vector<128x128xf32>
    %24 = arith.truncf %14 : vector<128x128xf32> to vector<128x128xbf16>
    %c0_14 = arith.constant 0 : index
    %c0_15 = arith.constant 0 : index
    %25 = vector.load %arg6[%c0_14, %c0_15] : memref<128x128xbf16, #tpu.memory_space<vmem>>, vector<128x128xbf16>
    %cst_16 = arith.constant dense<0.000000e+00> : vector<128x128xf32>
    %26 = tpu.matmul %24, %25, %cst_16 {dimension_numbers = #tpu.dot_dimension_numbers<[1], [0], [0], [1], [0, 0, 1, 1], [], []>} : vector<128x128xbf16>, vector<128x128xbf16>, vector<128x128xf32> -> vector<128x128xf32>
    %27 = arith.addf %23, %26 : vector<128x128xf32>
    %c0_17 = arith.constant 0 : index
    %c0_18 = arith.constant 0 : index
    %28 = vector.load %arg10[%c0_17, %c0_18] : memref<128x128xf32, #tpu.memory_space<vmem>>, vector<128x128xf32>
    tpu.vector_store %arg10[%c0_17, %c0_18], %27 {strides = array<i32>} : memref<128x128xf32, #tpu.memory_space<vmem>>, vector<128x128xf32>,
    %c0_19 = arith.constant 0 : index
    %c0_20 = arith.constant 0 : index
    %29 = vector.load %arg8[%c0_19, %c0_20] : memref<128x128xf32, #tpu.memory_space<vmem>>, vector<128x128xf32>
    tpu.vector_store %arg8[%c0_19, %c0_20], %10 {strides = array<i32>} : memref<128x128xf32, #tpu.memory_space<vmem>>, vector<128x128xf32>,
    %c0_i32_21 = arith.constant 0 : i32
    %30 = arith.cmpi eq, %arg3, %c0_i32_21 : i32
    %31 = arith.extui %30 : i1 to i32
    %c0_i32_22 = arith.constant 0 : i32
    %32 = arith.cmpi ne, %31, %c0_i32_22 : i32
    scf.if %32 {
      %c0_23 = arith.constant 0 : index
      %c0_24 = arith.constant 0 : index
      %33 = vector.load %arg9[%c0_23, %c0_24] : memref<128x128xf32, #tpu.memory_space<vmem>>, vector<128x128xf32>
      %34 = tpu.reciprocal %33 {approx = true} : vector<128x128xf32> -> vector<128x128xf32>
      %c0_25 = arith.constant 0 : index
      %c0_26 = arith.constant 0 : index
      %35 = vector.load %arg10[%c0_25, %c0_26] : memref<128x128xf32, #tpu.memory_space<vmem>>, vector<128x128xf32>
      %36 = arith.mulf %35, %34 : vector<128x128xf32>
      %37 = arith.truncf %36 : vector<128x128xf32> to vector<128x128xbf16>
      %c0_27 = arith.constant 0 : index
      %c0_28 = arith.constant 0 : index
      %38 = vector.load %arg7[%c0_27, %c0_28] : memref<128x128xbf16, #tpu.memory_space<vmem>>, vector<128x128xbf16>
      tpu.vector_store %arg7[%c0_27, %c0_28], %37 {strides = array<i32>} : memref<128x128xbf16, #tpu.memory_space<vmem>>, vector<128x128xbf16>,
    } else {
    }
    return
  }
  func.func @transform_0(%arg0: i32, %arg1: i32, %arg2: i32, %arg3: i32) -> (i32, i32) {
    %c1_i32 = arith.constant 1 : i32
    %0 = arith.muli %arg0, %c1_i32 : i32
    %1 = arith.addi %0, %arg2 : i32
    %c0_i32 = arith.constant 0 : i32
    return %1, %arg1 : i32, i32
  }
  func.func @transform_1(%arg0: i32, %arg1: i32, %arg2: i32, %arg3: i32) -> (i32, i32) {
    %c1_i32 = arith.constant 1 : i32
    %0 = arith.muli %arg0, %c1_i32 : i32
    %1 = arith.addi %0, %arg3 : i32
    %c4_i32 = arith.constant 4 : i32
    %2 = arith.addi %c4_i32, %arg1 : i32
    %c0_i32 = arith.constant 0 : i32
    return %1, %2 : i32, i32
  }
  func.func @transform_2(%arg0: i32, %arg1: i32, %arg2: i32, %arg3: i32) -> (i32, i32) {
    %c1_i32 = arith.constant 1 : i32
    %0 = arith.muli %arg0, %c1_i32 : i32
    %1 = arith.addi %0, %arg3 : i32
    %c8_i32 = arith.constant 8 : i32
    %2 = arith.addi %c8_i32, %arg1 : i32
    %c0_i32 = arith.constant 0 : i32
    return %1, %2 : i32, i32
  }
  func.func @transform_3(%arg0: i32, %arg1: i32, %arg2: i32, %arg3: i32) -> (i32, i32) {
    %c1_i32 = arith.constant 1 : i32
    %0 = arith.muli %arg0, %c1_i32 : i32
    %1 = arith.addi %0, %arg2 : i32
    %c0_i32 = arith.constant 0 : i32
    return %1, %arg1 : i32, i32
  }
}

module attributes {stable_mosaic.version = 11 : i64} {
  func.func @matmul_res_ln_kernel(%arg0: i32, %arg1: i32, %arg2: memref<256x512xbf16, #tpu.memory_space<vmem>>, %arg3: memref<512x128xbf16, #tpu.memory_space<vmem>>, %arg4: memref<1x128xf32, #tpu.memory_space<vmem>>, %arg5: memref<256x128xbf16, #tpu.memory_space<vmem>>, %arg6: memref<1x128xf32, #tpu.memory_space<vmem>>, %arg7: memref<1x128xf32, #tpu.memory_space<vmem>>, %arg8: memref<256x128xbf16, #tpu.memory_space<vmem>>, %arg9: memref<256x128xf32, #tpu.memory_space<vmem>>) attributes {dimension_semantics = [#tpu.dimension_semantics<parallel>, #tpu.dimension_semantics<arbitrary>], iteration_bounds = array<i64: 1, 1>, scalar_prefetch = 0 : i64, scratch_operands = 1 : i64, tpu.core_type = #tpu.core_type<tc>, window_params = [{transform_indices = @transform_0, window_bounds = array<i64: 256, 512>}, {transform_indices = @transform_1, window_bounds = array<i64: 512, 128>}, {pipeline_mode = #tpu.pipeline_mode<synchronous>, transform_indices = @transform_2, window_bounds = array<i64: 1, 128>}, {transform_indices = @transform_3, window_bounds = array<i64: 256, 128>}, {pipeline_mode = #tpu.pipeline_mode<synchronous>, transform_indices = @transform_4, window_bounds = array<i64: 1, 128>}, {pipeline_mode = #tpu.pipeline_mode<synchronous>, transform_indices = @transform_5, window_bounds = array<i64: 1, 128>}, {transform_indices = @transform_6, window_bounds = array<i64: 256, 128>}]} {
    %c0_i32 = arith.constant 0 : i32
    %0 = arith.cmpi eq, %arg1, %c0_i32 : i32
    %1 = arith.extui %0 : i1 to i32
    %c0_i32_0 = arith.constant 0 : i32
    %2 = arith.cmpi ne, %1, %c0_i32_0 : i32
    scf.if %2 {
      %cst_10 = arith.constant 0.000000e+00 : f32
      %12 = vector.broadcast %cst_10 : f32 to vector<256x128xf32>
      %c0_11 = arith.constant 0 : index
      %c0_12 = arith.constant 0 : index
      %13 = vector.load %arg9[%c0_11, %c0_12] : memref<256x128xf32, #tpu.memory_space<vmem>>, vector<256x128xf32>
      tpu.vector_store %arg9[%c0_11, %c0_12], %12 {strides = array<i32>} : memref<256x128xf32, #tpu.memory_space<vmem>>, vector<256x128xf32>,
    } else {
    }
    %c0 = arith.constant 0 : index
    %c0_1 = arith.constant 0 : index
    %3 = vector.load %arg9[%c0, %c0_1] : memref<256x128xf32, #tpu.memory_space<vmem>>, vector<256x128xf32>
    %c0_2 = arith.constant 0 : index
    %c0_3 = arith.constant 0 : index
    %4 = vector.load %arg2[%c0_2, %c0_3] : memref<256x512xbf16, #tpu.memory_space<vmem>>, vector<256x512xbf16>
    %c0_4 = arith.constant 0 : index
    %c0_5 = arith.constant 0 : index
    %5 = vector.load %arg3[%c0_4, %c0_5] : memref<512x128xbf16, #tpu.memory_space<vmem>>, vector<512x128xbf16>
    %cst = arith.constant dense<0.000000e+00> : vector<256x128xf32>
    %6 = tpu.matmul %4, %5, %cst {dimension_numbers = #tpu.dot_dimension_numbers<[1], [0], [0], [1], [0, 0, 1, 1], [], []>} : vector<256x512xbf16>, vector<512x128xbf16>, vector<256x128xf32> -> vector<256x128xf32>
    %7 = arith.addf %3, %6 : vector<256x128xf32>
    %c0_6 = arith.constant 0 : index
    %c0_7 = arith.constant 0 : index
    %8 = vector.load %arg9[%c0_6, %c0_7] : memref<256x128xf32, #tpu.memory_space<vmem>>, vector<256x128xf32>
    tpu.vector_store %arg9[%c0_6, %c0_7], %7 {strides = array<i32>} : memref<256x128xf32, #tpu.memory_space<vmem>>, vector<256x128xf32>,
    %c0_i32_8 = arith.constant 0 : i32
    %9 = arith.cmpi eq, %arg1, %c0_i32_8 : i32
    %10 = arith.extui %9 : i1 to i32
    %c0_i32_9 = arith.constant 0 : i32
    %11 = arith.cmpi ne, %10, %c0_i32_9 : i32
    scf.if %11 {
      %c0_10 = arith.constant 0 : index
      %c0_11 = arith.constant 0 : index
      %12 = vector.load %arg9[%c0_10, %c0_11] : memref<256x128xf32, #tpu.memory_space<vmem>>, vector<256x128xf32>
      %c0_12 = arith.constant 0 : index
      %c0_13 = arith.constant 0 : index
      %13 = vector.load %arg4[%c0_12, %c0_13] : memref<1x128xf32, #tpu.memory_space<vmem>>, vector<1x128xf32>
      %14 = vector.broadcast %13 : vector<1x128xf32> to vector<256x128xf32>
      %15 = arith.addf %12, %14 : vector<256x128xf32>
      %c0_14 = arith.constant 0 : index
      %c0_15 = arith.constant 0 : index
      %16 = vector.load %arg5[%c0_14, %c0_15] : memref<256x128xbf16, #tpu.memory_space<vmem>>, vector<256x128xbf16>
      %17 = arith.extf %16 : vector<256x128xbf16> to vector<256x128xf32>
      %18 = arith.addf %15, %17 : vector<256x128xf32>
      %c0_16 = arith.constant 0 : index
      %c0_17 = arith.constant 0 : index
      %19 = vector.load %arg6[%c0_16, %c0_17] : memref<1x128xf32, #tpu.memory_space<vmem>>, vector<1x128xf32>
      %c0_18 = arith.constant 0 : index
      %c0_19 = arith.constant 0 : index
      %20 = vector.load %arg7[%c0_18, %c0_19] : memref<1x128xf32, #tpu.memory_space<vmem>>, vector<1x128xf32>
      %cst_20 = arith.constant dense<0.000000e+00> : vector<256xf32>
      %21 = vector.multi_reduction <add>, %18, %cst_20 [1] : vector<256x128xf32> to vector<256xf32>
      %22 = vector.shape_cast %21 : vector<256xf32> to vector<256x1xf32>
      %cst_21 = arith.constant 1.280000e+02 : f32
      %23 = vector.broadcast %cst_21 : f32 to vector<256x1xf32>
      %24 = arith.divf %22, %23 : vector<256x1xf32>
      %25 = vector.broadcast %24 : vector<256x1xf32> to vector<256x128xf32>
      %26 = arith.subf %18, %25 : vector<256x128xf32>
      %27 = arith.mulf %26, %26 : vector<256x128xf32>
      %cst_22 = arith.constant dense<0.000000e+00> : vector<256xf32>
      %28 = vector.multi_reduction <add>, %27, %cst_22 [1] : vector<256x128xf32> to vector<256xf32>
      %29 = vector.shape_cast %28 : vector<256xf32> to vector<256x1xf32>
      %cst_23 = arith.constant 1.280000e+02 : f32
      %30 = vector.broadcast %cst_23 : f32 to vector<256x1xf32>
      %31 = arith.divf %29, %30 : vector<256x1xf32>
      %32 = vector.broadcast %24 : vector<256x1xf32> to vector<256x128xf32>
      %33 = arith.subf %18, %32 : vector<256x128xf32>
      %cst_24 = arith.constant 9.99999974E-6 : f32
      %34 = vector.broadcast %cst_24 : f32 to vector<256x1xf32>
      %35 = arith.addf %31, %34 : vector<256x1xf32>
      %36 = math.rsqrt %35 : vector<256x1xf32>
      %37 = vector.broadcast %36 : vector<256x1xf32> to vector<256x128xf32>
      %38 = arith.mulf %33, %37 : vector<256x128xf32>
      %39 = vector.broadcast %19 : vector<1x128xf32> to vector<256x128xf32>
      %40 = arith.mulf %38, %39 : vector<256x128xf32>
      %41 = vector.broadcast %20 : vector<1x128xf32> to vector<256x128xf32>
      %42 = arith.addf %40, %41 : vector<256x128xf32>
      %43 = arith.truncf %42 : vector<256x128xf32> to vector<256x128xbf16>
      %c0_25 = arith.constant 0 : index
      %c0_26 = arith.constant 0 : index
      %44 = vector.load %arg8[%c0_25, %c0_26] : memref<256x128xbf16, #tpu.memory_space<vmem>>, vector<256x128xbf16>
      tpu.vector_store %arg8[%c0_25, %c0_26], %43 {strides = array<i32>} : memref<256x128xbf16, #tpu.memory_space<vmem>>, vector<256x128xbf16>,
    } else {
    }
    return
  }
  func.func @transform_0(%arg0: i32, %arg1: i32) -> (i32, i32) {
    %c0_i32 = arith.constant 0 : i32
    return %arg0, %arg1 : i32, i32
  }
  func.func @transform_1(%arg0: i32, %arg1: i32) -> (i32, i32) {
    %c0_i32 = arith.constant 0 : i32
    %c0_i32_0 = arith.constant 0 : i32
    return %arg1, %c0_i32 : i32, i32
  }
  func.func @transform_2(%arg0: i32, %arg1: i32) -> (i32, i32) {
    %c0_i32 = arith.constant 0 : i32
    %c0_i32_0 = arith.constant 0 : i32
    %c0_i32_1 = arith.constant 0 : i32
    return %c0_i32, %c0_i32_0 : i32, i32
  }
  func.func @transform_3(%arg0: i32, %arg1: i32) -> (i32, i32) {
    %c0_i32 = arith.constant 0 : i32
    %c0_i32_0 = arith.constant 0 : i32
    return %arg0, %c0_i32 : i32, i32
  }
  func.func @transform_4(%arg0: i32, %arg1: i32) -> (i32, i32) {
    %c0_i32 = arith.constant 0 : i32
    %c0_i32_0 = arith.constant 0 : i32
    %c0_i32_1 = arith.constant 0 : i32
    return %c0_i32, %c0_i32_0 : i32, i32
  }
  func.func @transform_5(%arg0: i32, %arg1: i32) -> (i32, i32) {
    %c0_i32 = arith.constant 0 : i32
    %c0_i32_0 = arith.constant 0 : i32
    %c0_i32_1 = arith.constant 0 : i32
    return %c0_i32, %c0_i32_0 : i32, i32
  }
  func.func @transform_6(%arg0: i32, %arg1: i32) -> (i32, i32) {
    %c0_i32 = arith.constant 0 : i32
    %c0_i32_0 = arith.constant 0 : i32
    return %arg0, %c0_i32 : i32, i32
  }
}

module attributes {stable_mosaic.version = 11 : i64} {
  func.func @matmul_bias_kernel(%arg0: i32, %arg1: i32, %arg2: i32, %arg3: memref<256x128xbf16, #tpu.memory_space<vmem>>, %arg4: memref<128x256xbf16, #tpu.memory_space<vmem>>, %arg5: memref<1x256xf32, #tpu.memory_space<vmem>>, %arg6: memref<256x256xbf16, #tpu.memory_space<vmem>>, %arg7: memref<256x256xf32, #tpu.memory_space<vmem>>) attributes {dimension_semantics = [#tpu.dimension_semantics<parallel>, #tpu.dimension_semantics<parallel>, #tpu.dimension_semantics<arbitrary>], iteration_bounds = array<i64: 1, 1, 1>, scalar_prefetch = 0 : i64, scratch_operands = 1 : i64, tpu.core_type = #tpu.core_type<tc>, window_params = [{transform_indices = @transform_0, window_bounds = array<i64: 256, 128>}, {transform_indices = @transform_1, window_bounds = array<i64: 128, 256>}, {transform_indices = @transform_2, window_bounds = array<i64: 1, 256>}, {transform_indices = @transform_3, window_bounds = array<i64: 256, 256>}]} {
    %c0_i32 = arith.constant 0 : i32
    %0 = arith.cmpi eq, %arg2, %c0_i32 : i32
    %1 = arith.extui %0 : i1 to i32
    %c0_i32_0 = arith.constant 0 : i32
    %2 = arith.cmpi ne, %1, %c0_i32_0 : i32
    scf.if %2 {
      %cst_10 = arith.constant 0.000000e+00 : f32
      %12 = vector.broadcast %cst_10 : f32 to vector<256x256xf32>
      %c0_11 = arith.constant 0 : index
      %c0_12 = arith.constant 0 : index
      %13 = vector.load %arg7[%c0_11, %c0_12] : memref<256x256xf32, #tpu.memory_space<vmem>>, vector<256x256xf32>
      tpu.vector_store %arg7[%c0_11, %c0_12], %12 {strides = array<i32>} : memref<256x256xf32, #tpu.memory_space<vmem>>, vector<256x256xf32>,
    } else {
    }
    %c0 = arith.constant 0 : index
    %c0_1 = arith.constant 0 : index
    %3 = vector.load %arg7[%c0, %c0_1] : memref<256x256xf32, #tpu.memory_space<vmem>>, vector<256x256xf32>
    %c0_2 = arith.constant 0 : index
    %c0_3 = arith.constant 0 : index
    %4 = vector.load %arg3[%c0_2, %c0_3] : memref<256x128xbf16, #tpu.memory_space<vmem>>, vector<256x128xbf16>
    %c0_4 = arith.constant 0 : index
    %c0_5 = arith.constant 0 : index
    %5 = vector.load %arg4[%c0_4, %c0_5] : memref<128x256xbf16, #tpu.memory_space<vmem>>, vector<128x256xbf16>
    %cst = arith.constant dense<0.000000e+00> : vector<256x256xf32>
    %6 = tpu.matmul %4, %5, %cst {dimension_numbers = #tpu.dot_dimension_numbers<[1], [0], [0], [1], [0, 0, 1, 1], [], []>} : vector<256x128xbf16>, vector<128x256xbf16>, vector<256x256xf32> -> vector<256x256xf32>
    %7 = arith.addf %3, %6 : vector<256x256xf32>
    %c0_6 = arith.constant 0 : index
    %c0_7 = arith.constant 0 : index
    %8 = vector.load %arg7[%c0_6, %c0_7] : memref<256x256xf32, #tpu.memory_space<vmem>>, vector<256x256xf32>
    tpu.vector_store %arg7[%c0_6, %c0_7], %7 {strides = array<i32>} : memref<256x256xf32, #tpu.memory_space<vmem>>, vector<256x256xf32>,
    %c0_i32_8 = arith.constant 0 : i32
    %9 = arith.cmpi eq, %arg2, %c0_i32_8 : i32
    %10 = arith.extui %9 : i1 to i32
    %c0_i32_9 = arith.constant 0 : i32
    %11 = arith.cmpi ne, %10, %c0_i32_9 : i32
    scf.if %11 {
      %c0_10 = arith.constant 0 : index
      %c0_11 = arith.constant 0 : index
      %12 = vector.load %arg7[%c0_10, %c0_11] : memref<256x256xf32, #tpu.memory_space<vmem>>, vector<256x256xf32>
      %c0_12 = arith.constant 0 : index
      %c0_13 = arith.constant 0 : index
      %13 = vector.load %arg5[%c0_12, %c0_13] : memref<1x256xf32, #tpu.memory_space<vmem>>, vector<1x256xf32>
      %14 = vector.broadcast %13 : vector<1x256xf32> to vector<256x256xf32>
      %15 = arith.addf %12, %14 : vector<256x256xf32>
      %cst_14 = arith.constant 5.000000e-01 : f32
      %16 = vector.broadcast %cst_14 : f32 to vector<256x256xf32>
      %17 = arith.mulf %16, %15 : vector<256x256xf32>
      %cst_15 = arith.constant 0.707106769 : f32
      %18 = vector.broadcast %cst_15 : f32 to vector<256x256xf32>
      %19 = arith.mulf %15, %18 : vector<256x256xf32>
      %20 = math.absf %19 : vector<256x256xf32>
      %cst_16 = arith.constant 0.327591091 : f32
      %21 = vector.broadcast %cst_16 : f32 to vector<256x256xf32>
      %22 = arith.mulf %21, %20 : vector<256x256xf32>
      %cst_17 = arith.constant 1.000000e+00 : f32
      %23 = vector.broadcast %cst_17 : f32 to vector<256x256xf32>
      %24 = arith.addf %23, %22 : vector<256x256xf32>
      %cst_18 = arith.constant 1.000000e+00 : f32
      %25 = vector.broadcast %cst_18 : f32 to vector<256x256xf32>
      %26 = arith.divf %25, %24 : vector<256x256xf32>
      %cst_19 = arith.constant 1.06140542 : f32
      %27 = vector.broadcast %cst_19 : f32 to vector<256x256xf32>
      %28 = arith.mulf %27, %26 : vector<256x256xf32>
      %cst_20 = arith.constant -1.45315206 : f32
      %29 = vector.broadcast %cst_20 : f32 to vector<256x256xf32>
      %30 = arith.addf %28, %29 : vector<256x256xf32>
      %31 = arith.mulf %30, %26 : vector<256x256xf32>
      %cst_21 = arith.constant 1.42141378 : f32
      %32 = vector.broadcast %cst_21 : f32 to vector<256x256xf32>
      %33 = arith.addf %31, %32 : vector<256x256xf32>
      %34 = arith.mulf %33, %26 : vector<256x256xf32>
      %cst_22 = arith.constant -0.284496725 : f32
      %35 = vector.broadcast %cst_22 : f32 to vector<256x256xf32>
      %36 = arith.addf %34, %35 : vector<256x256xf32>
      %37 = arith.mulf %36, %26 : vector<256x256xf32>
      %cst_23 = arith.constant 0.254829586 : f32
      %38 = vector.broadcast %cst_23 : f32 to vector<256x256xf32>
      %39 = arith.addf %37, %38 : vector<256x256xf32>
      %40 = arith.mulf %39, %26 : vector<256x256xf32>
      %cst_24 = arith.constant 0.000000e+00 : f32
      %41 = vector.broadcast %cst_24 : f32 to vector<256x256xf32>
      %42 = arith.subf %41, %20 : vector<256x256xf32>
      %43 = arith.mulf %42, %20 : vector<256x256xf32>
      %44 = math.exp %43 : vector<256x256xf32>
      %45 = arith.mulf %40, %44 : vector<256x256xf32>
      %cst_25 = arith.constant 1.000000e+00 : f32
      %46 = vector.broadcast %cst_25 : f32 to vector<256x256xf32>
      %47 = arith.subf %46, %45 : vector<256x256xf32>
      %cst_26 = arith.constant 0.000000e+00 : f32
      %48 = vector.broadcast %cst_26 : f32 to vector<256x256xf32>
      %49 = arith.cmpf oge, %19, %48 : vector<256x256xf32>
      %cst_27 = arith.constant 0.000000e+00 : f32
      %50 = vector.broadcast %cst_27 : f32 to vector<256x256xf32>
      %51 = arith.subf %50, %47 : vector<256x256xf32>
      %52 = arith.select %49, %47, %51 : vector<256x256xi1>, vector<256x256xf32>
      %cst_28 = arith.constant 1.000000e+00 : f32
      %53 = vector.broadcast %cst_28 : f32 to vector<256x256xf32>
      %54 = arith.addf %53, %52 : vector<256x256xf32>
      %55 = arith.mulf %17, %54 : vector<256x256xf32>
      %56 = arith.truncf %55 : vector<256x256xf32> to vector<256x256xbf16>
      %c0_29 = arith.constant 0 : index
      %c0_30 = arith.constant 0 : index
      %57 = vector.load %arg6[%c0_29, %c0_30] : memref<256x256xbf16, #tpu.memory_space<vmem>>, vector<256x256xbf16>
      tpu.vector_store %arg6[%c0_29, %c0_30], %56 {strides = array<i32>} : memref<256x256xbf16, #tpu.memory_space<vmem>>, vector<256x256xbf16>,
    } else {
    }
    return
  }
  func.func @transform_0(%arg0: i32, %arg1: i32, %arg2: i32) -> (i32, i32) {
    %c0_i32 = arith.constant 0 : i32
    return %arg0, %arg2 : i32, i32
  }
  func.func @transform_1(%arg0: i32, %arg1: i32, %arg2: i32) -> (i32, i32) {
    %c0_i32 = arith.constant 0 : i32
    return %arg2, %arg1 : i32, i32
  }
  func.func @transform_2(%arg0: i32, %arg1: i32, %arg2: i32) -> (i32, i32) {
    %c0_i32 = arith.constant 0 : i32
    %c0_i32_0 = arith.constant 0 : i32
    return %c0_i32, %arg1 : i32, i32
  }
  func.func @transform_3(%arg0: i32, %arg1: i32, %arg2: i32) -> (i32, i32) {
    %c0_i32 = arith.constant 0 : i32
    return %arg0, %arg1 : i32, i32
  }
}

module attributes {stable_mosaic.version = 11 : i64} {
  func.func @matmul_res_ln_kernel(%arg0: i32, %arg1: i32, %arg2: memref<256x256xbf16, #tpu.memory_space<vmem>>, %arg3: memref<256x128xbf16, #tpu.memory_space<vmem>>, %arg4: memref<1x128xf32, #tpu.memory_space<vmem>>, %arg5: memref<256x128xbf16, #tpu.memory_space<vmem>>, %arg6: memref<1x128xf32, #tpu.memory_space<vmem>>, %arg7: memref<1x128xf32, #tpu.memory_space<vmem>>, %arg8: memref<256x128xbf16, #tpu.memory_space<vmem>>, %arg9: memref<256x128xf32, #tpu.memory_space<vmem>>) attributes {dimension_semantics = [#tpu.dimension_semantics<parallel>, #tpu.dimension_semantics<arbitrary>], iteration_bounds = array<i64: 1, 1>, scalar_prefetch = 0 : i64, scratch_operands = 1 : i64, tpu.core_type = #tpu.core_type<tc>, window_params = [{transform_indices = @transform_0, window_bounds = array<i64: 256, 256>}, {transform_indices = @transform_1, window_bounds = array<i64: 256, 128>}, {pipeline_mode = #tpu.pipeline_mode<synchronous>, transform_indices = @transform_2, window_bounds = array<i64: 1, 128>}, {transform_indices = @transform_3, window_bounds = array<i64: 256, 128>}, {pipeline_mode = #tpu.pipeline_mode<synchronous>, transform_indices = @transform_4, window_bounds = array<i64: 1, 128>}, {pipeline_mode = #tpu.pipeline_mode<synchronous>, transform_indices = @transform_5, window_bounds = array<i64: 1, 128>}, {transform_indices = @transform_6, window_bounds = array<i64: 256, 128>}]} {
    %c0_i32 = arith.constant 0 : i32
    %0 = arith.cmpi eq, %arg1, %c0_i32 : i32
    %1 = arith.extui %0 : i1 to i32
    %c0_i32_0 = arith.constant 0 : i32
    %2 = arith.cmpi ne, %1, %c0_i32_0 : i32
    scf.if %2 {
      %cst_10 = arith.constant 0.000000e+00 : f32
      %12 = vector.broadcast %cst_10 : f32 to vector<256x128xf32>
      %c0_11 = arith.constant 0 : index
      %c0_12 = arith.constant 0 : index
      %13 = vector.load %arg9[%c0_11, %c0_12] : memref<256x128xf32, #tpu.memory_space<vmem>>, vector<256x128xf32>
      tpu.vector_store %arg9[%c0_11, %c0_12], %12 {strides = array<i32>} : memref<256x128xf32, #tpu.memory_space<vmem>>, vector<256x128xf32>,
    } else {
    }
    %c0 = arith.constant 0 : index
    %c0_1 = arith.constant 0 : index
    %3 = vector.load %arg9[%c0, %c0_1] : memref<256x128xf32, #tpu.memory_space<vmem>>, vector<256x128xf32>
    %c0_2 = arith.constant 0 : index
    %c0_3 = arith.constant 0 : index
    %4 = vector.load %arg2[%c0_2, %c0_3] : memref<256x256xbf16, #tpu.memory_space<vmem>>, vector<256x256xbf16>
    %c0_4 = arith.constant 0 : index
    %c0_5 = arith.constant 0 : index
    %5 = vector.load %arg3[%c0_4, %c0_5] : memref<256x128xbf16, #tpu.memory_space<vmem>>, vector<256x128xbf16>
    %cst = arith.constant dense<0.000000e+00> : vector<256x128xf32>
    %6 = tpu.matmul %4, %5, %cst {dimension_numbers = #tpu.dot_dimension_numbers<[1], [0], [0], [1], [0, 0, 1, 1], [], []>} : vector<256x256xbf16>, vector<256x128xbf16>, vector<256x128xf32> -> vector<256x128xf32>
    %7 = arith.addf %3, %6 : vector<256x128xf32>
    %c0_6 = arith.constant 0 : index
    %c0_7 = arith.constant 0 : index
    %8 = vector.load %arg9[%c0_6, %c0_7] : memref<256x128xf32, #tpu.memory_space<vmem>>, vector<256x128xf32>
    tpu.vector_store %arg9[%c0_6, %c0_7], %7 {strides = array<i32>} : memref<256x128xf32, #tpu.memory_space<vmem>>, vector<256x128xf32>,
    %c0_i32_8 = arith.constant 0 : i32
    %9 = arith.cmpi eq, %arg1, %c0_i32_8 : i32
    %10 = arith.extui %9 : i1 to i32
    %c0_i32_9 = arith.constant 0 : i32
    %11 = arith.cmpi ne, %10, %c0_i32_9 : i32
    scf.if %11 {
      %c0_10 = arith.constant 0 : index
      %c0_11 = arith.constant 0 : index
      %12 = vector.load %arg9[%c0_10, %c0_11] : memref<256x128xf32, #tpu.memory_space<vmem>>, vector<256x128xf32>
      %c0_12 = arith.constant 0 : index
      %c0_13 = arith.constant 0 : index
      %13 = vector.load %arg4[%c0_12, %c0_13] : memref<1x128xf32, #tpu.memory_space<vmem>>, vector<1x128xf32>
      %14 = vector.broadcast %13 : vector<1x128xf32> to vector<256x128xf32>
      %15 = arith.addf %12, %14 : vector<256x128xf32>
      %c0_14 = arith.constant 0 : index
      %c0_15 = arith.constant 0 : index
      %16 = vector.load %arg5[%c0_14, %c0_15] : memref<256x128xbf16, #tpu.memory_space<vmem>>, vector<256x128xbf16>
      %17 = arith.extf %16 : vector<256x128xbf16> to vector<256x128xf32>
      %18 = arith.addf %15, %17 : vector<256x128xf32>
      %c0_16 = arith.constant 0 : index
      %c0_17 = arith.constant 0 : index
      %19 = vector.load %arg6[%c0_16, %c0_17] : memref<1x128xf32, #tpu.memory_space<vmem>>, vector<1x128xf32>
      %c0_18 = arith.constant 0 : index
      %c0_19 = arith.constant 0 : index
      %20 = vector.load %arg7[%c0_18, %c0_19] : memref<1x128xf32, #tpu.memory_space<vmem>>, vector<1x128xf32>
      %cst_20 = arith.constant dense<0.000000e+00> : vector<256xf32>
      %21 = vector.multi_reduction <add>, %18, %cst_20 [1] : vector<256x128xf32> to vector<256xf32>
      %22 = vector.shape_cast %21 : vector<256xf32> to vector<256x1xf32>
      %cst_21 = arith.constant 1.280000e+02 : f32
      %23 = vector.broadcast %cst_21 : f32 to vector<256x1xf32>
      %24 = arith.divf %22, %23 : vector<256x1xf32>
      %25 = vector.broadcast %24 : vector<256x1xf32> to vector<256x128xf32>
      %26 = arith.subf %18, %25 : vector<256x128xf32>
      %27 = arith.mulf %26, %26 : vector<256x128xf32>
      %cst_22 = arith.constant dense<0.000000e+00> : vector<256xf32>
      %28 = vector.multi_reduction <add>, %27, %cst_22 [1] : vector<256x128xf32> to vector<256xf32>
      %29 = vector.shape_cast %28 : vector<256xf32> to vector<256x1xf32>
      %cst_23 = arith.constant 1.280000e+02 : f32
      %30 = vector.broadcast %cst_23 : f32 to vector<256x1xf32>
      %31 = arith.divf %29, %30 : vector<256x1xf32>
      %32 = vector.broadcast %24 : vector<256x1xf32> to vector<256x128xf32>
      %33 = arith.subf %18, %32 : vector<256x128xf32>
      %cst_24 = arith.constant 9.99999974E-6 : f32
      %34 = vector.broadcast %cst_24 : f32 to vector<256x1xf32>
      %35 = arith.addf %31, %34 : vector<256x1xf32>
      %36 = math.rsqrt %35 : vector<256x1xf32>
      %37 = vector.broadcast %36 : vector<256x1xf32> to vector<256x128xf32>
      %38 = arith.mulf %33, %37 : vector<256x128xf32>
      %39 = vector.broadcast %19 : vector<1x128xf32> to vector<256x128xf32>
      %40 = arith.mulf %38, %39 : vector<256x128xf32>
      %41 = vector.broadcast %20 : vector<1x128xf32> to vector<256x128xf32>
      %42 = arith.addf %40, %41 : vector<256x128xf32>
      %43 = arith.truncf %42 : vector<256x128xf32> to vector<256x128xbf16>
      %c0_25 = arith.constant 0 : index
      %c0_26 = arith.constant 0 : index
      %44 = vector.load %arg8[%c0_25, %c0_26] : memref<256x128xbf16, #tpu.memory_space<vmem>>, vector<256x128xbf16>
      tpu.vector_store %arg8[%c0_25, %c0_26], %43 {strides = array<i32>} : memref<256x128xbf16, #tpu.memory_space<vmem>>, vector<256x128xbf16>,
    } else {
    }
    return
  }
  func.func @transform_0(%arg0: i32, %arg1: i32) -> (i32, i32) {
    %c0_i32 = arith.constant 0 : i32
    return %arg0, %arg1 : i32, i32
  }
  func.func @transform_1(%arg0: i32, %arg1: i32) -> (i32, i32) {
    %c0_i32 = arith.constant 0 : i32
    %c0_i32_0 = arith.constant 0 : i32
    return %arg1, %c0_i32 : i32, i32
  }
  func.func @transform_2(%arg0: i32, %arg1: i32) -> (i32, i32) {
    %c0_i32 = arith.constant 0 : i32
    %c0_i32_0 = arith.constant 0 : i32
    %c0_i32_1 = arith.constant 0 : i32
    return %c0_i32, %c0_i32_0 : i32, i32
  }
  func.func @transform_3(%arg0: i32, %arg1: i32) -> (i32, i32) {
    %c0_i32 = arith.constant 0 : i32
    %c0_i32_0 = arith.constant 0 : i32
    return %arg0, %c0_i32 : i32, i32
  }
  func.func @transform_4(%arg0: i32, %arg1: i32) -> (i32, i32) {
    %c0_i32 = arith.constant 0 : i32
    %c0_i32_0 = arith.constant 0 : i32
    %c0_i32_1 = arith.constant 0 : i32
    return %c0_i32, %c0_i32_0 : i32, i32
  }
  func.func @transform_5(%arg0: i32, %arg1: i32) -> (i32, i32) {
    %c0_i32 = arith.constant 0 : i32
    %c0_i32_0 = arith.constant 0 : i32
    %c0_i32_1 = arith.constant 0 : i32
    return %c0_i32, %c0_i32_0 : i32, i32
  }
  func.func @transform_6(%arg0: i32, %arg1: i32) -> (i32, i32) {
    %c0_i32 = arith.constant 0 : i32
    %c0_i32_0 = arith.constant 0 : i32
    return %arg0, %c0_i32 : i32, i32
  }
}

module attributes {stable_mosaic.version = 11 : i64} {
  func.func @ln_kernel(%arg0: i32, %arg1: memref<256x128xbf16, #tpu.memory_space<vmem>>, %arg2: memref<1x128xf32, #tpu.memory_space<vmem>>, %arg3: memref<1x128xf32, #tpu.memory_space<vmem>>, %arg4: memref<256x128xbf16, #tpu.memory_space<vmem>>) attributes {dimension_semantics = [#tpu.dimension_semantics<parallel>], iteration_bounds = array<i64: 1>, scalar_prefetch = 0 : i64, scratch_operands = 0 : i64, tpu.core_type = #tpu.core_type<tc>, window_params = [{transform_indices = @transform_0, window_bounds = array<i64: 256, 128>}, {pipeline_mode = #tpu.pipeline_mode<synchronous>, transform_indices = @transform_1, window_bounds = array<i64: 1, 128>}, {pipeline_mode = #tpu.pipeline_mode<synchronous>, transform_indices = @transform_2, window_bounds = array<i64: 1, 128>}, {transform_indices = @transform_3, window_bounds = array<i64: 256, 128>}]} {
    %c0 = arith.constant 0 : index
    %c0_0 = arith.constant 0 : index
    %0 = vector.load %arg1[%c0, %c0_0] : memref<256x128xbf16, #tpu.memory_space<vmem>>, vector<256x128xbf16>
    %1 = arith.extf %0 : vector<256x128xbf16> to vector<256x128xf32>
    %c0_1 = arith.constant 0 : index
    %c0_2 = arith.constant 0 : index
    %2 = vector.load %arg2[%c0_1, %c0_2] : memref<1x128xf32, #tpu.memory_space<vmem>>, vector<1x128xf32>
    %c0_3 = arith.constant 0 : index
    %c0_4 = arith.constant 0 : index
    %3 = vector.load %arg3[%c0_3, %c0_4] : memref<1x128xf32, #tpu.memory_space<vmem>>, vector<1x128xf32>
    %cst = arith.constant dense<0.000000e+00> : vector<256xf32>
    %4 = vector.multi_reduction <add>, %1, %cst [1] : vector<256x128xf32> to vector<256xf32>
    %5 = vector.shape_cast %4 : vector<256xf32> to vector<256x1xf32>
    %cst_5 = arith.constant 1.280000e+02 : f32
    %6 = vector.broadcast %cst_5 : f32 to vector<256x1xf32>
    %7 = arith.divf %5, %6 : vector<256x1xf32>
    %8 = vector.broadcast %7 : vector<256x1xf32> to vector<256x128xf32>
    %9 = arith.subf %1, %8 : vector<256x128xf32>
    %10 = arith.mulf %9, %9 : vector<256x128xf32>
    %cst_6 = arith.constant dense<0.000000e+00> : vector<256xf32>
    %11 = vector.multi_reduction <add>, %10, %cst_6 [1] : vector<256x128xf32> to vector<256xf32>
    %12 = vector.shape_cast %11 : vector<256xf32> to vector<256x1xf32>
    %cst_7 = arith.constant 1.280000e+02 : f32
    %13 = vector.broadcast %cst_7 : f32 to vector<256x1xf32>
    %14 = arith.divf %12, %13 : vector<256x1xf32>
    %15 = vector.broadcast %7 : vector<256x1xf32> to vector<256x128xf32>
    %16 = arith.subf %1, %15 : vector<256x128xf32>
    %cst_8 = arith.constant 9.99999974E-6 : f32
    %17 = vector.broadcast %cst_8 : f32 to vector<256x1xf32>
    %18 = arith.addf %14, %17 : vector<256x1xf32>
    %19 = math.rsqrt %18 : vector<256x1xf32>
    %20 = vector.broadcast %19 : vector<256x1xf32> to vector<256x128xf32>
    %21 = arith.mulf %16, %20 : vector<256x128xf32>
    %22 = vector.broadcast %2 : vector<1x128xf32> to vector<256x128xf32>
    %23 = arith.mulf %21, %22 : vector<256x128xf32>
    %24 = vector.broadcast %3 : vector<1x128xf32> to vector<256x128xf32>
    %25 = arith.addf %23, %24 : vector<256x128xf32>
    %26 = arith.truncf %25 : vector<256x128xf32> to vector<256x128xbf16>
    %c0_9 = arith.constant 0 : index
    %c0_10 = arith.constant 0 : index
    %27 = vector.load %arg4[%c0_9, %c0_10] : memref<256x128xbf16, #tpu.memory_space<vmem>>, vector<256x128xbf16>
    tpu.vector_store %arg4[%c0_9, %c0_10], %26 {strides = array<i32>} : memref<256x128xbf16, #tpu.memory_space<vmem>>, vector<256x128xbf16>,
    return
  }
  func.func @transform_0(%arg0: i32) -> (i32, i32) {
    %c0_i32 = arith.constant 0 : i32
    %c0_i32_0 = arith.constant 0 : i32
    return %arg0, %c0_i32 : i32, i32
  }
  func.func @transform_1(%arg0: i32) -> (i32, i32) {
    %c0_i32 = arith.constant 0 : i32
    %c0_i32_0 = arith.constant 0 : i32
    %c0_i32_1 = arith.constant 0 : i32
    return %c0_i32, %c0_i32_0 : i32, i32
  }
  func.func @transform_2(%arg0: i32) -> (i32, i32) {
    %c0_i32 = arith.constant 0 : i32
    %c0_i32_0 = arith.constant 0 : i32
    %c0_i32_1 = arith.constant 0 : i32
    return %c0_i32, %c0_i32_0 : i32, i32
  }
  func.func @transform_3(%arg0: i32) -> (i32, i32) {
    %c0_i32 = arith.constant 0 : i32
    %c0_i32_0 = arith.constant 0 : i32
    return %arg0, %c0_i32 : i32, i32
  }
}

module attributes {stable_mosaic.version = 11 : i64} {
  func.func @matmul_nobias_kernel(%arg0: i32, %arg1: i32, %arg2: i32, %arg3: memref<256x128xbf16, #tpu.memory_space<vmem>>, %arg4: memref<128x256xbf16, #tpu.memory_space<vmem>>, %arg5: memref<256x256xf32, #tpu.memory_space<vmem>>, %arg6: memref<256x256xf32, #tpu.memory_space<vmem>>) attributes {dimension_semantics = [#tpu.dimension_semantics<parallel>, #tpu.dimension_semantics<parallel>, #tpu.dimension_semantics<arbitrary>], iteration_bounds = array<i64: 1, 1, 1>, scalar_prefetch = 0 : i64, scratch_operands = 1 : i64, tpu.core_type = #tpu.core_type<tc>, window_params = [{transform_indices = @transform_0, window_bounds = array<i64: 256, 128>}, {transform_indices = @transform_1, window_bounds = array<i64: 128, 256>}, {transform_indices = @transform_2, window_bounds = array<i64: 256, 256>}]} {
    %c0_i32 = arith.constant 0 : i32
    %0 = arith.cmpi eq, %arg2, %c0_i32 : i32
    %1 = arith.extui %0 : i1 to i32
    %c0_i32_0 = arith.constant 0 : i32
    %2 = arith.cmpi ne, %1, %c0_i32_0 : i32
    scf.if %2 {
      %cst_10 = arith.constant 0.000000e+00 : f32
      %12 = vector.broadcast %cst_10 : f32 to vector<256x256xf32>
      %c0_11 = arith.constant 0 : index
      %c0_12 = arith.constant 0 : index
      %13 = vector.load %arg6[%c0_11, %c0_12] : memref<256x256xf32, #tpu.memory_space<vmem>>, vector<256x256xf32>
      tpu.vector_store %arg6[%c0_11, %c0_12], %12 {strides = array<i32>} : memref<256x256xf32, #tpu.memory_space<vmem>>, vector<256x256xf32>,
    } else {
    }
    %c0 = arith.constant 0 : index
    %c0_1 = arith.constant 0 : index
    %3 = vector.load %arg6[%c0, %c0_1] : memref<256x256xf32, #tpu.memory_space<vmem>>, vector<256x256xf32>
    %c0_2 = arith.constant 0 : index
    %c0_3 = arith.constant 0 : index
    %4 = vector.load %arg3[%c0_2, %c0_3] : memref<256x128xbf16, #tpu.memory_space<vmem>>, vector<256x128xbf16>
    %c0_4 = arith.constant 0 : index
    %c0_5 = arith.constant 0 : index
    %5 = vector.load %arg4[%c0_4, %c0_5] : memref<128x256xbf16, #tpu.memory_space<vmem>>, vector<128x256xbf16>
    %cst = arith.constant dense<0.000000e+00> : vector<256x256xf32>
    %6 = tpu.matmul %4, %5, %cst {dimension_numbers = #tpu.dot_dimension_numbers<[1], [0], [0], [1], [0, 0, 1, 1], [], []>} : vector<256x128xbf16>, vector<128x256xbf16>, vector<256x256xf32> -> vector<256x256xf32>
    %7 = arith.addf %3, %6 : vector<256x256xf32>
    %c0_6 = arith.constant 0 : index
    %c0_7 = arith.constant 0 : index
    %8 = vector.load %arg6[%c0_6, %c0_7] : memref<256x256xf32, #tpu.memory_space<vmem>>, vector<256x256xf32>
    tpu.vector_store %arg6[%c0_6, %c0_7], %7 {strides = array<i32>} : memref<256x256xf32, #tpu.memory_space<vmem>>, vector<256x256xf32>,
    %c0_i32_8 = arith.constant 0 : i32
    %9 = arith.cmpi eq, %arg2, %c0_i32_8 : i32
    %10 = arith.extui %9 : i1 to i32
    %c0_i32_9 = arith.constant 0 : i32
    %11 = arith.cmpi ne, %10, %c0_i32_9 : i32
    scf.if %11 {
      %c0_10 = arith.constant 0 : index
      %c0_11 = arith.constant 0 : index
      %12 = vector.load %arg6[%c0_10, %c0_11] : memref<256x256xf32, #tpu.memory_space<vmem>>, vector<256x256xf32>
      %c0_12 = arith.constant 0 : index
      %c0_13 = arith.constant 0 : index
      %13 = vector.load %arg5[%c0_12, %c0_13] : memref<256x256xf32, #tpu.memory_space<vmem>>, vector<256x256xf32>
      tpu.vector_store %arg5[%c0_12, %c0_13], %12 {strides = array<i32>} : memref<256x256xf32, #tpu.memory_space<vmem>>, vector<256x256xf32>,
    } else {
    }
    return
  }
  func.func @transform_0(%arg0: i32, %arg1: i32, %arg2: i32) -> (i32, i32) {
    %c0_i32 = arith.constant 0 : i32
    return %arg0, %arg2 : i32, i32
  }
  func.func @transform_1(%arg0: i32, %arg1: i32, %arg2: i32) -> (i32, i32) {
    %c0_i32 = arith.constant 0 : i32
    return %arg2, %arg1 : i32, i32
  }
  func.func @transform_2(%arg0: i32, %arg1: i32, %arg2: i32) -> (i32, i32) {
    %c0_i32 = arith.constant 0 : i32
    return %arg0, %arg1 : i32, i32
  }
}

</mosaic_0001>

<bundles_post_ra>
// kernel: _lambda_.13
= control target key start
LH: loop header
LB: loop body
LE: loop exit
PB: predicated region body
PF: predicated region fallthrough
CT: control target
= control target key end

     0   :  { %s2742_s0 = inlined_call_operand.vmem [shape: bf16[256,1536], index: 0, kind: input, shape index: {}, may-alias: {0,1,2}]   ;;  %s2743_s1 = inlined_call_operand.vmem [shape: bf16[256,1536], index: 1, kind: input, shape index: {}, may-alias: {0,1,2}]   ;;  %s2744_s2 = inlined_call_operand.vmem [shape: bf16[256,1536], index: 2, kind: input, shape index: {}, may-alias: {0,1,2}]   ;;  %s2745_s3 = inlined_call_operand.vmem [shape: bf16[256,512], index: 3, kind: output, shape index: {}]  }
   0x1   :  { %2747 = sst [smem:[#allocation10_spill]] %s2745_s3 }
   0x2   :  { %s2316_s12 = smov 0   ;;  %s2318_s13 = smov 0  }
   0x3   :  { %s2320_s14 = smov 0   ;;  %s2322_s15 = smov 0  }
   0x4   :  { %s2324_s16 = smov 0   ;;  %s2326_s17 = smov 0  }
   0x5   :  { %s2328_s18 = smov 0   ;;  %s2330_s19 = smov 0  }
   0x6   :  { %s2332_s20 = smov 0   ;;  %s2334_s21 = smov 0  }
   0x7   :  { %s2336_s22 = smov 0  }
   0x8 LB: > { %s35_s24 = sadd.s32 1, %s2286_s20  ;;  %s39_s25 = sadd.s32 1, %s2290_s21  ;;  %s2294_s22 = sphi %s2336_s22, %s13_s22   ;;  %s2290_s21 = sphi %s2334_s21, %s2765_s21   ;;  %s2286_s20 = sphi %s2332_s20, %s2764_s20   ;;  %s2282_s19 = sphi %s2330_s19, %s2763_s19   ;;  %s2278_s18 = sphi %s2328_s18, %s2762_s18   ;;  %s2274_s17 = sphi %s2326_s17, %s2761_s17   ;;  %s2270_s16 = sphi %s2324_s16, %s2760_s16   ;;  %s2266_s15 = sphi %s2322_s15, %s2759_s15   ;;  %s2262_s14 = sphi %s2320_s14, %s2758_s14   ;;  %s2258_s13 = sphi %s2318_s13, %s2757_s13   ;;  %s2254_s12 = sphi %s2316_s12, %s2756_s12  }
   0x9   : > { %p37_p0 = scmp.ge.s32.totalorder %s35_s24, 4  ;;  %s50_s26 = sadd.s32 1, %s2274_s17 }
   0xa   : > { %p57_p1 = scmp.ne.s32.totalorder %s2274_s17, %s2270_s16  ;;  %p58_p2 = scmp.eq.s32.totalorder %s2294_s22, 0 }
   0xb   : > { %s2767_s24 = smov (%p37_p0, %s35_s24), 0  ;;  %s2769_s25 = smov (!%p37_p0, %s39_s25), %s2290_s21 }
   0xc   : > { %s46_s27 = ssub.s32 %s2286_s20, %s2767_s24  ;;  %p41_p3 = scmp.ge.s32.totalorder %s2769_s25, 2 }
   0xd   : > { %s74_s28 = sadd.s32 4, %s2286_s20  ;;  %p2389_p4 = por %p58_p2, %p57_p1 }
   0xe   : > { %s76_s30 = sadd.s32 4, %s2767_s24  ;;  %s2771_s25 = smov (%p41_p3, %s2769_s25), 0 }
   0xf   : > { %2749 = sst [smem:[#allocation9_spill]] %s2771_s25  ;;  %s78_s4 = ssub.s32 %s74_s28, %s76_s30 }
  0x10   : > { %s82_s5 = sadd.s32 1, %s2266_s15  ;;  %s45_s6 = ssub.s32 %s2290_s21, %s2771_s25 }
  0x11   : > { %p89_p5 = scmp.ne.s32.totalorder %s2266_s15, %s2262_s14  ;;  %s47_s7 = sor.u32 %s46_s27, %s45_s6 }
  0x12   : > { %s79_s8 = sor.u32 %s78_s4, %s45_s6  ;;  %p48_p6 = scmp.eq.s32.totalorder %s47_s7, 0 }
  0x13   : > { %p80_p7 = scmp.eq.s32.totalorder %s79_s8, 0  ;;  %p2403_p8 = por %p89_p5, %p58_p2 }
  0x14   : > { %s106_s10 = sadd.s32 8, %s2286_s20  ;;  %s108_s30 = sadd.s32 8, %s2767_s24 }
  0x15   : > { %s2409_s11 = scalar_select %p48_p6, %s2274_s17, %s50_s26  }
  0x16   : > { %s2412_s28 = scalar_select %p80_p7, %s2266_s15, %s82_s5  }
  0x17   : > { %s114_s23 = sadd.s32 1, %s2258_s13  ;;  %s110_s25 = ssub.s32 %s106_s10, %s108_s30 }
  0x18   : > { %p121_p9 = scmp.ne.s32.totalorder %s2258_s13, %s2254_s12  ;;  %s111_s27 = sor.u32 %s110_s25, %s45_s6 }
  0x19   : > { %s2751_s3 = sadd.s32 4294967295, %s2294_s22   ;;  %p112_p11 = scmp.eq.s32.totalorder %s111_s27, 0 }
  0x1a   : > { %p155_p10 = scmp.eq.s32.totalorder %s2751_s3, 7  ;;  %p2422_p12 = por %p121_p9, %p58_p2 }
  0x1b   : > { %s2434_s26 = scalar_select %p112_p11, %s2258_s13, %s114_s23  }
  0x1c   : > { %p2429_p13 = por %p155_p10, %p57_p1  ;;  %p1747_p0 = scmp.ge.s32.totalorder %s2294_s22, 8 }
  0x1e   : > { %177 = sbr.rel (%p1747_p0) target bundleno = 91 (0x5b), region = 16 }
  0x25   : > { %180 = sbr.rel (!%p2389_p4) target bundleno = 55 (0x37), region = 20  ;;  %s182_s3 = sand.u32 (%p2389_p4), 1, %s2274_s17  }
  0x26   : > { %s1999_s25 = smul.u32 (%p2389_p4), 192, %s2290_s21  ;;  %s1748_s5 = sshll.u32 (%p2389_p4), %s182_s3, 6 }
  0x27   : > { %s184_s23 = scalar_lea.vmem (%p2389_p4), [#allocation5], %s1748_s5 }
  0x28   : > { %s188_s6 = sadd.s32 (%p2389_p4), %s2286_s20, %s1999_s25 }
  0x29   : > { %s1751_s8 = sshll.u32 (%p2389_p4), %s188_s6, 2 }
  0x2a   : > { %s2445_s27 = scalar_lea.vmem (%p2389_p4), %s2742_s0, %s1751_s8 }
  0x2b   : > { %v206_v0 = vld [vmem:[%s2445_s27] sm:$0xf] (%p2389_p4)  ;;  %v208_v1 = vld [vmem:[%s2445_s27 + $0x30] sm:$0xf] (%p2389_p4) }
  0x2c   : > { %v210_v2 = vld [vmem:[%s2445_s27 + $0x60] sm:$0xf]  ;;  %207 = vst [vmem:[%s184_s23] sm:$0xf] %v206_v0  ;;  %209 = vst [vmem:[%s184_s23 + $0x4] sm:$0xf] %v208_v1 }
  0x2d   : > { %211 = vst [vmem:[%s184_s23 + $0x8] sm:$0xf] %v210_v2  ;;  %v212_v3 = vld [vmem:[%s2445_s27 + $0x90] sm:$0xf]  ;;  %v214_v4 = vld [vmem:[%s2445_s27 + $0xc0] sm:$0xf] }
  0x2e   : > { %v216_v5 = vld [vmem:[%s2445_s27 + $0xf0] sm:$0xf]  ;;  %213 = vst [vmem:[%s184_s23 + $0xc] sm:$0xf] %v212_v3  ;;  %215 = vst [vmem:[%s184_s23 + $0x10] sm:$0xf] %v214_v4 }
  0x2f   : > { %217 = vst [vmem:[%s184_s23 + $0x14] sm:$0xf] %v216_v5  ;;  %v218_v6 = vld [vmem:[%s2445_s27 + $0x120] sm:$0xf]  ;;  %v220_v7 = vld [vmem:[%s2445_s27 + $0x150] sm:$0xf] }
  0x30   : > { %v222_v8 = vld [vmem:[%s2445_s27 + $0x180] sm:$0xf]  ;;  %219 = vst [vmem:[%s184_s23 + $0x18] sm:$0xf] %v218_v6  ;;  %221 = vst [vmem:[%s184_s23 + $0x1c] sm:$0xf] %v220_v7 }
  0x31   : > { %223 = vst [vmem:[%s184_s23 + $0x20] sm:$0xf] %v222_v8  ;;  %v224_v9 = vld [vmem:[%s2445_s27 + $0x1b0] sm:$0xf]  ;;  %v226_v10 = vld [vmem:[%s2445_s27 + $0x1e0] sm:$0xf] }
  0x32   : > { %v228_v11 = vld [vmem:[%s2445_s27 + $0x210] sm:$0xf]  ;;  %225 = vst [vmem:[%s184_s23 + $0x24] sm:$0xf] %v224_v9  ;;  %227 = vst [vmem:[%s184_s23 + $0x28] sm:$0xf] %v226_v10 }
  0x33   : > { %229 = vst [vmem:[%s184_s23 + $0x2c] sm:$0xf] %v228_v11  ;;  %v230_v12 = vld [vmem:[%s2445_s27 + $0x240] sm:$0xf]  ;;  %v232_v13 = vld [vmem:[%s2445_s27 + $0x270] sm:$0xf] }
  0x34   : > { %v234_v14 = vld [vmem:[%s2445_s27 + $0x2a0] sm:$0xf]  ;;  %231 = vst [vmem:[%s184_s23 + $0x30] sm:$0xf] %v230_v12  ;;  %233 = vst [vmem:[%s184_s23 + $0x34] sm:$0xf] %v232_v13 }
  0x35   : > { %235 = vst [vmem:[%s184_s23 + $0x38] sm:$0xf] %v234_v14  ;;  %v236_v15 = vld [vmem:[%s2445_s27 + $0x2d0] sm:$0xf] }
  0x36   : > { %237 = vst [vmem:[%s184_s23 + $0x3c] sm:$0xf] %v236_v15 }
  0x37 PF: > { %292 = sbr.rel (!%p2403_p8) target bundleno = 73 (0x49), region = 61  ;;  %s294_s29 = sand.u32 (%p2403_p8), 1, %s2266_s15  }
  0x38   : > { %s1642_s3 = smul.u32 (%p2403_p8), 192, %s2290_s21  ;;  %s1752_s25 = sshll.u32 (%p2403_p8), %s294_s29, 6 }
  0x39   : > { %s296_s9 = scalar_lea.vmem (%p2403_p8), [#allocation6], %s1752_s25 }
  0x3a   : > { %s1643_s5 = sadd.s32 (%p2403_p8), %s2286_s20, %s1642_s3 }
  0x3b   : > { %s1753_s6 = sshll.u32 (%p2403_p8), %s1643_s5, 2 }
  0x3c   : > { %s2471_s30 = scalar_lea.vmem (%p2403_p8), %s2743_s1, %s1753_s6 }
  0x3d   : > { %v1754_v16 = vld [vmem:[%s2471_s30 + $0x10] sm:$0xf] (%p2403_p8)  ;;  %v1755_v17 = vld [vmem:[%s2471_s30 + $0x40] sm:$0xf] (%p2403_p8) }
  0x3e   : > { %v1756_v18 = vld [vmem:[%s2471_s30 + $0x70] sm:$0xf]  ;;  %320 = vst [vmem:[%s296_s9] sm:$0xf] %v1754_v16  ;;  %322 = vst [vmem:[%s296_s9 + $0x4] sm:$0xf] %v1755_v17 }
  0x3f   : > { %324 = vst [vmem:[%s296_s9 + $0x8] sm:$0xf] %v1756_v18  ;;  %v1757_v19 = vld [vmem:[%s2471_s30 + $0xa0] sm:$0xf]  ;;  %v1758_v20 = vld [vmem:[%s2471_s30 + $0xd0] sm:$0xf] }
  0x40   : > { %v1759_v21 = vld [vmem:[%s2471_s30 + $0x100] sm:$0xf]  ;;  %326 = vst [vmem:[%s296_s9 + $0xc] sm:$0xf] %v1757_v19  ;;  %328 = vst [vmem:[%s296_s9 + $0x10] sm:$0xf] %v1758_v20 }
  0x41   : > { %330 = vst [vmem:[%s296_s9 + $0x14] sm:$0xf] %v1759_v21  ;;  %v1760_v22 = vld [vmem:[%s2471_s30 + $0x130] sm:$0xf]  ;;  %v1761_v23 = vld [vmem:[%s2471_s30 + $0x160] sm:$0xf] }
  0x42   : > { %v1762_v24 = vld [vmem:[%s2471_s30 + $0x190] sm:$0xf]  ;;  %332 = vst [vmem:[%s296_s9 + $0x18] sm:$0xf] %v1760_v22  ;;  %334 = vst [vmem:[%s296_s9 + $0x1c] sm:$0xf] %v1761_v23 }
  0x43   : > { %336 = vst [vmem:[%s296_s9 + $0x20] sm:$0xf] %v1762_v24  ;;  %v1763_v25 = vld [vmem:[%s2471_s30 + $0x1c0] sm:$0xf]  ;;  %v1764_v26 = vld [vmem:[%s2471_s30 + $0x1f0] sm:$0xf] }
  0x44   : > { %v1765_v27 = vld [vmem:[%s2471_s30 + $0x220] sm:$0xf]  ;;  %338 = vst [vmem:[%s296_s9 + $0x24] sm:$0xf] %v1763_v25  ;;  %340 = vst [vmem:[%s296_s9 + $0x28] sm:$0xf] %v1764_v26 }
  0x45   : > { %342 = vst [vmem:[%s296_s9 + $0x2c] sm:$0xf] %v1765_v27  ;;  %v1766_v28 = vld [vmem:[%s2471_s30 + $0x250] sm:$0xf]  ;;  %v1767_v29 = vld [vmem:[%s2471_s30 + $0x280] sm:$0xf] }
  0x46   : > { %v1768_v30 = vld [vmem:[%s2471_s30 + $0x2b0] sm:$0xf]  ;;  %344 = vst [vmem:[%s296_s9 + $0x30] sm:$0xf] %v1766_v28  ;;  %346 = vst [vmem:[%s296_s9 + $0x34] sm:$0xf] %v1767_v29 }
  0x47   : > { %348 = vst [vmem:[%s296_s9 + $0x38] sm:$0xf] %v1768_v30  ;;  %v1769_v31 = vld [vmem:[%s2471_s30 + $0x2e0] sm:$0xf] }
  0x48   : > { %350 = vst [vmem:[%s296_s9 + $0x3c] sm:$0xf] %v1769_v31 }
  0x49 PF: > { %405 = sbr.rel (!%p2422_p12) target bundleno = 91 (0x5b), region = 102  ;;  %s407_s27 = sand.u32 (%p2422_p12), 1, %s2258_s13  }
  0x4a   : > { %s1650_s23 = smul.u32 (%p2422_p12), 192, %s2290_s21  ;;  %s1770_s29 = sshll.u32 (%p2422_p12), %s407_s27, 6 }
  0x4b   : > { %s409_s4 = scalar_lea.vmem (%p2422_p12), [#allocation7], %s1770_s29 }
  0x4c   : > { %s1651_s3 = sadd.s32 (%p2422_p12), %s2286_s20, %s1650_s23 }
  0x4d   : > { %s1771_s25 = sshll.u32 (%p2422_p12), %s1651_s3, 2 }
  0x4e   : > { %s2497_s8 = scalar_lea.vmem (%p2422_p12), %s2744_s2, %s1771_s25 }
  0x4f   : > { %v1772_v32 = vld [vmem:[%s2497_s8 + $0x20] sm:$0xf] (%p2422_p12)  ;;  %v1773_v33 = vld [vmem:[%s2497_s8 + $0x50] sm:$0xf] (%p2422_p12) }
  0x50   : > { %v1774_v34 = vld [vmem:[%s2497_s8 + $0x80] sm:$0xf]  ;;  %433 = vst [vmem:[%s409_s4] sm:$0xf] %v1772_v32  ;;  %435 = vst [vmem:[%s409_s4 + $0x4] sm:$0xf] %v1773_v33 }
  0x51   : > { %437 = vst [vmem:[%s409_s4 + $0x8] sm:$0xf] %v1774_v34  ;;  %v1775_v35 = vld [vmem:[%s2497_s8 + $0xb0] sm:$0xf]  ;;  %v1776_v36 = vld [vmem:[%s2497_s8 + $0xe0] sm:$0xf] }
  0x52   : > { %v1777_v37 = vld [vmem:[%s2497_s8 + $0x110] sm:$0xf]  ;;  %439 = vst [vmem:[%s409_s4 + $0xc] sm:$0xf] %v1775_v35  ;;  %441 = vst [vmem:[%s409_s4 + $0x10] sm:$0xf] %v1776_v36 }
  0x53   : > { %443 = vst [vmem:[%s409_s4 + $0x14] sm:$0xf] %v1777_v37  ;;  %v1778_v38 = vld [vmem:[%s2497_s8 + $0x140] sm:$0xf]  ;;  %v1779_v39 = vld [vmem:[%s2497_s8 + $0x170] sm:$0xf] }
  0x54   : > { %v1780_v40 = vld [vmem:[%s2497_s8 + $0x1a0] sm:$0xf]  ;;  %445 = vst [vmem:[%s409_s4 + $0x18] sm:$0xf] %v1778_v38  ;;  %447 = vst [vmem:[%s409_s4 + $0x1c] sm:$0xf] %v1779_v39 }
  0x55   : > { %449 = vst [vmem:[%s409_s4 + $0x20] sm:$0xf] %v1780_v40  ;;  %v1781_v41 = vld [vmem:[%s2497_s8 + $0x1d0] sm:$0xf]  ;;  %v1782_v42 = vld [vmem:[%s2497_s8 + $0x200] sm:$0xf] }
  0x56   : > { %v1783_v43 = vld [vmem:[%s2497_s8 + $0x230] sm:$0xf]  ;;  %451 = vst [vmem:[%s409_s4 + $0x24] sm:$0xf] %v1781_v41  ;;  %453 = vst [vmem:[%s409_s4 + $0x28] sm:$0xf] %v1782_v42 }
  0x57   : > { %455 = vst [vmem:[%s409_s4 + $0x2c] sm:$0xf] %v1783_v43  ;;  %v1784_v44 = vld [vmem:[%s2497_s8 + $0x260] sm:$0xf]  ;;  %v1785_v45 = vld [vmem:[%s2497_s8 + $0x290] sm:$0xf] }
  0x58   : > { %v1786_v46 = vld [vmem:[%s2497_s8 + $0x2c0] sm:$0xf]  ;;  %457 = vst [vmem:[%s409_s4 + $0x30] sm:$0xf] %v1784_v44  ;;  %459 = vst [vmem:[%s409_s4 + $0x34] sm:$0xf] %v1785_v45 }
  0x59   : > { %461 = vst [vmem:[%s409_s4 + $0x38] sm:$0xf] %v1786_v46  ;;  %v1787_v47 = vld [vmem:[%s2497_s8 + $0x2f0] sm:$0xf] }
  0x5a   : > { %463 = vst [vmem:[%s409_s4 + $0x3c] sm:$0xf] %v1787_v47 }
  0x5b PF: > { %p1788_p1 = scmp.ge.s32.totalorder %s2294_s22, 1  ;;  %p517_p2 = scmp.lt.s32.totalorder %s2294_s22, 9 }
  0x5d   : > { %p518_p3 = pnand %p1788_p1, %p517_p2 }
  0x5e   : > { %s531_s10 = sand.u32 (!%p518_p3), 1, %s2262_s14   ;;  %s524_s9 = sand.u32 (!%p518_p3), 1, %s2270_s16  }
  0x5f   : > { %521 = sbr.rel (%p518_p3) target bundleno = 795 (0x31b), region = 143  ;;  %s1790_s30 = sshll.u32 (!%p518_p3), %s531_s10, 6 }
  0x60   : > { %s533_s27 = scalar_lea.vmem (!%p518_p3), [#allocation6], %s1790_s30  ;;  %s2519_s23 = sshll.u32 (!%p518_p3), %s524_s9, 6 }
  0x61   : > { %v2088_v48 = vld [vmem:[%s533_s27] sm:$0xff] (!%p518_p3)   ;;  %v2089_v49 = vld [vmem:[%s533_s27 + $0x8] sm:$0xff] (!%p518_p3)   ;;  %v2090_v50 = vld [vmem:[%s533_s27 + $0x10] sm:$0xff] (!%p518_p3)   ;;  %s2522_s29 = scalar_lea.vmem (!%p518_p3), [#allocation5], %s2519_s23  ;;  %s538_s14 = sand.u32 (!%p518_p3), 1, %s2254_s12  }
  0x62   : > { %1935 = vmatprep.subr.bf16.mxu0 (!%p518_p3), %v2088_v48  ;;  %v2096_v51 = vld [vmem:[%s2522_s29] sm:$0xff] (!%p518_p3)   ;;  %v2091_v52 = vld [vmem:[%s533_s27 + $0x18] sm:$0xff] (!%p518_p3)   ;;  %v2093_v54 = vld [vmem:[%s533_s27 + $0x28] sm:$0xff] (!%p518_p3)   ;;  %s1791_s16 = sshll.u32 (!%p518_p3), %s538_s14, 6  ;;  %s2669_s12 = scalar_lea.vmem (!%p518_p3), [#allocation8], %s2519_s23 }
  0x63   : > { %1936 = vmatpush3.bf16.xpose.msra.mxu0 (!%p518_p3), %v2088_v48  ;;  %1951 = vmatprep.mubr.bf16.mxu0 (!%p518_p3), %v2096_v51  ;;  %v2092_v53 = vld [vmem:[%s533_s27 + $0x20] sm:$0xff] (!%p518_p3)   ;;  %v2094_v55 = vld [vmem:[%s533_s27 + $0x30] sm:$0xff] (!%p518_p3)   ;;  %v2095_v56 = vld [vmem:[%s533_s27 + $0x38] sm:$0xff] (!%p518_p3)   ;;  %s2533_s3 = scalar_lea.vmem (!%p518_p3), [#allocation7], %s1791_s16 }
  0x64   : > { %1937 = vmatprep.subr.bf16.mxu0 (!%p518_p3), %v2089_v49  ;;  %v2097_v57 = vld [vmem:[%s2522_s29 + $0x8] sm:$0xff] (!%p518_p3)   ;;  %v2098_v58 = vld [vmem:[%s2522_s29 + $0x10] sm:$0xff] (!%p518_p3)   ;;  %v2099_v59 = vld [vmem:[%s2522_s29 + $0x18] sm:$0xff] (!%p518_p3)  }
  0x65   : > { %v2100_v60 = vld [vmem:[%s2522_s29 + $0x20] sm:$0xff] (!%p518_p3)   ;;  %v2101_v61 = vld [vmem:[%s2522_s29 + $0x28] sm:$0xff] (!%p518_p3)   ;;  %v2102_v62 = vld [vmem:[%s2522_s29 + $0x30] sm:$0xff] (!%p518_p3)  }
  0x66   : > { %v2103_v63 = vld [vmem:[%s2522_s29 + $0x38] sm:$0xff]   ;;  %v2104_v0 = vld [vmem:[%s2533_s3] sm:$0xff]   ;;  %v2105_v1 = vld [vmem:[%s2533_s3 + $0x8] sm:$0xff]   ;;  %s1855_s25 = sshll.u32 (%p2429_p13), %s2282_s19, 6  ;;  %s2754_s4 = sld [smem:[#allocation10_spill]] (%p2429_p13) }
  0x67   : > { %1967 = vmatprep.subr.bf16.mxu1 %v2104_v0  ;;  %v2106_v2 = vld [vmem:[%s2533_s3 + $0x10] sm:$0xff]   ;;  %v2107_v14 = vld [vmem:[%s2533_s3 + $0x18] sm:$0xff]   ;;  %v2108_v16 = vld [vmem:[%s2533_s3 + $0x20] sm:$0xff]   ;;  %s1518_s5 = sadd.s32 (%p2429_p13), %s2278_s18, %s1855_s25 }
  0x68   : > { %1968 = vmatpush3.bf16.msra.mxu1 %v2104_v0  ;;  %v2109_v20 = vld [vmem:[%s2533_s3 + $0x28] sm:$0xff]   ;;  %v2110_v22 = vld [vmem:[%s2533_s3 + $0x30] sm:$0xff]   ;;  %v2111_v23 = vld [vmem:[%s2533_s3 + $0x38] sm:$0xff]   ;;  %s1836_s7 = sshll.u32 (%p2429_p13), %s1518_s5, 2 }
  0x69   : > { %1969 = vmatprep.subr.bf16.mxu1 %v2105_v1 }
  0x6b   : > { %1938 = vmatpush3.bf16.xpose.msra.mxu0 %v2089_v49 }
  0x6c   : > { %1939 = vmatprep.subr.bf16.mxu0 %v2090_v50  ;;  %1970 = vmatpush3.bf16.msra.mxu1 %v2105_v1  ;;  %s1520_s10 = scalar_lea.vmem (%p2429_p13), %s2754_s4, %s1836_s7 }
  0x6d   : > { %1971 = vmatprep.subr.bf16.mxu1 %v2106_v2 }
  0x70   : > { %1972 = vmatpush3.bf16.msra.mxu1 %v2106_v2 }
  0x71   : > { %1973 = vmatprep.subr.bf16.mxu1 %v2107_v14 }
  0x73   : > { %1940 = vmatpush3.bf16.xpose.msra.mxu0 %v2090_v50 }
  0x74   : > { %1941 = vmatprep.subr.bf16.mxu0 %v2091_v52  ;;  %1974 = vmatpush3.bf16.msra.mxu1 %v2107_v14 }
  0x75   : > { %1975 = vmatprep.subr.bf16.mxu1 %v2108_v16 }
  0x78   : > { %1976 = vmatpush3.bf16.msra.mxu1 %v2108_v16 }
  0x79   : > { %1977 = vmatprep.subr.bf16.mxu1 %v2109_v20 }
  0x7b   : > { %1942 = vmatpush3.bf16.xpose.msra.mxu0 %v2091_v52 }
  0x7c   : > { %1943 = vmatprep.subr.bf16.mxu0 %v2092_v53  ;;  %1978 = vmatpush3.bf16.msra.mxu1 %v2109_v20 }
  0x7d   : > { %1979 = vmatprep.subr.bf16.mxu1 %v2110_v22 }
  0x80   : > { %1980 = vmatpush3.bf16.msra.mxu1 %v2110_v22 }
  0x81   : > { %1981 = vmatprep.subr.bf16.mxu1 %v2111_v23 }
  0x83   : > { %1944 = vmatpush3.bf16.xpose.msra.mxu0 %v2092_v53 }
  0x84   : > { %1945 = vmatprep.subr.bf16.mxu0 %v2093_v54  ;;  %1982 = vmatpush3.bf16.msra.mxu1 %v2111_v23 }
  0x8b   : > { %1946 = vmatpush3.bf16.xpose.msra.mxu0 %v2093_v54 }
  0x8c   : > { %1947 = vmatprep.subr.bf16.mxu0 %v2094_v55 }
  0x93   : > { %1948 = vmatpush3.bf16.xpose.msra.mxu0 %v2094_v55 }
  0x94   : > { %1949 = vmatprep.subr.bf16.mxu0 %v2095_v56 }
  0x9b   : > { %1950 = vmatpush3.bf16.xpose.msra.mxu0 %v2095_v56 }
  0xa2   : > { %1952 = vmatmul.mubr.bf16.vlgmr.msra.gmra.mrb[0].mxu0 %v2097_v57 }
  0xa3   : > { %1955 = vmatprep.mubr.bf16.mxu0 %v2098_v58 }
  0xaa   : > { %1956 = vmatmul.mubr.bf16.gmra.mrb[4].mxu0 %v2099_v59 }
  0xab   : > { %1959 = vmatprep.mubr.bf16.mxu0 %v2100_v60 }
  0xb2   : > { %1960 = vmatmul.mubr.bf16.gmra.mrb[8].mxu0 %v2101_v61 }
  0xb3   : > { %1963 = vmatprep.mubr.bf16.mxu0 %v2102_v62 }
  0xba   : > { %1964 = vmatmul.mubr.bf16.gmra.mrb[12].mxu0 %v2103_v63 }
 0x175   : > { %v1953_v3 = vpop.f32.mrb[0].mxu0 }
 0x176   : > { %876 = vmax.xlane.f32.xlu1 %v1953_v3  ;;  %v793_v4 = vpop.f32.mrb[1].mxu0 }
 0x177   : > { %872 = vmax.xlane.f32.xlu0 %v793_v4  ;;  %v1954_v5 = vpop.f32.mrb[2].mxu0 }
 0x178   : > { %v796_v6 = vpop.f32.mrb[3].mxu0 }
 0x17a   : > { %878 = vmax.xlane.f32.xlu1 %v1954_v5 }
 0x17b   : > { %874 = vmax.xlane.f32.xlu0 %v796_v6 }
 0x17d   : > { %v2538_v7 = vpop.f32.mrb[4].mxu0 }
 0x17e   : > { %v809_v8 = vpop.f32.mrb[5].mxu0 }
 0x17f   : > { %880 = vmax.xlane.f32.xlu0 %v809_v8  ;;  %v2540_v9 = vpop.f32.mrb[6].mxu0 }
 0x180   : > { %v812_v10 = vpop.f32.mrb[7].mxu0 }
 0x181   : > { %882 = vmax.xlane.f32.xlu1 %v812_v10 }
 0x183   : > { %884 = vmax.xlane.f32.xlu0 %v2538_v7 }
 0x185   : > { %886 = vmax.xlane.f32.xlu1 %v2540_v9  ;;  %v2544_v11 = vpop.f32.mrb[8].mxu0 }
 0x186   : > { %v2546_v12 = vpop.f32.mrb[9].mxu0 }
 0x187   : > { %888 = vmax.xlane.f32.xlu0 %v2546_v12  ;;  %v2549_v13 = vpop.f32.mrb[10].mxu0 }
 0x188   : > { %v2552_v15 = vpop.f32.mrb[11].mxu0 }
 0x189   : > { %890 = vmax.xlane.f32.xlu1 %v2552_v15 }
 0x18b   : > { %892 = vmax.xlane.f32.xlu0 %v2544_v11 }
 0x18d   : > { %894 = vmax.xlane.f32.xlu1 %v2549_v13  ;;  %v2558_v17 = vpop.f32.mrb[12].mxu0 }
 0x18e   : > { %v2560_v18 = vpop.f32.mrb[13].mxu0 }
 0x18f   : > { %896 = vmax.xlane.f32.xlu0 %v2560_v18  ;;  %v2563_v19 = vpop.f32.mrb[14].mxu0 }
 0x190   : > { %v2566_v21 = vpop.f32.mrb[15].mxu0 }
 0x191   : > { %898 = vmax.xlane.f32.xlu1 %v2566_v21 }
 0x193   : > { %900 = vmax.xlane.f32.xlu0 %v2558_v17 }
 0x195   : > { %902 = vmax.xlane.f32.xlu1 %v2563_v19 }
 0x203   : > { %v2573_v24 = vpop.xlane.xlu1 %876 }
 0x204   : > { %v970_v25 = vsub.f32 %v1953_v3, %v2573_v24  ;;  %v2576_v26 = vpop.xlane.xlu0 %872 }
 0x205   : > { %v968_v27 = vsub.f32 %v793_v4, %v2576_v26 }
 0x206   : > { %v988_v28 = vmul.f32 1.442695, %v970_v25 }
 0x207   : > { %v2579_v29 = vpop.xlane.xlu1 %878  ;;  %v984_v30 = vmul.f32 1.442695, %v968_v27 }
 0x208   : > { %v971_v31 = vsub.f32 %v1954_v5, %v2579_v29  ;;  %v2582_v32 = vpop.xlane.xlu0 %874  ;;  %2112 = vpow2.f32 %v988_v28 }
 0x209   : > { %v969_v33 = vsub.f32 %v796_v6, %v2582_v32  ;;  %2114 = vpow2.f32 %v984_v30 }
 0x20a   : > { %v990_v34 = vmul.f32 1.442695, %v971_v31 }
 0x20b   : > { %v986_v35 = vmul.f32 1.442695, %v969_v33 }
 0x20c   : > { %v2585_v36 = vpop.xlane.xlu0 %880  ;;  %2116 = vpow2.f32 %v990_v34 }
 0x20d   : > { %v972_v37 = vsub.f32 %v809_v8, %v2585_v36  ;;  %2118 = vpow2.f32 %v986_v35 }
 0x20e   : > { %v2588_v38 = vpop.xlane.xlu1 %882 }
 0x20f   : > { %v973_v39 = vsub.f32 %v812_v10, %v2588_v38  ;;  %v992_v41 = vmul.f32 1.442695, %v972_v37  ;;  %v922_v37 = vsub.f32 -inf, %v2573_v24 }
 0x210   : > { %v2591_v40 = vpop.xlane.xlu0 %884 }
 0x211   : > { %v974_v42 = vsub.f32 %v2538_v7, %v2591_v40  ;;  %v994_v43 = vmul.f32 1.442695, %v973_v39  ;;  %v920_v39 = vsub.f32 -inf, %v2576_v26  ;;  %v925_v26 = vsub.f32 -inf, %v2588_v38 }
 0x212   : > { %v2595_v44 = vpop.xlane.xlu1 %886  ;;  %v2113_v45 = vpop.eup %2112 }
 0x213   : > { %v996_v46 = vmul.f32 1.442695, %v974_v42  ;;  %2120 = vpow2.f32 %v994_v43  ;;  %v975_v47 = vsub.f32 %v2540_v9, %v2595_v44  ;;  %1052 = vadd.xlane.f32.xlu0 %v2113_v45  ;;  %v2115_v50 = vpop.eup %2114  ;;  %v921_v42 = vsub.f32 -inf, %v2582_v32 }
 0x214   : > { %v2599_v48 = vpop.xlane.xlu0 %888  ;;  %2122 = vpow2.f32 %v992_v41  ;;  %v923_v41 = vsub.f32 -inf, %v2579_v29  ;;  %v940_v43 = vmul.f32 1.442695, %v922_v37  ;;  %v927_v24 = vsub.f32 -inf, %v2595_v44 }
 0x215   : > { %v976_v49 = vsub.f32 %v2546_v12, %v2599_v48  ;;  %2124 = vpow2.f32 %v996_v46  ;;  %v998_v51 = vmul.f32 1.442695, %v975_v47 }
 0x216   : > { %v2603_v52 = vpop.xlane.xlu1 %890  ;;  %v2117_v53 = vpop.eup %2116  ;;  %v942_v46 = vmul.f32 1.442695, %v923_v41 }
 0x217   : > { %v1000_v54 = vmul.f32 1.442695, %v976_v49  ;;  %2126 = vpow2.f32 %v998_v51  ;;  %v977_v55 = vsub.f32 %v2552_v15, %v2603_v52  ;;  %1048 = vadd.xlane.f32.xlu0 %v2115_v50  ;;  %1054 = vadd.xlane.f32.xlu1 %v2117_v53  ;;  %v1145_v57 = vpack.c.bf16 %v2117_v53, %v2113_v45  ;;  %v2119_v58 = vpop.eup %2118 }
 0x218   : > { %v2607_v56 = vpop.xlane.xlu0 %892  ;;  %v1144_v61 = vpack.c.bf16 %v2119_v58, %v2115_v50  ;;  %v936_v45 = vmul.f32 1.442695, %v920_v39  ;;  %v938_v49 = vmul.f32 1.442695, %v921_v42  ;;  %v926_v51 = vsub.f32 -inf, %v2591_v40 }
 0x219   : > { %v978_v59 = vsub.f32 %v2544_v11, %v2607_v56  ;;  %v1002_v60 = vmul.f32 1.442695, %v977_v55  ;;  %2128 = vpow2.f32 %v1000_v54  ;;  %v924_v53 = vsub.f32 -inf, %v2585_v36 }
 0x21a   : > { %v2611_v62 = vpop.xlane.xlu1 %894  ;;  %1983 = vmatprep.mubr.bf16.mxu1 %v1144_v61  ;;  %v948_v32 = vmul.f32 1.442695, %v926_v51  ;;  %v930_v40 = vsub.f32 -inf, %v2607_v56 }
 0x21b   : > { %v1004_v63 = vmul.f32 1.442695, %v978_v59  ;;  %2130 = vpow2.f32 %v1002_v60  ;;  %v979_v0 = vsub.f32 %v2549_v13, %v2611_v62  ;;  %1050 = vadd.xlane.f32.xlu1 %v2119_v58  ;;  %1984 = vmatmul.mubr.bf16.vlgmr.msra.gmra.mrb[0].mxu1 %v1145_v57  ;;  %v944_v55 = vmul.f32 1.442695, %v924_v53 }
 0x21c   : > { %v2615_v1 = vpop.xlane.xlu0 %896  ;;  %v950_v57 = vmul.f32 1.442695, %v927_v24  ;;  %v928_v58 = vsub.f32 -inf, %v2599_v48  ;;  %v946_v59 = vmul.f32 1.442695, %v925_v26  ;;  %v929_v60 = vsub.f32 -inf, %v2603_v52 }
 0x21d   : > { %v980_v2 = vsub.f32 %v2560_v18, %v2615_v1  ;;  %v2121_v3 = vpop.eup %2120  ;;  %2132 = vpow2.f32 %v1004_v63  ;;  %v1006_v4 = vmul.f32 1.442695, %v979_v0  ;;  %v931_v44 = vsub.f32 -inf, %v2611_v62 }
 0x21e   : > { %v2619_v5 = vpop.xlane.xlu1 %898  ;;  %v2123_v6 = vpop.eup %2122  ;;  %v952_v0 = vmul.f32 1.442695, %v928_v58  ;;  %v956_v48 = vmul.f32 1.442695, %v930_v40 }
 0x21f   : > { %v1008_v7 = vmul.f32 1.442695, %v980_v2  ;;  %v2125_v8 = vpop.eup %2124  ;;  %2134 = vpow2.f32 %v1006_v4  ;;  %v981_v9 = vsub.f32 %v2566_v21, %v2619_v5  ;;  %v1146_v10 = vpack.c.bf16 %v2121_v3, %v2123_v6 }
 0x220   : > { %v2623_v11 = vpop.xlane.xlu0 %900  ;;  %1060 = vadd.xlane.f32.xlu0 %v2125_v8 }
 0x221   : > { %v982_v12 = vsub.f32 %v2558_v17, %v2623_v11  ;;  %v2127_v13 = vpop.eup %2126  ;;  %v1010_v14 = vmul.f32 1.442695, %v981_v9  ;;  %1987 = vmatprep.mubr.bf16.mxu1 %v1146_v10  ;;  %2136 = vpow2.f32 %v1008_v7  ;;  %v958_v7 = vmul.f32 1.442695, %v931_v44 }
 0x222   : > { %v2627_v15 = vpop.xlane.xlu1 %902  ;;  %1062 = vadd.xlane.f32.xlu1 %v2127_v13  ;;  %v1147_v20 = vpack.c.bf16 %v2127_v13, %v2125_v8 }
 0x223   : > { %v1012_v16 = vmul.f32 1.442695, %v982_v12  ;;  %2138 = vpow2.f32 %v1010_v14  ;;  %v983_v18 = vsub.f32 %v2563_v19, %v2627_v15  ;;  %v2129_v21 = vpop.eup %2128  ;;  %v932_v12 = vsub.f32 -inf, %v2615_v1 }
 0x224   : > { %1056 = vadd.xlane.f32.xlu0 %v2123_v6  ;;  %1988 = vmatmul.mubr.bf16.gmra.mrb[4].mxu1 %v1147_v20  ;;  %v933_v14 = vsub.f32 -inf, %v2619_v5 }
 0x225   : > { %v2131_v22 = vpop.eup %2130  ;;  %v1014_v23 = vmul.f32 1.442695, %v983_v18  ;;  %2140 = vpow2.f32 %v1012_v16  ;;  %v934_v18 = vsub.f32 -inf, %v2623_v11 }
 0x226   : > { %1058 = vadd.xlane.f32.xlu1 %v2121_v3  ;;  %v1148_v17 = vpack.c.bf16 %v2131_v22, %v2129_v21  ;;  %v954_v3 = vmul.f32 1.442695, %v929_v60  ;;  %v962_v1 = vmul.f32 1.442695, %v933_v14 }
 0x227   : > { %v2133_v25 = vpop.eup %2132  ;;  %2142 = vpow2.f32 %v1014_v23 }
 0x228   : > { %1991 = vmatprep.mubr.bf16.mxu1 %v1148_v17  ;;  %1068 = vadd.xlane.f32.xlu0 %v2133_v25  ;;  %2144 = vpow2.f32 %v940_v43  ;;  %v960_v17 = vmul.f32 1.442695, %v932_v12 }
 0x229   : > { %v2135_v27 = vpop.eup %2134  ;;  %2146 = vpow2.f32 %v936_v45 }
 0x22a   : > { %1070 = vadd.xlane.f32.xlu1 %v2135_v27  ;;  %v1149_v28 = vpack.c.bf16 %v2135_v27, %v2133_v25  ;;  %2148 = vpow2.f32 %v942_v46 }
 0x22b   : > { %v2137_v30 = vpop.eup %2136  ;;  %2150 = vpow2.f32 %v938_v49 }
 0x22c   : > { %1064 = vadd.xlane.f32.xlu0 %v2129_v21  ;;  %1992 = vmatmul.mubr.bf16.gmra.mrb[8].mxu1 %v1149_v28  ;;  %2152 = vpow2.f32 %v948_v32 }
 0x22d   : > { %v2139_v31 = vpop.eup %2138  ;;  %2154 = vpow2.f32 %v944_v55 }
 0x22e   : > { %1066 = vadd.xlane.f32.xlu1 %v2131_v22  ;;  %v1150_v19 = vpack.c.bf16 %v2139_v31, %v2137_v30  ;;  %2156 = vpow2.f32 %v950_v57  ;;  %v935_v22 = vsub.f32 -inf, %v2627_v15 }
 0x22f   : > { %v2141_v33 = vpop.eup %2140  ;;  %2158 = vpow2.f32 %v946_v59 }
 0x230   : > { %1072 = vadd.xlane.f32.xlu0 %v2137_v30  ;;  %1995 = vmatprep.mubr.bf16.mxu1 %v1150_v19  ;;  %2160 = vpow2.f32 %v952_v0  ;;  %v966_v19 = vmul.f32 1.442695, %v935_v22 }
 0x231   : > { %v2143_v34 = vpop.eup %2142  ;;  %2162 = vpow2.f32 %v954_v3 }
 0x232   : > { %1074 = vadd.xlane.f32.xlu1 %v2139_v31  ;;  %v1151_v35 = vpack.c.bf16 %v2143_v34, %v2141_v33  ;;  %v2145_v63 = vpop.eup %2144  ;;  %2164 = vpow2.f32 %v956_v48  ;;  %v964_v31 = vmul.f32 1.442695, %v934_v18 }
 0x233   : > { %v2147_v38 = vpop.eup %2146  ;;  %v1034_v6 = vmul.f32 0.0, %v2145_v63  ;;  %2166 = vpow2.f32 %v958_v7 }
 0x234   : > { %1076 = vadd.xlane.f32.xlu0 %v2141_v33  ;;  %1996 = vmatmul.mubr.bf16.gmra.mrb[12].mxu1 %v1151_v35  ;;  %v2149_v2 = vpop.eup %2148  ;;  %v1032_v52 = vmul.f32 0.0, %v2147_v38 }
 0x235   : > { %v2151_v4 = vpop.eup %2150  ;;  %v1035_v56 = vmul.f32 0.0, %v2149_v2 }
 0x236   : > { %1078 = vadd.xlane.f32.xlu1 %v2143_v34  ;;  %v1033_v13 = vmul.f32 0.0, %v2151_v4  ;;  %v2153_v21 = vpop.eup %2152 }
 0x237   : > { %v2155_v23 = vpop.eup %2154  ;;  %v1038_v5 = vmul.f32 0.0, %v2153_v21 }
 0x238   : > { %v2157_v27 = vpop.eup %2156  ;;  %v2647_v33 = vmul.f32 0.0, %v2155_v23 }
 0x239   : > { %v2159_v30 = vpop.eup %2158  ;;  %v2649_v34 = vmul.f32 0.0, %v2157_v27 }
 0x23a   : > { %v2161_v15 = vpop.eup %2160  ;;  %v2652_v37 = vmul.f32 0.0, %v2159_v30 }
 0x23b   : > { %v2163_v39 = vpop.eup %2162  ;;  %v2658_v59 = vmul.f32 0.0, %v2161_v15 }
 0x23c   : > { %v2165_v43 = vpop.eup %2164  ;;  %v2664_v2 = vmul.f32 0.0, %v2163_v39 }
 0x23d   : > { %v2167_v49 = vpop.eup %2166  ;;  %v2656_v32 = vmul.f32 0.0, %v2165_v43 }
 0x23e   : > { %v2661_v63 = vmul.f32 0.0, %v2167_v49 }
 0x2a0   : > { %v1053_v47 = vpop.xlane.xlu0 %1052 }
 0x2a1   : > { %v1082_v9 = vadd.f32 %v1053_v47, %v1034_v6 }
 0x2a3   : > { %2168 = vrcp.f32 %v1082_v9 }
 0x2a4   : > { %v1055_v50 = vpop.xlane.xlu1 %1054  ;;  %v1049_v29 = vpop.xlane.xlu0 %1048 }
 0x2a5   : > { %v1080_v62 = vadd.f32 %v1049_v29, %v1032_v52  ;;  %v1083_v16 = vadd.f32 %v1055_v50, %v1035_v56 }
 0x2a7   : > { %2170 = vrcp.f32 %v1080_v62 }
 0x2a8   : > { %v1051_v54 = vpop.xlane.xlu1 %1050  ;;  %2172 = vrcp.f32 %v1083_v16 }
 0x2a9   : > { %v1081_v20 = vadd.f32 %v1051_v54, %v1033_v13 }
 0x2ab   : > { %2174 = vrcp.f32 %v1081_v20 }
 0x2ac   : > { %2176 = vpow2.f32 %v960_v17 }
 0x2ad   : > { %v1061_v61 = vpop.xlane.xlu0 %1060  ;;  %2178 = vpow2.f32 %v962_v1  ;;  %v2169_v53 = vpop.eup %2168 }
 0x2ae   : > { %v1086_v11 = vadd.f32 %v1061_v61, %v1038_v5  ;;  %2180 = vpow2.f32 %v964_v31 }
 0x2af   : > { %v1063_v36 = vpop.xlane.xlu1 %1062  ;;  %2182 = vpow2.f32 %v966_v19 }
 0x2b0   : > { %v1087_v41 = vadd.f32 %v1063_v36, %v2649_v34  ;;  %2184 = vrcp.f32 %v1086_v11 }
 0x2b1   : > { %v1057_v8 = vpop.xlane.xlu0 %1056  ;;  %v2171_v29 = vpop.eup %2170 }
 0x2b2   : > { %v1084_v35 = vadd.f32 %v1057_v8, %v2647_v33  ;;  %v2173_v58 = vpop.eup %2172 }
 0x2b3   : > { %v1059_v10 = vpop.xlane.xlu1 %1058 }
 0x2b4   : > { %v1085_v45 = vadd.f32 %v1059_v10, %v2652_v37  ;;  %2186 = vrcp.f32 %v1084_v35 }
 0x2b5   : > { %v1069_v25 = vpop.xlane.xlu0 %1068  ;;  %2188 = vrcp.f32 %v1087_v41  ;;  %v2175_v40 = vpop.eup %2174 }
 0x2b6   : > { %2190 = vrcp.f32 %v1085_v45  ;;  %v1090_v36 = vadd.f32 %v1069_v25, %v2656_v32  ;;  %v2177_v48 = vpop.eup %2176 }
 0x2b7   : > { %v1071_v28 = vpop.xlane.xlu1 %1070  ;;  %v1044_v16 = vmul.f32 0.0, %v2177_v48 }
 0x2b8   : > { %2192 = vrcp.f32 %v1090_v36 }
 0x2b9   : > { %v1065_v42 = vpop.xlane.xlu0 %1064 }
 0x2ba   : > { %v1088_v0 = vadd.f32 %v1065_v42, %v2658_v59 }
 0x2bb   : > { %v1067_v46 = vpop.xlane.xlu1 %1066 }
 0x2bc   : > { %v1089_v8 = vadd.f32 %v1067_v46, %v2664_v2  ;;  %2194 = vrcp.f32 %v1088_v0 }
 0x2bd   : > { %v1073_v44 = vpop.xlane.xlu0 %1072 }
 0x2be   : > { %v1092_v30 = vadd.f32 %v1073_v44, %v1044_v16 }
 0x2bf   : > { %v1075_v3 = vpop.xlane.xlu1 %1074 }
 0x2c1   : > { %v1077_v18 = vpop.xlane.xlu0 %1076 }
 0x2c3   : > { %v1079_v17 = vpop.xlane.xlu1 %1078 }
 0x2ee   : > { %v1985_v47 = vpop.f32.mrb[0].mxu1 }
 0x2ef   : > { %v1315_v50 = vadd.f32 %v1985_v47, %v1034_v6  ;;  %v1250_v51 = vpop.f32.mrb[1].mxu1  ;;  %v1091_v6 = vadd.f32 %v1071_v28, %v2661_v63 }
 0x2f0   : > { %v1313_v24 = vadd.f32 %v1250_v51, %v1032_v52  ;;  %v1986_v26 = vpop.f32.mrb[2].mxu1  ;;  %v2179_v52 = vpop.eup %2178 }
 0x2f1   : > { %v1414_v54 = vmul.f32 %v2169_v53, %v1315_v50  ;;  %v1316_v55 = vadd.f32 %v1986_v26, %v1035_v56  ;;  %v1253_v57 = vpop.f32.mrb[3].mxu1  ;;  %v2181_v56 = vpop.eup %2180  ;;  %2196 = vrcp.f32 %v1091_v6  ;;  %v1045_v15 = vmul.f32 0.0, %v2179_v52 }
 0x2f2   : > { %v1412_v60 = vmul.f32 %v2171_v29, %v1313_v24  ;;  %v1314_v61 = vadd.f32 %v1253_v57, %v1033_v13  ;;  %v2183_v12 = vpop.eup %2182  ;;  %2198 = vrcp.f32 %v1089_v8  ;;  %v1046_v23 = vmul.f32 0.0, %v2181_v56 }
 0x2f3   : > { %v1415_v38 = vmul.f32 %v2173_v58, %v1316_v55  ;;  %v2185_v14 = vpop.eup %2184  ;;  %v1047_v31 = vmul.f32 0.0, %v2183_v12  ;;  %v1093_v42 = vadd.f32 %v1075_v3, %v1045_v15  ;;  %2200 = vrcp.f32 %v1092_v30 }
 0x2f4   : > { %v1413_v4 = vmul.f32 %v2175_v40, %v1314_v61  ;;  %v2187_v22 = vpop.eup %2186 }
 0x2f5   : > { %v1864_v7 = vpack.c.bf16 %v1415_v38, %v1414_v54  ;;  %v2189_v28 = vpop.eup %2188  ;;  %v1095_v39 = vadd.f32 %v1079_v17, %v1047_v31 }
 0x2f6   : > { %v1859_v9 = vpack.c.bf16 %v1413_v4, %v1412_v60  ;;  %v2191_v11 = vpop.eup %2190 }
 0x2f7   : > { %1896 = vst [vmem:[%s2669_s12 + $0x8] sm:$0xff] %v1864_v7   ;;  %v1989_v10 = vpop.f32.mrb[4].mxu1  ;;  %v2193_v49 = vpop.eup %2192 }
 0x2f8   : > { %1860 = vst [vmem:[%s2669_s12] sm:$0xff] %v1859_v9   ;;  %v1319_v62 = vadd.f32 %v1989_v10, %v1038_v5  ;;  %v1266_v13 = vpop.f32.mrb[5].mxu1  ;;  %v2195_v51 = vpop.eup %2194 }
 0x2f9   : > { %v1317_v20 = vadd.f32 %v1266_v13, %v2647_v33  ;;  %v1990_v21 = vpop.f32.mrb[6].mxu1  ;;  %v1094_v33 = vadd.f32 %v1077_v18, %v1046_v23 }
 0x2fa   : > { %v1418_v25 = vmul.f32 %v2185_v14, %v1319_v62  ;;  %v1320_v27 = vadd.f32 %v1990_v21, %v2649_v34  ;;  %v1269_v1 = vpop.f32.mrb[7].mxu1 }
 0x2fb   : > { %v1416_v5 = vmul.f32 %v2187_v22, %v1317_v20  ;;  %v1318_v19 = vadd.f32 %v1269_v1, %v2652_v37  ;;  %2202 = vrcp.f32 %v1094_v33  ;;  %v2197_v29 = vpop.eup %2196 }
 0x2fc   : > { %v1419_v35 = vmul.f32 %v2189_v28, %v1320_v27  ;;  %2204 = vrcp.f32 %v1095_v39 }
 0x2fd   : > { %v1417_v41 = vmul.f32 %v2191_v11, %v1318_v19  ;;  %2206 = vrcp.f32 %v1093_v42 }
 0x2fe   : > { %v1874_v43 = vpack.c.bf16 %v1419_v35, %v1418_v25  ;;  %v1540_v13 = vld [vmem:[%s2669_s12 + $0x8] sm:$0xf] (%p2429_p13)  ;;  %v1542_v14 = vld [vmem:[%s2669_s12 + $0xc] sm:$0xf] (%p2429_p13) }
 0x2ff   : > { %v1869_v45 = vpack.c.bf16 %v1417_v41, %v1416_v5  ;;  %v1993_v34 = vpop.f32.mrb[8].mxu1  ;;  %v1536_v12 = vld [vmem:[%s2669_s12] sm:$0xf] (%p2429_p13)  ;;  %v1538_v62 = vld [vmem:[%s2669_s12 + $0x4] sm:$0xf] (%p2429_p13) }
 0x300   : > { %1898 = vst [vmem:[%s2669_s12 + $0x18] sm:$0xff] %v1874_v43   ;;  %v1323_v46 = vadd.f32 %v1993_v34, %v2656_v32  ;;  %v1282_v47 = vpop.f32.mrb[9].mxu1  ;;  %v2199_v32 = vpop.eup %2198  ;;  %1537 = vst [vmem:[%s1520_s10] sm:$0xf] (%p2429_p13), %v1536_v12 }
 0x301   : > { %1897 = vst [vmem:[%s2669_s12 + $0x10] sm:$0xff] %v1869_v45   ;;  %v1321_v37 = vadd.f32 %v1282_v47, %v2658_v59  ;;  %v1994_v50 = vpop.f32.mrb[10].mxu1  ;;  %v2201_v44 = vpop.eup %2200  ;;  %1539 = vst [vmem:[%s1520_s10 + $0x10] sm:$0xf] (%p2429_p13), %v1538_v62 }
 0x302   : > { %v1422_v53 = vmul.f32 %v2193_v49, %v1323_v46  ;;  %v1324_v24 = vadd.f32 %v1994_v50, %v2661_v63  ;;  %v1285_v26 = vpop.f32.mrb[11].mxu1  ;;  %1541 = vst [vmem:[%s1520_s10 + $0x20] sm:$0xf] (%p2429_p13), %v1540_v13  ;;  %1543 = vst [vmem:[%s1520_s10 + $0x30] sm:$0xf] (%p2429_p13), %v1542_v14 }
 0x303   : > { %v1420_v54 = vmul.f32 %v2195_v51, %v1321_v37  ;;  %v1322_v55 = vadd.f32 %v1285_v26, %v2664_v2 }
 0x304   : > { %v1423_v57 = vmul.f32 %v2197_v29, %v1324_v24 }
 0x305   : > { %v1421_v58 = vmul.f32 %v2199_v32, %v1322_v55  ;;  %v2203_v0 = vpop.eup %2202 }
 0x306   : > { %v1884_v60 = vpack.c.bf16 %v1423_v57, %v1422_v53  ;;  %v2205_v48 = vpop.eup %2204 }
 0x307   : > { %v1879_v61 = vpack.c.bf16 %v1421_v58, %v1420_v54  ;;  %v1997_v40 = vpop.f32.mrb[12].mxu1  ;;  %v2207_v7 = vpop.eup %2206  ;;  %v1548_v20 = vld [vmem:[%s2669_s12 + $0x18] sm:$0xf] (%p2429_p13)  ;;  %v1550_v21 = vld [vmem:[%s2669_s12 + $0x1c] sm:$0xf] (%p2429_p13) }
 0x308   : > { %1900 = vst [vmem:[%s2669_s12 + $0x28] sm:$0xff] %v1884_v60   ;;  %v1327_v59 = vadd.f32 %v1997_v40, %v1046_v23  ;;  %v1298_v36 = vpop.f32.mrb[13].mxu1  ;;  %v1546_v18 = vld [vmem:[%s2669_s12 + $0x14] sm:$0xf] (%p2429_p13)  ;;  %1549 = vst [vmem:[%s1520_s10 + $0x60] sm:$0xf] (%p2429_p13), %v1548_v20 }
 0x309   : > { %1899 = vst [vmem:[%s2669_s12 + $0x20] sm:$0xff] %v1879_v61   ;;  %v1325_v38 = vadd.f32 %v1298_v36, %v1044_v16  ;;  %v1998_v63 = vpop.f32.mrb[14].mxu1  ;;  %v1544_v16 = vld [vmem:[%s2669_s12 + $0x10] sm:$0xf] (%p2429_p13)  ;;  %1547 = vst [vmem:[%s1520_s10 + $0x50] sm:$0xf] (%p2429_p13), %v1546_v18 }
 0x30a   : > { %v1328_v3 = vadd.f32 %v1998_v63, %v1047_v31  ;;  %v1301_v4 = vpop.f32.mrb[15].mxu1  ;;  %v1426_v52 = vmul.f32 %v2203_v0, %v1327_v59  ;;  %1545 = vst [vmem:[%s1520_s10 + $0x40] sm:$0xf] (%p2429_p13), %v1544_v16  ;;  %1551 = vst [vmem:[%s1520_s10 + $0x70] sm:$0xf] (%p2429_p13), %v1550_v21 }
 0x30b   : > { %v1424_v2 = vmul.f32 %v2201_v44, %v1325_v38  ;;  %v1326_v6 = vadd.f32 %v1301_v4, %v1045_v15  ;;  %1514 = sbr.rel (!%p2429_p13) target bundleno = 795 (0x31b), region = 167 }
 0x30c   : > { %v1427_v8 = vmul.f32 %v2205_v48, %v1328_v3 }
 0x30d   : > { %v1425_v9 = vmul.f32 %v2207_v7, %v1326_v6 }
 0x30e   : > { %v1894_v56 = vpack.c.bf16 %v1427_v8, %v1426_v52 }
 0x30f   : > { %v1889_v10 = vpack.c.bf16 %v1425_v9, %v1424_v2  ;;  %v1556_v17 = vld [vmem:[%s2669_s12 + $0x28] sm:$0xf] (%p2429_p13)  ;;  %v1558_v25 = vld [vmem:[%s2669_s12 + $0x2c] sm:$0xf] (%p2429_p13) }
 0x310   : > { %1902 = vst [vmem:[%s2669_s12 + $0x38] sm:$0xff] %v1894_v56   ;;  %v1552_v22 = vld [vmem:[%s2669_s12 + $0x20] sm:$0xf] (%p2429_p13)  ;;  %v1554_v23 = vld [vmem:[%s2669_s12 + $0x24] sm:$0xf] (%p2429_p13) }
 0x311   : > { %1901 = vst [vmem:[%s2669_s12 + $0x30] sm:$0xff] %v1889_v10   ;;  %1553 = vst [vmem:[%s1520_s10 + $0x80] sm:$0xf] (%p2429_p13), %v1552_v22 }
 0x312   : > { %1555 = vst [vmem:[%s1520_s10 + $0x90] sm:$0xf] %v1554_v23  ;;  %1557 = vst [vmem:[%s1520_s10 + $0xa0] sm:$0xf] %v1556_v17 }
 0x313   : > { %1559 = vst [vmem:[%s1520_s10 + $0xb0] sm:$0xf] %v1558_v25 }
 0x317   : > { %v1564_v28 = vld [vmem:[%s2669_s12 + $0x38] sm:$0xf]  ;;  %v1566_v30 = vld [vmem:[%s2669_s12 + $0x3c] sm:$0xf] }
 0x318   : > { %v1560_v27 = vld [vmem:[%s2669_s12 + $0x30] sm:$0xf]  ;;  %v1562_v1 = vld [vmem:[%s2669_s12 + $0x34] sm:$0xf]  ;;  %1565 = vst [vmem:[%s1520_s10 + $0xe0] sm:$0xf] %v1564_v28 }
 0x319   : > { %1561 = vst [vmem:[%s1520_s10 + $0xc0] sm:$0xf] %v1560_v27  ;;  %1563 = vst [vmem:[%s1520_s10 + $0xd0] sm:$0xf] %v1562_v1 }
 0x31a   : > { %1567 = vst [vmem:[%s1520_s10 + $0xf0] sm:$0xf] %v1566_v30 }
 0x31b PF: > { %s13_s22 = sadd.s32 1, %s2294_s22   ;;  %s2755_s30 = sld [smem:[#allocation9_spill]] }
 0x31c   : > { %p10_p4 = scmp.ge.s32.totalorder %s13_s22, 10   ;;  %s2756_s12 = smov %s2258_s13 }
 0x31d   : > { %s2757_s13 = smov %s2434_s26  ;;  %s2758_s14 = smov %s2266_s15 }
 0x31e   : > { %s2759_s15 = smov %s2412_s28  ;;  %s2760_s16 = smov %s2274_s17 }
 0x31f   : > { %s2761_s17 = smov %s2409_s11  ;;  %s2762_s18 = smov %s2286_s20 }
 0x320   : > { %s2763_s19 = smov %s2290_s21  ;;  %s2764_s20 = smov %s2767_s24 }
 0x321   : > { %s2765_s21 = smov %s2755_s30  ;;  %12 = sbr.rel (!%p10_p4) target bundleno = 8 (0x8), region = 255 }

// kernel: _lambda_.14
= control target key start
LH: loop header
LB: loop body
LE: loop exit
PB: predicated region body
PF: predicated region fallthrough
CT: control target
= control target key end

     0   :  { %s3454_s1 = inlined_call_operand.vmem [shape: bf16[512,128], index: 1, kind: input, shape index: {}]   ;;  %s3455_s0 = inlined_call_operand.vmem [shape: bf16[256,512], index: 0, kind: input, shape index: {}]   ;;  %s3456_s3 = inlined_call_operand.vmem [shape: bf16[256,128], index: 3, kind: input, shape index: {}]   ;;  %s3457_s2 = inlined_call_operand.vmem [shape: f32[1,128], index: 2, kind: input, shape index: {}]   ;;  %s3458_s4 = inlined_call_operand.vmem [shape: f32[1,128], index: 4, kind: input, shape index: {}]   ;;  %s3459_s5 = inlined_call_operand.vmem [shape: f32[1,128], index: 5, kind: input, shape index: {}]   ;;  %s3460_s6 = inlined_call_operand.vmem [shape: bf16[256,128], index: 6, kind: output, shape index: {}]  }
   0x1   :  { %v2444_v0 = vld [vmem:[%s3454_s1 + $0x40] sm:$0xff]   ;;  %v2448_v4 = vld [vmem:[%s3454_s1 + $0x48] sm:$0xff]   ;;  %v2452_v8 = vld [vmem:[%s3454_s1 + $0x50] sm:$0xff]  }
   0x2   :  { %v2445_v1 = vld [vmem:[%s3454_s1 + $0xc0] sm:$0xff]   ;;  %2220 = vmatprep.subr.bf16.mxu0 %v2444_v0  ;;  %v2449_v5 = vld [vmem:[%s3454_s1 + $0xc8] sm:$0xff]   ;;  %v2453_v9 = vld [vmem:[%s3454_s1 + $0xd0] sm:$0xff]  }
   0x3   :  { %v2446_v2 = vld [vmem:[%s3454_s1] sm:$0xff]   ;;  %2332 = vmatprep.subr.bf16.mxu1 %v2445_v1  ;;  %v2450_v6 = vld [vmem:[%s3454_s1 + $0x8] sm:$0xff]   ;;  %v2454_v10 = vld [vmem:[%s3454_s1 + $0x10] sm:$0xff]  }
   0x4   :  { %v2447_v3 = vld [vmem:[%s3454_s1 + $0x80] sm:$0xff]   ;;  %2221 = vmatpush3.bf16.msra.mxu0 %v2446_v2  ;;  %v2451_v7 = vld [vmem:[%s3454_s1 + $0x88] sm:$0xff]   ;;  %v2455_v11 = vld [vmem:[%s3454_s1 + $0x90] sm:$0xff]  }
   0x5   :  { %2333 = vmatpush3.bf16.msra.mxu1 %v2447_v3  ;;  %2222 = vmatprep.subr.bf16.mxu0 %v2448_v4  ;;  %v2456_v12 = vld [vmem:[%s3454_s1 + $0x58] sm:$0xff]   ;;  %v2460_v16 = vld [vmem:[%s3454_s1 + $0x60] sm:$0xff]   ;;  %v2464_v20 = vld [vmem:[%s3454_s1 + $0x68] sm:$0xff]  }
   0x6   :  { %2334 = vmatprep.subr.bf16.mxu1 %v2449_v5  ;;  %v2457_v13 = vld [vmem:[%s3454_s1 + $0xd8] sm:$0xff]   ;;  %v2461_v17 = vld [vmem:[%s3454_s1 + $0xe0] sm:$0xff]   ;;  %v2465_v21 = vld [vmem:[%s3454_s1 + $0xe8] sm:$0xff]  }
   0x7   :  { %v2458_v14 = vld [vmem:[%s3454_s1 + $0x18] sm:$0xff]   ;;  %v2462_v18 = vld [vmem:[%s3454_s1 + $0x20] sm:$0xff]   ;;  %v2466_v22 = vld [vmem:[%s3454_s1 + $0x28] sm:$0xff]  }
   0x8   :  { %2223 = vmatpush3.bf16.msra.mxu0 %v2450_v6  ;;  %v2459_v15 = vld [vmem:[%s3454_s1 + $0x98] sm:$0xff]   ;;  %v2463_v19 = vld [vmem:[%s3454_s1 + $0xa0] sm:$0xff]   ;;  %v2467_v23 = vld [vmem:[%s3454_s1 + $0xa8] sm:$0xff]  }
   0x9   :  { %2335 = vmatpush3.bf16.msra.mxu1 %v2451_v7  ;;  %2224 = vmatprep.subr.bf16.mxu0 %v2452_v8  ;;  %v2468_v24 = vld [vmem:[%s3454_s1 + $0x70] sm:$0xff]   ;;  %v2472_v28 = vld [vmem:[%s3454_s1 + $0x78] sm:$0xff]  }
   0xa   :  { %2336 = vmatprep.subr.bf16.mxu1 %v2453_v9  ;;  %v2469_v25 = vld [vmem:[%s3454_s1 + $0xf0] sm:$0xff]   ;;  %v2473_v29 = vld [vmem:[%s3454_s1 + $0xf8] sm:$0xff]  }
   0xb   :  { %v2470_v26 = vld [vmem:[%s3454_s1 + $0x30] sm:$0xff]   ;;  %v2474_v30 = vld [vmem:[%s3454_s1 + $0x38] sm:$0xff]  }
   0xc   :  { %2225 = vmatpush3.bf16.msra.mxu0 %v2454_v10  ;;  %v2471_v27 = vld [vmem:[%s3454_s1 + $0xb0] sm:$0xff]   ;;  %v2475_v31 = vld [vmem:[%s3454_s1 + $0xb8] sm:$0xff]  }
   0xd   :  { %2337 = vmatpush3.bf16.msra.mxu1 %v2455_v11  ;;  %2226 = vmatprep.subr.bf16.mxu0 %v2456_v12  ;;  %v2476_v32 = vld [vmem:[%s3455_s0] ss:$16 sps:$4 sm:$0xff]   ;;  %v2478_v33 = vld [vmem:[%s3455_s0 + $0x4] ss:$16 sps:$4 sm:$0xff]   ;;  %v2479_v34 = vld [vmem:[%s3455_s0 + $0x8] ss:$16 sps:$4 sm:$0xff]  }
   0xe   :  { %2338 = vmatprep.subr.bf16.mxu1 %v2457_v13  ;;  %v2481_v35 = vld [vmem:[%s3455_s0 + $0xc] ss:$16 sps:$4 sm:$0xff]   ;;  %764 = vmatprep.mubr.bf16.mxu0 %v2478_v33  ;;  %v2482_v36 = vld [vmem:[%s3455_s0 + $0x24] ss:$16 sps:$4 sm:$0xff]   ;;  %v2486_v38 = vld [vmem:[%s3455_s0 + $0x20] ss:$16 sps:$4 sm:$0xff]  }
   0xf   :  { %925 = vmatprep.mubr.bf16.mxu1 %v2481_v35  ;;  %v2484_v37 = vld [vmem:[%s3455_s0 + $0x2c] ss:$16 sps:$4 sm:$0xff]   ;;  %v2487_v39 = vld [vmem:[%s3455_s0 + $0x28] ss:$16 sps:$4 sm:$0xff]   ;;  %v2488_v40 = vld [vmem:[%s3455_s0 + $0x44] ss:$16 sps:$4 sm:$0xff]  }
  0x10   :  { %2227 = vmatpush3.bf16.msra.mxu0 %v2458_v14  ;;  %v2490_v41 = vld [vmem:[%s3455_s0 + $0x4c] ss:$16 sps:$4 sm:$0xff]   ;;  %v2492_v42 = vld [vmem:[%s3455_s0 + $0x40] ss:$16 sps:$4 sm:$0xff]   ;;  %v2493_v43 = vld [vmem:[%s3455_s0 + $0x48] ss:$16 sps:$4 sm:$0xff]  }
  0x11   :  { %2339 = vmatpush3.bf16.msra.mxu1 %v2459_v15  ;;  %2228 = vmatprep.subr.bf16.mxu0 %v2460_v16  ;;  %v2494_v44 = vld [vmem:[%s3455_s0 + $0x64] ss:$16 sps:$4 sm:$0xff]   ;;  %v2496_v45 = vld [vmem:[%s3455_s0 + $0x6c] ss:$16 sps:$4 sm:$0xff]   ;;  %v2498_v46 = vld [vmem:[%s3455_s0 + $0x60] ss:$16 sps:$4 sm:$0xff]  }
  0x12   :  { %2340 = vmatprep.subr.bf16.mxu1 %v2461_v17  ;;  %v2499_v47 = vld [vmem:[%s3455_s0 + $0x68] ss:$16 sps:$4 sm:$0xff]   ;;  %v2500_v48 = vld [vmem:[%s3455_s0 + $0x84] ss:$16 sps:$4 sm:$0xff]   ;;  %v2502_v49 = vld [vmem:[%s3455_s0 + $0x8c] ss:$16 sps:$4 sm:$0xff]  }
  0x13   :  { %v2504_v50 = vld [vmem:[%s3455_s0 + $0x80] ss:$16 sps:$4 sm:$0xff]   ;;  %v2505_v51 = vld [vmem:[%s3455_s0 + $0x88] ss:$16 sps:$4 sm:$0xff]   ;;  %v2506_v52 = vld [vmem:[%s3455_s0 + $0xa4] ss:$16 sps:$4 sm:$0xff]  }
  0x14   :  { %2229 = vmatpush3.bf16.msra.mxu0 %v2462_v18  ;;  %v2508_v53 = vld [vmem:[%s3455_s0 + $0xac] ss:$16 sps:$4 sm:$0xff]   ;;  %v2510_v54 = vld [vmem:[%s3455_s0 + $0xa0] ss:$16 sps:$4 sm:$0xff]   ;;  %v2511_v55 = vld [vmem:[%s3455_s0 + $0xa8] ss:$16 sps:$4 sm:$0xff]  }
  0x15   :  { %2341 = vmatpush3.bf16.msra.mxu1 %v2463_v19  ;;  %2230 = vmatprep.subr.bf16.mxu0 %v2464_v20  ;;  %v2512_v56 = vld [vmem:[%s3455_s0 + $0xc4] ss:$16 sps:$4 sm:$0xff]   ;;  %v2514_v57 = vld [vmem:[%s3455_s0 + $0xcc] ss:$16 sps:$4 sm:$0xff]   ;;  %v2516_v58 = vld [vmem:[%s3455_s0 + $0xc0] ss:$16 sps:$4 sm:$0xff]  }
  0x16   :  { %2342 = vmatprep.subr.bf16.mxu1 %v2465_v21  ;;  %v2517_v59 = vld [vmem:[%s3455_s0 + $0xc8] ss:$16 sps:$4 sm:$0xff]   ;;  %v2518_v60 = vld [vmem:[%s3455_s0 + $0xe4] ss:$16 sps:$4 sm:$0xff]   ;;  %v2520_v61 = vld [vmem:[%s3455_s0 + $0xec] ss:$16 sps:$4 sm:$0xff]  }
  0x17   :  { %v2522_v62 = vld [vmem:[%s3455_s0 + $0xe0] ss:$16 sps:$4 sm:$0xff]   ;;  %v2523_v63 = vld [vmem:[%s3455_s0 + $0xe8] ss:$16 sps:$4 sm:$0xff]   ;;  %v2524_v0 = vld [vmem:[%s3455_s0 + $0x104] ss:$16 sps:$4 sm:$0xff]  }
  0x18   :  { %2231 = vmatpush3.bf16.msra.mxu0 %v2466_v22  ;;  %v2526_v1 = vld [vmem:[%s3455_s0 + $0x10c] ss:$16 sps:$4 sm:$0xff]   ;;  %v2528_v2 = vld [vmem:[%s3455_s0 + $0x100] ss:$16 sps:$4 sm:$0xff]   ;;  %v2529_v3 = vld [vmem:[%s3455_s0 + $0x108] ss:$16 sps:$4 sm:$0xff]  }
  0x19   :  { %2343 = vmatpush3.bf16.msra.mxu1 %v2467_v23  ;;  %2232 = vmatprep.subr.bf16.mxu0 %v2468_v24  ;;  %v2530_v4 = vld [vmem:[%s3455_s0 + $0x124] ss:$16 sps:$4 sm:$0xff]   ;;  %v2532_v5 = vld [vmem:[%s3455_s0 + $0x12c] ss:$16 sps:$4 sm:$0xff]   ;;  %v2534_v6 = vld [vmem:[%s3455_s0 + $0x120] ss:$16 sps:$4 sm:$0xff]  }
  0x1a   :  { %2344 = vmatprep.subr.bf16.mxu1 %v2469_v25  ;;  %v2535_v7 = vld [vmem:[%s3455_s0 + $0x128] ss:$16 sps:$4 sm:$0xff]   ;;  %v2536_v8 = vld [vmem:[%s3455_s0 + $0x144] ss:$16 sps:$4 sm:$0xff]   ;;  %v2538_v9 = vld [vmem:[%s3455_s0 + $0x14c] ss:$16 sps:$4 sm:$0xff]  }
  0x1b   :  { %v2540_v10 = vld [vmem:[%s3455_s0 + $0x140] ss:$16 sps:$4 sm:$0xff]   ;;  %v2541_v11 = vld [vmem:[%s3455_s0 + $0x148] ss:$16 sps:$4 sm:$0xff]   ;;  %v2542_v12 = vld [vmem:[%s3455_s0 + $0x164] ss:$16 sps:$4 sm:$0xff]  }
  0x1c   :  { %2233 = vmatpush3.bf16.msra.mxu0 %v2470_v26  ;;  %v2544_v13 = vld [vmem:[%s3455_s0 + $0x16c] ss:$16 sps:$4 sm:$0xff]   ;;  %v2546_v14 = vld [vmem:[%s3455_s0 + $0x160] ss:$16 sps:$4 sm:$0xff]   ;;  %v2547_v15 = vld [vmem:[%s3455_s0 + $0x168] ss:$16 sps:$4 sm:$0xff]  }
  0x1d   :  { %2345 = vmatpush3.bf16.msra.mxu1 %v2471_v27  ;;  %2234 = vmatprep.subr.bf16.mxu0 %v2472_v28  ;;  %v2548_v16 = vld [vmem:[%s3455_s0 + $0x184] ss:$16 sps:$4 sm:$0xff]   ;;  %v2550_v17 = vld [vmem:[%s3455_s0 + $0x18c] ss:$16 sps:$4 sm:$0xff]   ;;  %v2552_v18 = vld [vmem:[%s3455_s0 + $0x180] ss:$16 sps:$4 sm:$0xff]  }
  0x1e   :  { %2346 = vmatprep.subr.bf16.mxu1 %v2473_v29  ;;  %v2553_v19 = vld [vmem:[%s3455_s0 + $0x188] ss:$16 sps:$4 sm:$0xff]   ;;  %v2554_v20 = vld [vmem:[%s3455_s0 + $0x1a4] ss:$16 sps:$4 sm:$0xff]   ;;  %v2556_v21 = vld [vmem:[%s3455_s0 + $0x1ac] ss:$16 sps:$4 sm:$0xff]  }
  0x1f   :  { %v2558_v22 = vld [vmem:[%s3455_s0 + $0x1a0] ss:$16 sps:$4 sm:$0xff]   ;;  %v2559_v23 = vld [vmem:[%s3455_s0 + $0x1a8] ss:$16 sps:$4 sm:$0xff]   ;;  %v2560_v24 = vld [vmem:[%s3455_s0 + $0x1c4] ss:$16 sps:$4 sm:$0xff]  }
  0x20   :  { %2235 = vmatpush3.bf16.msra.mxu0 %v2474_v30  ;;  %v2562_v25 = vld [vmem:[%s3455_s0 + $0x1cc] ss:$16 sps:$4 sm:$0xff]   ;;  %v2564_v26 = vld [vmem:[%s3455_s0 + $0x1c0] ss:$16 sps:$4 sm:$0xff]   ;;  %v2565_v27 = vld [vmem:[%s3455_s0 + $0x1c8] ss:$16 sps:$4 sm:$0xff]  }
  0x21   :  { %2347 = vmatpush3.bf16.msra.mxu1 %v2475_v31  ;;  %v2566_v28 = vld [vmem:[%s3455_s0 + $0x1e4] ss:$16 sps:$4 sm:$0xff]   ;;  %v2568_v29 = vld [vmem:[%s3455_s0 + $0x1ec] ss:$16 sps:$4 sm:$0xff]   ;;  %v2570_v30 = vld [vmem:[%s3455_s0 + $0x1e0] ss:$16 sps:$4 sm:$0xff]  }
  0x22   :  { %v2571_v31 = vld [vmem:[%s3455_s0 + $0x1e8] ss:$16 sps:$4 sm:$0xff]  }
  0x23   :  { %765 = vmatmul.mubr.bf16.vlgmr.msra.gmra.mrb[0].mxu0 %v2476_v32 }
  0x24   :  { %926 = vmatmul.mubr.bf16.vlgmr.msra.gmra.mrb[0].mxu1 %v2479_v34  ;;  %772 = vmatprep.mubr.bf16.mxu0 %v2482_v36 }
  0x25   :  { %933 = vmatprep.mubr.bf16.mxu1 %v2484_v37 }
  0x2b   :  { %773 = vmatmul.mubr.bf16.gmra.mrb[4].mxu0 %v2486_v38  ;;  %v2047_v38 = vld [vmem:[%s3456_s3] sm:$0xff]  }
  0x2c   :  { %934 = vmatmul.mubr.bf16.gmra.mrb[4].mxu1 %v2487_v39  ;;  %780 = vmatprep.mubr.bf16.mxu0 %v2488_v40 }
  0x2d   :  { %941 = vmatprep.mubr.bf16.mxu1 %v2490_v41 }
  0x33   :  { %781 = vmatmul.mubr.bf16.gmra.mrb[8].mxu0 %v2492_v42 }
  0x34   :  { %942 = vmatmul.mubr.bf16.gmra.mrb[8].mxu1 %v2493_v43  ;;  %788 = vmatprep.mubr.bf16.mxu0 %v2494_v44  ;;  %v2965_v44 = vld [vmem:[%s3457_s2] ss:$0 sm:$0xff] }
  0x35   :  { %949 = vmatprep.mubr.bf16.mxu1 %v2496_v45 }
  0x3b   :  { %789 = vmatmul.mubr.bf16.gmra.mrb[12].mxu0 %v2498_v46 }
  0x3c   :  { %950 = vmatmul.mubr.bf16.gmra.mrb[12].mxu1 %v2499_v47  ;;  %796 = vmatprep.mubr.bf16.mxu0 %v2500_v48  ;;  %v2048_v47 = vunpack.c.l.bf16 %v2047_v38 }
  0x3d   :  { %957 = vmatprep.mubr.bf16.mxu1 %v2502_v49 }
  0x43   :  { %797 = vmatmul.mubr.bf16.gmra.mrb[16].mxu0 %v2504_v50 }
  0x44   :  { %958 = vmatmul.mubr.bf16.gmra.mrb[16].mxu1 %v2505_v51  ;;  %804 = vmatprep.mubr.bf16.mxu0 %v2506_v52 }
  0x45   :  { %965 = vmatprep.mubr.bf16.mxu1 %v2508_v53 }
  0x4b   :  { %805 = vmatmul.mubr.bf16.gmra.mrb[20].mxu0 %v2510_v54 }
  0x4c   :  { %966 = vmatmul.mubr.bf16.gmra.mrb[20].mxu1 %v2511_v55  ;;  %812 = vmatprep.mubr.bf16.mxu0 %v2512_v56  ;;  %v2049_v55 = vunpack.c.h.bf16 %v2047_v38 }
  0x4d   :  { %973 = vmatprep.mubr.bf16.mxu1 %v2514_v57 }
  0x53   :  { %813 = vmatmul.mubr.bf16.gmra.mrb[24].mxu0 %v2516_v58 }
  0x54   :  { %974 = vmatmul.mubr.bf16.gmra.mrb[24].mxu1 %v2517_v59  ;;  %820 = vmatprep.mubr.bf16.mxu0 %v2518_v60  ;;  %v2190_v59 = vld [vmem:[%s3456_s3 + $0x8] sm:$0xff]  }
  0x55   :  { %981 = vmatprep.mubr.bf16.mxu1 %v2520_v61 }
  0x5b   :  { %821 = vmatmul.mubr.bf16.gmra.mrb[28].mxu0 %v2522_v62 }
  0x5c   :  { %982 = vmatmul.mubr.bf16.gmra.mrb[28].mxu1 %v2523_v63  ;;  %828 = vmatprep.mubr.bf16.mxu0 %v2524_v0 }
  0x5d   :  { %989 = vmatprep.mubr.bf16.mxu1 %v2526_v1 }
  0x63   :  { %829 = vmatmul.mubr.bf16.gmra.mrb[32].mxu0 %v2528_v2 }
  0x64   :  { %990 = vmatmul.mubr.bf16.gmra.mrb[32].mxu1 %v2529_v3  ;;  %836 = vmatprep.mubr.bf16.mxu0 %v2530_v4  ;;  %v2052_v4 = vunpack.c.l.bf16 %v2190_v59 }
  0x65   :  { %997 = vmatprep.mubr.bf16.mxu1 %v2532_v5 }
  0x6b   :  { %837 = vmatmul.mubr.bf16.gmra.mrb[36].mxu0 %v2534_v6 }
  0x6c   :  { %998 = vmatmul.mubr.bf16.gmra.mrb[36].mxu1 %v2535_v7  ;;  %844 = vmatprep.mubr.bf16.mxu0 %v2536_v8 }
  0x6d   :  { %1005 = vmatprep.mubr.bf16.mxu1 %v2538_v9 }
  0x73   :  { %845 = vmatmul.mubr.bf16.gmra.mrb[40].mxu0 %v2540_v10 }
  0x74   :  { %1006 = vmatmul.mubr.bf16.gmra.mrb[40].mxu1 %v2541_v11  ;;  %852 = vmatprep.mubr.bf16.mxu0 %v2542_v12  ;;  %v2053_v12 = vunpack.c.h.bf16 %v2190_v59 }
  0x75   :  { %1013 = vmatprep.mubr.bf16.mxu1 %v2544_v13 }
  0x7b   :  { %853 = vmatmul.mubr.bf16.gmra.mrb[44].mxu0 %v2546_v14 }
  0x7c   :  { %1014 = vmatmul.mubr.bf16.gmra.mrb[44].mxu1 %v2547_v15  ;;  %860 = vmatprep.mubr.bf16.mxu0 %v2548_v16  ;;  %v2191_v16 = vld [vmem:[%s3456_s3 + $0x10] sm:$0xff]  }
  0x7d   :  { %1021 = vmatprep.mubr.bf16.mxu1 %v2550_v17 }
  0x83   :  { %861 = vmatmul.mubr.bf16.gmra.mrb[48].mxu0 %v2552_v18 }
  0x84   :  { %1022 = vmatmul.mubr.bf16.gmra.mrb[48].mxu1 %v2553_v19  ;;  %868 = vmatprep.mubr.bf16.mxu0 %v2554_v20 }
  0x85   :  { %1029 = vmatprep.mubr.bf16.mxu1 %v2556_v21 }
  0x8b   :  { %869 = vmatmul.mubr.bf16.gmra.mrb[52].mxu0 %v2558_v22 }
  0x8c   :  { %1030 = vmatmul.mubr.bf16.gmra.mrb[52].mxu1 %v2559_v23  ;;  %876 = vmatprep.mubr.bf16.mxu0 %v2560_v24 }
  0x8d   :  { %1037 = vmatprep.mubr.bf16.mxu1 %v2562_v25  ;;  %v2056_v25 = vunpack.c.l.bf16 %v2191_v16 }
  0x93   :  { %877 = vmatmul.mubr.bf16.gmra.mrb[56].mxu0 %v2564_v26 }
  0x94   :  { %1038 = vmatmul.mubr.bf16.gmra.mrb[56].mxu1 %v2565_v27  ;;  %884 = vmatprep.mubr.bf16.mxu0 %v2566_v28  ;;  %v2057_v28 = vunpack.c.h.bf16 %v2191_v16 }
  0x95   :  { %1045 = vmatprep.mubr.bf16.mxu1 %v2568_v29 }
  0x9b   :  { %885 = vmatmul.mubr.bf16.gmra.mrb[60].mxu0 %v2570_v30 }
  0x9c   :  { %1046 = vmatmul.mubr.bf16.gmra.mrb[60].mxu1 %v2571_v31 }
  0xf6   :  { %v2236_v32 = vpop.f32.mrb[0].mxu0 }
  0xf7   :  { %v2348_v33 = vpop.f32.mrb[0].mxu1  ;;  %v2237_v34 = vpop.f32.mrb[1].mxu0 }
  0xf8   :  { %v2238_v35 = vadd.f32 %v2237_v34, %v2236_v32  ;;  %v2349_v36 = vpop.f32.mrb[1].mxu1  ;;  %v2239_v37 = vpop.f32.mrb[2].mxu0 }
  0xf9   :  { %v2350_v39 = vadd.f32 %v2349_v36, %v2348_v33  ;;  %v2351_v40 = vpop.f32.mrb[2].mxu1  ;;  %v2240_v41 = vpop.f32.mrb[3].mxu0 }
  0xfa   :  { %v2241_v42 = vadd.f32 %v2240_v41, %v2239_v37  ;;  %v2352_v43 = vpop.f32.mrb[3].mxu1  ;;  %v2192_v37 = vld [vmem:[%s3456_s3 + $0x18] sm:$0xff]  }
  0xfb   :  { %v928_v45 = vadd.f32 %v2350_v39, %v2238_v35  ;;  %v2353_v46 = vadd.f32 %v2352_v43, %v2351_v40 }
  0xfd   :  { %v931_v48 = vadd.f32 %v2353_v46, %v2241_v42  ;;  %v1160_v49 = vadd.f32 %v2965_v44, %v928_v45 }
  0xfe   :  { %v2242_v50 = vpop.f32.mrb[4].mxu0 }
  0xff   :  { %v2354_v51 = vpop.f32.mrb[4].mxu1  ;;  %v2243_v52 = vpop.f32.mrb[5].mxu0  ;;  %v2968_v53 = vadd.f32 %v2048_v47, %v1160_v49  ;;  %v1161_v54 = vadd.f32 %v2965_v44, %v931_v48  ;;  %v2060_v47 = vunpack.c.l.bf16 %v2192_v37 }
 0x100   :  { %v2244_v56 = vadd.f32 %v2243_v52, %v2242_v50  ;;  %v2355_v57 = vpop.f32.mrb[5].mxu1  ;;  %v2245_v58 = vpop.f32.mrb[6].mxu0  ;;  %v2061_v50 = vunpack.c.h.bf16 %v2192_v37 }
 0x101   :  { %v2356_v60 = vadd.f32 %v2355_v57, %v2354_v51  ;;  %v2357_v61 = vpop.f32.mrb[6].mxu1  ;;  %1290 = vadd.xlane.f32.xlu0 %v2968_v53  ;;  %v2246_v62 = vpop.f32.mrb[7].mxu0  ;;  %v2975_v3 = vadd.f32 %v2049_v55, %v1161_v54 }
 0x102   :  { %v2247_v63 = vadd.f32 %v2246_v62, %v2245_v58  ;;  %v2358_v0 = vpop.f32.mrb[7].mxu1 }
 0x103   :  { %v936_v1 = vadd.f32 %v2356_v60, %v2244_v56  ;;  %v2359_v2 = vadd.f32 %v2358_v0, %v2357_v61  ;;  %v2193_v60 = vld [vmem:[%s3456_s3 + $0x20] sm:$0xff]  }
 0x105   :  { %v939_v5 = vadd.f32 %v2359_v2, %v2247_v63  ;;  %1292 = vadd.xlane.f32.xlu0 %v2975_v3  ;;  %v1162_v6 = vadd.f32 %v2965_v44, %v936_v1 }
 0x106   :  { %v2248_v7 = vpop.f32.mrb[8].mxu0 }
 0x107   :  { %v2360_v8 = vpop.f32.mrb[8].mxu1  ;;  %v2249_v9 = vpop.f32.mrb[9].mxu0  ;;  %v2979_v10 = vadd.f32 %v2052_v4, %v1162_v6  ;;  %v1163_v11 = vadd.f32 %v2965_v44, %v939_v5  ;;  %v2064_v6 = vunpack.c.l.bf16 %v2193_v60 }
 0x108   :  { %v2250_v13 = vadd.f32 %v2249_v9, %v2248_v7  ;;  %v2361_v14 = vpop.f32.mrb[9].mxu1  ;;  %v2251_v15 = vpop.f32.mrb[10].mxu0  ;;  %v2065_v9 = vunpack.c.h.bf16 %v2193_v60 }
 0x109   :  { %v2362_v17 = vadd.f32 %v2361_v14, %v2360_v8  ;;  %v2363_v18 = vpop.f32.mrb[10].mxu1  ;;  %1294 = vadd.xlane.f32.xlu1 %v2979_v10  ;;  %v2252_v19 = vpop.f32.mrb[11].mxu0  ;;  %v2986_v24 = vadd.f32 %v2053_v12, %v1163_v11 }
 0x10a   :  { %v2253_v20 = vadd.f32 %v2252_v19, %v2251_v15  ;;  %v2364_v21 = vpop.f32.mrb[11].mxu1  ;;  %v2194_v19 = vld [vmem:[%s3456_s3 + $0x28] sm:$0xff]  }
 0x10b   :  { %v944_v22 = vadd.f32 %v2362_v17, %v2250_v13  ;;  %v2365_v23 = vadd.f32 %v2364_v21, %v2363_v18 }
 0x10d   :  { %v947_v26 = vadd.f32 %v2365_v23, %v2253_v20  ;;  %1296 = vadd.xlane.f32.xlu1 %v2986_v24  ;;  %v1164_v27 = vadd.f32 %v2965_v44, %v944_v22 }
 0x10e   :  { %v2254_v29 = vpop.f32.mrb[12].mxu0 }
 0x10f   :  { %v2366_v30 = vpop.f32.mrb[12].mxu1  ;;  %v2255_v31 = vpop.f32.mrb[13].mxu0  ;;  %v2990_v32 = vadd.f32 %v2056_v25, %v1164_v27  ;;  %v1165_v33 = vadd.f32 %v2965_v44, %v947_v26 }
 0x110   :  { %v2256_v34 = vadd.f32 %v2255_v31, %v2254_v29  ;;  %v2367_v35 = vpop.f32.mrb[13].mxu1  ;;  %v2257_v36 = vpop.f32.mrb[14].mxu0  ;;  %v2068_v29 = vunpack.c.l.bf16 %v2194_v19 }
 0x111   :  { %v2368_v38 = vadd.f32 %v2367_v35, %v2366_v30  ;;  %v2369_v39 = vpop.f32.mrb[14].mxu1  ;;  %1298 = vadd.xlane.f32.xlu0 %v2990_v32  ;;  %v2258_v40 = vpop.f32.mrb[15].mxu0  ;;  %v2997_v41 = vadd.f32 %v2057_v28, %v1165_v33  ;;  %v2069_v33 = vunpack.c.h.bf16 %v2194_v19 }
 0x112   :  { %v2259_v42 = vadd.f32 %v2258_v40, %v2257_v36  ;;  %v2370_v43 = vpop.f32.mrb[15].mxu1 }
 0x113   :  { %v952_v45 = vadd.f32 %v2368_v38, %v2256_v34  ;;  %v2371_v46 = vadd.f32 %v2370_v43, %v2369_v39  ;;  %1300 = vadd.xlane.f32.xlu1 %v2997_v41  ;;  %v2195_v43 = vld [vmem:[%s3456_s3 + $0x30] sm:$0xff]  }
 0x115   :  { %v955_v48 = vadd.f32 %v2371_v46, %v2259_v42  ;;  %v1166_v49 = vadd.f32 %v2965_v44, %v952_v45 }
 0x116   :  { %v2260_v51 = vpop.f32.mrb[16].mxu0 }
 0x117   :  { %v2372_v52 = vpop.f32.mrb[16].mxu1  ;;  %v2261_v54 = vpop.f32.mrb[17].mxu0  ;;  %v3001_v55 = vadd.f32 %v2060_v47, %v1166_v49  ;;  %v1167_v56 = vadd.f32 %v2965_v44, %v955_v48 }
 0x118   :  { %v2262_v57 = vadd.f32 %v2261_v54, %v2260_v51  ;;  %v2373_v58 = vpop.f32.mrb[17].mxu1  ;;  %v2263_v59 = vpop.f32.mrb[18].mxu0  ;;  %v2072_v54 = vunpack.c.l.bf16 %v2195_v43 }
 0x119   :  { %v2374_v61 = vadd.f32 %v2373_v58, %v2372_v52  ;;  %v2375_v62 = vpop.f32.mrb[18].mxu1  ;;  %1302 = vadd.xlane.f32.xlu0 %v3001_v55  ;;  %v2264_v63 = vpop.f32.mrb[19].mxu0  ;;  %v3008_v0 = vadd.f32 %v2061_v50, %v1167_v56  ;;  %v2073_v58 = vunpack.c.h.bf16 %v2195_v43 }
 0x11a   :  { %v2265_v1 = vadd.f32 %v2264_v63, %v2263_v59  ;;  %v2376_v2 = vpop.f32.mrb[19].mxu1 }
 0x11b   :  { %v960_v4 = vadd.f32 %v2374_v61, %v2262_v57  ;;  %v2377_v5 = vadd.f32 %v2376_v2, %v2375_v62  ;;  %1304 = vadd.xlane.f32.xlu1 %v3008_v0 }
 0x11d   :  { %v963_v7 = vadd.f32 %v2377_v5, %v2265_v1  ;;  %v1168_v8 = vadd.f32 %v2965_v44, %v960_v4  ;;  %v2196_v5 = vld [vmem:[%s3456_s3 + $0x38] sm:$0xff]  }
 0x11e   :  { %v2266_v11 = vpop.f32.mrb[20].mxu0  ;;  %v2077_v19 = vunpack.c.h.bf16 %v2196_v5 }
 0x11f   :  { %v2378_v12 = vpop.f32.mrb[20].mxu1  ;;  %v2267_v13 = vpop.f32.mrb[21].mxu0  ;;  %v3012_v14 = vadd.f32 %v2064_v6, %v1168_v8  ;;  %v1169_v15 = vadd.f32 %v2965_v44, %v963_v7 }
 0x120   :  { %v2268_v16 = vadd.f32 %v2267_v13, %v2266_v11  ;;  %v2379_v17 = vpop.f32.mrb[21].mxu1  ;;  %v2269_v18 = vpop.f32.mrb[22].mxu0 }
 0x121   :  { %v2380_v20 = vadd.f32 %v2379_v17, %v2378_v12  ;;  %v2381_v21 = vpop.f32.mrb[22].mxu1  ;;  %1306 = vadd.xlane.f32.xlu0 %v3012_v14  ;;  %v2270_v22 = vpop.f32.mrb[23].mxu0  ;;  %v3019_v23 = vadd.f32 %v2065_v9, %v1169_v15 }
 0x122   :  { %v2271_v25 = vadd.f32 %v2270_v22, %v2269_v18  ;;  %v2382_v26 = vpop.f32.mrb[23].mxu1 }
 0x123   :  { %v968_v27 = vadd.f32 %v2380_v20, %v2268_v16  ;;  %v2383_v28 = vadd.f32 %v2382_v26, %v2381_v21  ;;  %1308 = vadd.xlane.f32.xlu1 %v3019_v23  ;;  %v2076_v16 = vunpack.c.l.bf16 %v2196_v5 }
 0x125   :  { %v971_v30 = vadd.f32 %v2383_v28, %v2271_v25  ;;  %v1170_v31 = vadd.f32 %v2965_v44, %v968_v27 }
 0x126   :  { %v2272_v34 = vpop.f32.mrb[24].mxu0 }
 0x127   :  { %v2384_v35 = vpop.f32.mrb[24].mxu1  ;;  %v2273_v36 = vpop.f32.mrb[25].mxu0  ;;  %v3023_v37 = vadd.f32 %v2068_v29, %v1170_v31  ;;  %v1171_v38 = vadd.f32 %v2965_v44, %v971_v30  ;;  %v2197_v30 = vld [vmem:[%s3456_s3 + $0x40] sm:$0xff]  }
 0x128   :  { %v2274_v39 = vadd.f32 %v2273_v36, %v2272_v34  ;;  %v2385_v40 = vpop.f32.mrb[25].mxu1  ;;  %v2275_v42 = vpop.f32.mrb[26].mxu0 }
 0x129   :  { %v2386_v45 = vadd.f32 %v2385_v40, %v2384_v35  ;;  %v2387_v46 = vpop.f32.mrb[26].mxu1  ;;  %1310 = vadd.xlane.f32.xlu0 %v3023_v37  ;;  %v2276_v47 = vpop.f32.mrb[27].mxu0  ;;  %v3030_v48 = vadd.f32 %v2069_v33, %v1171_v38 }
 0x12a   :  { %v2277_v49 = vadd.f32 %v2276_v47, %v2275_v42  ;;  %v2388_v50 = vpop.f32.mrb[27].mxu1  ;;  %v2080_v42 = vunpack.c.l.bf16 %v2197_v30 }
 0x12b   :  { %v976_v51 = vadd.f32 %v2386_v45, %v2274_v39  ;;  %v2389_v52 = vadd.f32 %v2388_v50, %v2387_v46  ;;  %1312 = vadd.xlane.f32.xlu1 %v3030_v48  ;;  %v2081_v46 = vunpack.c.h.bf16 %v2197_v30 }
 0x12d   :  { %v979_v56 = vadd.f32 %v2389_v52, %v2277_v49  ;;  %v1172_v57 = vadd.f32 %v2965_v44, %v976_v51 }
 0x12e   :  { %v2278_v59 = vpop.f32.mrb[28].mxu0 }
 0x12f   :  { %v2390_v60 = vpop.f32.mrb[28].mxu1  ;;  %v2279_v61 = vpop.f32.mrb[29].mxu0  ;;  %v3034_v62 = vadd.f32 %v2072_v54, %v1172_v57  ;;  %v1173_v63 = vadd.f32 %v2965_v44, %v979_v56 }
 0x130   :  { %v2280_v1 = vadd.f32 %v2279_v61, %v2278_v59  ;;  %v2391_v2 = vpop.f32.mrb[29].mxu1  ;;  %v2281_v4 = vpop.f32.mrb[30].mxu0 }
 0x131   :  { %v2392_v6 = vadd.f32 %v2391_v2, %v2390_v60  ;;  %v2393_v7 = vpop.f32.mrb[30].mxu1  ;;  %1314 = vadd.xlane.f32.xlu0 %v3034_v62  ;;  %v2282_v8 = vpop.f32.mrb[31].mxu0  ;;  %v3041_v9 = vadd.f32 %v2073_v58, %v1173_v63  ;;  %v2198_v58 = vld [vmem:[%s3456_s3 + $0x48] sm:$0xff]  }
 0x132   :  { %v2283_v11 = vadd.f32 %v2282_v8, %v2281_v4  ;;  %v2394_v12 = vpop.f32.mrb[31].mxu1 }
 0x133   :  { %v984_v13 = vadd.f32 %v2392_v6, %v2280_v1  ;;  %v2395_v15 = vadd.f32 %v2394_v12, %v2393_v7  ;;  %1316 = vadd.xlane.f32.xlu1 %v3041_v9  ;;  %v2084_v6 = vunpack.c.l.bf16 %v2198_v58 }
 0x135   :  { %v987_v17 = vadd.f32 %v2395_v15, %v2283_v11  ;;  %v1174_v18 = vadd.f32 %v2965_v44, %v984_v13  ;;  %v2085_v11 = vunpack.c.h.bf16 %v2198_v58 }
 0x136   :  { %v2284_v20 = vpop.f32.mrb[32].mxu0 }
 0x137   :  { %v2396_v21 = vpop.f32.mrb[32].mxu1  ;;  %v2285_v22 = vpop.f32.mrb[33].mxu0  ;;  %v3045_v25 = vadd.f32 %v2076_v16, %v1174_v18  ;;  %v1175_v26 = vadd.f32 %v2965_v44, %v987_v17 }
 0x138   :  { %v2286_v27 = vadd.f32 %v2285_v22, %v2284_v20  ;;  %v2397_v28 = vpop.f32.mrb[33].mxu1  ;;  %v2287_v29 = vpop.f32.mrb[34].mxu0 }
 0x139   :  { %v2398_v31 = vadd.f32 %v2397_v28, %v2396_v21  ;;  %v2399_v33 = vpop.f32.mrb[34].mxu1  ;;  %1318 = vadd.xlane.f32.xlu0 %v3045_v25  ;;  %v2288_v34 = vpop.f32.mrb[35].mxu0  ;;  %v3052_v35 = vadd.f32 %v2077_v19, %v1175_v26  ;;  %v2199_v21 = vld [vmem:[%s3456_s3 + $0x50] sm:$0xff]  }
 0x13a   :  { %v2289_v36 = vadd.f32 %v2288_v34, %v2287_v29  ;;  %v2400_v38 = vpop.f32.mrb[35].mxu1  ;;  %v2088_v34 = vunpack.c.l.bf16 %v2199_v21 }
 0x13b   :  { %v992_v39 = vadd.f32 %v2398_v31, %v2286_v27  ;;  %v2401_v40 = vadd.f32 %v2400_v38, %v2399_v33  ;;  %1320 = vadd.xlane.f32.xlu1 %v3052_v35 }
 0x13d   :  { %v995_v43 = vadd.f32 %v2401_v40, %v2289_v36  ;;  %v1176_v45 = vadd.f32 %v2965_v44, %v992_v39  ;;  %v2089_v39 = vunpack.c.h.bf16 %v2199_v21 }
 0x13e   :  { %v2290_v47 = vpop.f32.mrb[36].mxu0 }
 0x13f   :  { %v2402_v49 = vpop.f32.mrb[36].mxu1  ;;  %v2291_v50 = vpop.f32.mrb[37].mxu0  ;;  %v3056_v51 = vadd.f32 %v2080_v42, %v1176_v45  ;;  %v1177_v52 = vadd.f32 %v2965_v44, %v995_v43 }
 0x140   :  { %v2292_v54 = vadd.f32 %v2291_v50, %v2290_v47  ;;  %v2403_v56 = vpop.f32.mrb[37].mxu1  ;;  %v2293_v57 = vpop.f32.mrb[38].mxu0 }
 0x141   :  { %v2404_v59 = vadd.f32 %v2403_v56, %v2402_v49  ;;  %v2405_v60 = vpop.f32.mrb[38].mxu1  ;;  %1322 = vadd.xlane.f32.xlu0 %v3056_v51  ;;  %v2294_v61 = vpop.f32.mrb[39].mxu0  ;;  %v3063_v63 = vadd.f32 %v2081_v46, %v1177_v52  ;;  %v2200_v52 = vld [vmem:[%s3456_s3 + $0x58] sm:$0xff]  }
 0x142   :  { %v2295_v1 = vadd.f32 %v2294_v61, %v2293_v57  ;;  %v2406_v2 = vpop.f32.mrb[39].mxu1 }
 0x143   :  { %v1000_v4 = vadd.f32 %v2404_v59, %v2292_v54  ;;  %v2407_v5 = vadd.f32 %v2406_v2, %v2405_v60  ;;  %1324 = vadd.xlane.f32.xlu1 %v3063_v63  ;;  %v2092_v2 = vunpack.c.l.bf16 %v2200_v52 }
 0x145   :  { %v1003_v7 = vadd.f32 %v2407_v5, %v2295_v1  ;;  %v1178_v8 = vadd.f32 %v2965_v44, %v1000_v4 }
 0x146   :  { %v2296_v12 = vpop.f32.mrb[40].mxu0 }
 0x147   :  { %v2408_v13 = vpop.f32.mrb[40].mxu1  ;;  %v2297_v15 = vpop.f32.mrb[41].mxu0  ;;  %v3067_v16 = vadd.f32 %v2084_v6, %v1178_v8  ;;  %v1179_v17 = vadd.f32 %v2965_v44, %v1003_v7  ;;  %v2093_v6 = vunpack.c.h.bf16 %v2200_v52  ;;  %v2202_v52 = vld [vmem:[%s3456_s3 + $0x68] sm:$0xff]  }
 0x148   :  { %v2298_v18 = vadd.f32 %v2297_v15, %v2296_v12  ;;  %v2409_v19 = vpop.f32.mrb[41].mxu1  ;;  %v2299_v20 = vpop.f32.mrb[42].mxu0 }
 0x149   :  { %v2410_v22 = vadd.f32 %v2409_v19, %v2408_v13  ;;  %v2411_v26 = vpop.f32.mrb[42].mxu1  ;;  %1326 = vadd.xlane.f32.xlu0 %v3067_v16  ;;  %v2300_v27 = vpop.f32.mrb[43].mxu0  ;;  %v3074_v28 = vadd.f32 %v2085_v11, %v1179_v17  ;;  %v2201_v19 = vld [vmem:[%s3456_s3 + $0x60] sm:$0xff]  }
 0x14a   :  { %v2301_v29 = vadd.f32 %v2300_v27, %v2299_v20  ;;  %v2412_v30 = vpop.f32.mrb[43].mxu1 }
 0x14b   :  { %v1008_v31 = vadd.f32 %v2410_v22, %v2298_v18  ;;  %v2413_v33 = vadd.f32 %v2412_v30, %v2411_v26  ;;  %1328 = vadd.xlane.f32.xlu1 %v3074_v28 }
 0x14d   :  { %v1011_v36 = vadd.f32 %v2413_v33, %v2301_v29  ;;  %v1180_v38 = vadd.f32 %v2965_v44, %v1008_v31  ;;  %v2096_v33 = vunpack.c.l.bf16 %v2201_v19 }
 0x14e   :  { %v2302_v40 = vpop.f32.mrb[44].mxu0 }
 0x14f   :  { %v2414_v42 = vpop.f32.mrb[44].mxu1  ;;  %v2303_v43 = vpop.f32.mrb[45].mxu0  ;;  %v3078_v45 = vadd.f32 %v2088_v34, %v1180_v38  ;;  %v1181_v46 = vadd.f32 %v2965_v44, %v1011_v36  ;;  %v2097_v38 = vunpack.c.h.bf16 %v2201_v19 }
 0x150   :  { %v2304_v47 = vadd.f32 %v2303_v43, %v2302_v40  ;;  %v2415_v49 = vpop.f32.mrb[45].mxu1  ;;  %v2305_v50 = vpop.f32.mrb[46].mxu0 }
 0x151   :  { %v2416_v54 = vadd.f32 %v2415_v49, %v2414_v42  ;;  %v2417_v56 = vpop.f32.mrb[46].mxu1  ;;  %1330 = vadd.xlane.f32.xlu0 %v3078_v45  ;;  %v2306_v57 = vpop.f32.mrb[47].mxu0  ;;  %v3085_v58 = vadd.f32 %v2089_v39, %v1181_v46 }
 0x152   :  { %v2307_v59 = vadd.f32 %v2306_v57, %v2305_v50  ;;  %v2418_v60 = vpop.f32.mrb[47].mxu1 }
 0x153   :  { %v1016_v61 = vadd.f32 %v2416_v54, %v2304_v47  ;;  %v2419_v1 = vadd.f32 %v2418_v60, %v2417_v56  ;;  %1332 = vadd.xlane.f32.xlu1 %v3085_v58 }
 0x155   :  { %v1019_v4 = vadd.f32 %v2419_v1, %v2307_v59  ;;  %v1182_v5 = vadd.f32 %v2965_v44, %v1016_v61 }
 0x156   :  { %v2308_v7 = vpop.f32.mrb[48].mxu0 }
 0x157   :  { %v2420_v8 = vpop.f32.mrb[48].mxu1  ;;  %v2309_v11 = vpop.f32.mrb[49].mxu0  ;;  %v3089_v12 = vadd.f32 %v2092_v2, %v1182_v5  ;;  %v1183_v13 = vadd.f32 %v2965_v44, %v1019_v4  ;;  %v2100_v4 = vunpack.c.l.bf16 %v2202_v52 }
 0x158   :  { %v2310_v15 = vadd.f32 %v2309_v11, %v2308_v7  ;;  %v2421_v17 = vpop.f32.mrb[49].mxu1  ;;  %v2311_v18 = vpop.f32.mrb[50].mxu0  ;;  %v2101_v7 = vunpack.c.h.bf16 %v2202_v52 }
 0x159   :  { %v2422_v20 = vadd.f32 %v2421_v17, %v2420_v8  ;;  %v2423_v21 = vpop.f32.mrb[50].mxu1  ;;  %1334 = vadd.xlane.f32.xlu0 %v3089_v12  ;;  %v2312_v22 = vpop.f32.mrb[51].mxu0  ;;  %v3096_v26 = vadd.f32 %v2093_v6, %v1183_v13 }
 0x15a   :  { %v2313_v27 = vadd.f32 %v2312_v22, %v2311_v18  ;;  %v2424_v29 = vpop.f32.mrb[51].mxu1 }
 0x15b   :  { %v1024_v30 = vadd.f32 %v2422_v20, %v2310_v15  ;;  %v2425_v31 = vadd.f32 %v2424_v29, %v2423_v21  ;;  %1336 = vadd.xlane.f32.xlu1 %v3096_v26  ;;  %v2203_v21 = vld [vmem:[%s3456_s3 + $0x70] sm:$0xff]  }
 0x15d   :  { %v1027_v34 = vadd.f32 %v2425_v31, %v2313_v27  ;;  %v1184_v36 = vadd.f32 %v2965_v44, %v1024_v30 }
 0x15e   :  { %v2314_v39 = vpop.f32.mrb[52].mxu0 }
 0x15f   :  { %v2426_v40 = vpop.f32.mrb[52].mxu1  ;;  %v2315_v42 = vpop.f32.mrb[53].mxu0  ;;  %v3100_v43 = vadd.f32 %v2096_v33, %v1184_v36  ;;  %v1185_v46 = vadd.f32 %v2965_v44, %v1027_v34 }
 0x160   :  { %v2316_v47 = vadd.f32 %v2315_v42, %v2314_v39  ;;  %v2427_v49 = vpop.f32.mrb[53].mxu1  ;;  %v2317_v50 = vpop.f32.mrb[54].mxu0  ;;  %v2105_v42 = vunpack.c.h.bf16 %v2203_v21 }
 0x161   :  { %v2428_v54 = vadd.f32 %v2427_v49, %v2426_v40  ;;  %v2429_v56 = vpop.f32.mrb[54].mxu1  ;;  %1338 = vadd.xlane.f32.xlu0 %v3100_v43  ;;  %v2318_v57 = vpop.f32.mrb[55].mxu0  ;;  %v3107_v59 = vadd.f32 %v2097_v38, %v1185_v46  ;;  %v2104_v38 = vunpack.c.l.bf16 %v2203_v21 }
 0x162   :  { %v2319_v60 = vadd.f32 %v2318_v57, %v2317_v50  ;;  %v2430_v61 = vpop.f32.mrb[55].mxu1 }
 0x163   :  { %v1032_v1 = vadd.f32 %v2428_v54, %v2316_v47  ;;  %v2431_v2 = vadd.f32 %v2430_v61, %v2429_v56  ;;  %1340 = vadd.xlane.f32.xlu1 %v3107_v59 }
 0x165   :  { %v1035_v5 = vadd.f32 %v2431_v2, %v2319_v60  ;;  %v1186_v6 = vadd.f32 %v2965_v44, %v1032_v1  ;;  %v2204_v60 = vld [vmem:[%s3456_s3 + $0x78] sm:$0xff]  }
 0x166   :  { %v2320_v8 = vpop.f32.mrb[56].mxu0 }
 0x167   :  { %v2432_v11 = vpop.f32.mrb[56].mxu1  ;;  %v2321_v13 = vpop.f32.mrb[57].mxu0  ;;  %v3111_v15 = vadd.f32 %v2100_v4, %v1186_v6  ;;  %v1187_v17 = vadd.f32 %v2965_v44, %v1035_v5 }
 0x168   :  { %v2322_v18 = vadd.f32 %v2321_v13, %v2320_v8  ;;  %v2433_v19 = vpop.f32.mrb[57].mxu1  ;;  %v2323_v20 = vpop.f32.mrb[58].mxu0 }
 0x169   :  { %v2434_v22 = vadd.f32 %v2433_v19, %v2432_v11  ;;  %v2435_v27 = vpop.f32.mrb[58].mxu1  ;;  %1342 = vadd.xlane.f32.xlu0 %v3111_v15  ;;  %v2324_v29 = vpop.f32.mrb[59].mxu0  ;;  %v3118_v30 = vadd.f32 %v2101_v7, %v1187_v17  ;;  %v2108_v11 = vunpack.c.l.bf16 %v2204_v60 }
 0x16a   :  { %v2325_v31 = vadd.f32 %v2324_v29, %v2323_v20  ;;  %v2436_v33 = vpop.f32.mrb[59].mxu1 }
 0x16b   :  { %v1040_v34 = vadd.f32 %v2434_v22, %v2322_v18  ;;  %v2437_v36 = vadd.f32 %v2436_v33, %v2435_v27  ;;  %1344 = vadd.xlane.f32.xlu1 %v3118_v30  ;;  %v2109_v18 = vunpack.c.h.bf16 %v2204_v60 }
 0x16d   :  { %v1043_v39 = vadd.f32 %v2437_v36, %v2325_v31  ;;  %v1188_v40 = vadd.f32 %v2965_v44, %v1040_v34 }
 0x16e   :  { %v2326_v46 = vpop.f32.mrb[60].mxu0 }
 0x16f   :  { %v2438_v47 = vpop.f32.mrb[60].mxu1  ;;  %v2327_v49 = vpop.f32.mrb[61].mxu0  ;;  %v3122_v50 = vadd.f32 %v2104_v38, %v1188_v40  ;;  %v1189_v52 = vadd.f32 %v2965_v44, %v1043_v39 }
 0x170   :  { %v2328_v54 = vadd.f32 %v2327_v49, %v2326_v46  ;;  %v2439_v56 = vpop.f32.mrb[61].mxu1  ;;  %v2329_v57 = vpop.f32.mrb[62].mxu0 }
 0x171   :  { %v2440_v61 = vadd.f32 %v2439_v56, %v2438_v47  ;;  %v2441_v1 = vpop.f32.mrb[62].mxu1  ;;  %1346 = vadd.xlane.f32.xlu0 %v3122_v50  ;;  %v2330_v2 = vpop.f32.mrb[63].mxu0  ;;  %v3129_v4 = vadd.f32 %v2105_v42, %v1189_v52 }
 0x172   :  { %v2331_v5 = vadd.f32 %v2330_v2, %v2329_v57  ;;  %v2442_v6 = vpop.f32.mrb[63].mxu1 }
 0x173   :  { %v1048_v7 = vadd.f32 %v2440_v61, %v2328_v54  ;;  %v2443_v8 = vadd.f32 %v2442_v6, %v2441_v1  ;;  %1348 = vadd.xlane.f32.xlu1 %v3129_v4 }
 0x175   :  { %v1051_v13 = vadd.f32 %v2443_v8, %v2331_v5  ;;  %v1190_v17 = vadd.f32 %v2965_v44, %v1048_v7 }
 0x177   :  { %v3133_v19 = vadd.f32 %v2108_v11, %v1190_v17  ;;  %v1191_v20 = vadd.f32 %v2965_v44, %v1051_v13 }
 0x179   :  { %1350 = vadd.xlane.f32.xlu0 %v3133_v19  ;;  %v3137_v21 = vadd.f32 %v2109_v18, %v1191_v20 }
 0x17b   :  { %1352 = vadd.xlane.f32.xlu1 %v3137_v21 }
 0x18e   :  { %v1291_v22 = vpop.xlane.xlu0 %1290 }
 0x18f   :  { %v1355_v27 = vmul.f32 0.0078125, %v1291_v22 }
 0x191   :  { %v3141_v29 = vsub.f32 %v2968_v53, %v1355_v27 }
 0x192   :  { %v1293_v31 = vpop.xlane.xlu0 %1292 }
 0x193   :  { %v1356_v33 = vmul.f32 0.0078125, %v1293_v31  ;;  %v1419_v34 = vmul.f32 %v3141_v29, %v3141_v29 }
 0x195   :  { %v3146_v36 = vsub.f32 %v2975_v3, %v1356_v33  ;;  %1451 = vadd.xlane.f32.xlu0 %v1419_v34 }
 0x196   :  { %v1295_v44 = vpop.xlane.xlu1 %1294 }
 0x197   :  { %v1357_v38 = vmul.f32 0.0078125, %v1295_v44  ;;  %v1420_v39 = vmul.f32 %v3146_v36, %v3146_v36 }
 0x199   :  { %v3151_v40 = vsub.f32 %v2979_v10, %v1357_v38  ;;  %1453 = vadd.xlane.f32.xlu1 %v1420_v39 }
 0x19a   :  { %v1297_v53 = vpop.xlane.xlu1 %1296 }
 0x19b   :  { %v1358_v42 = vmul.f32 0.0078125, %v1297_v53  ;;  %v1421_v46 = vmul.f32 %v3151_v40, %v3151_v40 }
 0x19d   :  { %v3156_v47 = vsub.f32 %v2986_v24, %v1358_v42  ;;  %1455 = vadd.xlane.f32.xlu0 %v1421_v46 }
 0x19e   :  { %v1299_v3 = vpop.xlane.xlu0 %1298 }
 0x19f   :  { %v1359_v49 = vmul.f32 0.0078125, %v1299_v3  ;;  %v1422_v52 = vmul.f32 %v3156_v47, %v3156_v47 }
 0x1a0   :  { %v1301_v54 = vpop.xlane.xlu1 %1300 }
 0x1a1   :  { %v3161_v56 = vsub.f32 %v2990_v32, %v1359_v49  ;;  %v1360_v10 = vmul.f32 0.0078125, %v1301_v54  ;;  %1457 = vadd.xlane.f32.xlu1 %v1422_v52 }
 0x1a3   :  { %v3164_v57 = vsub.f32 %v2997_v41, %v1360_v10  ;;  %v1423_v60 = vmul.f32 %v3161_v56, %v3161_v56 }
 0x1a5   :  { %1459 = vadd.xlane.f32.xlu0 %v1423_v60  ;;  %v1424_v24 = vmul.f32 %v3164_v57, %v3164_v57 }
 0x1a6   :  { %v1303_v61 = vpop.xlane.xlu0 %1302 }
 0x1a7   :  { %v1361_v1 = vmul.f32 0.0078125, %v1303_v61  ;;  %1461 = vadd.xlane.f32.xlu1 %v1424_v24 }
 0x1a8   :  { %v1305_v2 = vpop.xlane.xlu1 %1304 }
 0x1a9   :  { %v3171_v5 = vsub.f32 %v3001_v55, %v1361_v1  ;;  %v1362_v32 = vmul.f32 0.0078125, %v1305_v2 }
 0x1ab   :  { %v3174_v6 = vsub.f32 %v3008_v0, %v1362_v32  ;;  %v1425_v41 = vmul.f32 %v3171_v5, %v3171_v5 }
 0x1ad   :  { %1463 = vadd.xlane.f32.xlu0 %v1425_v41  ;;  %v1426_v7 = vmul.f32 %v3174_v6, %v3174_v6 }
 0x1ae   :  { %v1307_v8 = vpop.xlane.xlu0 %1306 }
 0x1af   :  { %v1363_v11 = vmul.f32 0.0078125, %v1307_v8  ;;  %1465 = vadd.xlane.f32.xlu1 %v1426_v7 }
 0x1b0   :  { %v1309_v13 = vpop.xlane.xlu1 %1308 }
 0x1b1   :  { %v3181_v17 = vsub.f32 %v3012_v14, %v1363_v11  ;;  %v1364_v55 = vmul.f32 0.0078125, %v1309_v13 }
 0x1b3   :  { %v3184_v18 = vsub.f32 %v3019_v23, %v1364_v55  ;;  %v1427_v0 = vmul.f32 %v3181_v17, %v3181_v17 }
 0x1b5   :  { %1467 = vadd.xlane.f32.xlu0 %v1427_v0  ;;  %v1428_v20 = vmul.f32 %v3184_v18, %v3184_v18 }
 0x1b6   :  { %v1311_v22 = vpop.xlane.xlu0 %1310 }
 0x1b7   :  { %v1365_v27 = vmul.f32 0.0078125, %v1311_v22  ;;  %1469 = vadd.xlane.f32.xlu1 %v1428_v20 }
 0x1b8   :  { %v1313_v31 = vpop.xlane.xlu1 %1312 }
 0x1b9   :  { %v3191_v33 = vsub.f32 %v3023_v37, %v1365_v27  ;;  %v1366_v14 = vmul.f32 0.0078125, %v1313_v31 }
 0x1bb   :  { %v3194_v34 = vsub.f32 %v3030_v48, %v1366_v14  ;;  %v1429_v23 = vmul.f32 %v3191_v33, %v3191_v33 }
 0x1bd   :  { %1471 = vadd.xlane.f32.xlu0 %v1429_v23  ;;  %v1430_v44 = vmul.f32 %v3194_v34, %v3194_v34 }
 0x1be   :  { %v1315_v38 = vpop.xlane.xlu0 %1314 }
 0x1bf   :  { %v1367_v39 = vmul.f32 0.0078125, %v1315_v38  ;;  %1473 = vadd.xlane.f32.xlu1 %v1430_v44 }
 0x1c0   :  { %v1317_v53 = vpop.xlane.xlu1 %1316 }
 0x1c1   :  { %v3201_v42 = vsub.f32 %v3034_v62, %v1367_v39  ;;  %v1368_v37 = vmul.f32 0.0078125, %v1317_v53 }
 0x1c3   :  { %v3204_v46 = vsub.f32 %v3041_v9, %v1368_v37  ;;  %v1431_v48 = vmul.f32 %v3201_v42, %v3201_v42 }
 0x1c5   :  { %1475 = vadd.xlane.f32.xlu0 %v1431_v48  ;;  %v1432_v3 = vmul.f32 %v3204_v46, %v3204_v46 }
 0x1c6   :  { %v1319_v49 = vpop.xlane.xlu0 %1318 }
 0x1c7   :  { %v1369_v52 = vmul.f32 0.0078125, %v1319_v49  ;;  %1477 = vadd.xlane.f32.xlu1 %v1432_v3 }
 0x1c8   :  { %v1321_v54 = vpop.xlane.xlu1 %1320 }
 0x1c9   :  { %v3211_v10 = vsub.f32 %v3045_v25, %v1369_v52  ;;  %v1370_v62 = vmul.f32 0.0078125, %v1321_v54 }
 0x1cb   :  { %v3214_v60 = vsub.f32 %v3052_v35, %v1370_v62  ;;  %v1433_v9 = vmul.f32 %v3211_v10, %v3211_v10 }
 0x1cd   :  { %1479 = vadd.xlane.f32.xlu0 %v1433_v9  ;;  %v1434_v24 = vmul.f32 %v3214_v60, %v3214_v60 }
 0x1ce   :  { %v1323_v61 = vpop.xlane.xlu0 %1322 }
 0x1cf   :  { %v1371_v1 = vmul.f32 0.0078125, %v1323_v61  ;;  %1481 = vadd.xlane.f32.xlu1 %v1434_v24 }
 0x1d0   :  { %v1325_v2 = vpop.xlane.xlu1 %1324 }
 0x1d1   :  { %v3221_v32 = vsub.f32 %v3056_v51, %v1371_v1  ;;  %v1372_v25 = vmul.f32 0.0078125, %v1325_v2 }
 0x1d3   :  { %v3224_v41 = vsub.f32 %v3063_v63, %v1372_v25  ;;  %v1435_v35 = vmul.f32 %v3221_v32, %v3221_v32 }
 0x1d5   :  { %1483 = vadd.xlane.f32.xlu0 %v1435_v35  ;;  %v1436_v7 = vmul.f32 %v3224_v41, %v3224_v41 }
 0x1d6   :  { %v1327_v8 = vpop.xlane.xlu0 %1326 }
 0x1d7   :  { %v1373_v11 = vmul.f32 0.0078125, %v1327_v8  ;;  %1485 = vadd.xlane.f32.xlu1 %v1436_v7 }
 0x1d8   :  { %v1329_v13 = vpop.xlane.xlu1 %1328 }
 0x1d9   :  { %v3231_v55 = vsub.f32 %v3067_v16, %v1373_v11  ;;  %v1374_v51 = vmul.f32 0.0078125, %v1329_v13 }
 0x1db   :  { %v3234_v0 = vsub.f32 %v3074_v28, %v1374_v51  ;;  %v1437_v63 = vmul.f32 %v3231_v55, %v3231_v55 }
 0x1dd   :  { %1487 = vadd.xlane.f32.xlu0 %v1437_v63  ;;  %v1438_v20 = vmul.f32 %v3234_v0, %v3234_v0 }
 0x1de   :  { %v1331_v22 = vpop.xlane.xlu0 %1330 }
 0x1df   :  { %v1375_v27 = vmul.f32 0.0078125, %v1331_v22  ;;  %1489 = vadd.xlane.f32.xlu1 %v1438_v20 }
 0x1e0   :  { %v1333_v31 = vpop.xlane.xlu1 %1332 }
 0x1e1   :  { %v3241_v14 = vsub.f32 %v3078_v45, %v1375_v27  ;;  %v1376_v16 = vmul.f32 0.0078125, %v1333_v31 }
 0x1e3   :  { %v3244_v23 = vsub.f32 %v3085_v58, %v1376_v16  ;;  %v1439_v28 = vmul.f32 %v3241_v14, %v3241_v14 }
 0x1e5   :  { %1491 = vadd.xlane.f32.xlu0 %v1439_v28  ;;  %v1440_v44 = vmul.f32 %v3244_v23, %v3244_v23 }
 0x1e6   :  { %v1335_v38 = vpop.xlane.xlu0 %1334 }
 0x1e7   :  { %v1377_v39 = vmul.f32 0.0078125, %v1335_v38  ;;  %1493 = vadd.xlane.f32.xlu1 %v1440_v44 }
 0x1e8   :  { %v1337_v53 = vpop.xlane.xlu1 %1336 }
 0x1e9   :  { %v3251_v37 = vsub.f32 %v3089_v12, %v1377_v39  ;;  %v1378_v45 = vmul.f32 0.0078125, %v1337_v53 }
 0x1eb   :  { %v3254_v48 = vsub.f32 %v3096_v26, %v1378_v45  ;;  %v1441_v58 = vmul.f32 %v3251_v37, %v3251_v37 }
 0x1ed   :  { %1495 = vadd.xlane.f32.xlu0 %v1441_v58  ;;  %v1442_v3 = vmul.f32 %v3254_v48, %v3254_v48 }
 0x1ee   :  { %v1339_v49 = vpop.xlane.xlu0 %1338 }
 0x1ef   :  { %v1379_v52 = vmul.f32 0.0078125, %v1339_v49  ;;  %1497 = vadd.xlane.f32.xlu1 %v1442_v3 }
 0x1f0   :  { %v1341_v54 = vpop.xlane.xlu1 %1340 }
 0x1f1   :  { %v3261_v62 = vsub.f32 %v3100_v43, %v1379_v52  ;;  %v1380_v12 = vmul.f32 0.0078125, %v1341_v54 }
 0x1f3   :  { %v3264_v9 = vsub.f32 %v3107_v59, %v1380_v12  ;;  %v1443_v26 = vmul.f32 %v3261_v62, %v3261_v62 }
 0x1f5   :  { %1499 = vadd.xlane.f32.xlu0 %v1443_v26  ;;  %v1444_v24 = vmul.f32 %v3264_v9, %v3264_v9 }
 0x1f6   :  { %v1343_v61 = vpop.xlane.xlu0 %1342 }
 0x1f7   :  { %v1381_v1 = vmul.f32 0.0078125, %v1343_v61  ;;  %1501 = vadd.xlane.f32.xlu1 %v1444_v24 }
 0x1f8   :  { %v1345_v2 = vpop.xlane.xlu1 %1344 }
 0x1f9   :  { %v3271_v25 = vsub.f32 %v3111_v15, %v1381_v1  ;;  %v1382_v43 = vmul.f32 0.0078125, %v1345_v2  ;;  %v3304_v1 = vld [vmem:[%s3458_s4] ss:$0 sm:$0xff] }
 0x1fb   :  { %v3274_v35 = vsub.f32 %v3118_v30, %v1382_v43  ;;  %v1445_v59 = vmul.f32 %v3271_v25, %v3271_v25 }
 0x1fd   :  { %1503 = vadd.xlane.f32.xlu0 %v1445_v59  ;;  %v1446_v7 = vmul.f32 %v3274_v35, %v3274_v35 }
 0x1fe   :  { %v1347_v8 = vpop.xlane.xlu0 %1346 }
 0x1ff   :  { %v1383_v11 = vmul.f32 0.0078125, %v1347_v8  ;;  %1505 = vadd.xlane.f32.xlu1 %v1446_v7 }
 0x200   :  { %v1349_v13 = vpop.xlane.xlu1 %1348 }
 0x201   :  { %v3281_v51 = vsub.f32 %v3122_v50, %v1383_v11  ;;  %v1384_v15 = vmul.f32 0.0078125, %v1349_v13 }
 0x203   :  { %v3284_v63 = vsub.f32 %v3129_v4, %v1384_v15  ;;  %v1447_v30 = vmul.f32 %v3281_v51, %v3281_v51 }
 0x205   :  { %1507 = vadd.xlane.f32.xlu0 %v1447_v30  ;;  %v1448_v20 = vmul.f32 %v3284_v63, %v3284_v63 }
 0x206   :  { %v1351_v22 = vpop.xlane.xlu0 %1350 }
 0x207   :  { %v1385_v27 = vmul.f32 0.0078125, %v1351_v22  ;;  %1509 = vadd.xlane.f32.xlu1 %v1448_v20 }
 0x208   :  { %v1353_v31 = vpop.xlane.xlu1 %1352 }
 0x209   :  { %v3291_v16 = vsub.f32 %v3133_v19, %v1385_v27  ;;  %v1386_v50 = vmul.f32 0.0078125, %v1353_v31 }
 0x20b   :  { %v3294_v28 = vsub.f32 %v3137_v21, %v1386_v50  ;;  %v1449_v4 = vmul.f32 %v3291_v16, %v3291_v16 }
 0x20d   :  { %1511 = vadd.xlane.f32.xlu0 %v1449_v4  ;;  %v1450_v44 = vmul.f32 %v3294_v28, %v3294_v28 }
 0x20f   :  { %1513 = vadd.xlane.f32.xlu1 %v1450_v44 }
 0x222   :  { %v1452_v38 = vpop.xlane.xlu0 %1451 }
 0x223   :  { %v1515_v39 = vmul.f32 0.0078125, %v1452_v38 }
 0x225   :  { %v1547_v53 = vadd.f32 1e-05, %v1515_v39 }
 0x226   :  { %v1454_v45 = vpop.xlane.xlu1 %1453 }
 0x227   :  { %2572 = vrsqrt.f32 %v1547_v53  ;;  %v1516_v58 = vmul.f32 0.0078125, %v1454_v45 }
 0x229   :  { %v1548_v19 = vadd.f32 1e-05, %v1516_v58 }
 0x22a   :  { %v1456_v3 = vpop.xlane.xlu0 %1455 }
 0x22b   :  { %2574 = vrsqrt.f32 %v1548_v19  ;;  %v1517_v49 = vmul.f32 0.0078125, %v1456_v3 }
 0x22d   :  { %v1549_v21 = vadd.f32 1e-05, %v1517_v49 }
 0x22e   :  { %v1458_v52 = vpop.xlane.xlu1 %1457 }
 0x22f   :  { %2576 = vrsqrt.f32 %v1549_v21  ;;  %v1518_v54 = vmul.f32 0.0078125, %v1458_v52 }
 0x231   :  { %v2573_v12 = vpop.eup %2572  ;;  %v1550_v26 = vadd.f32 1e-05, %v1518_v54 }
 0x232   :  { %v1611_v24 = vmul.f32 %v2573_v12, %v3141_v29  ;;  %v1460_v61 = vpop.xlane.xlu0 %1459  ;;  %v3311_v29 = vld [vmem:[%s3459_s5] ss:$0 sm:$0xff] }
 0x233   :  { %2578 = vrsqrt.f32 %v1550_v26  ;;  %v1519_v2 = vmul.f32 0.0078125, %v1460_v61 }
 0x234   :  { %v1462_v43 = vpop.xlane.xlu1 %1461  ;;  %v1649_v11 = vmul.f32 %v3304_v1, %v1611_v24 }
 0x235   :  { %v2575_v59 = vpop.eup %2574  ;;  %v1551_v7 = vadd.f32 1e-05, %v1519_v2  ;;  %v1520_v8 = vmul.f32 0.0078125, %v1462_v43 }
 0x236   :  { %v1612_v13 = vmul.f32 %v2575_v59, %v3146_v36  ;;  %v1687_v22 = vadd.f32 %v3311_v29, %v1649_v11 }
 0x237   :  { %2580 = vrsqrt.f32 %v1551_v7  ;;  %v1552_v15 = vadd.f32 1e-05, %v1520_v8 }
 0x238   :  { %v1650_v30 = vmul.f32 %v3304_v1, %v1612_v13 }
 0x239   :  { %v2577_v20 = vpop.eup %2576  ;;  %2582 = vrsqrt.f32 %v1552_v15 }
 0x23a   :  { %v1688_v27 = vadd.f32 %v3311_v29, %v1650_v30  ;;  %v1613_v31 = vmul.f32 %v2577_v20, %v3151_v40  ;;  %v1464_v50 = vpop.xlane.xlu0 %1463 }
 0x23b   :  { %v1521_v4 = vmul.f32 0.0078125, %v1464_v50 }
 0x23c   :  { %v2113_v36 = vpack.c.bf16 %v1688_v27, %v1687_v22  ;;  %v1466_v44 = vpop.xlane.xlu1 %1465  ;;  %v1651_v45 = vmul.f32 %v3304_v1, %v1613_v31 }
 0x23d   :  { %v2579_v38 = vpop.eup %2578  ;;  %v1553_v39 = vadd.f32 1e-05, %v1521_v4  ;;  %v1522_v53 = vmul.f32 0.0078125, %v1466_v44 }
 0x23e   :  { %2114 = vst [vmem:[%s3460_s6] sm:$0xff] %v2113_v36   ;;  %v1614_v58 = vmul.f32 %v2579_v38, %v3156_v47  ;;  %v1689_v49 = vadd.f32 %v3311_v29, %v1651_v45 }
 0x23f   :  { %2584 = vrsqrt.f32 %v1553_v39  ;;  %v1554_v19 = vadd.f32 1e-05, %v1522_v53 }
 0x240   :  { %v1652_v3 = vmul.f32 %v3304_v1, %v1614_v58 }
 0x241   :  { %v2581_v40 = vpop.eup %2580  ;;  %2586 = vrsqrt.f32 %v1554_v19 }
 0x242   :  { %v1690_v21 = vadd.f32 %v3311_v29, %v1652_v3  ;;  %v1615_v52 = vmul.f32 %v2581_v40, %v3161_v56  ;;  %v1468_v54 = vpop.xlane.xlu0 %1467 }
 0x243   :  { %v2583_v12 = vpop.eup %2582  ;;  %v1523_v26 = vmul.f32 0.0078125, %v1468_v54 }
 0x244   :  { %v2118_v24 = vpack.c.bf16 %v1690_v21, %v1689_v49  ;;  %v1653_v61 = vmul.f32 %v3304_v1, %v1615_v52  ;;  %v1616_v47 = vmul.f32 %v2583_v12, %v3164_v57  ;;  %v1470_v2 = vpop.xlane.xlu1 %1469 }
 0x245   :  { %v1555_v43 = vadd.f32 1e-05, %v1523_v26  ;;  %v1524_v59 = vmul.f32 0.0078125, %v1470_v2 }
 0x246   :  { %2205 = vst [vmem:[%s3460_s6 + $0x8] sm:$0xff] %v2118_v24   ;;  %v1654_v7 = vmul.f32 %v3304_v1, %v1616_v47  ;;  %v1691_v56 = vadd.f32 %v3311_v29, %v1653_v61 }
 0x247   :  { %2588 = vrsqrt.f32 %v1555_v43  ;;  %v1556_v8 = vadd.f32 1e-05, %v1524_v59 }
 0x248   :  { %v1692_v11 = vadd.f32 %v3311_v29, %v1654_v7 }
 0x249   :  { %v2585_v13 = vpop.eup %2584  ;;  %2590 = vrsqrt.f32 %v1556_v8 }
 0x24a   :  { %v2123_v15 = vpack.c.bf16 %v1692_v11, %v1691_v56  ;;  %v1617_v57 = vmul.f32 %v2585_v13, %v3171_v5  ;;  %v1472_v30 = vpop.xlane.xlu0 %1471 }
 0x24b   :  { %v2587_v20 = vpop.eup %2586  ;;  %v1525_v22 = vmul.f32 0.0078125, %v1472_v30 }
 0x24c   :  { %2206 = vst [vmem:[%s3460_s6 + $0x10] sm:$0xff] %v2123_v15   ;;  %v1655_v27 = vmul.f32 %v3304_v1, %v1617_v57  ;;  %v1618_v31 = vmul.f32 %v2587_v20, %v3174_v6  ;;  %v1474_v50 = vpop.xlane.xlu1 %1473 }
 0x24d   :  { %v1557_v4 = vadd.f32 1e-05, %v1525_v22  ;;  %v1526_v36 = vmul.f32 0.0078125, %v1474_v50 }
 0x24e   :  { %v1656_v44 = vmul.f32 %v3304_v1, %v1618_v31  ;;  %v1693_v5 = vadd.f32 %v3311_v29, %v1655_v27 }
 0x24f   :  { %2592 = vrsqrt.f32 %v1557_v4  ;;  %v1558_v38 = vadd.f32 1e-05, %v1526_v36 }
 0x250   :  { %v1694_v39 = vadd.f32 %v3311_v29, %v1656_v44 }
 0x251   :  { %v2589_v53 = vpop.eup %2588  ;;  %2594 = vrsqrt.f32 %v1558_v38 }
 0x252   :  { %v2128_v45 = vpack.c.bf16 %v1694_v39, %v1693_v5  ;;  %v1619_v58 = vmul.f32 %v2589_v53, %v3181_v17  ;;  %v1476_v19 = vpop.xlane.xlu0 %1475 }
 0x253   :  { %v2591_v3 = vpop.eup %2590  ;;  %v1527_v40 = vmul.f32 0.0078125, %v1476_v19 }
 0x254   :  { %2207 = vst [vmem:[%s3460_s6 + $0x18] sm:$0xff] %v2128_v45   ;;  %v1657_v6 = vmul.f32 %v3304_v1, %v1619_v58  ;;  %v1620_v49 = vmul.f32 %v2591_v3, %v3184_v18  ;;  %v1478_v21 = vpop.xlane.xlu1 %1477 }
 0x255   :  { %v1559_v52 = vadd.f32 1e-05, %v1527_v40  ;;  %v1528_v54 = vmul.f32 0.0078125, %v1478_v21 }
 0x256   :  { %v1658_v12 = vmul.f32 %v3304_v1, %v1620_v49  ;;  %v1695_v17 = vadd.f32 %v3311_v29, %v1657_v6 }
 0x257   :  { %2596 = vrsqrt.f32 %v1559_v52  ;;  %v1560_v26 = vadd.f32 1e-05, %v1528_v54 }
 0x258   :  { %v1696_v24 = vadd.f32 %v3311_v29, %v1658_v12 }
 0x259   :  { %v2593_v61 = vpop.eup %2592  ;;  %2598 = vrsqrt.f32 %v1560_v26 }
 0x25a   :  { %v2133_v47 = vpack.c.bf16 %v1696_v24, %v1695_v17  ;;  %v1621_v2 = vmul.f32 %v2593_v61, %v3191_v33  ;;  %v1480_v43 = vpop.xlane.xlu0 %1479 }
 0x25b   :  { %v2595_v59 = vpop.eup %2594  ;;  %v1529_v7 = vmul.f32 0.0078125, %v1480_v43 }
 0x25c   :  { %2208 = vst [vmem:[%s3460_s6 + $0x20] sm:$0xff] %v2133_v47   ;;  %v1659_v18 = vmul.f32 %v3304_v1, %v1621_v2  ;;  %v1622_v8 = vmul.f32 %v2595_v59, %v3194_v34  ;;  %v1482_v56 = vpop.xlane.xlu1 %1481 }
 0x25d   :  { %v1561_v11 = vadd.f32 1e-05, %v1529_v7  ;;  %v1530_v13 = vmul.f32 0.0078125, %v1482_v56 }
 0x25e   :  { %v1660_v15 = vmul.f32 %v3304_v1, %v1622_v8  ;;  %v1697_v33 = vadd.f32 %v3311_v29, %v1659_v18 }
 0x25f   :  { %2600 = vrsqrt.f32 %v1561_v11  ;;  %v1562_v57 = vadd.f32 1e-05, %v1530_v13 }
 0x260   :  { %v1698_v30 = vadd.f32 %v3311_v29, %v1660_v15 }
 0x261   :  { %v2597_v20 = vpop.eup %2596  ;;  %2602 = vrsqrt.f32 %v1562_v57 }
 0x262   :  { %v2138_v22 = vpack.c.bf16 %v1698_v30, %v1697_v33  ;;  %v1623_v27 = vmul.f32 %v2597_v20, %v3201_v42  ;;  %v1484_v31 = vpop.xlane.xlu0 %1483 }
 0x263   :  { %v2599_v50 = vpop.eup %2598  ;;  %v1531_v4 = vmul.f32 0.0078125, %v1484_v31 }
 0x264   :  { %2209 = vst [vmem:[%s3460_s6 + $0x28] sm:$0xff] %v2138_v22   ;;  %v1661_v34 = vmul.f32 %v3304_v1, %v1623_v27  ;;  %v1624_v36 = vmul.f32 %v2599_v50, %v3204_v46  ;;  %v1486_v44 = vpop.xlane.xlu1 %1485 }
 0x265   :  { %v1563_v38 = vadd.f32 1e-05, %v1531_v4  ;;  %v1532_v5 = vmul.f32 0.0078125, %v1486_v44 }
 0x266   :  { %v1662_v39 = vmul.f32 %v3304_v1, %v1624_v36  ;;  %v1699_v42 = vadd.f32 %v3311_v29, %v1661_v34 }
 0x267   :  { %2604 = vrsqrt.f32 %v1563_v38  ;;  %v1564_v53 = vadd.f32 1e-05, %v1532_v5 }
 0x268   :  { %v1700_v45 = vadd.f32 %v3311_v29, %v1662_v39 }
 0x269   :  { %v2601_v58 = vpop.eup %2600  ;;  %2606 = vrsqrt.f32 %v1564_v53 }
 0x26a   :  { %v2143_v19 = vpack.c.bf16 %v1700_v45, %v1699_v42  ;;  %v1625_v3 = vmul.f32 %v2601_v58, %v3211_v10  ;;  %v1488_v40 = vpop.xlane.xlu0 %1487 }
 0x26b   :  { %v2603_v6 = vpop.eup %2602  ;;  %v1533_v49 = vmul.f32 0.0078125, %v1488_v40 }
 0x26c   :  { %2210 = vst [vmem:[%s3460_s6 + $0x30] sm:$0xff] %v2143_v19   ;;  %v1663_v46 = vmul.f32 %v3304_v1, %v1625_v3  ;;  %v1626_v21 = vmul.f32 %v2603_v6, %v3214_v60  ;;  %v1490_v52 = vpop.xlane.xlu1 %1489 }
 0x26d   :  { %v1565_v54 = vadd.f32 1e-05, %v1533_v49  ;;  %v1534_v12 = vmul.f32 0.0078125, %v1490_v52 }
 0x26e   :  { %v1664_v26 = vmul.f32 %v3304_v1, %v1626_v21  ;;  %v1701_v10 = vadd.f32 %v3311_v29, %v1663_v46 }
 0x26f   :  { %2608 = vrsqrt.f32 %v1565_v54  ;;  %v1566_v17 = vadd.f32 1e-05, %v1534_v12 }
 0x270   :  { %v1702_v24 = vadd.f32 %v3311_v29, %v1664_v26 }
 0x271   :  { %v2605_v61 = vpop.eup %2604  ;;  %2610 = vrsqrt.f32 %v1566_v17 }
 0x272   :  { %v2148_v47 = vpack.c.bf16 %v1702_v24, %v1701_v10  ;;  %v1627_v2 = vmul.f32 %v2605_v61, %v3221_v32  ;;  %v1492_v43 = vpop.xlane.xlu0 %1491 }
 0x273   :  { %v2607_v59 = vpop.eup %2606  ;;  %v1535_v7 = vmul.f32 0.0078125, %v1492_v43 }
 0x274   :  { %2211 = vst [vmem:[%s3460_s6 + $0x38] sm:$0xff] %v2148_v47   ;;  %v1665_v60 = vmul.f32 %v3304_v1, %v1627_v2  ;;  %v1628_v18 = vmul.f32 %v2607_v59, %v3224_v41  ;;  %v1494_v8 = vpop.xlane.xlu1 %1493 }
 0x275   :  { %v1567_v56 = vadd.f32 1e-05, %v1535_v7  ;;  %v1536_v11 = vmul.f32 0.0078125, %v1494_v8 }
 0x276   :  { %v1666_v13 = vmul.f32 %v3304_v1, %v1628_v18  ;;  %v1703_v32 = vadd.f32 %v3311_v29, %v1665_v60 }
 0x277   :  { %2612 = vrsqrt.f32 %v1567_v56  ;;  %v1568_v15 = vadd.f32 1e-05, %v1536_v11 }
 0x278   :  { %v1704_v57 = vadd.f32 %v3311_v29, %v1666_v13 }
 0x279   :  { %v2609_v33 = vpop.eup %2608  ;;  %2614 = vrsqrt.f32 %v1568_v15 }
 0x27a   :  { %v2153_v30 = vpack.c.bf16 %v1704_v57, %v1703_v32  ;;  %v1629_v20 = vmul.f32 %v2609_v33, %v3231_v55  ;;  %v1496_v22 = vpop.xlane.xlu0 %1495 }
 0x27b   :  { %v2611_v27 = vpop.eup %2610  ;;  %v1537_v31 = vmul.f32 0.0078125, %v1496_v22 }
 0x27c   :  { %2212 = vst [vmem:[%s3460_s6 + $0x40] sm:$0xff] %v2153_v30   ;;  %v1667_v41 = vmul.f32 %v3304_v1, %v1629_v20  ;;  %v1630_v50 = vmul.f32 %v2611_v27, %v3234_v0  ;;  %v1498_v4 = vpop.xlane.xlu1 %1497 }
 0x27d   :  { %v1569_v34 = vadd.f32 1e-05, %v1537_v31  ;;  %v1538_v36 = vmul.f32 0.0078125, %v1498_v4 }
 0x27e   :  { %v1668_v44 = vmul.f32 %v3304_v1, %v1630_v50  ;;  %v1705_v55 = vadd.f32 %v3311_v29, %v1667_v41 }
 0x27f   :  { %2616 = vrsqrt.f32 %v1569_v34  ;;  %v1570_v38 = vadd.f32 1e-05, %v1538_v36 }
 0x280   :  { %v1706_v5 = vadd.f32 %v3311_v29, %v1668_v44 }
 0x281   :  { %v2613_v39 = vpop.eup %2612  ;;  %2618 = vrsqrt.f32 %v1570_v38 }
 0x282   :  { %v2158_v53 = vpack.c.bf16 %v1706_v5, %v1705_v55  ;;  %v1631_v42 = vmul.f32 %v2613_v39, %v3241_v14  ;;  %v1500_v45 = vpop.xlane.xlu0 %1499 }
 0x283   :  { %v2615_v58 = vpop.eup %2614  ;;  %v1539_v19 = vmul.f32 0.0078125, %v1500_v45 }
 0x284   :  { %2213 = vst [vmem:[%s3460_s6 + $0x48] sm:$0xff] %v2158_v53   ;;  %v1669_v0 = vmul.f32 %v3304_v1, %v1631_v42  ;;  %v1632_v3 = vmul.f32 %v2615_v58, %v3244_v23  ;;  %v1502_v40 = vpop.xlane.xlu1 %1501 }
 0x285   :  { %v1571_v6 = vadd.f32 1e-05, %v1539_v19  ;;  %v1540_v49 = vmul.f32 0.0078125, %v1502_v40 }
 0x286   :  { %v1670_v46 = vmul.f32 %v3304_v1, %v1632_v3  ;;  %v1707_v14 = vadd.f32 %v3311_v29, %v1669_v0 }
 0x287   :  { %2620 = vrsqrt.f32 %v1571_v6  ;;  %v1572_v21 = vadd.f32 1e-05, %v1540_v49 }
 0x288   :  { %v1708_v52 = vadd.f32 %v3311_v29, %v1670_v46 }
 0x289   :  { %v2617_v54 = vpop.eup %2616  ;;  %2622 = vrsqrt.f32 %v1572_v21 }
 0x28a   :  { %v2163_v12 = vpack.c.bf16 %v1708_v52, %v1707_v14  ;;  %v1633_v26 = vmul.f32 %v2617_v54, %v3251_v37  ;;  %v1504_v17 = vpop.xlane.xlu0 %1503 }
 0x28b   :  { %v2619_v10 = vpop.eup %2618  ;;  %v1541_v24 = vmul.f32 0.0078125, %v1504_v17 }
 0x28c   :  { %2214 = vst [vmem:[%s3460_s6 + $0x50] sm:$0xff] %v2163_v12   ;;  %v1671_v23 = vmul.f32 %v3304_v1, %v1633_v26  ;;  %v1634_v61 = vmul.f32 %v2619_v10, %v3254_v48  ;;  %v1506_v47 = vpop.xlane.xlu1 %1505 }
 0x28d   :  { %v1573_v2 = vadd.f32 1e-05, %v1541_v24  ;;  %v1542_v43 = vmul.f32 0.0078125, %v1506_v47 }
 0x28e   :  { %v1672_v59 = vmul.f32 %v3304_v1, %v1634_v61  ;;  %v1709_v37 = vadd.f32 %v3311_v29, %v1671_v23 }
 0x28f   :  { %2624 = vrsqrt.f32 %v1573_v2  ;;  %v1574_v7 = vadd.f32 1e-05, %v1542_v43 }
 0x290   :  { %v1710_v60 = vadd.f32 %v3311_v29, %v1672_v59 }
 0x291   :  { %v2621_v18 = vpop.eup %2620  ;;  %2626 = vrsqrt.f32 %v1574_v7 }
 0x292   :  { %v2168_v8 = vpack.c.bf16 %v1710_v60, %v1709_v37  ;;  %v1635_v56 = vmul.f32 %v2621_v18, %v3261_v62  ;;  %v1508_v11 = vpop.xlane.xlu0 %1507 }
 0x293   :  { %v2623_v13 = vpop.eup %2622  ;;  %v1543_v15 = vmul.f32 0.0078125, %v1508_v11 }
 0x294   :  { %2215 = vst [vmem:[%s3460_s6 + $0x58] sm:$0xff] %v2168_v8   ;;  %v1673_v48 = vmul.f32 %v3304_v1, %v1635_v56  ;;  %v1636_v32 = vmul.f32 %v2623_v13, %v3264_v9  ;;  %v1510_v57 = vpop.xlane.xlu1 %1509 }
 0x295   :  { %v1575_v33 = vadd.f32 1e-05, %v1543_v15  ;;  %v1544_v30 = vmul.f32 0.0078125, %v1510_v57 }
 0x296   :  { %v1674_v20 = vmul.f32 %v3304_v1, %v1636_v32  ;;  %v1711_v62 = vadd.f32 %v3311_v29, %v1673_v48 }
 0x297   :  { %2628 = vrsqrt.f32 %v1575_v33  ;;  %v1576_v22 = vadd.f32 1e-05, %v1544_v30 }
 0x298   :  { %v1712_v27 = vadd.f32 %v3311_v29, %v1674_v20 }
 0x299   :  { %v2625_v31 = vpop.eup %2624  ;;  %2630 = vrsqrt.f32 %v1576_v22 }
 0x29a   :  { %v2173_v41 = vpack.c.bf16 %v1712_v27, %v1711_v62  ;;  %v1637_v50 = vmul.f32 %v2625_v31, %v3271_v25  ;;  %v1512_v4 = vpop.xlane.xlu0 %1511 }
 0x29b   :  { %v2627_v34 = vpop.eup %2626  ;;  %v1545_v36 = vmul.f32 0.0078125, %v1512_v4 }
 0x29c   :  { %2216 = vst [vmem:[%s3460_s6 + $0x60] sm:$0xff] %v2173_v41   ;;  %v1675_v9 = vmul.f32 %v3304_v1, %v1637_v50  ;;  %v1638_v44 = vmul.f32 %v2627_v34, %v3274_v35  ;;  %v1514_v38 = vpop.xlane.xlu1 %1513 }
 0x29d   :  { %v1577_v55 = vadd.f32 1e-05, %v1545_v36  ;;  %v1546_v5 = vmul.f32 0.0078125, %v1514_v38 }
 0x29e   :  { %v1676_v39 = vmul.f32 %v3304_v1, %v1638_v44  ;;  %v1713_v25 = vadd.f32 %v3311_v29, %v1675_v9 }
 0x29f   :  { %2632 = vrsqrt.f32 %v1577_v55  ;;  %v1578_v53 = vadd.f32 1e-05, %v1546_v5 }
 0x2a0   :  { %v1714_v42 = vadd.f32 %v3311_v29, %v1676_v39 }
 0x2a1   :  { %v2629_v45 = vpop.eup %2628  ;;  %2634 = vrsqrt.f32 %v1578_v53 }
 0x2a2   :  { %v2178_v58 = vpack.c.bf16 %v1714_v42, %v1713_v25  ;;  %v1639_v19 = vmul.f32 %v2629_v45, %v3281_v51 }
 0x2a3   :  { %v2631_v0 = vpop.eup %2630 }
 0x2a4   :  { %2217 = vst [vmem:[%s3460_s6 + $0x68] sm:$0xff] %v2178_v58   ;;  %v1677_v35 = vmul.f32 %v3304_v1, %v1639_v19  ;;  %v1640_v3 = vmul.f32 %v2631_v0, %v3284_v63 }
 0x2a6   :  { %v1678_v40 = vmul.f32 %v3304_v1, %v1640_v3  ;;  %v1715_v6 = vadd.f32 %v3311_v29, %v1677_v35 }
 0x2a8   :  { %v1716_v49 = vadd.f32 %v3311_v29, %v1678_v40 }
 0x2a9   :  { %v2633_v46 = vpop.eup %2632 }
 0x2aa   :  { %v2183_v21 = vpack.c.bf16 %v1716_v49, %v1715_v6  ;;  %v1641_v14 = vmul.f32 %v2633_v46, %v3291_v16 }
 0x2ab   :  { %v2635_v51 = vpop.eup %2634 }
 0x2ac   :  { %2218 = vst [vmem:[%s3460_s6 + $0x70] sm:$0xff] %v2183_v21   ;;  %v1679_v52 = vmul.f32 %v3304_v1, %v1641_v14  ;;  %v1642_v54 = vmul.f32 %v2635_v51, %v3294_v28 }
 0x2ae   :  { %v1680_v63 = vmul.f32 %v3304_v1, %v1642_v54  ;;  %v1717_v12 = vadd.f32 %v3311_v29, %v1679_v52 }
 0x2b0   :  { %v1718_v26 = vadd.f32 %v3311_v29, %v1680_v63 }
 0x2b2   :  { %v2188_v17 = vpack.c.bf16 %v1718_v26, %v1717_v12 }
 0x2b4   :  { %2219 = vst [vmem:[%s3460_s6 + $0x78] sm:$0xff] %v2188_v17  }

// kernel: _lambda_.15
= control target key start
LH: loop header
LB: loop body
LE: loop exit
PB: predicated region body
PF: predicated region fallthrough
CT: control target
= control target key end

     0   :  { %v3200_v1 = vmov 0   ;;  %v761_v33 = vlaneseq  ;;  %s4889_s1 = inlined_call_operand.vmem [shape: bf16[128,256], index: 1, kind: input, shape index: {}]   ;;  %s4890_s0 = inlined_call_operand.vmem [shape: bf16[256,128], index: 0, kind: input, shape index: {}]   ;;  %s4891_s2 = inlined_call_operand.vmem [shape: f32[1,256], index: 2, kind: input, shape index: {}]   ;;  %s4892_s3 = inlined_call_operand.vmem [shape: bf16[256,256], index: 3, kind: output, shape index: {}]  }
   0x1   :  { %v2904_v0 = vld [vmem:[%s4889_s1 + $0x4] ss:$8 sps:$4 sm:$0xff]   ;;  %403 = vmatprep.mubr.bf16.mxu0 %v3200_v1  ;;  %483 = vmatprep.mubr.bf16.mxu1 %v3200_v1  ;;  %v2906_v2 = vld [vmem:[%s4889_s1] ss:$8 sps:$4 sm:$0xff]   ;;  %v2907_v3 = vld [vmem:[%s4889_s1 + $0x14] ss:$8 sps:$4 sm:$0xff]  }
   0x2   :  { %371 = vmatprep.subr.bf16.mxu0 %v2904_v0  ;;  %2887 = vmatprep.subr.bf16.mxu1 %v2904_v0  ;;  %v2909_v4 = vld [vmem:[%s4889_s1 + $0x10] ss:$8 sps:$4 sm:$0xff]   ;;  %v2910_v5 = vld [vmem:[%s4889_s1 + $0x24] ss:$8 sps:$4 sm:$0xff]   ;;  %v2912_v6 = vld [vmem:[%s4889_s1 + $0x20] ss:$8 sps:$4 sm:$0xff]  }
   0x3   :  { %372 = vmatpush1.bf16.msra.mxu0 %v2906_v2  ;;  %2895 = vmatpush1.bf16.msra.mxu1 %v2906_v2  ;;  %v2913_v7 = vld [vmem:[%s4889_s1 + $0x34] ss:$8 sps:$4 sm:$0xff]   ;;  %v2915_v8 = vld [vmem:[%s4889_s1 + $0x30] ss:$8 sps:$4 sm:$0xff]   ;;  %v2916_v9 = vld [vmem:[%s4889_s1 + $0x44] ss:$8 sps:$4 sm:$0xff]  }
   0x4   :  { %373 = vmatprep.subr.bf16.mxu0 %v2907_v3  ;;  %2888 = vmatprep.subr.bf16.mxu1 %v2907_v3  ;;  %v2918_v10 = vld [vmem:[%s4889_s1 + $0x40] ss:$8 sps:$4 sm:$0xff]   ;;  %v2919_v11 = vld [vmem:[%s4889_s1 + $0x54] ss:$8 sps:$4 sm:$0xff]   ;;  %v2921_v12 = vld [vmem:[%s4889_s1 + $0x50] ss:$8 sps:$4 sm:$0xff]  }
   0x5   :  { %v2922_v13 = vld [vmem:[%s4889_s1 + $0x64] ss:$8 sps:$4 sm:$0xff]   ;;  %v2924_v14 = vld [vmem:[%s4889_s1 + $0x60] ss:$8 sps:$4 sm:$0xff]   ;;  %v2925_v15 = vld [vmem:[%s4889_s1 + $0x74] ss:$8 sps:$4 sm:$0xff]  }
   0x6   :  { %v2927_v16 = vld [vmem:[%s4889_s1 + $0x70] ss:$8 sps:$4 sm:$0xff]   ;;  %v2928_v17 = vld [vmem:[%s4890_s0] sm:$0xff]   ;;  %v2930_v19 = vld [vmem:[%s4890_s0 + $0x8] sm:$0xff]   ;;  %v762_v34 = vshrl.u32 %v761_v33, 7 }
   0x7   :  { %374 = vmatpush1.bf16.msra.mxu0 %v2909_v4  ;;  %2896 = vmatpush1.bf16.msra.mxu1 %v2909_v4  ;;  %v2929_v18 = vld [vmem:[%s4890_s0 + $0x40] sm:$0xff]   ;;  %v2931_v20 = vld [vmem:[%s4890_s0 + $0x48] sm:$0xff]   ;;  %v2932_v21 = vld [vmem:[%s4890_s0 + $0x10] sm:$0xff]  }
   0x8   :  { %375 = vmatprep.subr.bf16.mxu0 %v2910_v5  ;;  %2889 = vmatprep.subr.bf16.mxu1 %v2910_v5  ;;  %v2933_v22 = vld [vmem:[%s4890_s0 + $0x50] sm:$0xff]   ;;  %v2934_v23 = vld [vmem:[%s4890_s0 + $0x18] sm:$0xff]   ;;  %v2936_v25 = vld [vmem:[%s4890_s0 + $0x20] sm:$0xff]   ;;  %v763_v35 = vsub.s32 0, %v762_v34  ;;  %v767_v37 = vsub.s32 1, %v762_v34 }
   0x9   :  { %v2935_v24 = vld [vmem:[%s4890_s0 + $0x58] sm:$0xff]   ;;  %v2937_v26 = vld [vmem:[%s4890_s0 + $0x60] sm:$0xff]   ;;  %v2938_v27 = vld [vmem:[%s4890_s0 + $0x28] sm:$0xff]  }
   0xa   :  { %v2939_v28 = vld [vmem:[%s4890_s0 + $0x68] sm:$0xff]   ;;  %v2940_v29 = vld [vmem:[%s4890_s0 + $0x30] sm:$0xff]   ;;  %v2942_v31 = vld [vmem:[%s4890_s0 + $0x38] sm:$0xff]  }
   0xb   :  { %376 = vmatpush1.bf16.msra.mxu0 %v2912_v6  ;;  %2897 = vmatpush1.bf16.msra.mxu1 %v2912_v6  ;;  %v2941_v30 = vld [vmem:[%s4890_s0 + $0x70] sm:$0xff]   ;;  %v2943_v32 = vld [vmem:[%s4890_s0 + $0x78] sm:$0xff]   ;;  %v759_v36 = vld [vmem:[%s4891_s2] sm:$0x3] }
   0xc   :  { %377 = vmatprep.subr.bf16.mxu0 %v2913_v7  ;;  %2890 = vmatprep.subr.bf16.mxu1 %v2913_v7  ;;  %v3336_v38 = vrot.slane %v759_v36, %v763_v35  ;;  %v3338_v39 = vrot.slane %v759_v36, %v767_v37 }
   0xf   :  { %378 = vmatpush1.bf16.msra.mxu0 %v2915_v8  ;;  %2898 = vmatpush1.bf16.msra.mxu1 %v2915_v8 }
  0x10   :  { %379 = vmatprep.subr.bf16.mxu0 %v2916_v9  ;;  %2891 = vmatprep.subr.bf16.mxu1 %v2916_v9 }
  0x13   :  { %380 = vmatpush1.bf16.msra.mxu0 %v2918_v10  ;;  %2899 = vmatpush1.bf16.msra.mxu1 %v2918_v10 }
  0x14   :  { %381 = vmatprep.subr.bf16.mxu0 %v2919_v11  ;;  %2892 = vmatprep.subr.bf16.mxu1 %v2919_v11 }
  0x17   :  { %382 = vmatpush1.bf16.msra.mxu0 %v2921_v12  ;;  %2900 = vmatpush1.bf16.msra.mxu1 %v2921_v12 }
  0x18   :  { %383 = vmatprep.subr.bf16.mxu0 %v2922_v13  ;;  %2893 = vmatprep.subr.bf16.mxu1 %v2922_v13 }
  0x1b   :  { %384 = vmatpush1.bf16.msra.mxu0 %v2924_v14  ;;  %2901 = vmatpush1.bf16.msra.mxu1 %v2924_v14 }
  0x1c   :  { %385 = vmatprep.subr.bf16.mxu0 %v2925_v15  ;;  %2894 = vmatprep.subr.bf16.mxu1 %v2925_v15 }
  0x1f   :  { %386 = vmatpush1.bf16.msra.mxu0 %v2927_v16  ;;  %2902 = vmatpush1.bf16.msra.mxu1 %v2927_v16 }
  0x22   :  { %404 = vmatmul.mubr.bf16.vlgmr.msra.gmra.mrb[0].mxu0 %v2928_v17  ;;  %484 = vmatmul.mubr.bf16.vlgmr.msra.gmra.mrb[0].mxu1 %v2929_v18 }
  0x23   :  { %413 = vmatprep.mubr.bf16.mxu0 %v3200_v1  ;;  %493 = vmatprep.mubr.bf16.mxu1 %v3200_v1 }
  0x2a   :  { %414 = vmatmul.mubr.bf16.gmra.mrb[4].mxu0 %v2930_v19  ;;  %494 = vmatmul.mubr.bf16.gmra.mrb[4].mxu1 %v2931_v20 }
  0x2b   :  { %423 = vmatprep.mubr.bf16.mxu0 %v3200_v1  ;;  %503 = vmatprep.mubr.bf16.mxu1 %v3200_v1 }
  0x32   :  { %424 = vmatmul.mubr.bf16.gmra.mrb[8].mxu0 %v2932_v21  ;;  %504 = vmatmul.mubr.bf16.gmra.mrb[8].mxu1 %v2933_v22 }
  0x33   :  { %433 = vmatprep.mubr.bf16.mxu0 %v3200_v1  ;;  %513 = vmatprep.mubr.bf16.mxu1 %v3200_v1 }
  0x3a   :  { %434 = vmatmul.mubr.bf16.gmra.mrb[12].mxu0 %v2934_v23  ;;  %514 = vmatmul.mubr.bf16.gmra.mrb[12].mxu1 %v2935_v24 }
  0x3b   :  { %443 = vmatprep.mubr.bf16.mxu0 %v3200_v1  ;;  %523 = vmatprep.mubr.bf16.mxu1 %v3200_v1 }
  0x42   :  { %444 = vmatmul.mubr.bf16.gmra.mrb[16].mxu0 %v2936_v25  ;;  %524 = vmatmul.mubr.bf16.gmra.mrb[16].mxu1 %v2937_v26 }
  0x43   :  { %453 = vmatprep.mubr.bf16.mxu0 %v3200_v1  ;;  %533 = vmatprep.mubr.bf16.mxu1 %v3200_v1 }
  0x4a   :  { %454 = vmatmul.mubr.bf16.gmra.mrb[20].mxu0 %v2938_v27  ;;  %534 = vmatmul.mubr.bf16.gmra.mrb[20].mxu1 %v2939_v28 }
  0x4b   :  { %463 = vmatprep.mubr.bf16.mxu0 %v3200_v1  ;;  %543 = vmatprep.mubr.bf16.mxu1 %v3200_v1 }
  0x52   :  { %464 = vmatmul.mubr.bf16.gmra.mrb[24].mxu0 %v2940_v29  ;;  %544 = vmatmul.mubr.bf16.gmra.mrb[24].mxu1 %v2941_v30 }
  0x53   :  { %473 = vmatprep.mubr.bf16.mxu0 %v3200_v1  ;;  %553 = vmatprep.mubr.bf16.mxu1 %v3200_v1 }
  0x5a   :  { %474 = vmatmul.mubr.bf16.gmra.mrb[28].mxu0 %v2942_v31  ;;  %554 = vmatmul.mubr.bf16.gmra.mrb[28].mxu1 %v2943_v32 }
  0xf5   :  { %v405_v40 = vpop.f32.mrb[0].mxu0  ;;  %v485_v41 = vpop.f32.mrb[0].mxu1 }
  0xf6   :  { %v771_v42 = vadd.f32 %v3336_v38, %v405_v40  ;;  %v803_v43 = vadd.f32 %v3336_v38, %v485_v41  ;;  %v407_v44 = vpop.f32.mrb[1].mxu0  ;;  %v487_v45 = vpop.f32.mrb[1].mxu1 }
  0xf7   :  { %v3343_v46 = vadd.f32 %v3338_v39, %v407_v44  ;;  %v3346_v47 = vadd.f32 %v3338_v39, %v487_v45  ;;  %v409_v48 = vpop.f32.mrb[2].mxu0  ;;  %v489_v49 = vpop.f32.mrb[2].mxu1 }
  0xf8   :  { %v3348_v50 = vmul.f32 0.70710677, %v771_v42  ;;  %v3350_v51 = vmul.f32 0.70710677, %v803_v43  ;;  %v411_v3 = vpop.f32.mrb[3].mxu0  ;;  %v491_v4 = vpop.f32.mrb[3].mxu1  ;;  %v3367_v11 = vadd.f32 %v3336_v38, %v409_v48  ;;  %v3374_v14 = vadd.f32 %v3336_v38, %v489_v49 }
  0xf9   :  { %v3353_v52 = vmul.f32 0.70710677, %v3343_v46  ;;  %v3356_v53 = vmul.f32 0.70710677, %v3346_v47  ;;  %v3384_v20 = vadd.f32 %v3338_v39, %v411_v3  ;;  %v3395_v28 = vadd.f32 %v3338_v39, %v491_v4 }
  0xfa   :  { %v963_v54 = vand.u32 2147483647, %v3348_v50  ;;  %v995_v55 = vand.u32 2147483647, %v3350_v51  ;;  %v3381_v19 = vmul.f32 0.70710677, %v3367_v11 }
  0xfb   :  { %v964_v56 = vand.u32 2147483647, %v3353_v52  ;;  %v996_v57 = vand.u32 2147483647, %v3356_v53  ;;  %v3391_v25 = vmul.f32 0.70710677, %v3374_v14 }
  0xfc   :  { %v1027_v58 = vmul.f32 0.3275911, %v963_v54  ;;  %v1859_v59 = vsub.f32 0.0, %v963_v54  ;;  %v1059_v60 = vmul.f32 0.3275911, %v995_v55  ;;  %v1891_v61 = vsub.f32 0.0, %v995_v55 }
  0xfd   :  { %v1028_v62 = vmul.f32 0.3275911, %v964_v56  ;;  %v1860_v63 = vsub.f32 0.0, %v964_v56  ;;  %v1060_v2 = vmul.f32 0.3275911, %v996_v57  ;;  %v3362_v7 = vpop.f32.mrb[4].mxu0 }
  0xfe   :  { %v1091_v0 = vadd.f32 1.0, %v1027_v58  ;;  %v1123_v1 = vadd.f32 1.0, %v1059_v60  ;;  %v1923_v5 = vmul.f32 %v1859_v59, %v963_v54  ;;  %v1955_v6 = vmul.f32 %v1891_v61, %v995_v55  ;;  %v3364_v8 = vpop.f32.mrb[4].mxu1  ;;  %v3369_v12 = vpop.f32.mrb[5].mxu0 }
  0xff   :  { %v1092_v9 = vadd.f32 1.0, %v1028_v62  ;;  %v1924_v10 = vmul.f32 %v1860_v63, %v964_v56  ;;  %v3371_v13 = vpop.f32.mrb[5].mxu1  ;;  %v3376_v15 = vpop.f32.mrb[6].mxu0  ;;  %v1124_v17 = vadd.f32 1.0, %v1060_v2  ;;  %v1892_v18 = vsub.f32 0.0, %v996_v57 }
 0x100   :  { %2944 = vrcp.f32 %v1091_v0  ;;  %v3378_v16 = vpop.f32.mrb[6].mxu1  ;;  %v3386_v21 = vpop.f32.mrb[7].mxu0  ;;  %v1987_v23 = vmul.f32 1.442695, %v1923_v5  ;;  %v2051_v24 = vmul.f32 1.442695, %v1955_v6 }
 0x101   :  { %2946 = vrcp.f32 %v1123_v1  ;;  %v3388_v22 = vpop.f32.mrb[7].mxu1  ;;  %v1989_v26 = vmul.f32 1.442695, %v1924_v10  ;;  %v965_v27 = vand.u32 2147483647, %v3381_v19  ;;  %v3397_v29 = vmul.f32 0.5, %v771_v42 }
 0x102   :  { %2948 = vrcp.f32 %v1092_v9  ;;  %v997_v30 = vand.u32 2147483647, %v3391_v25  ;;  %v3401_v31 = vmul.f32 0.70710677, %v3384_v20  ;;  %v3405_v33 = vmul.f32 0.5, %v803_v43 }
 0x103   :  { %2950 = vrcp.f32 %v1124_v17  ;;  %v1029_v34 = vmul.f32 0.3275911, %v965_v27  ;;  %v1861_v35 = vsub.f32 0.0, %v965_v27  ;;  %v1956_v40 = vmul.f32 %v1892_v18, %v996_v57 }
 0x104   :  { %v1061_v41 = vmul.f32 0.3275911, %v997_v30  ;;  %v1893_v42 = vsub.f32 0.0, %v997_v30  ;;  %v966_v44 = vand.u32 2147483647, %v3401_v31  ;;  %2952 = vpow2.f32 %v1987_v23 }
 0x105   :  { %v3403_v32 = vpop.f32.mrb[8].mxu0  ;;  %v3407_v36 = vpop.f32.mrb[8].mxu1  ;;  %v1093_v48 = vadd.f32 1.0, %v1029_v34  ;;  %v1925_v49 = vmul.f32 %v1861_v35, %v965_v27  ;;  %v3415_v43 = vmul.f32 0.70710677, %v3395_v28  ;;  %2954 = vpow2.f32 %v2051_v24 }
 0x106   :  { %v3409_v37 = vpop.f32.mrb[9].mxu0  ;;  %v3412_v45 = vpop.f32.mrb[9].mxu1  ;;  %v1125_v56 = vadd.f32 1.0, %v1061_v41  ;;  %v1030_v58 = vmul.f32 0.3275911, %v966_v44  ;;  %v1862_v57 = vsub.f32 0.0, %v966_v44  ;;  %v1957_v63 = vmul.f32 %v1893_v42, %v997_v30 }
 0x107   :  { %4893 = vst [vmem:[#allocation3_spill] sm:$0xff] %v3412_v45  ;;  %v3417_v54 = vpop.f32.mrb[10].mxu0  ;;  %v3419_v55 = vpop.f32.mrb[10].mxu1  ;;  %v3428_v62 = vmul.f32 0.5, %v3343_v46  ;;  %2956 = vrcp.f32 %v1093_v48  ;;  %v998_v0 = vand.u32 2147483647, %v3415_v43  ;;  %v3437_v18 = vadd.f32 %v3336_v38, %v3362_v7 }
 0x108   :  { %4894 = vst [vmem:[#allocation4_spill] sm:$0xff] %v3417_v54  ;;  %4895 = vst [vmem:[#allocation5_spill] sm:$0xff] %v3419_v55  ;;  %v3421_v59 = vpop.f32.mrb[11].mxu0  ;;  %v3423_v60 = vpop.f32.mrb[11].mxu1  ;;  %v2053_v3 = vmul.f32 1.442695, %v1956_v40  ;;  %2958 = vrcp.f32 %v1125_v56  ;;  %v1926_v9 = vmul.f32 %v1862_v57, %v966_v44 }
 0x109   :  { %4896 = vst [vmem:[#allocation6_spill] sm:$0xff] %v3421_v59  ;;  %4897 = vst [vmem:[#allocation7_spill] sm:$0xff] %v3423_v60  ;;  %v1094_v4 = vadd.f32 1.0, %v1030_v58  ;;  %v1991_v6 = vmul.f32 1.442695, %v1925_v49  ;;  %2960 = vpow2.f32 %v1989_v26  ;;  %v1894_v46 = vsub.f32 0.0, %v998_v0 }
 0x10a   :  { %v3425_v61 = vpop.eup %2944  ;;  %v1062_v10 = vmul.f32 0.3275911, %v998_v0  ;;  %v2055_v34 = vmul.f32 1.442695, %v1957_v63  ;;  %v1993_v42 = vmul.f32 1.442695, %v1926_v9 }
 0x10b   :  { %v3431_v1 = vpop.eup %2946  ;;  %v1283_v2 = vmul.f32 1.0614054, %v3425_v61  ;;  %2962 = vrcp.f32 %v1094_v4  ;;  %v1958_v48 = vmul.f32 %v1894_v46, %v998_v0  ;;  %v3453_v49 = vmul.f32 0.70710677, %v3437_v18 }
 0x10c   :  { %v1315_v5 = vmul.f32 1.0614054, %v3431_v1  ;;  %v3443_v27 = vpop.eup %2948  ;;  %v1126_v35 = vadd.f32 1.0, %v1062_v10  ;;  %2964 = vpow2.f32 %v2053_v3  ;;  %v3457_v4 = vmul.f32 0.5, %v3346_v47 }
 0x10d   :  { %v1347_v17 = vadd.f32 -1.4531521, %v1283_v2  ;;  %v3439_v23 = vpop.f32.mrb[12].mxu0  ;;  %v3441_v24 = vpop.f32.mrb[12].mxu1  ;;  %v1284_v26 = vmul.f32 1.0614054, %v3443_v27  ;;  %2966 = vpow2.f32 %v1991_v6 }
 0x10e   :  { %4898 = vst [vmem:[#allocation8_spill] sm:$0xff] %v3439_v23  ;;  %4899 = vst [vmem:[#allocation9_spill] sm:$0xff] %v3441_v24  ;;  %v1379_v30 = vadd.f32 -1.4531521, %v1315_v5  ;;  %v3445_v40 = vpop.f32.mrb[13].mxu0  ;;  %v3449_v7 = vpop.eup %2950  ;;  %2968 = vrcp.f32 %v1126_v35  ;;  %vm2243_vm0 = vcmp.ge.f32.partialorder %v3348_v50, 0.0 }
 0x10f   :  { %4900 = vst [vmem:[#allocation10_spill] sm:$0xff] %v3445_v40  ;;  %v1411_v41 = vmul.f32 %v3425_v61, %v1347_v17  ;;  %v1348_v58 = vadd.f32 -1.4531521, %v1284_v26  ;;  %v1316_v57 = vmul.f32 1.0614054, %v3449_v7  ;;  %v2953_v63 = vpop.eup %2952  ;;  %2970 = vpow2.f32 %v2055_v34  ;;  %v3521_v50 = vpop.f32.mrb[14].mxu0 }
 0x110   :  { %v1443_v44 = vmul.f32 %v3431_v1, %v1379_v30  ;;  %v967_v3 = vand.u32 2147483647, %v3453_v49  ;;  %v2955_v5 = vpop.eup %2954  ;;  %2972 = vpow2.f32 %v1993_v42  ;;  %v2057_v46 = vmul.f32 1.442695, %v1958_v48 }
 0x111   :  { %v1475_v56 = vadd.f32 1.4214138, %v1411_v41  ;;  %v1412_v0 = vmul.f32 %v3443_v27, %v1348_v58  ;;  %v1380_v9 = vadd.f32 -1.4531521, %v1316_v57  ;;  %v3462_v10 = vpop.eup %2956  ;;  %v3472_v42 = vadd.f32 %v3336_v38, %v3364_v8 }
 0x112   :  { %v1507_v2 = vadd.f32 1.4214138, %v1443_v44  ;;  %v1031_v30 = vmul.f32 0.3275911, %v967_v3  ;;  %v1863_v35 = vsub.f32 0.0, %v967_v3  ;;  %v3465_v41 = vpop.eup %2958  ;;  %2974 = vpow2.f32 %v2057_v46 }
 0x113   :  { %v1539_v6 = vmul.f32 %v3425_v61, %v1475_v56  ;;  %v1476_v34 = vadd.f32 1.4214138, %v1412_v0  ;;  %v1444_v26 = vmul.f32 %v3449_v7, %v1380_v9  ;;  %v1285_v44 = vmul.f32 1.0614054, %v3462_v10 }
 0x114   :  { %v1571_v17 = vmul.f32 %v3431_v1, %v1507_v2  ;;  %v1317_v58 = vmul.f32 1.0614054, %v3465_v41  ;;  %v1095_v57 = vadd.f32 1.0, %v1031_v30  ;;  %v2961_v2 = vpop.eup %2960  ;;  %vm2275_vm1 = vcmp.ge.f32.partialorder %v3350_v51, 0.0 }
 0x115   :  { %v1603_v47 = vadd.f32 -0.28449672, %v1539_v6  ;;  %v1540_v40 = vmul.f32 %v3443_v27, %v1476_v34  ;;  %v1508_v24 = vadd.f32 1.4214138, %v1444_v26  ;;  %v1349_v6 = vadd.f32 -1.4531521, %v1285_v44  ;;  %v3476_v0 = vpop.eup %2962 }
 0x116   :  { %v1635_v56 = vadd.f32 -0.28449672, %v1571_v17  ;;  %v1381_v23 = vadd.f32 -1.4531521, %v1317_v58  ;;  %v3479_v17 = vmul.f32 %v1863_v35, %v967_v3  ;;  %v2965_v30 = vpop.eup %2964  ;;  %v1286_v44 = vmul.f32 1.0614054, %v3476_v0 }
 0x117   :  { %v1667_v48 = vmul.f32 %v3425_v61, %v1603_v47  ;;  %v1604_v59 = vadd.f32 -0.28449672, %v1540_v40  ;;  %v1572_v8 = vmul.f32 %v3449_v7, %v1508_v24  ;;  %v1413_v55 = vmul.f32 %v3462_v10, %v1349_v6  ;;  %v3483_v47 = vpop.eup %2966 }
 0x118   :  { %v1699_v9 = vmul.f32 %v3431_v1, %v1635_v56  ;;  %v1445_v26 = vmul.f32 %v3465_v41, %v1381_v23  ;;  %2976 = vrcp.f32 %v1095_v57  ;;  %v3488_v46 = vpop.eup %2968  ;;  %v1350_v6 = vadd.f32 -1.4531521, %v1286_v44 }
 0x119   :  { %v1731_v60 = vadd.f32 0.2548296, %v1667_v48  ;;  %v1668_v24 = vmul.f32 %v3443_v27, %v1604_v59  ;;  %v1636_v40 = vadd.f32 -0.28449672, %v1572_v8  ;;  %v1477_v35 = vadd.f32 1.4214138, %v1413_v55  ;;  %v2971_v56 = vpop.eup %2970 }
 0x11a   :  { %v1763_v34 = vadd.f32 0.2548296, %v1699_v9  ;;  %v1509_v48 = vadd.f32 1.4214138, %v1445_v26  ;;  %v1318_v23 = vmul.f32 1.0614054, %v3488_v46  ;;  %v3495_v9 = vpop.eup %2972 }
 0x11b   :  { %v1795_v3 = vmul.f32 %v3425_v61, %v1731_v60  ;;  %v1732_v54 = vadd.f32 0.2548296, %v1668_v24  ;;  %v1700_v45 = vmul.f32 %v3449_v7, %v1636_v40  ;;  %v1541_v60 = vmul.f32 %v3462_v10, %v1477_v35  ;;  %v3499_v61 = vpop.f32.mrb[13].mxu1 }
 0x11c   :  { %v1827_v58 = vmul.f32 %v3431_v1, %v1763_v34  ;;  %4901 = vst [vmem:[#allocation11_spill] sm:$0xff] %v3499_v61  ;;  %vm2244_vm2 = vcmp.ge.f32.partialorder %v3353_v52, 0.0  ;;  %v1573_v55 = vmul.f32 %v3465_v41, %v1509_v48  ;;  %v1414_v1 = vmul.f32 %v3476_v0, %v1350_v6  ;;  %v3509_v6 = vpop.eup %2974 }
 0x11d   :  { %v2115_v57 = vmul.f32 %v2953_v63, %v1795_v3  ;;  %v1382_v8 = vadd.f32 -1.4531521, %v1318_v23  ;;  %v1796_v26 = vmul.f32 %v3443_v27, %v1732_v54  ;;  %v1764_v44 = vadd.f32 0.2548296, %v1700_v45 }
 0x11e   :  { %v2147_v59 = vmul.f32 %v2955_v5, %v1827_v58  ;;  %v1605_v63 = vadd.f32 -0.28449672, %v1541_v60  ;;  %vm2276_vm3 = vcmp.ge.f32.partialorder %v3356_v53, 0.0  ;;  %v1637_v24 = vadd.f32 -0.28449672, %v1573_v55 }
 0x11f   :  { %v2179_v34 = vsub.f32 1.0, %v2115_v57  ;;  %v1478_v40 = vadd.f32 1.4214138, %v1414_v1  ;;  %v1446_v35 = vmul.f32 %v3488_v46, %v1382_v8  ;;  %v2116_v58 = vmul.f32 %v2961_v2, %v1796_v26 }
 0x120   :  { %v2211_v3 = vsub.f32 1.0, %v2147_v59  ;;  %v1828_v61 = vmul.f32 %v3449_v7, %v1764_v44  ;;  %v1669_v48 = vmul.f32 %v3462_v10, %v1605_v63  ;;  %v1701_v54 = vmul.f32 %v3465_v41, %v1637_v24 }
 0x121   :  { %v2307_v5 = vsub.f32 0.0, %v2179_v34  ;;  %v1542_v45 = vmul.f32 %v3476_v0, %v1478_v40  ;;  %v1510_v27 = vadd.f32 1.4214138, %v1446_v35  ;;  %v2180_v60 = vsub.f32 1.0, %v2116_v58 }
 0x122   :  { %v2339_v23 = vsub.f32 0.0, %v2211_v3  ;;  %v2148_v59 = vmul.f32 %v2965_v30, %v1828_v61  ;;  %v1733_v55 = vadd.f32 0.2548296, %v1669_v48  ;;  %v3515_v1 = vpop.eup %2976  ;;  %vm2245_vm4 = vcmp.ge.f32.partialorder %v3381_v19, 0.0  ;;  %v3531_v48 = vpop.f32.mrb[14].mxu1 }
 0x123   :  { %v2371_v57 = vsel %vm2243_vm0, %v2179_v34, %v2307_v5  ;;  %v1765_v8 = vadd.f32 0.2548296, %v1701_v54  ;;  %v1606_v26 = vadd.f32 -0.28449672, %v1542_v45  ;;  %v2308_v63 = vsub.f32 0.0, %v2180_v60 }
 0x124   :  { %v2435_v2 = vadd.f32 1.0, %v2371_v57  ;;  %v2403_v7 = vsel %vm2275_vm1, %v2211_v3, %v2339_v23  ;;  %v2212_v24 = vsub.f32 1.0, %v2148_v59  ;;  %v1797_v40 = vmul.f32 %v3462_v10, %v1733_v55 }
 0x125   :  { %v2467_v44 = vadd.f32 1.0, %v2403_v7  ;;  %v1829_v30 = vmul.f32 %v3465_v41, %v1765_v8  ;;  %v1670_v61 = vmul.f32 %v3476_v0, %v1606_v26  ;;  %v1574_v34 = vmul.f32 %v3488_v46, %v1510_v27 }
 0x126   :  { %v1995_v51 = vmul.f32 1.442695, %v3479_v17  ;;  %v2499_v3 = vmul.f32 %v2435_v2, %v3397_v29  ;;  %v2372_v35 = vsel %vm2244_vm2, %v2180_v60, %v2308_v63  ;;  %v2340_v5 = vsub.f32 0.0, %v2212_v24 }
 0x127   :  { %v2117_v58 = vmul.f32 %v3483_v47, %v1797_v40  ;;  %v2436_v10 = vadd.f32 1.0, %v2372_v35  ;;  %v2149_v23 = vmul.f32 %v2971_v56, %v1829_v30  ;;  %v1734_v54 = vadd.f32 0.2548296, %v1670_v61 }
 0x128   :  { %v1638_v41 = vadd.f32 -0.28449672, %v1574_v34  ;;  %v2531_v45 = vmul.f32 %v2467_v44, %v3405_v33  ;;  %v2404_v27 = vsel %vm2276_vm3, %v2212_v24, %v2340_v5  ;;  %v1287_v29 = vmul.f32 1.0614054, %v3515_v1 }
 0x129   :  { %v2181_v17 = vsub.f32 1.0, %v2117_v58  ;;  %v2500_v52 = vmul.f32 %v2436_v10, %v3428_v62  ;;  %v2468_v57 = vadd.f32 1.0, %v2404_v27  ;;  %v2213_v60 = vsub.f32 1.0, %v2149_v23  ;;  %v3569_v23 = vpop.f32.mrb[15].mxu0  ;;  %v3574_v27 = vpop.f32.mrb[15].mxu1 }
 0x12a   :  { %v1798_v47 = vmul.f32 %v3476_v0, %v1734_v54  ;;  %v1702_v55 = vmul.f32 %v3488_v46, %v1638_v41  ;;  %v1351_v56 = vadd.f32 -1.4531521, %v1287_v29  ;;  %v3541_v2 = vmul.f32 0.70710677, %v3472_v42 }
 0x12b   :  { %v2309_v59 = vsub.f32 0.0, %v2181_v17  ;;  %v2855_v33 = vpack.c.bf16 %v2500_v52, %v2499_v3  ;;  %v2532_v53 = vmul.f32 %v2468_v57, %v3457_v4  ;;  %v2341_v7 = vsub.f32 0.0, %v2213_v60 }
 0x12c   :  { %v2118_v8 = vmul.f32 %v3495_v9, %v1798_v47  ;;  %v1766_v26 = vadd.f32 0.2548296, %v1702_v55  ;;  %v1415_v44 = vmul.f32 %v3515_v1, %v1351_v56  ;;  %v999_v0 = vand.u32 2147483647, %v3541_v2 }
 0x12d   :  { %v2373_v62 = vsel %vm2245_vm4, %v2181_v17, %v2309_v59  ;;  %2755 = vst [vmem:[%s4892_s3] sm:$0xff] %v2855_v33  ;;  %v2871_v63 = vpack.c.bf16 %v2532_v53, %v2531_v45  ;;  %v3554_v4 = vadd.f32 %v3338_v39, %v3369_v12  ;;  %v837_v9 = vmul.f32 0.5, %v3367_v11 }
 0x12e   :  { %v2437_v24 = vadd.f32 1.0, %v2373_v62  ;;  %v2182_v40 = vsub.f32 1.0, %v2118_v8  ;;  %v1830_v19 = vmul.f32 %v3488_v46, %v1766_v26  ;;  %v1479_v30 = vadd.f32 1.4214138, %v1415_v44 }
 0x12f   :  { %v1063_v61 = vmul.f32 0.3275911, %v999_v0  ;;  %2771 = vst [vmem:[%s4892_s3 + $0x80] sm:$0xff] %v2871_v63  ;;  %vm2277_vm5 = vcmp.ge.f32.partialorder %v3391_v25, 0.0  ;;  %vm2246_vm6 = vcmp.ge.f32.partialorder %v3401_v31, 0.0  ;;  %2978 = vpow2.f32 %v1995_v51 }
 0x130   :  { %v2310_v34 = vsub.f32 0.0, %v2182_v40  ;;  %v2405_v3 = vsel %vm2277_vm5, %v2213_v60, %v2341_v7  ;;  %v2150_v12 = vmul.f32 %v3509_v6, %v1830_v19  ;;  %v1543_v35 = vmul.f32 %v3515_v1, %v1479_v30  ;;  %v3594_v19 = vpop.f32.mrb[16].mxu0 }
 0x131   :  { %v1127_v11 = vadd.f32 1.0, %v1063_v61  ;;  %v2501_v5 = vmul.f32 %v2437_v24, %v837_v9  ;;  %v838_v46 = vmul.f32 0.5, %v3384_v20  ;;  %v3567_v10 = vmul.f32 0.70710677, %v3554_v4 }
 0x132   :  { %v2374_v58 = vsel %vm2246_vm6, %v2182_v40, %v2310_v34  ;;  %v2214_v54 = vsub.f32 1.0, %v2150_v12  ;;  %v1607_v31 = vadd.f32 -0.28449672, %v1543_v35  ;;  %v2469_v51 = vadd.f32 1.0, %v2405_v3 }
 0x133   :  { %v2438_v25 = vadd.f32 1.0, %v2374_v58  ;;  %2980 = vrcp.f32 %v1127_v11  ;;  %v1895_v41 = vsub.f32 0.0, %v999_v0  ;;  %v968_v6 = vand.u32 2147483647, %v3567_v10 }
 0x134   :  { %v808_v45 = vadd.f32 %v3338_v39, %v3371_v13  ;;  %v2342_v17 = vsub.f32 0.0, %v2214_v54  ;;  %v1671_v29 = vmul.f32 %v3515_v1, %v1607_v31  ;;  %v777_v52 = vadd.f32 %v3336_v38, %v3376_v15 }
 0x135   :  { %v2502_v20 = vmul.f32 %v2438_v25, %v838_v46  ;;  %v869_v57 = vmul.f32 0.5, %v3374_v14  ;;  %vm2278_vm7 = vcmp.ge.f32.partialorder %v3415_v43, 0.0  ;;  %v1032_v60 = vmul.f32 0.3275911, %v968_v6 }
 0x136   :  { %v2406_v59 = vsel %vm2278_vm7, %v2214_v54, %v2342_v17  ;;  %v1735_v55 = vadd.f32 0.2548296, %v1671_v29  ;;  %v3581_v56 = vmul.f32 0.70710677, %v808_v45  ;;  %v870_v33 = vmul.f32 0.5, %v3395_v28 }
 0x137   :  { %v2856_v47 = vpack.c.bf16 %v2502_v20, %v2501_v5  ;;  %v2533_v13 = vmul.f32 %v2469_v51, %v869_v57  ;;  %v2470_v53 = vadd.f32 1.0, %v2406_v59  ;;  %v1096_v7 = vadd.f32 1.0, %v1032_v60 }
 0x138   :  { %v1799_v15 = vmul.f32 %v3515_v1, %v1735_v55  ;;  %v1959_v14 = vmul.f32 %v1895_v41, %v999_v0  ;;  %v1000_v43 = vand.u32 2147483647, %v3581_v56  ;;  %v3589_v8 = vmul.f32 0.70710677, %v777_v52  ;;  %v3596_v1 = vpop.f32.mrb[16].mxu1 }
 0x139   :  { %2756 = vst [vmem:[%s4892_s3 + $0x8] sm:$0xff] %v2856_v47  ;;  %v2979_v62 = vpop.eup %2978  ;;  %v2534_v26 = vmul.f32 %v2470_v53, %v870_v33  ;;  %2982 = vrcp.f32 %v1096_v7  ;;  %v809_v44 = vadd.f32 %v3336_v38, %v3378_v16  ;;  %v1864_v9 = vsub.f32 0.0, %v968_v6 }
 0x13a   :  { %v2119_v28 = vmul.f32 %v2979_v62, %v1799_v15  ;;  %v1064_v63 = vmul.f32 0.3275911, %v1000_v43  ;;  %v969_v24 = vand.u32 2147483647, %v3589_v8  ;;  %v2059_v61 = vmul.f32 1.442695, %v1959_v14 }
 0x13b   :  { %v2872_v40 = vpack.c.bf16 %v2534_v26, %v2533_v13  ;;  %v839_v16 = vmul.f32 0.5, %v3437_v18  ;;  %v3605_v35 = vmul.f32 0.70710677, %v809_v44  ;;  %v3609_v11 = vadd.f32 %v3338_v39, %v3386_v21 }
 0x13c   :  { %v2183_v30 = vsub.f32 1.0, %v2119_v28  ;;  %v1128_v34 = vadd.f32 1.0, %v1064_v63  ;;  %v1033_v3 = vmul.f32 0.3275911, %v969_v24  ;;  %vm2247_vm8 = vcmp.ge.f32.partialorder %v3453_v49, 0.0 }
 0x13d   :  { %v3598_v0 = vpop.eup %2980  ;;  %2772 = vst [vmem:[%s4892_s3 + $0x88] sm:$0xff] %v2872_v40  ;;  %v1896_v5 = vsub.f32 0.0, %v1000_v43  ;;  %v1928_v25 = vmul.f32 %v1864_v9, %v968_v6  ;;  %v1865_v54 = vsub.f32 0.0, %v969_v24  ;;  %v1001_v31 = vand.u32 2147483647, %v3605_v35 }
 0x13e   :  { %v1319_v12 = vmul.f32 1.0614054, %v3598_v0  ;;  %2984 = vrcp.f32 %v1128_v34  ;;  %v1097_v46 = vadd.f32 1.0, %v1033_v3  ;;  %v2311_v51 = vsub.f32 0.0, %v2183_v30 }
 0x13f   :  { %v3614_v18 = vmul.f32 0.5, %v3472_v42  ;;  %2986 = vpow2.f32 %v2059_v61  ;;  %v3617_v41 = vmul.f32 0.70710677, %v3609_v11  ;;  %v3621_v20 = vmul.f32 0.5, %v3554_v4  ;;  %v3634_v4 = vpop.f32.mrb[17].mxu0 }
 0x140   :  { %v1383_v58 = vadd.f32 -1.4531521, %v1319_v12  ;;  %v3623_v17 = vmul.f32 0.5, %v808_v45  ;;  %2988 = vrcp.f32 %v1097_v46  ;;  %v1960_v6 = vmul.f32 %v1896_v5, %v1000_v43 }
 0x141   :  { %v3625_v29 = vmul.f32 0.5, %v777_v52  ;;  %v1065_v57 = vmul.f32 0.3275911, %v1001_v31  ;;  %v970_v60 = vand.u32 2147483647, %v3617_v41  ;;  %v1929_v55 = vmul.f32 %v1865_v54, %v969_v24  ;;  %v3646_v24 = vpop.f32.mrb[17].mxu1 }
 0x142   :  { %v1447_v21 = vmul.f32 %v3598_v0, %v1383_v58  ;;  %v1997_v59 = vmul.f32 1.442695, %v1928_v25  ;;  %v3632_v13 = vadd.f32 %v3338_v39, %v3388_v22  ;;  %v2375_v45 = vsel %vm2247_vm8, %v2183_v30, %v2311_v51 }
 0x143   :  { %v3628_v42 = vpop.eup %2982  ;;  %v1129_v33 = vadd.f32 1.0, %v1065_v57  ;;  %v1034_v53 = vmul.f32 0.3275911, %v970_v60  ;;  %v3640_v15 = vmul.f32 0.5, %v809_v44  ;;  %v1897_v14 = vsub.f32 0.0, %v1001_v31 }
 0x144   :  { %v1511_v47 = vadd.f32 1.4214138, %v1447_v21  ;;  %v1288_v52 = vmul.f32 1.0614054, %v3628_v42  ;;  %v3643_v43 = vmul.f32 0.70710677, %v3632_v13  ;;  %v3653_v61 = vadd.f32 %v3336_v38, %v3403_v32 }
 0x145   :  { %v2061_v22 = vmul.f32 1.442695, %v1960_v6  ;;  %2990 = vrcp.f32 %v1129_v33  ;;  %v1098_v26 = vadd.f32 1.0, %v1034_v53  ;;  %v2439_v28 = vadd.f32 1.0, %v2375_v45 }
 0x146   :  { %v1575_v7 = vmul.f32 %v3598_v0, %v1511_v47  ;;  %v1352_v62 = vadd.f32 -1.4531521, %v1288_v52  ;;  %2992 = vpow2.f32 %v1997_v59  ;;  %v1002_v49 = vand.u32 2147483647, %v3643_v43 }
 0x147   :  { %v1999_v9 = vmul.f32 1.442695, %v1929_v55  ;;  %v1866_v30 = vsub.f32 0.0, %v970_v60  ;;  %v1961_v12 = vmul.f32 %v1897_v14, %v1001_v31  ;;  %2994 = vrcp.f32 %v1098_v26 }
 0x148   :  { %v1639_v63 = vadd.f32 -0.28449672, %v1575_v7  ;;  %v3648_v40 = vpop.eup %2984  ;;  %v1416_v44 = vmul.f32 %v3628_v42, %v1352_v62  ;;  %2996 = vpow2.f32 %v2061_v22  ;;  %v1066_v58 = vmul.f32 0.3275911, %v1002_v49 }
 0x149   :  { %v1320_v3 = vmul.f32 1.0614054, %v3648_v40  ;;  %v2987_v5 = vpop.eup %2986  ;;  %v1898_v25 = vsub.f32 0.0, %v1002_v49  ;;  %v3659_v51 = vmul.f32 %v2439_v28, %v839_v16  ;;  %v3662_v32 = vmul.f32 0.70710677, %v3653_v61 }
 0x14a   :  { %v1703_v34 = vmul.f32 %v3598_v0, %v1639_v63  ;;  %v1480_v46 = vadd.f32 1.4214138, %v1416_v44  ;;  %v3657_v54 = vpop.eup %2988  ;;  %v1930_v31 = vmul.f32 %v1866_v30, %v970_v60  ;;  %v1130_v59 = vadd.f32 1.0, %v1066_v58 }
 0x14b   :  { %v1384_v6 = vadd.f32 -1.4531521, %v1320_v3  ;;  %v1289_v47 = vmul.f32 1.0614054, %v3657_v54  ;;  %v2063_v52 = vmul.f32 1.442695, %v1961_v12  ;;  %v3671_v7 = vadd.f32 %v3336_v38, %v3407_v36 }
 0x14c   :  { %v1767_v21 = vadd.f32 0.2548296, %v1703_v34  ;;  %v1544_v57 = vmul.f32 %v3628_v42, %v1480_v46  ;;  %v971_v33 = vand.u32 2147483647, %v3662_v32  ;;  %2998 = vrcp.f32 %v1130_v59 }
 0x14d   :  { %v1448_v45 = vmul.f32 %v3648_v40, %v1384_v6  ;;  %v1353_v53 = vadd.f32 -1.4531521, %v1289_v47  ;;  %vm2279_vm9 = vcmp.ge.f32.partialorder %v3541_v2, 0.0  ;;  %v1962_v60 = vmul.f32 %v1898_v25, %v1002_v49 }
 0x14e   :  { %v1831_v55 = vmul.f32 %v3598_v0, %v1767_v21  ;;  %v1608_v16 = vadd.f32 -0.28449672, %v1544_v57  ;;  %v1035_v22 = vmul.f32 0.3275911, %v971_v33  ;;  %3000 = vpow2.f32 %v1999_v9 }
 0x14f   :  { %v1512_v62 = vadd.f32 1.4214138, %v1448_v45  ;;  %v3674_v26 = vpop.eup %2990  ;;  %v1417_v28 = vmul.f32 %v3657_v54, %v1353_v53  ;;  %v2001_v63 = vmul.f32 1.442695, %v1930_v31  ;;  %3002 = vpow2.f32 %v2063_v52 }
 0x150   :  { %v2151_v14 = vmul.f32 %v2987_v5, %v1831_v55  ;;  %v1672_v0 = vmul.f32 %v3628_v42, %v1608_v16  ;;  %v2993_v44 = vpop.eup %2992  ;;  %v1321_v36 = vmul.f32 1.0614054, %v3674_v26  ;;  %v1099_v3 = vadd.f32 1.0, %v1035_v22 }
 0x151   :  { %v1576_v34 = vmul.f32 %v3648_v40, %v1512_v62  ;;  %v1481_v5 = vadd.f32 1.4214138, %v1417_v28  ;;  %v3681_v49 = vmul.f32 0.70710677, %v3671_v7  ;;  %v3683_v46 = vpop.eup %2994  ;;  %vm2248_vm10 = vcmp.ge.f32.partialorder %v3567_v10, 0.0 }
 0x152   :  { %v2215_v30 = vsub.f32 1.0, %v2151_v14  ;;  %v1736_v12 = vadd.f32 0.2548296, %v1672_v0  ;;  %v1385_v9 = vadd.f32 -1.4531521, %v1321_v36  ;;  %3004 = vrcp.f32 %v1099_v3  ;;  %v2997_v21 = vpop.eup %2996 }
 0x153   :  { %v1640_v58 = vadd.f32 -0.28449672, %v1576_v34  ;;  %v2065_v25 = vmul.f32 1.442695, %v1962_v60  ;;  %v1545_v47 = vmul.f32 %v3657_v54, %v1481_v5  ;;  %v1290_v31 = vmul.f32 1.0614054, %v3683_v46 }
 0x154   :  { %v2343_v6 = vsub.f32 0.0, %v2215_v30  ;;  %v1800_v57 = vmul.f32 %v3628_v42, %v1736_v12  ;;  %v1449_v55 = vmul.f32 %v3674_v26, %v1385_v9  ;;  %3006 = vpow2.f32 %v2001_v63  ;;  %v3702_v34 = vpop.f32.mrb[18].mxu0 }
 0x155   :  { %v1704_v59 = vmul.f32 %v3648_v40, %v1640_v58  ;;  %v3692_v45 = vand.u32 2147483647, %v3681_v49  ;;  %v1609_v16 = vadd.f32 -0.28449672, %v1545_v47  ;;  %v1354_v53 = vadd.f32 -1.4531521, %v1290_v31 }
 0x156   :  { %v2120_v52 = vmul.f32 %v2993_v44, %v1800_v57  ;;  %v1867_v14 = vsub.f32 0.0, %v971_v33  ;;  %v1513_v60 = vadd.f32 1.4214138, %v1449_v55  ;;  %3008 = vpow2.f32 %v2065_v25  ;;  %v3695_v22 = vpop.eup %2998 }
 0x157   :  { %v1768_v62 = vadd.f32 0.2548296, %v1704_v59  ;;  %v1067_v42 = vmul.f32 0.3275911, %v3692_v45  ;;  %v2407_v0 = vsel %vm2279_vm9, %v2215_v30, %v2343_v6  ;;  %vm2280_vm11 = vcmp.ge.f32.partialorder %v3581_v56, 0.0 }
 0x158   :  { %v2184_v28 = vsub.f32 1.0, %v2120_v52  ;;  %v1673_v63 = vmul.f32 %v3657_v54, %v1609_v16  ;;  %v1418_v44 = vmul.f32 %v3683_v46, %v1354_v53  ;;  %v1577_v3 = vmul.f32 %v3674_v26, %v1513_v60  ;;  %v3001_v58 = vpop.eup %3000 }
 0x159   :  { %v1832_v36 = vmul.f32 %v3648_v40, %v1768_v62  ;;  %v1322_v12 = vmul.f32 1.0614054, %v3695_v22  ;;  %v1131_v5 = vadd.f32 1.0, %v1067_v42  ;;  %v1931_v25 = vmul.f32 %v1867_v14, %v971_v33  ;;  %v3003_v31 = vpop.eup %3002 }
 0x15a   :  { %v2312_v9 = vsub.f32 0.0, %v2184_v28  ;;  %v1737_v2 = vadd.f32 0.2548296, %v1673_v63  ;;  %v1482_v30 = vadd.f32 1.4214138, %v1418_v44  ;;  %v2471_v59 = vadd.f32 1.0, %v2407_v0 }
 0x15b   :  { %v2152_v6 = vmul.f32 %v2997_v21, %v1832_v36  ;;  %v1641_v57 = vadd.f32 -0.28449672, %v1577_v3  ;;  %v1386_v47 = vadd.f32 -1.4531521, %v1322_v12  ;;  %3010 = vrcp.f32 %v1131_v5 }
 0x15c   :  { %v2376_v55 = vsel %vm2248_vm10, %v2184_v28, %v2312_v9  ;;  %v1801_v40 = vmul.f32 %v3657_v54, %v1737_v2  ;;  %vm2249_vm12 = vcmp.ge.f32.partialorder %v3589_v8, 0.0  ;;  %v1546_v52 = vmul.f32 %v3683_v46, %v1482_v30  ;;  %v3712_v16 = vpop.eup %3004 }
 0x15d   :  { %v2440_v53 = vadd.f32 1.0, %v2376_v55  ;;  %v2216_v62 = vsub.f32 1.0, %v2152_v6  ;;  %v1705_v33 = vmul.f32 %v3674_v26, %v1641_v57  ;;  %v1450_v21 = vmul.f32 %v3695_v22, %v1386_v47 }
 0x15e   :  { %v2121_v14 = vmul.f32 %v3001_v58, %v1801_v40  ;;  %v1610_v60 = vadd.f32 -0.28449672, %v1546_v52  ;;  %v1291_v42 = vmul.f32 1.0614054, %v3712_v16  ;;  %v2003_v10 = vmul.f32 1.442695, %v1931_v25  ;;  %v3007_v0 = vpop.eup %3006 }
 0x15f   :  { %v2504_v54 = vmul.f32 %v2440_v53, %v3621_v20  ;;  %v2344_v28 = vsub.f32 0.0, %v2216_v62  ;;  %v1769_v63 = vadd.f32 0.2548296, %v1705_v33  ;;  %v1514_v44 = vadd.f32 1.4214138, %v1450_v21  ;;  %v3725_v20 = vpop.f32.mrb[18].mxu1 }
 0x160   :  { %v2535_v36 = vmul.f32 %v2471_v59, %v3614_v18  ;;  %v2185_v3 = vsub.f32 1.0, %v2121_v14  ;;  %v1674_v12 = vmul.f32 %v3683_v46, %v1610_v60  ;;  %v1355_v5 = vadd.f32 -1.4531521, %v1291_v42  ;;  %v3009_v9 = vpop.eup %3008  ;;  %v3746_v60 = vpop.f32.mrb[19].mxu0 }
 0x161   :  { %v2857_v2 = vpack.c.bf16 %v2504_v54, %v3659_v51  ;;  %v2408_v58 = vsel %vm2280_vm11, %v2216_v62, %v2344_v28  ;;  %v1833_v30 = vmul.f32 %v3674_v26, %v1769_v63  ;;  %v1578_v25 = vmul.f32 %v3695_v22, %v1514_v44  ;;  %v3756_v44 = vpop.f32.mrb[19].mxu1 }
 0x162   :  { %v2472_v6 = vadd.f32 1.0, %v2408_v58  ;;  %v2313_v57 = vsub.f32 0.0, %v2185_v3  ;;  %v1738_v47 = vadd.f32 0.2548296, %v1674_v12  ;;  %v1419_v18 = vmul.f32 %v3712_v16, %v1355_v5  ;;  %v4902_v58 = vld [vmem:[#allocation3_spill] sm:$0xff] }
 0x163   :  { %2757 = vst [vmem:[%s4892_s3 + $0x10] sm:$0xff] %v2857_v2  ;;  %v2153_v59 = vmul.f32 %v3003_v31, %v1833_v30  ;;  %vm2281_vm13 = vcmp.ge.f32.partialorder %v3605_v35, 0.0  ;;  %v1642_v56 = vadd.f32 -0.28449672, %v1578_v25  ;;  %v3734_v51 = vadd.f32 %v3338_v39, %v3409_v37 }
 0x164   :  { %v2536_v26 = vmul.f32 %v2472_v6, %v3623_v17  ;;  %v1802_v55 = vmul.f32 %v3683_v46, %v1738_v47  ;;  %v1483_v40 = vadd.f32 1.4214138, %v1419_v18  ;;  %v1899_v52 = vsub.f32 0.0, %v3692_v45 }
 0x165   :  { %v3739_v53 = vpop.eup %3010  ;;  %v2377_v62 = vsel %vm2249_vm12, %v2185_v3, %v2313_v57  ;;  %v2217_v31 = vsub.f32 1.0, %v2153_v59  ;;  %v1706_v33 = vmul.f32 %v3695_v22, %v1642_v56  ;;  %3012 = vpow2.f32 %v2003_v10 }
 0x166   :  { %v2873_v21 = vpack.c.bf16 %v2536_v26, %v2535_v36  ;;  %v2122_v14 = vmul.f32 %v3007_v0, %v1802_v55  ;;  %v1547_v37 = vmul.f32 %v3712_v16, %v1483_v40  ;;  %v1323_v17 = vmul.f32 1.0614054, %v3739_v53 }
 0x167   :  { %v2345_v46 = vsub.f32 0.0, %v2217_v31  ;;  %v842_v42 = vmul.f32 0.5, %v3609_v11  ;;  %v1770_v54 = vadd.f32 0.2548296, %v1706_v33  ;;  %v3750_v28 = vmul.f32 0.70710677, %v3734_v51 }
 0x168   :  { %2773 = vst [vmem:[%s4892_s3 + $0x90] sm:$0xff] %v2873_v21  ;;  %v2186_v8 = vsub.f32 1.0, %v2122_v14  ;;  %v1611_v10 = vadd.f32 -0.28449672, %v1547_v37  ;;  %v1387_v0 = vadd.f32 -1.4531521, %v1323_v17  ;;  %v1963_v63 = vmul.f32 %v1899_v52, %v3692_v45 }
 0x169   :  { %v2441_v36 = vadd.f32 1.0, %v2377_v62  ;;  %vm2250_vm14 = vcmp.ge.f32.partialorder %v3617_v41, 0.0  ;;  %v1834_v11 = vmul.f32 %v3695_v22, %v1770_v54  ;;  %v972_v3 = vand.u32 2147483647, %v3750_v28  ;;  %v4903_v33 = vld [vmem:[#allocation4_spill] sm:$0xff] }
 0x16a   :  { %v2314_v12 = vsub.f32 0.0, %v2186_v8  ;;  %v1675_v5 = vmul.f32 %v3712_v16, %v1611_v10  ;;  %v1451_v2 = vmul.f32 %v3739_v53, %v1387_v0  ;;  %v3765_v30 = vadd.f32 %v3338_v39, %v4902_v58  ;;  %v4904_v0 = vld [vmem:[#allocation5_spill] sm:$0xff] }
 0x16b   :  { %v2409_v45 = vsel %vm2281_vm13, %v2217_v31, %v2345_v46  ;;  %v874_v25 = vmul.f32 0.5, %v3632_v13  ;;  %v2154_v6 = vmul.f32 %v3009_v9, %v1834_v11  ;;  %v1036_v41 = vmul.f32 0.3275911, %v972_v3 }
 0x16c   :  { %v2378_v57 = vsel %vm2250_vm14, %v2186_v8, %v2314_v12  ;;  %v1739_v22 = vadd.f32 0.2548296, %v1675_v5  ;;  %v1515_v47 = vadd.f32 1.4214138, %v1451_v2  ;;  %v2067_v18 = vmul.f32 1.442695, %v1963_v63 }
 0x16d   :  { %v2505_v59 = vmul.f32 %v2441_v36, %v3625_v29  ;;  %v2442_v56 = vadd.f32 1.0, %v2378_v57  ;;  %v2218_v26 = vsub.f32 1.0, %v2154_v6  ;;  %v1100_v55 = vadd.f32 1.0, %v1036_v41  ;;  %v4905_v5 = vld [vmem:[#allocation6_spill] sm:$0xff]  ;;  %v3796_v2 = vpop.f32.mrb[20].mxu0  ;;  %v3799_v41 = vpop.f32.mrb[20].mxu1 }
 0x16e   :  { %v2473_v40 = vadd.f32 1.0, %v2409_v45  ;;  %v1803_v52 = vmul.f32 %v3712_v16, %v1739_v22  ;;  %v1579_v62 = vmul.f32 %v3739_v53, %v1515_v47  ;;  %v3774_v35 = vmul.f32 0.70710677, %v3765_v30  ;;  %4906 = vst [vmem:[#allocation3_spill] sm:$0xff] %v3799_v41 }
 0x16f   :  { %v3013_v13 = vpop.eup %3012  ;;  %v2506_v9 = vmul.f32 %v2442_v56, %v842_v42  ;;  %v2346_v31 = vsub.f32 0.0, %v2218_v26  ;;  %3014 = vrcp.f32 %v1100_v55  ;;  %v3778_v21 = vadd.f32 %v3336_v38, %v4903_v33 }
 0x170   :  { %vm2282_vm15 = vcmp.ge.f32.partialorder %v3643_v43, 0.0  ;;  %v1643_v29 = vadd.f32 -0.28449672, %v1579_v62  ;;  %3016 = vpow2.f32 %v2067_v18  ;;  %v1004_v14 = vand.u32 2147483647, %v3774_v35 }
 0x171   :  { %v2858_v16 = vpack.c.bf16 %v2506_v9, %v2505_v59  ;;  %v2410_v37 = vsel %vm2282_vm15, %v2218_v26, %v2346_v31  ;;  %v2123_v17 = vmul.f32 %v3013_v13, %v1803_v52  ;;  %v1868_v46 = vsub.f32 0.0, %v972_v3 }
 0x172   :  { %v2537_v54 = vmul.f32 %v2473_v40, %v3640_v15  ;;  %v2474_v8 = vadd.f32 1.0, %v2410_v37  ;;  %v1707_v42 = vmul.f32 %v3739_v53, %v1643_v29  ;;  %v1068_v10 = vmul.f32 0.3275911, %v1004_v14 }
 0x173   :  { %2758 = vst [vmem:[%s4892_s3 + $0x18] sm:$0xff] %v2858_v16  ;;  %v3788_v43 = vmul.f32 0.70710677, %v3778_v21  ;;  %v813_v63 = vadd.f32 %v3336_v38, %v4904_v0  ;;  %v3794_v15 = vadd.f32 %v3338_v39, %v4905_v5  ;;  %v2187_v58 = vsub.f32 1.0, %v2123_v17 }
 0x174   :  { %v2538_v36 = vmul.f32 %v2474_v8, %v874_v25  ;;  %v1771_v11 = vadd.f32 0.2548296, %v1707_v42  ;;  %v1132_v12 = vadd.f32 1.0, %v1068_v10  ;;  %v1932_v45 = vmul.f32 %v1868_v46, %v972_v3  ;;  %v4908_v8 = vld [vmem:[#allocation7_spill] sm:$0xff] }
 0x175   :  { %v973_v6 = vand.u32 2147483647, %v3788_v43  ;;  %v1900_v22 = vsub.f32 0.0, %v1004_v14  ;;  %v3802_v47 = vmul.f32 0.5, %v3653_v61  ;;  %vm2251_vm0 = vcmp.ge.f32.partialorder %v3662_v32, 0.0 }
 0x176   :  { %v2874_v57 = vpack.c.bf16 %v2538_v36, %v2537_v54  ;;  %3018 = vrcp.f32 %v1132_v12  ;;  %v1835_v25 = vmul.f32 %v3739_v53, %v1771_v11  ;;  %v3809_v59 = vmul.f32 0.70710677, %v813_v63 }
 0x177   :  { %v1037_v18 = vmul.f32 0.3275911, %v973_v6  ;;  %v1869_v3 = vsub.f32 0.0, %v973_v6  ;;  %v3812_v56 = vmul.f32 0.70710677, %v3794_v15  ;;  %v2315_v55 = vsub.f32 0.0, %v2187_v58 }
 0x178   :  { %2774 = vst [vmem:[%s4892_s3 + $0x98] sm:$0xff] %v2874_v57  ;;  %v3817_v61 = vmul.f32 0.5, %v3671_v7  ;;  %v2005_v53 = vmul.f32 1.442695, %v1932_v45  ;;  %v3820_v62 = vmul.f32 0.5, %v3734_v51  ;;  %v1964_v9 = vmul.f32 %v1900_v22, %v1004_v14  ;;  %v3828_v7 = vpop.f32.mrb[21].mxu0 }
 0x179   :  { %v3814_v26 = vpop.eup %3014  ;;  %v1101_v40 = vadd.f32 1.0, %v1037_v18  ;;  %v1005_v31 = vand.u32 2147483647, %v3809_v59  ;;  %v3825_v29 = vmul.f32 0.5, %v3765_v30  ;;  %v974_v16 = vand.u32 2147483647, %v3812_v56 }
 0x17a   :  { %v3017_v52 = vpop.eup %3016  ;;  %v1292_v13 = vmul.f32 1.0614054, %v3814_v26  ;;  %4907 = vst [vmem:[#allocation4_spill] sm:$0xff] %v3828_v7  ;;  %v1933_v17 = vmul.f32 %v1869_v3, %v973_v6  ;;  %v2379_v51 = vsel %vm2251_vm0, %v2187_v58, %v2315_v55  ;;  %v3834_v42 = vadd.f32 %v3338_v39, %v4908_v8 }
 0x17b   :  { %v2155_v33 = vmul.f32 %v3017_v52, %v1835_v25  ;;  %3020 = vrcp.f32 %v1101_v40  ;;  %v1069_v46 = vmul.f32 0.3275911, %v1005_v31  ;;  %v1901_v54 = vsub.f32 0.0, %v1005_v31 }
 0x17c   :  { %v1356_v37 = vadd.f32 -1.4531521, %v1292_v13  ;;  %3022 = vpow2.f32 %v2005_v53  ;;  %v1038_v14 = vmul.f32 0.3275911, %v974_v16  ;;  %vm2283_vm1 = vcmp.ge.f32.partialorder %v3681_v49, 0.0  ;;  %v4909_v13 = vld [vmem:[#allocation8_spill] sm:$0xff] }
 0x17d   :  { %v2069_v10 = vmul.f32 1.442695, %v1964_v9  ;;  %v1133_v0 = vadd.f32 1.0, %v1069_v46  ;;  %v1870_v36 = vsub.f32 0.0, %v974_v16  ;;  %v2219_v11 = vsub.f32 1.0, %v2155_v33 }
 0x17e   :  { %v1420_v30 = vmul.f32 %v3814_v26, %v1356_v37  ;;  %v3839_v12 = vmul.f32 0.5, %v3778_v21  ;;  %v1965_v5 = vmul.f32 %v1901_v54, %v1005_v31  ;;  %v1102_v32 = vadd.f32 1.0, %v1038_v14  ;;  %v3855_v31 = vpop.f32.mrb[21].mxu1 }
 0x17f   :  { %v2007_v6 = vmul.f32 1.442695, %v1933_v17  ;;  %3024 = vrcp.f32 %v1133_v0  ;;  %v3844_v57 = vmul.f32 0.70710677, %v3834_v42  ;;  %v2443_v22 = vadd.f32 1.0, %v2379_v51  ;;  %4910 = vst [vmem:[#allocation5_spill] sm:$0xff] %v3855_v31 }
 0x180   :  { %v3841_v58 = vpop.eup %3018  ;;  %v1484_v45 = vadd.f32 1.4214138, %v1420_v30  ;;  %v3847_v18 = vmul.f32 0.5, %v813_v63  ;;  %3026 = vrcp.f32 %v1102_v32  ;;  %v1934_v21 = vmul.f32 %v1870_v36, %v974_v16  ;;  %v4911_v51 = vld [vmem:[#allocation9_spill] sm:$0xff] }
 0x181   :  { %v1324_v25 = vmul.f32 1.0614054, %v3841_v58  ;;  %3028 = vpow2.f32 %v2069_v10  ;;  %v1006_v55 = vand.u32 2147483647, %v3844_v57  ;;  %v2347_v53 = vsub.f32 0.0, %v2219_v11 }
 0x182   :  { %v1548_v3 = vmul.f32 %v3814_v26, %v1484_v45  ;;  %v2071_v52 = vmul.f32 1.442695, %v1965_v5  ;;  %v3853_v9 = vadd.f32 %v3336_v38, %v4909_v13  ;;  %3030 = vpow2.f32 %v2007_v6 }
 0x183   :  { %v1388_v40 = vadd.f32 -1.4531521, %v1324_v25  ;;  %v3858_v63 = vmul.f32 0.5, %v3794_v15  ;;  %v1070_v37 = vmul.f32 0.3275911, %v1006_v55  ;;  %v1902_v46 = vsub.f32 0.0, %v1006_v55 }
 0x184   :  { %v1612_v33 = vadd.f32 -0.28449672, %v1548_v3  ;;  %v3864_v54 = vmul.f32 0.70710677, %v3853_v9  ;;  %v3868_v14 = vadd.f32 %v3336_v38, %v4911_v51  ;;  %v2009_v10 = vmul.f32 1.442695, %v1934_v21 }
 0x185   :  { %v3860_v17 = vpop.eup %3020  ;;  %v1452_v16 = vmul.f32 %v3841_v58, %v1388_v40  ;;  %v1134_v15 = vadd.f32 1.0, %v1070_v37  ;;  %v2411_v36 = vsel %vm2283_vm1, %v2219_v11, %v2347_v53  ;;  %3032 = vpow2.f32 %v2071_v52 }
 0x186   :  { %v1676_v8 = vmul.f32 %v3814_v26, %v1612_v33  ;;  %v1293_v30 = vmul.f32 1.0614054, %v3860_v17  ;;  %v3023_v0 = vpop.eup %3022  ;;  %v975_v32 = vand.u32 2147483647, %v3864_v54  ;;  %v3876_v45 = vmul.f32 %v2443_v22, %v3802_v47  ;;  %v3887_v22 = vpop.f32.mrb[22].mxu0 }
 0x187   :  { %v1516_v5 = vadd.f32 1.4214138, %v1452_v16  ;;  %3034 = vrcp.f32 %v1134_v15  ;;  %vm2252_vm2 = vcmp.ge.f32.partialorder %v3750_v28, 0.0  ;;  %v1966_v21 = vmul.f32 %v1902_v46, %v1006_v55  ;;  %4912 = vst [vmem:[#allocation6_spill] sm:$0xff] %v3887_v22  ;;  %v4913_v16 = vld [vmem:[#allocation10_spill] sm:$0xff] }
 0x188   :  { %v1740_v6 = vadd.f32 0.2548296, %v1676_v8  ;;  %v1357_v25 = vadd.f32 -1.4531521, %v1293_v30  ;;  %v1039_v40 = vmul.f32 0.3275911, %v975_v32  ;;  %3036 = vpow2.f32 %v2009_v10 }
 0x189   :  { %v1580_v3 = vmul.f32 %v3841_v58, %v1516_v5  ;;  %v3881_v13 = vmul.f32 0.70710677, %v3868_v14  ;;  %v3883_v49 = vpop.eup %3024  ;;  %v2475_v11 = vadd.f32 1.0, %v2411_v36  ;;  %v3894_v46 = vadd.f32 %v3338_v39, %v4913_v16 }
 0x18a   :  { %v1804_v53 = vmul.f32 %v3814_v26, %v1740_v6  ;;  %v1421_v47 = vmul.f32 %v3860_v17, %v1357_v25  ;;  %v3889_v52 = vpop.eup %3026  ;;  %v1325_v37 = vmul.f32 1.0614054, %v3883_v49  ;;  %v1103_v55 = vadd.f32 1.0, %v1039_v40 }
 0x18b   :  { %v1644_v33 = vadd.f32 -0.28449672, %v1580_v3  ;;  %v3029_v51 = vpop.eup %3028  ;;  %v1294_v26 = vmul.f32 1.0614054, %v3889_v52  ;;  %v3898_v15 = vand.u32 2147483647, %v3881_v13 }
 0x18c   :  { %v2124_v8 = vmul.f32 %v3023_v0, %v1804_v53  ;;  %v1485_v30 = vadd.f32 1.4214138, %v1421_v47  ;;  %v1389_v36 = vadd.f32 -1.4531521, %v1325_v37  ;;  %v2073_v5 = vmul.f32 1.442695, %v1966_v21  ;;  %v3031_v6 = vpop.eup %3030 }
 0x18d   :  { %v1708_v10 = vmul.f32 %v3841_v58, %v1644_v33  ;;  %3038 = vrcp.f32 %v1103_v55  ;;  %v1358_v40 = vadd.f32 -1.4531521, %v1294_v26  ;;  %v1071_v16 = vmul.f32 0.3275911, %v3898_v15 }
 0x18e   :  { %v2188_v25 = vsub.f32 1.0, %v2124_v8  ;;  %v1549_v3 = vmul.f32 %v3860_v17, %v1485_v30  ;;  %v1453_v0 = vmul.f32 %v3883_v49, %v1389_v36  ;;  %v1871_v53 = vsub.f32 0.0, %v975_v32 }
 0x18f   :  { %v1772_v22 = vadd.f32 0.2548296, %v1708_v10  ;;  %v3905_v47 = vmul.f32 0.70710677, %v3894_v46  ;;  %vm2284_vm3 = vcmp.ge.f32.partialorder %v3774_v35, 0.0  ;;  %v1422_v21 = vmul.f32 %v3889_v52, %v1358_v40  ;;  %v3033_v55 = vpop.eup %3032 }
 0x190   :  { %v2316_v31 = vsub.f32 0.0, %v2188_v25  ;;  %v1613_v33 = vadd.f32 -0.28449672, %v1549_v3  ;;  %v1135_v37 = vadd.f32 1.0, %v1071_v16  ;;  %v3910_v8 = vmul.f32 %v2475_v11, %v3817_v61  ;;  %v3920_v11 = vpop.f32.mrb[22].mxu1 }
 0x191   :  { %v1836_v30 = vmul.f32 %v3841_v58, %v1772_v22  ;;  %v1517_v26 = vadd.f32 1.4214138, %v1453_v0  ;;  %3040 = vpow2.f32 %v2073_v5  ;;  %v3913_v10 = vpop.eup %3034  ;;  %v1486_v41 = vadd.f32 1.4214138, %v1422_v21  ;;  %4914 = vst [vmem:[#allocation7_spill] sm:$0xff] %v3920_v11 }
 0x192   :  { %v2380_v36 = vsel %vm2252_vm2, %v2188_v25, %v2316_v31  ;;  %v1677_v7 = vmul.f32 %v3860_v17, %v1613_v33  ;;  %3042 = vrcp.f32 %v1135_v37  ;;  %v1326_v61 = vmul.f32 1.0614054, %v3913_v10  ;;  %v3037_v58 = vpop.eup %3036 }
 0x193   :  { %v2444_v3 = vadd.f32 1.0, %v2380_v36  ;;  %v2156_v40 = vmul.f32 %v3029_v51, %v1836_v30  ;;  %v1581_v16 = vmul.f32 %v3883_v49, %v1517_v26  ;;  %v1550_v5 = vmul.f32 %v3889_v52, %v1486_v41 }
 0x194   :  { %v1741_v22 = vadd.f32 0.2548296, %v1677_v7  ;;  %v1935_v0 = vmul.f32 %v1871_v53, %v975_v32  ;;  %v3924_v28 = vand.u32 2147483647, %v3905_v47  ;;  %vm2253_vm4 = vcmp.ge.f32.partialorder %v3788_v43, 0.0 }
 0x195   :  { %v2508_v31 = vmul.f32 %v2444_v3, %v3820_v62  ;;  %v2220_v25 = vsub.f32 1.0, %v2156_v40  ;;  %v1645_v51 = vadd.f32 -0.28449672, %v1581_v16  ;;  %v1390_v33 = vadd.f32 -1.4531521, %v1326_v61 }
 0x196   :  { %v1805_v21 = vmul.f32 %v3860_v17, %v1741_v22  ;;  %v1614_v37 = vadd.f32 -0.28449672, %v1550_v5  ;;  %v1903_v30 = vsub.f32 0.0, %v3898_v15  ;;  %v1040_v7 = vmul.f32 0.3275911, %v3924_v28 }
 0x197   :  { %v3931_v26 = vpop.eup %3038  ;;  %v2859_v41 = vpack.c.bf16 %v2508_v31, %v3876_v45  ;;  %v2348_v32 = vsub.f32 0.0, %v2220_v25  ;;  %v1709_v53 = vmul.f32 %v3883_v49, %v1645_v51  ;;  %v1454_v62 = vmul.f32 %v3913_v10, %v1390_v33 }
 0x198   :  { %v2125_v36 = vmul.f32 %v3031_v6, %v1805_v21  ;;  %v1678_v3 = vmul.f32 %v3889_v52, %v1614_v37  ;;  %v1295_v40 = vmul.f32 1.0614054, %v3931_v26  ;;  %v1104_v17 = vadd.f32 1.0, %v1040_v7 }
 0x199   :  { %2759 = vst [vmem:[%s4892_s3 + $0x20] sm:$0xff] %v2859_v41  ;;  %v2412_v16 = vsel %vm2284_vm3, %v2220_v25, %v2348_v32  ;;  %v1773_v61 = vadd.f32 0.2548296, %v1709_v53  ;;  %v1518_v45 = vadd.f32 1.4214138, %v1454_v62  ;;  %v1967_v7 = vmul.f32 %v1903_v30, %v3898_v15  ;;  %v3951_v32 = vpop.f32.mrb[23].mxu0 }
 0x19a   :  { %v2011_v22 = vmul.f32 1.442695, %v1935_v0  ;;  %v2476_v5 = vadd.f32 1.0, %v2412_v16  ;;  %v2189_v31 = vsub.f32 1.0, %v2125_v36  ;;  %v1742_v51 = vadd.f32 0.2548296, %v1678_v3 }
 0x19b   :  { %v1359_v33 = vadd.f32 -1.4531521, %v1295_v40  ;;  %v3041_v6 = vpop.eup %3040  ;;  %v1837_v21 = vmul.f32 %v3883_v49, %v1773_v61  ;;  %v1582_v37 = vmul.f32 %v3913_v10, %v1518_v45  ;;  %3044 = vrcp.f32 %v1104_v17 }
 0x19c   :  { %v3946_v11 = vpop.eup %3042  ;;  %v2540_v35 = vmul.f32 %v2476_v5, %v3825_v29  ;;  %v2317_v25 = vsub.f32 0.0, %v2189_v31  ;;  %v1806_v41 = vmul.f32 %v3889_v52, %v1742_v51  ;;  %v1872_v36 = vsub.f32 0.0, %v3924_v28 }
 0x19d   :  { %v1423_v0 = vmul.f32 %v3931_v26, %v1359_v33  ;;  %v2157_v53 = vmul.f32 %v3033_v55, %v1837_v21  ;;  %v1646_v62 = vadd.f32 -0.28449672, %v1582_v37  ;;  %v1327_v49 = vmul.f32 1.0614054, %v3946_v11  ;;  %v4915_v21 = vld [vmem:[#allocation11_spill] sm:$0xff] }
 0x19e   :  { %v2875_v15 = vpack.c.bf16 %v2540_v35, %v3910_v8  ;;  %v2381_v30 = vsel %vm2253_vm4, %v2189_v31, %v2317_v25  ;;  %v2126_v3 = vmul.f32 %v3037_v58, %v1806_v41  ;;  %vm2285_vm5 = vcmp.ge.f32.partialorder %v3809_v59, 0.0  ;;  %v3964_v8 = vpop.f32.mrb[23].mxu1 }
 0x19f   :  { %v1487_v29 = vadd.f32 1.4214138, %v1423_v0  ;;  %v2445_v40 = vadd.f32 1.0, %v2381_v30  ;;  %v2221_v17 = vsub.f32 1.0, %v2157_v53  ;;  %v1710_v52 = vmul.f32 %v3913_v10, %v1646_v62 }
 0x1a0   :  { %v1391_v16 = vadd.f32 -1.4531521, %v1327_v49  ;;  %2775 = vst [vmem:[%s4892_s3 + $0xa0] sm:$0xff] %v2875_v15  ;;  %v2190_v55 = vsub.f32 1.0, %v2126_v3  ;;  %3046 = vpow2.f32 %v2011_v22  ;;  %v2075_v5 = vmul.f32 1.442695, %v1967_v7 }
 0x1a1   :  { %v1551_v61 = vmul.f32 %v3931_v26, %v1487_v29  ;;  %v2349_v43 = vsub.f32 0.0, %v2221_v17  ;;  %v1774_v58 = vadd.f32 0.2548296, %v1710_v52  ;;  %v1936_v33 = vmul.f32 %v1872_v36, %v3924_v28 }
 0x1a2   :  { %v1455_v45 = vmul.f32 %v3946_v11, %v1391_v16  ;;  %v2318_v31 = vsub.f32 0.0, %v2190_v55  ;;  %v3970_v37 = vadd.f32 %v3338_v39, %v4915_v21  ;;  %v2509_v35 = vmul.f32 %v2445_v40, %v3839_v12 }
 0x1a3   :  { %v1615_v51 = vadd.f32 -0.28449672, %v1551_v61  ;;  %vm2254_vm6 = vcmp.ge.f32.partialorder %v3812_v56, 0.0  ;;  %v1838_v22 = vmul.f32 %v3913_v10, %v1774_v58  ;;  %v2413_v41 = vsel %vm2285_vm5, %v2221_v17, %v2349_v43 }
 0x1a4   :  { %v1519_v25 = vadd.f32 1.4214138, %v1455_v45  ;;  %v2382_v0 = vsel %vm2254_vm6, %v2190_v55, %v2318_v31  ;;  %v3980_v28 = vadd.f32 %v3336_v38, %v3521_v50  ;;  %v3986_v56 = vmul.f32 0.70710677, %v3970_v37 }
 0x1a5   :  { %v1679_v7 = vmul.f32 %v3931_v26, %v1615_v51  ;;  %v3982_v53 = vpop.eup %3044  ;;  %v2446_v62 = vadd.f32 1.0, %v2382_v0  ;;  %v2158_v49 = vmul.f32 %v3041_v6, %v1838_v22  ;;  %3048 = vpow2.f32 %v2075_v5 }
 0x1a6   :  { %v1583_v12 = vmul.f32 %v3946_v11, %v1519_v25  ;;  %v1296_v59 = vmul.f32 1.0614054, %v3982_v53  ;;  %v2013_v36 = vmul.f32 1.442695, %v1936_v33  ;;  %v1008_v50 = vand.u32 2147483647, %v3986_v56 }
 0x1a7   :  { %v1743_v10 = vadd.f32 0.2548296, %v1679_v7  ;;  %v2510_v15 = vmul.f32 %v2446_v62, %v3858_v63  ;;  %v2222_v30 = vsub.f32 1.0, %v2158_v49  ;;  %v2477_v29 = vadd.f32 1.0, %v2413_v41  ;;  %v4006_v25 = vpop.f32.mrb[24].mxu1 }
 0x1a8   :  { %v1647_v3 = vadd.f32 -0.28449672, %v1583_v12  ;;  %v1360_v6 = vadd.f32 -1.4531521, %v1296_v59  ;;  %v3993_v17 = vmul.f32 0.70710677, %v3980_v28  ;;  %3050 = vpow2.f32 %v2013_v36 }
 0x1a9   :  { %v1807_v40 = vmul.f32 %v3931_v26, %v1743_v10  ;;  %v2860_v52 = vpack.c.bf16 %v2510_v15, %v2509_v35  ;;  %v2350_v16 = vsub.f32 0.0, %v2222_v30  ;;  %v1072_v61 = vmul.f32 0.3275911, %v1008_v50 }
 0x1aa   :  { %v1711_v55 = vmul.f32 %v3946_v11, %v1647_v3  ;;  %v3047_v43 = vpop.eup %3046  ;;  %v878_v58 = vmul.f32 0.5, %v3834_v42  ;;  %vm2286_vm7 = vcmp.ge.f32.partialorder %v3844_v57, 0.0  ;;  %v1424_v63 = vmul.f32 %v3982_v53, %v1360_v6  ;;  %v4004_v42 = vpop.f32.mrb[24].mxu0 }
 0x1ab   :  { %v977_v45 = vand.u32 2147483647, %v3993_v17  ;;  %2760 = vst [vmem:[%s4892_s3 + $0x28] sm:$0xff] %v2860_v52  ;;  %v2414_v26 = vsel %vm2286_vm7, %v2222_v30, %v2350_v16  ;;  %v1136_v31 = vadd.f32 1.0, %v1072_v61  ;;  %v2541_v51 = vmul.f32 %v2477_v29, %v3847_v18 }
 0x1ac   :  { %v1775_v5 = vadd.f32 0.2548296, %v1711_v55  ;;  %v2478_v33 = vadd.f32 1.0, %v2414_v26  ;;  %v2127_v21 = vmul.f32 %v3047_v43, %v1807_v40  ;;  %v1488_v35 = vadd.f32 1.4214138, %v1424_v63  ;;  %v4031_v40 = vpop.f32.mrb[25].mxu0 }
 0x1ad   :  { %3052 = vrcp.f32 %v1136_v31  ;;  %v1904_v57 = vsub.f32 0.0, %v1008_v50  ;;  %v1041_v22 = vmul.f32 0.3275911, %v977_v45  ;;  %v817_v7 = vadd.f32 %v3336_v38, %v3531_v48 }
 0x1ae   :  { %v2542_v41 = vmul.f32 %v2478_v33, %v878_v58  ;;  %v1552_v0 = vmul.f32 %v3982_v53, %v1488_v35  ;;  %v1839_v62 = vmul.f32 %v3946_v11, %v1775_v5  ;;  %v2191_v10 = vsub.f32 1.0, %v2127_v21 }
 0x1af   :  { %v1105_v49 = vadd.f32 1.0, %v1041_v22  ;;  %v3049_v18 = vpop.eup %3048  ;;  %v1968_v36 = vmul.f32 %v1904_v57, %v1008_v50  ;;  %v4016_v30 = vmul.f32 0.70710677, %v817_v7  ;;  %v4020_v48 = vadd.f32 %v3338_v39, %v3569_v23 }
 0x1b0   :  { %v2876_v12 = vpack.c.bf16 %v2542_v41, %v2541_v51  ;;  %v1616_v59 = vadd.f32 -0.28449672, %v1552_v0  ;;  %v4024_v11 = vadd.f32 %v3338_v39, %v3574_v27  ;;  %v847_v3 = vmul.f32 0.5, %v3853_v9 }
 0x1b1   :  { %3054 = vrcp.f32 %v1105_v49  ;;  %vm2255_vm8 = vcmp.ge.f32.partialorder %v3864_v54, 0.0  ;;  %v4029_v50 = vmul.f32 0.5, %v3868_v14  ;;  %v2159_v29 = vmul.f32 %v3049_v18, %v1839_v62 }
 0x1b2   :  { %2776 = vst [vmem:[%s4892_s3 + $0xa8] sm:$0xff] %v2876_v12  ;;  %v1680_v15 = vmul.f32 %v3982_v53, %v1616_v59  ;;  %v2319_v6 = vsub.f32 0.0, %v2191_v10  ;;  %v848_v52 = vmul.f32 0.5, %v3894_v46  ;;  %v1009_v23 = vand.u32 2147483647, %v4016_v30  ;;  %v3051_v55 = vpop.eup %3050 }
 0x1b3   :  { %vm2256_vm9 = vcmp.ge.f32.partialorder %v3905_v47, 0.0  ;;  %v1873_v27 = vsub.f32 0.0, %v977_v45  ;;  %v4037_v9 = vmul.f32 0.70710677, %v4020_v48  ;;  %v4040_v61 = vmul.f32 0.70710677, %v4024_v11 }
 0x1b4   :  { %v1744_v16 = vadd.f32 0.2548296, %v1680_v15  ;;  %vm2287_vm10 = vcmp.ge.f32.partialorder %v3881_v13, 0.0  ;;  %v4045_v43 = vmul.f32 0.5, %v3970_v37  ;;  %v2077_v46 = vmul.f32 1.442695, %v1968_v36 }
 0x1b5   :  { %v1073_v58 = vmul.f32 0.3275911, %v1009_v23  ;;  %v2223_v26 = vsub.f32 1.0, %v2159_v29  ;;  %v4050_v5 = vmul.f32 0.5, %v3980_v28  ;;  %v978_v31 = vand.u32 2147483647, %v4037_v9 }
 0x1b6   :  { %v1808_v14 = vmul.f32 %v3982_v53, %v1744_v16  ;;  %v1010_v51 = vand.u32 2147483647, %v4040_v61  ;;  %v2383_v33 = vsel %vm2255_vm8, %v2191_v10, %v2319_v6  ;;  %v1937_v35 = vmul.f32 %v1873_v27, %v977_v45  ;;  %v4061_v28 = vpop.f32.mrb[25].mxu1 }
 0x1b7   :  { %v4047_v63 = vpop.eup %3052  ;;  %v1137_v37 = vadd.f32 1.0, %v1073_v58  ;;  %v1042_v57 = vmul.f32 0.3275911, %v978_v31  ;;  %v4059_v41 = vadd.f32 %v3336_v38, %v3594_v19  ;;  %v4063_v49 = vmul.f32 0.5, %v817_v7 }
 0x1b8   :  { %v2128_v21 = vmul.f32 %v3051_v55, %v1808_v14  ;;  %v1328_v53 = vmul.f32 1.0614054, %v4047_v63  ;;  %v1074_v22 = vmul.f32 0.3275911, %v1010_v51  ;;  %v2447_v18 = vadd.f32 1.0, %v2383_v33  ;;  %v4074_v14 = vpop.f32.mrb[26].mxu0 }
 0x1b9   :  { %3056 = vrcp.f32 %v1137_v37  ;;  %v2351_v12 = vsub.f32 0.0, %v2223_v26  ;;  %v1905_v10 = vsub.f32 0.0, %v1009_v23  ;;  %v1106_v59 = vadd.f32 1.0, %v1042_v57 }
 0x1ba   :  { %v2192_v0 = vsub.f32 1.0, %v2128_v21  ;;  %v1392_v62 = vadd.f32 -1.4531521, %v1328_v53  ;;  %v1138_v19 = vadd.f32 1.0, %v1074_v22  ;;  %3058 = vpow2.f32 %v2077_v46 }
 0x1bb   :  { %v4065_v54 = vpop.eup %3054  ;;  %v2015_v29 = vmul.f32 1.442695, %v1937_v35  ;;  %v1874_v6 = vsub.f32 0.0, %v978_v31  ;;  %v4070_v16 = vmul.f32 0.70710677, %v4059_v41  ;;  %3060 = vrcp.f32 %v1106_v59 }
 0x1bc   :  { %v2320_v45 = vsub.f32 0.0, %v2192_v0  ;;  %v1456_v36 = vmul.f32 %v4047_v63, %v1392_v62  ;;  %v1297_v15 = vmul.f32 1.0614054, %v4065_v54  ;;  %v2511_v58 = vmul.f32 %v2447_v18, %v847_v3 }
 0x1bd   :  { %v2415_v33 = vsel %vm2287_vm10, %v2223_v26, %v2351_v12  ;;  %v4079_v46 = vand.u32 2147483647, %v4070_v16  ;;  %v1969_v35 = vmul.f32 %v1905_v10, %v1009_v23  ;;  %3062 = vrcp.f32 %v1138_v19 }
 0x1be   :  { %v2384_v7 = vsel %vm2256_vm9, %v2192_v0, %v2320_v45  ;;  %v1520_v55 = vadd.f32 1.4214138, %v1456_v36  ;;  %v1361_v27 = vadd.f32 -1.4531521, %v1297_v15  ;;  %v1938_v57 = vmul.f32 %v1874_v6, %v978_v31 }
 0x1bf   :  { %v2448_v21 = vadd.f32 1.0, %v2384_v7  ;;  %v1906_v22 = vsub.f32 0.0, %v1010_v51  ;;  %v1043_v0 = vmul.f32 0.3275911, %v4079_v46  ;;  %3064 = vpow2.f32 %v2015_v29 }
 0x1c0   :  { %v1584_v53 = vmul.f32 %v4047_v63, %v1520_v55  ;;  %v1425_v37 = vmul.f32 %v4065_v54, %v1361_v27  ;;  %v4086_v13 = vadd.f32 %v3336_v38, %v3596_v1  ;;  %v2479_v26 = vadd.f32 1.0, %v2415_v33  ;;  %v4114_v33 = vpop.f32.mrb[26].mxu1 }
 0x1c1   :  { %v2512_v47 = vmul.f32 %v2448_v21, %v848_v52  ;;  %v1107_v12 = vadd.f32 1.0, %v1043_v0  ;;  %v4090_v59 = vadd.f32 %v3338_v39, %v3634_v4  ;;  %v2079_v10 = vmul.f32 1.442695, %v1969_v35 }
 0x1c2   :  { %v1648_v62 = vadd.f32 -0.28449672, %v1584_v53  ;;  %v1489_v3 = vadd.f32 1.4214138, %v1425_v37  ;;  %v4097_v45 = vmul.f32 0.70710677, %v4086_v13  ;;  %v1970_v15 = vmul.f32 %v1906_v22, %v1010_v51 }
 0x1c3   :  { %v2861_v18 = vpack.c.bf16 %v2512_v47, %v2511_v58  ;;  %v4092_v23 = vpop.eup %3056  ;;  %v2017_v36 = vmul.f32 1.442695, %v1938_v57  ;;  %3066 = vrcp.f32 %v1107_v12  ;;  %v4105_v7 = vmul.f32 %v2479_v26, %v4029_v50 }
 0x1c4   :  { %v1712_v52 = vmul.f32 %v4047_v63, %v1648_v62  ;;  %v1553_v31 = vmul.f32 %v4065_v54, %v1489_v3  ;;  %v1329_v1 = vmul.f32 1.0614054, %v4092_v23  ;;  %v1011_v29 = vand.u32 2147483647, %v4097_v45  ;;  %v3059_v6 = vpop.eup %3058 }
 0x1c5   :  { %2761 = vst [vmem:[%s4892_s3 + $0x30] sm:$0xff] %v2861_v18  ;;  %vm2288_vm11 = vcmp.ge.f32.partialorder %v3986_v56, 0.0  ;;  %v4109_v27 = vmul.f32 0.5, %v4020_v48  ;;  %v4112_v58 = vmul.f32 0.70710677, %v4090_v59  ;;  %v4116_v51 = vpop.eup %3060  ;;  %3068 = vpow2.f32 %v2079_v10 }
 0x1c6   :  { %v1776_v4 = vadd.f32 0.2548296, %v1712_v52  ;;  %v1617_v19 = vadd.f32 -0.28449672, %v1553_v31  ;;  %v1393_v55 = vadd.f32 -1.4531521, %v1329_v1  ;;  %3070 = vpow2.f32 %v2017_v36 }
 0x1c7   :  { %v1075_v50 = vmul.f32 0.3275911, %v1011_v29  ;;  %v1298_v35 = vmul.f32 1.0614054, %v4116_v51  ;;  %v2081_v47 = vmul.f32 1.442695, %v1970_v15  ;;  %v4125_v57 = vpop.eup %3062 }
 0x1c8   :  { %v1840_v21 = vmul.f32 %v4047_v63, %v1776_v4  ;;  %v1681_v53 = vmul.f32 %v4065_v54, %v1617_v19  ;;  %v1457_v37 = vmul.f32 %v4092_v23, %v1393_v55  ;;  %v4123_v48 = vand.u32 2147483647, %v4112_v58 }
 0x1c9   :  { %v1875_v62 = vsub.f32 0.0, %v4079_v46  ;;  %v1139_v3 = vadd.f32 1.0, %v1075_v50  ;;  %v1362_v26 = vadd.f32 -1.4531521, %v1298_v35  ;;  %v1330_v18 = vmul.f32 1.0614054, %v4125_v57  ;;  %v3065_v12 = vpop.eup %3064 }
 0x1ca   :  { %v2160_v22 = vmul.f32 %v3059_v6, %v1840_v21  ;;  %v1745_v0 = vadd.f32 0.2548296, %v1681_v53  ;;  %v1521_v63 = vadd.f32 1.4214138, %v1457_v37  ;;  %v1907_v10 = vsub.f32 0.0, %v1011_v29  ;;  %v4134_v21 = vpop.f32.mrb[27].mxu0 }
 0x1cb   :  { %3072 = vrcp.f32 %v1139_v3  ;;  %v1426_v15 = vmul.f32 %v4116_v51, %v1362_v26  ;;  %v1394_v4 = vadd.f32 -1.4531521, %v1330_v18  ;;  %v1044_v19 = vmul.f32 0.3275911, %v4123_v48 }
 0x1cc   :  { %v2224_v52 = vsub.f32 1.0, %v2160_v22  ;;  %v1809_v31 = vmul.f32 %v4065_v54, %v1745_v0  ;;  %v1585_v1 = vmul.f32 %v4092_v23, %v1521_v63  ;;  %3074 = vpow2.f32 %v2081_v47 }
 0x1cd   :  { %v1939_v36 = vmul.f32 %v1875_v62, %v4079_v46  ;;  %v4136_v53 = vpop.eup %3066  ;;  %vm2257_vm12 = vcmp.ge.f32.partialorder %v3993_v17, 0.0  ;;  %v1490_v50 = vadd.f32 1.4214138, %v1426_v15  ;;  %v1458_v37 = vmul.f32 %v4125_v57, %v1394_v4 }
 0x1ce   :  { %v2352_v6 = vsub.f32 0.0, %v2224_v52  ;;  %v2129_v55 = vmul.f32 %v3065_v12, %v1809_v31  ;;  %v1649_v54 = vadd.f32 -0.28449672, %v1585_v1  ;;  %v1108_v35 = vadd.f32 1.0, %v1044_v19 }
 0x1cf   :  { %v1299_v3 = vmul.f32 1.0614054, %v4136_v53  ;;  %v1971_v47 = vmul.f32 %v1907_v10, %v1011_v29  ;;  %v1554_v62 = vmul.f32 %v4116_v51, %v1490_v50  ;;  %v1522_v26 = vadd.f32 1.4214138, %v1458_v37  ;;  %v3069_v18 = vpop.eup %3068 }
 0x1d0   :  { %v2416_v22 = vsel %vm2288_vm11, %v2224_v52, %v2352_v6  ;;  %v2193_v0 = vsub.f32 1.0, %v2129_v55  ;;  %v1713_v46 = vmul.f32 %v4092_v23, %v1649_v54  ;;  %v2019_v31 = vmul.f32 1.442695, %v1939_v36  ;;  %v3071_v55 = vpop.eup %3070 }
 0x1d1   :  { %v2480_v63 = vadd.f32 1.0, %v2416_v22  ;;  %v1363_v12 = vadd.f32 -1.4531521, %v1299_v3  ;;  %3076 = vrcp.f32 %v1108_v35  ;;  %v4147_v1 = vadd.f32 %v3338_v39, %v3646_v24 }
 0x1d2   :  { %v1777_v52 = vadd.f32 0.2548296, %v1713_v46  ;;  %v1618_v15 = vadd.f32 -0.28449672, %v1554_v62  ;;  %v1586_v29 = vmul.f32 %v4125_v57, %v1522_v26  ;;  %v2321_v10 = vsub.f32 0.0, %v2193_v0 }
 0x1d3   :  { %v2544_v56 = vmul.f32 %v2480_v63, %v4045_v43  ;;  %vm2289_vm13 = vcmp.ge.f32.partialorder %v4016_v30, 0.0  ;;  %v4153_v4 = vmul.f32 0.5, %v4024_v11  ;;  %v1427_v19 = vmul.f32 %v4136_v53, %v1363_v12 }
 0x1d4   :  { %v2083_v6 = vmul.f32 1.442695, %v1971_v47  ;;  %v1841_v24 = vmul.f32 %v4092_v23, %v1777_v52  ;;  %v1682_v43 = vmul.f32 %v4116_v51, %v1618_v15  ;;  %v1876_v54 = vsub.f32 0.0, %v4123_v48 }
 0x1d5   :  { %v2877_v36 = vpack.c.bf16 %v2544_v56, %v4105_v7  ;;  %v4160_v50 = vpop.eup %3072  ;;  %v1650_v37 = vadd.f32 -0.28449672, %v1586_v29  ;;  %v1491_v35 = vadd.f32 1.4214138, %v1427_v19  ;;  %v4163_v22 = vmul.f32 0.70710677, %v4147_v1 }
 0x1d6   :  { %v4167_v11 = vadd.f32 %v3336_v38, %v3702_v34  ;;  %v2161_v23 = vmul.f32 %v3069_v18, %v1841_v24  ;;  %v1746_v7 = vadd.f32 0.2548296, %v1682_v43  ;;  %3078 = vpow2.f32 %v2019_v31  ;;  %v3075_v47 = vpop.eup %3074  ;;  %v4180_v31 = vpop.f32.mrb[27].mxu1 }
 0x1d7   :  { %2777 = vst [vmem:[%s4892_s3 + $0xb0] sm:$0xff] %v2877_v36  ;;  %v1331_v3 = vmul.f32 1.0614054, %v4160_v50  ;;  %v2385_v63 = vsel %vm2257_vm12, %v2193_v0, %v2321_v10  ;;  %vm2258_vm14 = vcmp.ge.f32.partialorder %v4037_v9, 0.0  ;;  %v1714_v46 = vmul.f32 %v4125_v57, %v1650_v37  ;;  %v4210_v9 = vpop.f32.mrb[28].mxu0 }
 0x1d8   :  { %v1555_v34 = vmul.f32 %v4136_v53, %v1491_v35  ;;  %v1012_v62 = vand.u32 2147483647, %v4163_v22  ;;  %v2225_v26 = vsub.f32 1.0, %v2161_v23  ;;  %v1810_v12 = vmul.f32 %v4116_v51, %v1746_v7 }
 0x1d9   :  { %v1395_v18 = vadd.f32 -1.4531521, %v1331_v3  ;;  %3080 = vpow2.f32 %v2083_v6  ;;  %v1778_v56 = vadd.f32 0.2548296, %v1714_v46  ;;  %v1940_v17 = vmul.f32 %v1876_v54, %v4123_v48 }
 0x1da   :  { %v1619_v52 = vadd.f32 -0.28449672, %v1555_v34  ;;  %v1076_v0 = vmul.f32 0.3275911, %v1012_v62  ;;  %v2449_v15 = vadd.f32 1.0, %v2385_v63  ;;  %v2353_v29 = vsub.f32 0.0, %v2225_v26 }
 0x1db   :  { %v2130_v10 = vmul.f32 %v3071_v55, %v1810_v12  ;;  %vm2290_vm15 = vcmp.ge.f32.partialorder %v4040_v61, 0.0  ;;  %v1459_v19 = vmul.f32 %v4160_v50, %v1395_v18  ;;  %v4185_v36 = vpop.eup %3076  ;;  %v1842_v51 = vmul.f32 %v4125_v57, %v1778_v56 }
 0x1dc   :  { %v1683_v6 = vmul.f32 %v4136_v53, %v1619_v52  ;;  %v1140_v24 = vadd.f32 1.0, %v1076_v0  ;;  %v4190_v43 = vmul.f32 0.70710677, %v4167_v11  ;;  %v2417_v48 = vsel %vm2289_vm13, %v2225_v26, %v2353_v29 }
 0x1dd   :  { %v2194_v54 = vsub.f32 1.0, %v2130_v10  ;;  %v1523_v37 = vadd.f32 1.4214138, %v1459_v19  ;;  %v1300_v55 = vmul.f32 1.0614054, %v4185_v36  ;;  %v2162_v35 = vmul.f32 %v3075_v47, %v1842_v51 }
 0x1de   :  { %v1747_v23 = vadd.f32 0.2548296, %v1683_v6  ;;  %v2021_v7 = vmul.f32 1.442695, %v1940_v17  ;;  %3082 = vrcp.f32 %v1140_v24  ;;  %v2513_v3 = vmul.f32 %v2449_v15, %v4050_v5 }
 0x1df   :  { %v2322_v57 = vsub.f32 0.0, %v2194_v54  ;;  %v1587_v63 = vmul.f32 %v4160_v50, %v1523_v37  ;;  %v1364_v46 = vadd.f32 -1.4531521, %v1300_v55  ;;  %v2481_v34 = vadd.f32 1.0, %v2417_v48  ;;  %v4216_v37 = vpop.f32.mrb[28].mxu1 }
 0x1e0   :  { %v2226_v12 = vsub.f32 1.0, %v2162_v35  ;;  %v1811_v18 = vmul.f32 %v4136_v53, %v1747_v23  ;;  %v4199_v30 = vand.u32 2147483647, %v4190_v43  ;;  %v3079_v26 = vpop.eup %3078  ;;  %v1908_v17 = vsub.f32 0.0, %v1012_v62 }
 0x1e1   :  { %v2386_v47 = vsel %vm2258_vm14, %v2194_v54, %v2322_v57  ;;  %v1651_v56 = vadd.f32 -0.28449672, %v1587_v63  ;;  %v1428_v52 = vmul.f32 %v4185_v36, %v1364_v46  ;;  %3084 = vpow2.f32 %v2021_v7 }
 0x1e2   :  { %v2450_v5 = vadd.f32 1.0, %v2386_v47  ;;  %v2354_v0 = vsub.f32 0.0, %v2226_v12  ;;  %v2131_v15 = vmul.f32 %v3079_v26, %v1811_v18  ;;  %v1045_v29 = vmul.f32 0.3275911, %v4199_v30 }
 0x1e3   :  { %v3081_v10 = vpop.eup %3080  ;;  %v1715_v19 = vmul.f32 %v4160_v50, %v1651_v56  ;;  %v1492_v53 = vadd.f32 1.4214138, %v1428_v52  ;;  %v4208_v51 = vadd.f32 %v3336_v38, %v3725_v20  ;;  %v2545_v6 = vmul.f32 %v2481_v34, %v4063_v49 }
 0x1e4   :  { %v2514_v24 = vmul.f32 %v2450_v5, %v4109_v27  ;;  %v2418_v48 = vsel %vm2290_vm15, %v2226_v12, %v2354_v0  ;;  %v1109_v54 = vadd.f32 1.0, %v1045_v29  ;;  %v2195_v35 = vsub.f32 1.0, %v2131_v15 }
 0x1e5   :  { %v2482_v55 = vadd.f32 1.0, %v2418_v48  ;;  %v1779_v23 = vadd.f32 0.2548296, %v1715_v19  ;;  %v1556_v7 = vmul.f32 %v4185_v36, %v1492_v53  ;;  %v1972_v20 = vmul.f32 %v1908_v17, %v1012_v62  ;;  %v4258_v53 = vpop.f32.mrb[29].mxu0 }
 0x1e6   :  { %v2862_v57 = vpack.c.bf16 %v2514_v24, %v2513_v3  ;;  %3086 = vrcp.f32 %v1109_v54  ;;  %v4223_v61 = vadd.f32 %v3338_v39, %v3746_v60  ;;  %v851_v34 = vmul.f32 0.5, %v4059_v41 }
 0x1e7   :  { %v2546_v63 = vmul.f32 %v2482_v55, %v4153_v4  ;;  %v1843_v49 = vmul.f32 %v4160_v50, %v1779_v23  ;;  %v1620_v46 = vadd.f32 -0.28449672, %v1556_v7  ;;  %vm2259_vm0 = vcmp.ge.f32.partialorder %v4070_v16, 0.0 }
 0x1e8   :  { %v4225_v27 = vpop.eup %3082  ;;  %2762 = vst [vmem:[%s4892_s3 + $0x38] sm:$0xff] %v2862_v57  ;;  %v4233_v62 = vmul.f32 0.70710677, %v4208_v51  ;;  %v2323_v50 = vsub.f32 0.0, %v2195_v35  ;;  %v2085_v18 = vmul.f32 1.442695, %v1972_v20  ;;  %v4240_v47 = vadd.f32 %v3338_v39, %v3756_v44 }
 0x1e9   :  { %v2878_v4 = vpack.c.bf16 %v2546_v63, %v2545_v6  ;;  %v2163_v3 = vmul.f32 %v3081_v10, %v1843_v49  ;;  %v1684_v12 = vmul.f32 %v4185_v36, %v1620_v46  ;;  %v1332_v60 = vmul.f32 1.0614054, %v4225_v27 }
 0x1ea   :  { %v1013_v26 = vand.u32 2147483647, %v4233_v62  ;;  %v4246_v41 = vmul.f32 0.5, %v4086_v13  ;;  %v1877_v52 = vsub.f32 0.0, %v4199_v30  ;;  %v4250_v17 = vmul.f32 0.70710677, %v4223_v61 }
 0x1eb   :  { %2778 = vst [vmem:[%s4892_s3 + $0xb8] sm:$0xff] %v2878_v4  ;;  %v1748_v56 = vadd.f32 0.2548296, %v1684_v12  ;;  %vm2291_vm1 = vcmp.ge.f32.partialorder %v4097_v45, 0.0  ;;  %v852_v5 = vmul.f32 0.5, %v4090_v59  ;;  %v3085_v15 = vpop.eup %3084  ;;  %v2387_v29 = vsel %vm2259_vm0, %v2195_v35, %v2323_v50  ;;  %v4265_v35 = vpop.f32.mrb[29].mxu1 }
 0x1ec   :  { %v1396_v0 = vadd.f32 -1.4531521, %v1332_v60  ;;  %v1077_v44 = vmul.f32 0.3275911, %v1013_v26  ;;  %v2227_v10 = vsub.f32 1.0, %v2163_v3  ;;  %v1909_v48 = vsub.f32 0.0, %v1013_v26 }
 0x1ed   :  { %v1812_v13 = vmul.f32 %v4185_v36, %v1748_v56  ;;  %v982_v19 = vand.u32 2147483647, %v4250_v17  ;;  %v4262_v54 = vmul.f32 0.70710677, %v4240_v47  ;;  %3088 = vpow2.f32 %v2085_v18  ;;  %v4916_v45 = vld [vmem:[#allocation3_spill] sm:$0xff] }
 0x1ee   :  { %v1460_v6 = vmul.f32 %v4225_v27, %v1396_v0  ;;  %v1141_v24 = vadd.f32 1.0, %v1077_v44  ;;  %v1941_v55 = vmul.f32 %v1877_v52, %v4199_v30  ;;  %v2451_v36 = vadd.f32 1.0, %v2387_v29 }
 0x1ef   :  { %v2132_v59 = vmul.f32 %v3085_v15, %v1812_v13  ;;  %v1046_v16 = vmul.f32 0.3275911, %v982_v19  ;;  %vm2260_vm2 = vcmp.ge.f32.partialorder %v4112_v58, 0.0  ;;  %v2355_v57 = vsub.f32 0.0, %v2227_v10 }
 0x1f0   :  { %v4267_v23 = vpop.eup %3086  ;;  %v1524_v7 = vadd.f32 1.4214138, %v1460_v6  ;;  %3090 = vrcp.f32 %v1141_v24  ;;  %v4272_v46 = vmul.f32 0.5, %v4147_v1  ;;  %v1973_v4 = vmul.f32 %v1909_v48, %v1013_v26 }
 0x1f1   :  { %v2196_v20 = vsub.f32 1.0, %v2132_v59  ;;  %v1301_v63 = vmul.f32 1.0614054, %v4267_v23  ;;  %v1110_v49 = vadd.f32 1.0, %v1046_v16  ;;  %v1014_v50 = vand.u32 2147483647, %v4262_v54 }
 0x1f2   :  { %v1588_v30 = vmul.f32 %v4225_v27, %v1524_v7  ;;  %v2023_v60 = vmul.f32 1.442695, %v1941_v55  ;;  %v2515_v18 = vmul.f32 %v2451_v36, %v851_v34  ;;  %v1878_v52 = vsub.f32 0.0, %v982_v19 }
 0x1f3   :  { %v2324_v3 = vsub.f32 0.0, %v2196_v20  ;;  %v1365_v12 = vadd.f32 -1.4531521, %v1301_v63  ;;  %3092 = vrcp.f32 %v1110_v49  ;;  %v1078_v0 = vmul.f32 0.3275911, %v1014_v50 }
 0x1f4   :  { %v1652_v56 = vadd.f32 -0.28449672, %v1588_v30  ;;  %v2419_v44 = vsel %vm2291_vm1, %v2227_v10, %v2355_v57  ;;  %v4283_v26 = vadd.f32 %v3336_v38, %v3796_v2  ;;  %v2087_v6 = vmul.f32 1.442695, %v1973_v4  ;;  %v4293_v10 = vpop.f32.mrb[30].mxu0 }
 0x1f5   :  { %v2388_v1 = vsel %vm2260_vm2, %v2196_v20, %v2324_v3  ;;  %v1429_v15 = vmul.f32 %v4267_v23, %v1365_v12  ;;  %v1142_v34 = vadd.f32 1.0, %v1078_v0  ;;  %3094 = vpow2.f32 %v2023_v60 }
 0x1f6   :  { %v2452_v29 = vadd.f32 1.0, %v2388_v1  ;;  %v1716_v13 = vmul.f32 %v4225_v27, %v1652_v56  ;;  %v4287_v48 = vmul.f32 0.70710677, %v4283_v26  ;;  %v4291_v58 = vadd.f32 %v3336_v38, %v4916_v45  ;;  %v4917_v1 = vld [vmem:[#allocation4_spill] sm:$0xff] }
 0x1f7   :  { %v1493_v24 = vadd.f32 1.4214138, %v1429_v15  ;;  %v1942_v2 = vmul.f32 %v1878_v52, %v982_v19  ;;  %3096 = vrcp.f32 %v1142_v34  ;;  %v3089_v16 = vpop.eup %3088  ;;  %v2483_v36 = vadd.f32 1.0, %v2419_v44 }
 0x1f8   :  { %v2516_v59 = vmul.f32 %v2452_v29, %v852_v5  ;;  %v1780_v55 = vadd.f32 0.2548296, %v1716_v13  ;;  %vm2292_vm3 = vcmp.ge.f32.partialorder %v4163_v22, 0.0  ;;  %v4297_v7 = vmul.f32 0.5, %v4167_v11 }
 0x1f9   :  { %v1557_v57 = vmul.f32 %v4267_v23, %v1493_v24  ;;  %v983_v20 = vand.u32 2147483647, %v4287_v48  ;;  %v1910_v5 = vsub.f32 0.0, %v1014_v50  ;;  %v4305_v19 = vmul.f32 0.70710677, %v4291_v58 }
 0x1fa   :  { %v4301_v63 = vpop.eup %3090  ;;  %v2863_v49 = vpack.c.bf16 %v2516_v59, %v2515_v18  ;;  %v1844_v30 = vmul.f32 %v4225_v27, %v1780_v55  ;;  %3098 = vpow2.f32 %v2087_v6  ;;  %v2025_v60 = vmul.f32 1.442695, %v1942_v2  ;;  %v4312_v18 = vpop.f32.mrb[30].mxu1 }
 0x1fb   :  { %v1621_v4 = vadd.f32 -0.28449672, %v1557_v57  ;;  %v1333_v3 = vmul.f32 1.0614054, %v4301_v63  ;;  %v1047_v12 = vmul.f32 0.3275911, %v983_v20  ;;  %v4319_v15 = vadd.f32 %v3338_v39, %v4917_v1 }
 0x1fc   :  { %2763 = vst [vmem:[%s4892_s3 + $0x40] sm:$0xff] %v2863_v49  ;;  %v2164_v11 = vmul.f32 %v3089_v16, %v1844_v30  ;;  %v1015_v56 = vand.u32 2147483647, %v4305_v19  ;;  %v1974_v34 = vmul.f32 %v1910_v5, %v1014_v50  ;;  %v2547_v24 = vmul.f32 %v2483_v36, %v4246_v41 }
 0x1fd   :  { %v4314_v27 = vpop.eup %3092  ;;  %v1685_v52 = vmul.f32 %v4267_v23, %v1621_v4  ;;  %v1397_v0 = vadd.f32 -1.4531521, %v1333_v3  ;;  %v1111_v44 = vadd.f32 1.0, %v1047_v12  ;;  %v1879_v16 = vsub.f32 0.0, %v983_v20 }
 0x1fe   :  { %v2228_v29 = vsub.f32 1.0, %v2164_v11  ;;  %v1302_v13 = vmul.f32 1.0614054, %v4314_v27  ;;  %v1079_v6 = vmul.f32 0.3275911, %v1015_v56  ;;  %v1911_v3 = vsub.f32 0.0, %v1015_v56 }
 0x1ff   :  { %v1749_v45 = vadd.f32 0.2548296, %v1685_v52  ;;  %v1461_v59 = vmul.f32 %v4301_v63, %v1397_v0  ;;  %3100 = vrcp.f32 %v1111_v44  ;;  %v3095_v49 = vpop.eup %3094  ;;  %v4326_v12 = vmul.f32 0.70710677, %v4319_v15 }
 0x200   :  { %v2356_v55 = vsub.f32 0.0, %v2228_v29  ;;  %v1366_v2 = vadd.f32 -1.4531521, %v1302_v13  ;;  %v1143_v57 = vadd.f32 1.0, %v1079_v6  ;;  %3102 = vpow2.f32 %v2025_v60 }
 0x201   :  { %v1813_v30 = vmul.f32 %v4267_v23, %v1749_v45  ;;  %v1525_v4 = vadd.f32 1.4214138, %v1461_v59  ;;  %v4328_v50 = vpop.eup %3096  ;;  %v2089_v5 = vmul.f32 1.442695, %v1974_v34  ;;  %v1943_v1 = vmul.f32 %v1879_v16, %v983_v20 }
 0x202   :  { %v2420_v41 = vsel %vm2292_vm3, %v2228_v29, %v2356_v55  ;;  %v1430_v36 = vmul.f32 %v4314_v27, %v1366_v2  ;;  %v1334_v23 = vmul.f32 1.0614054, %v4328_v50  ;;  %3104 = vrcp.f32 %v1143_v57  ;;  %v4345_v2 = vpop.f32.mrb[31].mxu0 }
 0x203   :  { %v2484_v11 = vadd.f32 1.0, %v2420_v41  ;;  %v2133_v52 = vmul.f32 %v3095_v49, %v1813_v30  ;;  %v1589_v0 = vmul.f32 %v4301_v63, %v1525_v4  ;;  %v4336_v13 = vand.u32 2147483647, %v4326_v12  ;;  %4918 = vst [vmem:[#allocation8_spill] sm:$0xff] %v4345_v2  ;;  %v4919_v49 = vld [vmem:[#allocation5_spill] sm:$0xff] }
 0x204   :  { %v1494_v44 = vadd.f32 1.4214138, %v1430_v36  ;;  %vm2261_vm4 = vcmp.ge.f32.partialorder %v4190_v43, 0.0  ;;  %v1398_v29 = vadd.f32 -1.4531521, %v1334_v23  ;;  %v1975_v60 = vmul.f32 %v1911_v3, %v1015_v56  ;;  %v3099_v34 = vpop.eup %3098 }
 0x205   :  { %v2548_v6 = vmul.f32 %v2484_v11, %v4272_v46  ;;  %v1653_v22 = vadd.f32 -0.28449672, %v1589_v0  ;;  %v2197_v45 = vsub.f32 1.0, %v2133_v52  ;;  %v4341_v59 = vmul.f32 0.5, %v4208_v51 }
 0x206   :  { %v1558_v55 = vmul.f32 %v4314_v27, %v1494_v44  ;;  %v1048_v20 = vmul.f32 0.3275911, %v4336_v13  ;;  %v1462_v46 = vmul.f32 %v4328_v50, %v1398_v29  ;;  %v4351_v30 = vadd.f32 %v3338_v39, %v4919_v49 }
 0x207   :  { %v2879_v16 = vpack.c.bf16 %v2548_v6, %v2547_v24  ;;  %v1717_v57 = vmul.f32 %v4301_v63, %v1653_v22  ;;  %v4354_v56 = vmul.f32 0.5, %v4223_v61  ;;  %v2027_v4 = vmul.f32 1.442695, %v1943_v1 }
 0x208   :  { %v1622_v51 = vadd.f32 -0.28449672, %v1558_v55  ;;  %v1112_v3 = vadd.f32 1.0, %v1048_v20  ;;  %v1526_v36 = vadd.f32 1.4214138, %v1462_v46  ;;  %3106 = vpow2.f32 %v2089_v5 }
 0x209   :  { %v4356_v41 = vpop.eup %3100  ;;  %2779 = vst [vmem:[%s4892_s3 + $0xc0] sm:$0xff] %v2879_v16  ;;  %v1781_v24 = vadd.f32 0.2548296, %v1717_v57  ;;  %v2091_v11 = vmul.f32 1.442695, %v1975_v60  ;;  %v2325_v52 = vsub.f32 0.0, %v2197_v45 }
 0x20a   :  { %v1686_v0 = vmul.f32 %v4314_v27, %v1622_v51  ;;  %v1303_v23 = vmul.f32 1.0614054, %v4356_v41  ;;  %3108 = vrcp.f32 %v1112_v3  ;;  %vm2293_vm5 = vcmp.ge.f32.partialorder %v4233_v62, 0.0  ;;  %v3103_v6 = vpop.eup %3102  ;;  %v4920_v60 = vld [vmem:[#allocation6_spill] sm:$0xff]  ;;  %v4378_v57 = vpop.f32.mrb[31].mxu1 }
 0x20b   :  { %v1845_v61 = vmul.f32 %v4301_v63, %v1781_v24  ;;  %v1590_v44 = vmul.f32 %v4328_v50, %v1526_v36  ;;  %v4367_v1 = vmul.f32 0.70710677, %v4351_v30  ;;  %v4370_v5 = vmul.f32 0.5, %v4240_v47  ;;  %4921 = vst [vmem:[#allocation9_spill] sm:$0xff] %v4378_v57 }
 0x20c   :  { %v1750_v22 = vadd.f32 0.2548296, %v1686_v0  ;;  %v1367_v29 = vadd.f32 -1.4531521, %v1303_v23  ;;  %v4374_v55 = vadd.f32 %v3336_v38, %v4920_v60  ;;  %vm2262_vm6 = vcmp.ge.f32.partialorder %v4250_v17, 0.0  ;;  %v4380_v46 = vpop.eup %3104 }
 0x20d   :  { %v2165_v20 = vmul.f32 %v3099_v34, %v1845_v61  ;;  %v1654_v63 = vadd.f32 -0.28449672, %v1590_v44  ;;  %3110 = vpow2.f32 %v2027_v4  ;;  %v1016_v16 = vand.u32 2147483647, %v4367_v1 }
 0x20e   :  { %v2389_v47 = vsel %vm2261_vm4, %v2197_v45, %v2325_v52  ;;  %v1814_v49 = vmul.f32 %v4314_v27, %v1750_v22  ;;  %v1431_v51 = vmul.f32 %v4356_v41, %v1367_v29  ;;  %3112 = vpow2.f32 %v2091_v11 }
 0x20f   :  { %v2229_v3 = vsub.f32 1.0, %v2165_v20  ;;  %v1718_v34 = vmul.f32 %v4328_v50, %v1654_v63  ;;  %v1335_v24 = vmul.f32 1.0614054, %v4380_v46  ;;  %v1080_v4 = vmul.f32 0.3275911, %v1016_v16 }
 0x210   :  { %v2134_v36 = vmul.f32 %v3103_v6, %v1814_v49  ;;  %v1495_v0 = vadd.f32 1.4214138, %v1431_v51  ;;  %v1880_v23 = vsub.f32 0.0, %v4336_v13  ;;  %v4390_v61 = vmul.f32 0.70710677, %v4374_v55 }
 0x211   :  { %v2357_v43 = vsub.f32 0.0, %v2229_v3  ;;  %v1782_v45 = vadd.f32 0.2548296, %v1718_v34  ;;  %v1399_v52 = vadd.f32 -1.4531521, %v1335_v24  ;;  %v1144_v27 = vadd.f32 1.0, %v1080_v4 }
 0x212   :  { %v2453_v44 = vadd.f32 1.0, %v2389_v47  ;;  %v2198_v22 = vsub.f32 1.0, %v2134_v36  ;;  %v1559_v11 = vmul.f32 %v4356_v41, %v1495_v0  ;;  %v4394_v29 = vand.u32 2147483647, %v4390_v61  ;;  %v3107_v60 = vpop.eup %3106 }
 0x213   :  { %v1846_v6 = vmul.f32 %v4328_v50, %v1782_v45  ;;  %vm2294_vm7 = vcmp.ge.f32.partialorder %v4262_v54, 0.0  ;;  %v1463_v20 = vmul.f32 %v4380_v46, %v1399_v52  ;;  %3114 = vrcp.f32 %v1144_v27 }
 0x214   :  { %v4399_v63 = vpop.eup %3108  ;;  %v2421_v49 = vsel %vm2293_vm5, %v2229_v3, %v2357_v43  ;;  %v2326_v47 = vsub.f32 0.0, %v2198_v22  ;;  %v1623_v51 = vadd.f32 -0.28449672, %v1559_v11  ;;  %v1944_v34 = vmul.f32 %v1880_v23, %v4336_v13 }
 0x215   :  { %v2166_v24 = vmul.f32 %v3107_v60, %v1846_v6  ;;  %v1527_v4 = vadd.f32 1.4214138, %v1463_v20  ;;  %v1304_v36 = vmul.f32 1.0614054, %v4399_v63  ;;  %v1049_v50 = vmul.f32 0.3275911, %v4394_v29 }
 0x216   :  { %v2517_v0 = vmul.f32 %v2453_v44, %v4297_v7  ;;  %v2390_v45 = vsel %vm2262_vm6, %v2198_v22, %v2326_v47  ;;  %v1687_v52 = vmul.f32 %v4356_v41, %v1623_v51  ;;  %v1912_v27 = vsub.f32 0.0, %v1016_v16  ;;  %v4922_v51 = vld [vmem:[#allocation7_spill] sm:$0xff] }
 0x217   :  { %v3111_v62 = vpop.eup %3110  ;;  %v2454_v3 = vadd.f32 1.0, %v2390_v45  ;;  %v2230_v43 = vsub.f32 1.0, %v2166_v24  ;;  %v1591_v11 = vmul.f32 %v4380_v46, %v1527_v4  ;;  %v1368_v13 = vadd.f32 -1.4531521, %v1304_v36 }
 0x218   :  { %v3113_v23 = vpop.eup %3112  ;;  %v2485_v60 = vadd.f32 1.0, %v2421_v49  ;;  %v1751_v6 = vadd.f32 0.2548296, %v1687_v52  ;;  %v2029_v20 = vmul.f32 1.442695, %v1944_v34  ;;  %v1113_v57 = vadd.f32 1.0, %v1049_v50 }
 0x219   :  { %v2518_v2 = vmul.f32 %v2454_v3, %v4354_v56  ;;  %v2358_v7 = vsub.f32 0.0, %v2230_v43  ;;  %v1655_v44 = vadd.f32 -0.28449672, %v1591_v11  ;;  %v1432_v17 = vmul.f32 %v4399_v63, %v1368_v13 }
 0x21a   :  { %v1815_v22 = vmul.f32 %v4356_v41, %v1751_v6  ;;  %v1976_v47 = vmul.f32 %v1912_v27, %v1016_v16  ;;  %3116 = vrcp.f32 %v1113_v57  ;;  %v4416_v24 = vadd.f32 %v3336_v38, %v4922_v51 }
 0x21b   :  { %v2864_v4 = vpack.c.bf16 %v2518_v2, %v2517_v0  ;;  %v2422_v49 = vsel %vm2294_vm7, %v2230_v43, %v2358_v7  ;;  %v1719_v34 = vmul.f32 %v4380_v46, %v1655_v44  ;;  %v1496_v36 = vadd.f32 1.4214138, %v1432_v17 }
 0x21c   :  { %v2549_v56 = vmul.f32 %v2485_v60, %v4341_v59  ;;  %v2486_v50 = vadd.f32 1.0, %v2422_v49  ;;  %v2135_v45 = vmul.f32 %v3111_v62, %v1815_v22  ;;  %3118 = vpow2.f32 %v2029_v20 }
 0x21d   :  { %v4422_v52 = vpop.eup %3114  ;;  %2764 = vst [vmem:[%s4892_s3 + $0x48] sm:$0xff] %v2864_v4  ;;  %v1783_v41 = vadd.f32 0.2548296, %v1719_v34  ;;  %v1560_v2 = vmul.f32 %v4399_v63, %v1496_v36  ;;  %v4429_v54 = vmul.f32 0.70710677, %v4416_v24  ;;  %v4435_v0 = vadd.f32 %v3338_v39, %v3951_v32 }
 0x21e   :  { %v2550_v16 = vmul.f32 %v2486_v50, %v4370_v5  ;;  %v2199_v57 = vsub.f32 1.0, %v2135_v45  ;;  %v1336_v59 = vmul.f32 1.0614054, %v4422_v52  ;;  %v2093_v3 = vmul.f32 1.442695, %v1976_v47 }
 0x21f   :  { %v1847_v27 = vmul.f32 %v4380_v46, %v1783_v41  ;;  %v1624_v62 = vadd.f32 -0.28449672, %v1560_v2  ;;  %v1017_v43 = vand.u32 2147483647, %v4429_v54  ;;  %v1881_v60 = vsub.f32 0.0, %v4394_v29 }
 0x220   :  { %v2880_v11 = vpack.c.bf16 %v2550_v16, %v2549_v56  ;;  %v1400_v13 = vadd.f32 -1.4531521, %v1336_v59  ;;  %v2327_v6 = vsub.f32 0.0, %v2199_v57  ;;  %v855_v32 = vmul.f32 0.5, %v4283_v26 }
 0x221   :  { %v2167_v20 = vmul.f32 %v3113_v23, %v1847_v27  ;;  %v1688_v5 = vmul.f32 %v4399_v63, %v1624_v62  ;;  %v1081_v7 = vmul.f32 0.3275911, %v1017_v43  ;;  %v4447_v44 = vmul.f32 0.70710677, %v4435_v0 }
 0x222   :  { %2780 = vst [vmem:[%s4892_s3 + $0xc8] sm:$0xff] %v2880_v11  ;;  %v1464_v46 = vmul.f32 %v4422_v52, %v1400_v13  ;;  %vm2263_vm8 = vcmp.ge.f32.partialorder %v4287_v48, 0.0  ;;  %3120 = vpow2.f32 %v2093_v3  ;;  %v1945_v4 = vmul.f32 %v1881_v60, %v4394_v29 }
 0x223   :  { %v1752_v17 = vadd.f32 0.2548296, %v1688_v5  ;;  %v1145_v22 = vadd.f32 1.0, %v1081_v7  ;;  %v2231_v47 = vsub.f32 1.0, %v2167_v20  ;;  %v986_v49 = vand.u32 2147483647, %v4447_v44 }
 0x224   :  { %v4450_v23 = vpop.eup %3116  ;;  %v1528_v51 = vadd.f32 1.4214138, %v1464_v46  ;;  %v2391_v34 = vsel %vm2263_vm8, %v2199_v57, %v2327_v6  ;;  %v1913_v56 = vsub.f32 0.0, %v1017_v43  ;;  %v4459_v41 = vadd.f32 %v3338_v39, %v3964_v8 }
 0x225   :  { %v1816_v26 = vmul.f32 %v4399_v63, %v1752_v17  ;;  %v1305_v36 = vmul.f32 1.0614054, %v4450_v23  ;;  %3122 = vrcp.f32 %v1145_v22  ;;  %v1050_v45 = vmul.f32 0.3275911, %v986_v49 }
 0x226   :  { %v3119_v50 = vpop.eup %3118  ;;  %v1592_v48 = vmul.f32 %v4422_v52, %v1528_v51  ;;  %v4462_v2 = vmul.f32 0.5, %v4291_v58  ;;  %vm2295_vm9 = vcmp.ge.f32.partialorder %v4305_v19, 0.0  ;;  %v2359_v63 = vsub.f32 0.0, %v2231_v47 }
 0x227   :  { %v2136_v29 = vmul.f32 %v3119_v50, %v1816_v26  ;;  %v1369_v16 = vadd.f32 -1.4531521, %v1305_v36  ;;  %v2031_v59 = vmul.f32 1.442695, %v1945_v4  ;;  %v1114_v27 = vadd.f32 1.0, %v1050_v45 }
 0x228   :  { %v1656_v57 = vadd.f32 -0.28449672, %v1592_v48  ;;  %v2455_v62 = vadd.f32 1.0, %v2391_v34  ;;  %v856_v3 = vmul.f32 0.5, %v4319_v15  ;;  %v1977_v60 = vmul.f32 %v1913_v56, %v1017_v43 }
 0x229   :  { %v2200_v11 = vsub.f32 1.0, %v2136_v29  ;;  %v1433_v13 = vmul.f32 %v4450_v23, %v1369_v16  ;;  %3124 = vrcp.f32 %v1114_v27  ;;  %v4469_v58 = vmul.f32 0.70710677, %v4459_v41 }
 0x22a   :  { %v1720_v8 = vmul.f32 %v4422_v52, %v1656_v57  ;;  %vm2264_vm10 = vcmp.ge.f32.partialorder %v4326_v12, 0.0  ;;  %v4474_v5 = vadd.f32 %v3336_v38, %v4004_v42  ;;  %v2423_v15 = vsel %vm2295_vm9, %v2231_v47, %v2359_v63 }
 0x22b   :  { %v2328_v6 = vsub.f32 0.0, %v2200_v11  ;;  %v1497_v20 = vadd.f32 1.4214138, %v1433_v13  ;;  %3126 = vpow2.f32 %v2031_v59  ;;  %v1018_v46 = vand.u32 2147483647, %v4469_v58 }
 0x22c   :  { %v1784_v7 = vadd.f32 0.2548296, %v1720_v8  ;;  %v3121_v43 = vpop.eup %3120  ;;  %v2519_v17 = vmul.f32 %v2455_v62, %v855_v32  ;;  %v1882_v4 = vsub.f32 0.0, %v986_v49  ;;  %v2095_v26 = vmul.f32 1.442695, %v1977_v60 }
 0x22d   :  { %v2392_v22 = vsel %vm2264_vm10, %v2200_v11, %v2328_v6  ;;  %v1561_v51 = vmul.f32 %v4450_v23, %v1497_v20  ;;  %v1082_v36 = vmul.f32 0.3275911, %v1018_v46  ;;  %v2487_v42 = vadd.f32 1.0, %v2423_v15 }
 0x22e   :  { %v2456_v12 = vadd.f32 1.0, %v2392_v22  ;;  %v1848_v34 = vmul.f32 %v4422_v52, %v1784_v7  ;;  %v888_v56 = vmul.f32 0.5, %v4351_v30  ;;  %v4483_v47 = vmul.f32 0.70710677, %v4474_v5 }
 0x22f   :  { %v1625_v19 = vadd.f32 -0.28449672, %v1561_v51  ;;  %v4485_v50 = vpop.eup %3122  ;;  %v1146_v45 = vadd.f32 1.0, %v1082_v36  ;;  %v4489_v29 = vadd.f32 %v3336_v38, %v4006_v25  ;;  %v1946_v63 = vmul.f32 %v1882_v4, %v986_v49 }
 0x230   :  { %v2520_v48 = vmul.f32 %v2456_v12, %v856_v3  ;;  %v2168_v32 = vmul.f32 %v3121_v43, %v1848_v34  ;;  %v1337_v16 = vmul.f32 1.0614054, %v4485_v50  ;;  %v987_v30 = vand.u32 2147483647, %v4483_v47 }
 0x231   :  { %v1689_v52 = vmul.f32 %v4450_v23, %v1625_v19  ;;  %3128 = vrcp.f32 %v1146_v45  ;;  %v1914_v27 = vsub.f32 0.0, %v1018_v46  ;;  %vm2296_vm11 = vcmp.ge.f32.partialorder %v4367_v1, 0.0 }
 0x232   :  { %v2865_v57 = vpack.c.bf16 %v2520_v48, %v2519_v17  ;;  %v2232_v59 = vsub.f32 1.0, %v2168_v32  ;;  %v1401_v11 = vadd.f32 -1.4531521, %v1337_v16  ;;  %v1051_v3 = vmul.f32 0.3275911, %v987_v30 }
 0x233   :  { %v1753_v62 = vadd.f32 0.2548296, %v1689_v52  ;;  %v4494_v13 = vpop.eup %3124  ;;  %3130 = vpow2.f32 %v2095_v26  ;;  %v4501_v49 = vmul.f32 0.70710677, %v4489_v29  ;;  %v2551_v7 = vmul.f32 %v2487_v42, %v4462_v2 }
 0x234   :  { %2765 = vst [vmem:[%s4892_s3 + $0x50] sm:$0xff] %v2865_v57  ;;  %v2360_v25 = vsub.f32 0.0, %v2232_v59  ;;  %v1465_v60 = vmul.f32 %v4485_v50, %v1401_v11  ;;  %v1306_v6 = vmul.f32 1.0614054, %v4494_v13  ;;  %v1115_v20 = vadd.f32 1.0, %v1051_v3 }
 0x235   :  { %v1817_v8 = vmul.f32 %v4450_v23, %v1753_v62  ;;  %v3127_v15 = vpop.eup %3126  ;;  %v2033_v17 = vmul.f32 1.442695, %v1946_v63  ;;  %v1019_v22 = vand.u32 2147483647, %v4501_v49  ;;  %v1978_v12 = vmul.f32 %v1914_v27, %v1018_v46 }
 0x236   :  { %v2424_v43 = vsel %vm2296_vm11, %v2232_v59, %v2360_v25  ;;  %v1529_v51 = vadd.f32 1.4214138, %v1465_v60  ;;  %v1370_v4 = vadd.f32 -1.4531521, %v1306_v6  ;;  %3132 = vrcp.f32 %v1115_v20 }
 0x237   :  { %v2488_v1 = vadd.f32 1.0, %v2424_v43  ;;  %v2137_v34 = vmul.f32 %v3127_v15, %v1817_v8  ;;  %v1083_v26 = vmul.f32 0.3275911, %v1019_v22  ;;  %v4510_v23 = vadd.f32 %v3338_v39, %v4031_v40 }
 0x238   :  { %v1593_v19 = vmul.f32 %v4485_v50, %v1529_v51  ;;  %v1434_v2 = vmul.f32 %v4494_v13, %v1370_v4  ;;  %v1883_v42 = vsub.f32 0.0, %v987_v30  ;;  %v4515_v48 = vmul.f32 0.5, %v4374_v55 }
 0x239   :  { %v2552_v36 = vmul.f32 %v2488_v1, %v888_v56  ;;  %v4518_v32 = vmul.f32 0.5, %v4416_v24  ;;  %3134 = vpow2.f32 %v2033_v17  ;;  %v1147_v46 = vadd.f32 1.0, %v1083_v26 }
 0x23a   :  { %vm2265_vm12 = vcmp.ge.f32.partialorder %v4390_v61, 0.0  ;;  %v1657_v52 = vadd.f32 -0.28449672, %v1593_v19  ;;  %v1498_v40 = vadd.f32 1.4214138, %v1434_v2  ;;  %v2201_v63 = vsub.f32 1.0, %v2137_v34 }
 0x23b   :  { %v2881_v45 = vpack.c.bf16 %v2552_v36, %v2551_v7  ;;  %v2097_v16 = vmul.f32 1.442695, %v1978_v12  ;;  %v4521_v56 = vpop.eup %3128  ;;  %3136 = vrcp.f32 %v1147_v46  ;;  %v4524_v57 = vmul.f32 0.70710677, %v4510_v23 }
 0x23c   :  { %v4528_v55 = vadd.f32 %v3338_v39, %v4061_v28  ;;  %v1721_v24 = vmul.f32 %v4485_v50, %v1657_v52  ;;  %v1562_v59 = vmul.f32 %v4494_v13, %v1498_v40  ;;  %v1338_v27 = vmul.f32 1.0614054, %v4521_v56 }
 0x23d   :  { %2781 = vst [vmem:[%s4892_s3 + $0xd0] sm:$0xff] %v2881_v45  ;;  %v1947_v62 = vmul.f32 %v1883_v42, %v987_v30  ;;  %v3131_v11 = vpop.eup %3130  ;;  %v4537_v3 = vmul.f32 0.5, %v4435_v0  ;;  %v4540_v25 = vmul.f32 0.5, %v4459_v41  ;;  %v1915_v28 = vsub.f32 0.0, %v1019_v22 }
 0x23e   :  { %v988_v8 = vand.u32 2147483647, %v4524_v57  ;;  %v1785_v60 = vadd.f32 0.2548296, %v1721_v24  ;;  %v1626_v6 = vadd.f32 -0.28449672, %v1562_v59  ;;  %3138 = vpow2.f32 %v2097_v16 }
 0x23f   :  { %v1402_v20 = vadd.f32 -1.4531521, %v1338_v27  ;;  %v2329_v15 = vsub.f32 0.0, %v2201_v63  ;;  %v4544_v43 = vmul.f32 0.70710677, %v4528_v55  ;;  %v1979_v51 = vmul.f32 %v1915_v28, %v1019_v22 }
 0x240   :  { %v1052_v7 = vmul.f32 0.3275911, %v988_v8  ;;  %v1849_v30 = vmul.f32 %v4485_v50, %v1785_v60  ;;  %v1690_v0 = vmul.f32 %v4494_v13, %v1626_v6  ;;  %v2035_v41 = vmul.f32 1.442695, %v1947_v62  ;;  %v4549_v1 = vpop.eup %3132 }
 0x241   :  { %v1466_v17 = vmul.f32 %v4521_v56, %v1402_v20  ;;  %v4552_v12 = vand.u32 2147483647, %v4544_v43  ;;  %v4556_v34 = vadd.f32 %v3336_v38, %v4074_v14  ;;  %v1307_v50 = vmul.f32 1.0614054, %v4549_v1 }
 0x242   :  { %v1116_v4 = vadd.f32 1.0, %v1052_v7  ;;  %v2169_v26 = vmul.f32 %v3131_v11, %v1849_v30  ;;  %v1754_v36 = vadd.f32 0.2548296, %v1690_v0  ;;  %v2393_v42 = vsel %vm2265_vm12, %v2201_v63, %v2329_v15 }
 0x243   :  { %v1530_v19 = vadd.f32 1.4214138, %v1466_v17  ;;  %v3135_v2 = vpop.eup %3134  ;;  %vm2266_vm13 = vcmp.ge.f32.partialorder %v4447_v44, 0.0  ;;  %v4563_v22 = vmul.f32 0.5, %v4474_v5  ;;  %v1084_v46 = vmul.f32 0.3275911, %v4552_v12 }
 0x244   :  { %3140 = vrcp.f32 %v1116_v4  ;;  %v1818_v14 = vmul.f32 %v4494_v13, %v1754_v36  ;;  %v1371_v52 = vadd.f32 -1.4531521, %v1307_v50  ;;  %v1884_v40 = vsub.f32 0.0, %v988_v8 }
 0x245   :  { %v1594_v45 = vmul.f32 %v4521_v56, %v1530_v19  ;;  %v4568_v16 = vpop.eup %3136  ;;  %vm2297_vm14 = vcmp.ge.f32.partialorder %v4429_v54, 0.0  ;;  %3142 = vpow2.f32 %v2035_v41  ;;  %v2099_v61 = vmul.f32 1.442695, %v1979_v51 }
 0x246   :  { %v1148_v63 = vadd.f32 1.0, %v1084_v46  ;;  %v4572_v24 = vmul.f32 0.70710677, %v4556_v34  ;;  %v2233_v5 = vsub.f32 1.0, %v2169_v26  ;;  %v2138_v59 = vmul.f32 %v3135_v2, %v1818_v14 }
 0x247   :  { %v1658_v27 = vadd.f32 -0.28449672, %v1594_v45  ;;  %v1435_v62 = vmul.f32 %v4549_v1, %v1371_v52  ;;  %v2457_v13 = vadd.f32 1.0, %v2393_v42  ;;  %v1339_v11 = vmul.f32 1.0614054, %v4568_v16 }
 0x248   :  { %3144 = vrcp.f32 %v1148_v63  ;;  %v4577_v28 = vand.u32 2147483647, %v4572_v24  ;;  %v2202_v60 = vsub.f32 1.0, %v2138_v59  ;;  %v1948_v15 = vmul.f32 %v1884_v40, %v988_v8  ;;  %v3139_v7 = vpop.eup %3138 }
 0x249   :  { %v1722_v6 = vmul.f32 %v4521_v56, %v1658_v27  ;;  %v1499_v20 = vadd.f32 1.4214138, %v1435_v62  ;;  %v4581_v30 = vmul.f32 0.5, %v4489_v29  ;;  %v1403_v0 = vadd.f32 -1.4531521, %v1339_v11 }
 0x24a   :  { %3146 = vpow2.f32 %v2099_v61  ;;  %v1053_v17 = vmul.f32 0.3275911, %v4577_v28  ;;  %v2361_v41 = vsub.f32 0.0, %v2233_v5  ;;  %v2330_v51 = vsub.f32 0.0, %v2202_v60 }
 0x24b   :  { %v1786_v4 = vadd.f32 0.2548296, %v1722_v6  ;;  %v1563_v26 = vmul.f32 %v4549_v1, %v1499_v20  ;;  %v2521_v36 = vmul.f32 %v2457_v13, %v4515_v48  ;;  %vm2298_vm15 = vcmp.ge.f32.partialorder %v4469_v58, 0.0 }
 0x24c   :  { %v1467_v19 = vmul.f32 %v4568_v16, %v1403_v0  ;;  %v1916_v8 = vsub.f32 0.0, %v4552_v12  ;;  %v1117_v50 = vadd.f32 1.0, %v1053_v17  ;;  %v2394_v29 = vsel %vm2266_vm13, %v2202_v60, %v2330_v51 }
 0x24d   :  { %v1850_v2 = vmul.f32 %v4521_v56, %v1786_v4  ;;  %v1627_v42 = vadd.f32 -0.28449672, %v1563_v26  ;;  %v2037_v46 = vmul.f32 1.442695, %v1948_v15  ;;  %v2458_v45 = vadd.f32 1.0, %v2394_v29 }
 0x24e   :  { %v4592_v14 = vpop.eup %3140  ;;  %v1531_v52 = vadd.f32 1.4214138, %v1467_v19  ;;  %3148 = vrcp.f32 %v1117_v50  ;;  %v4596_v48 = vadd.f32 %v3336_v38, %v4114_v33  ;;  %v2425_v40 = vsel %vm2297_vm14, %v2233_v5, %v2361_v41 }
 0x24f   :  { %v2170_v61 = vmul.f32 %v3139_v7, %v1850_v2  ;;  %v1691_v44 = vmul.f32 %v4549_v1, %v1627_v42  ;;  %v1308_v63 = vmul.f32 1.0614054, %v4592_v14  ;;  %v3143_v56 = vpop.eup %3142  ;;  %v2522_v59 = vmul.f32 %v2458_v45, %v4537_v3 }
 0x250   :  { %v1595_v27 = vmul.f32 %v4568_v16, %v1531_v52  ;;  %v1980_v62 = vmul.f32 %v1916_v8, %v4552_v12  ;;  %v4606_v13 = vmul.f32 0.70710677, %v4596_v48  ;;  %3150 = vpow2.f32 %v2037_v46 }
 0x251   :  { %v2234_v33 = vsub.f32 1.0, %v2170_v61  ;;  %v1755_v11 = vadd.f32 0.2548296, %v1691_v44  ;;  %v1372_v60 = vadd.f32 -1.4531521, %v1308_v63  ;;  %v2489_v5 = vadd.f32 1.0, %v2425_v40 }
 0x252   :  { %v4608_v54 = vpop.eup %3144  ;;  %v2866_v6 = vpack.c.bf16 %v2522_v59, %v2521_v36  ;;  %v1659_v20 = vadd.f32 -0.28449672, %v1595_v27  ;;  %v1021_v15 = vand.u32 2147483647, %v4606_v13  ;;  %v2101_v51 = vmul.f32 1.442695, %v1980_v62 }
 0x253   :  { %v2362_v7 = vsub.f32 0.0, %v2234_v33  ;;  %v1819_v3 = vmul.f32 %v4549_v1, %v1755_v11  ;;  %v1436_v0 = vmul.f32 %v4592_v14, %v1372_v60  ;;  %v1340_v12 = vmul.f32 1.0614054, %v4608_v54 }
 0x254   :  { %v3147_v17 = vpop.eup %3146  ;;  %2766 = vst [vmem:[%s4892_s3 + $0x58] sm:$0xff] %v2866_v6  ;;  %v1723_v41 = vmul.f32 %v4568_v16, %v1659_v20  ;;  %v1885_v4 = vsub.f32 0.0, %v4577_v28  ;;  %v1085_v26 = vmul.f32 0.3275911, %v1021_v15  ;;  %v2553_v50 = vmul.f32 %v2489_v5, %v4518_v32 }
 0x255   :  { %v2426_v36 = vsel %vm2298_vm15, %v2234_v33, %v2362_v7  ;;  %v2139_v19 = vmul.f32 %v3143_v56, %v1819_v3  ;;  %v1500_v1 = vadd.f32 1.4214138, %v1436_v0  ;;  %v1404_v8 = vadd.f32 -1.4531521, %v1340_v12 }
 0x256   :  { %v2490_v29 = vadd.f32 1.0, %v2426_v36  ;;  %v1787_v2 = vadd.f32 0.2548296, %v1723_v41  ;;  %v1149_v42 = vadd.f32 1.0, %v1085_v26  ;;  %v4626_v40 = vadd.f32 %v3338_v39, %v4134_v21 }
 0x257   :  { %v2203_v46 = vsub.f32 1.0, %v2139_v19  ;;  %v1564_v45 = vmul.f32 %v4592_v14, %v1500_v1  ;;  %v1468_v52 = vmul.f32 %v4608_v54, %v1404_v8  ;;  %v1949_v32 = vmul.f32 %v1885_v4, %v4577_v28 }
 0x258   :  { %v4628_v61 = vpop.eup %3148  ;;  %v2554_v58 = vmul.f32 %v2490_v29, %v4540_v25  ;;  %v1851_v44 = vmul.f32 %v4568_v16, %v1787_v2  ;;  %3152 = vrcp.f32 %v1149_v42  ;;  %vm2267_vm0 = vcmp.ge.f32.partialorder %v4483_v47, 0.0 }
 0x259   :  { %v1628_v63 = vadd.f32 -0.28449672, %v1564_v45  ;;  %v1532_v56 = vadd.f32 1.4214138, %v1468_v52  ;;  %3154 = vpow2.f32 %v2101_v51  ;;  %v1309_v62 = vmul.f32 1.0614054, %v4628_v61 }
 0x25a   :  { %v2882_v59 = vpack.c.bf16 %v2554_v58, %v2553_v50  ;;  %v2171_v27 = vmul.f32 %v3147_v17, %v1851_v44  ;;  %v1917_v21 = vsub.f32 0.0, %v1021_v15  ;;  %v3151_v33 = vpop.eup %3150  ;;  %v2331_v11 = vsub.f32 0.0, %v2203_v46 }
 0x25b   :  { %vm2299_vm1 = vcmp.ge.f32.partialorder %v4501_v49, 0.0  ;;  %v1692_v25 = vmul.f32 %v4592_v14, %v1628_v63  ;;  %v1596_v16 = vmul.f32 %v4608_v54, %v1532_v56  ;;  %v4639_v28 = vmul.f32 0.70710677, %v4626_v40 }
 0x25c   :  { %2782 = vst [vmem:[%s4892_s3 + $0xd8] sm:$0xff] %v2882_v59  ;;  %v2235_v60 = vsub.f32 1.0, %v2171_v27  ;;  %v1373_v5 = vadd.f32 -1.4531521, %v1309_v62  ;;  %v2039_v6 = vmul.f32 1.442695, %v1949_v32  ;;  %v4646_v20 = vadd.f32 %v3338_v39, %v4180_v31 }
 0x25d   :  { %v1756_v7 = vadd.f32 0.2548296, %v1692_v25  ;;  %v1660_v3 = vadd.f32 -0.28449672, %v1596_v16  ;;  %v990_v0 = vand.u32 2147483647, %v4639_v28  ;;  %v1981_v51 = vmul.f32 %v1917_v21, %v1021_v15 }
 0x25e   :  { %v860_v12 = vmul.f32 0.5, %v4510_v23  ;;  %v4651_v17 = vmul.f32 0.5, %v4528_v55  ;;  %v1437_v41 = vmul.f32 %v4628_v61, %v1373_v5  ;;  %v2395_v4 = vsel %vm2267_vm0, %v2203_v46, %v2331_v11 }
 0x25f   :  { %v1820_v26 = vmul.f32 %v4592_v14, %v1756_v7  ;;  %v1724_v31 = vmul.f32 %v4608_v54, %v1660_v3  ;;  %v1054_v36 = vmul.f32 0.3275911, %v990_v0  ;;  %v2363_v19 = vsub.f32 0.0, %v2235_v60 }
 0x260   :  { %vm2268_vm2 = vcmp.ge.f32.partialorder %v4524_v57, 0.0  ;;  %v1501_v1 = vadd.f32 1.4214138, %v1437_v41  ;;  %v4660_v23 = vmul.f32 0.70710677, %v4646_v20  ;;  %3156 = vpow2.f32 %v2039_v6 }
 0x261   :  { %v2140_v55 = vmul.f32 %v3151_v33, %v1820_v26  ;;  %v1788_v8 = vadd.f32 0.2548296, %v1724_v31  ;;  %v1118_v50 = vadd.f32 1.0, %v1054_v36  ;;  %v2459_v47 = vadd.f32 1.0, %v2395_v4 }
 0x262   :  { %v4662_v15 = vpop.eup %3152  ;;  %vm2300_vm3 = vcmp.ge.f32.partialorder %v4544_v43, 0.0  ;;  %v1565_v14 = vmul.f32 %v4628_v61, %v1501_v1  ;;  %v1022_v29 = vand.u32 2147483647, %v4660_v23  ;;  %v4669_v2 = vadd.f32 %v3336_v38, %v4210_v9 }
 0x263   :  { %v3155_v42 = vpop.eup %3154  ;;  %v2204_v46 = vsub.f32 1.0, %v2140_v55  ;;  %v1852_v45 = vmul.f32 %v4608_v54, %v1788_v8  ;;  %v1341_v52 = vmul.f32 1.0614054, %v4662_v15  ;;  %v2103_v58 = vmul.f32 1.442695, %v1981_v51 }
 0x264   :  { %v2427_v44 = vsel %vm2299_vm1, %v2235_v60, %v2363_v19  ;;  %v1629_v32 = vadd.f32 -0.28449672, %v1565_v14  ;;  %3158 = vrcp.f32 %v1118_v50  ;;  %v1086_v63 = vmul.f32 0.3275911, %v1022_v29 }
 0x265   :  { %v2332_v56 = vsub.f32 0.0, %v2204_v46  ;;  %v2172_v59 = vmul.f32 %v3155_v42, %v1852_v45  ;;  %v1405_v27 = vadd.f32 -1.4531521, %v1341_v52  ;;  %v1886_v62 = vsub.f32 0.0, %v990_v0 }
 0x266   :  { %v2523_v9 = vmul.f32 %v2459_v47, %v4563_v22  ;;  %v1693_v21 = vmul.f32 %v4628_v61, %v1629_v32  ;;  %v1150_v33 = vadd.f32 1.0, %v1086_v63  ;;  %v4678_v54 = vmul.f32 0.70710677, %v4669_v2 }
 0x267   :  { %v2491_v11 = vadd.f32 1.0, %v2427_v44  ;;  %v2396_v49 = vsel %vm2268_vm2, %v2204_v46, %v2332_v56  ;;  %v2236_v25 = vsub.f32 1.0, %v2172_v59  ;;  %v1469_v16 = vmul.f32 %v4662_v15, %v1405_v27 }
 0x268   :  { %v2460_v60 = vadd.f32 1.0, %v2396_v49  ;;  %v1757_v5 = vadd.f32 0.2548296, %v1693_v21  ;;  %3160 = vrcp.f32 %v1150_v33  ;;  %v991_v6 = vand.u32 2147483647, %v4678_v54 }
 0x269   :  { %v2364_v7 = vsub.f32 0.0, %v2236_v25  ;;  %v1533_v22 = vadd.f32 1.4214138, %v1469_v16  ;;  %3162 = vpow2.f32 %v2103_v58  ;;  %v1950_v3 = vmul.f32 %v1886_v62, %v990_v0 }
 0x26a   :  { %v2524_v41 = vmul.f32 %v2460_v60, %v860_v12  ;;  %v1821_v51 = vmul.f32 %v4628_v61, %v1757_v5  ;;  %v1918_v4 = vsub.f32 0.0, %v1022_v29  ;;  %v1055_v26 = vmul.f32 0.3275911, %v991_v6  ;;  %v3157_v31 = vpop.eup %3156 }
 0x26b   :  { %v2555_v57 = vmul.f32 %v2491_v11, %v4581_v30  ;;  %v2428_v36 = vsel %vm2300_vm3, %v2236_v25, %v2364_v7  ;;  %v1597_v19 = vmul.f32 %v4662_v15, %v1533_v22  ;;  %v4691_v1 = vadd.f32 %v3336_v38, %v4216_v37 }
 0x26c   :  { %v2867_v55 = vpack.c.bf16 %v2524_v41, %v2523_v9  ;;  %v2492_v8 = vadd.f32 1.0, %v2428_v36  ;;  %v2141_v0 = vmul.f32 %v3157_v31, %v1821_v51  ;;  %v1119_v12 = vadd.f32 1.0, %v1055_v26 }
 0x26d   :  { %v1661_v50 = vadd.f32 -0.28449672, %v1597_v19  ;;  %v2041_v61 = vmul.f32 1.442695, %v1950_v3  ;;  %v4694_v47 = vmul.f32 0.70710677, %v4691_v1  ;;  %v1982_v30 = vmul.f32 %v1918_v4, %v1022_v29 }
 0x26e   :  { %v4696_v14 = vpop.eup %3158  ;;  %2767 = vst [vmem:[%s4892_s3 + $0x60] sm:$0xff] %v2867_v55  ;;  %v2556_v43 = vmul.f32 %v2492_v8, %v4651_v17  ;;  %3164 = vrcp.f32 %v1119_v12  ;;  %v4704_v37 = vadd.f32 %v3338_v39, %v4258_v53  ;;  %v2205_v58 = vsub.f32 1.0, %v2141_v0 }
 0x26f   :  { %v1725_v42 = vmul.f32 %v4662_v15, %v1661_v50  ;;  %v1310_v46 = vmul.f32 1.0614054, %v4696_v14  ;;  %v1023_v45 = vand.u32 2147483647, %v4694_v47  ;;  %3166 = vpow2.f32 %v2041_v61 }
 0x270   :  { %v2883_v52 = vpack.c.bf16 %v2556_v43, %v2555_v57  ;;  %v2105_v53 = vmul.f32 1.442695, %v1982_v30  ;;  %v4715_v17 = vmul.f32 0.70710677, %v4704_v37  ;;  %v1887_v9 = vsub.f32 0.0, %v991_v6 }
 0x271   :  { %v1789_v44 = vadd.f32 0.2548296, %v1725_v42  ;;  %v1374_v32 = vadd.f32 -1.4531521, %v1310_v46  ;;  %v1087_v63 = vmul.f32 0.3275911, %v1023_v45  ;;  %v4723_v49 = vadd.f32 %v3338_v39, %v4265_v35 }
 0x272   :  { %v4709_v56 = vpop.eup %3160  ;;  %2783 = vst [vmem:[%s4892_s3 + $0xe0] sm:$0xff] %v2883_v52  ;;  %v2333_v21 = vsub.f32 0.0, %v2205_v58  ;;  %v992_v11 = vand.u32 2147483647, %v4715_v17  ;;  %v1919_v5 = vsub.f32 0.0, %v1023_v45  ;;  %v861_v7 = vmul.f32 0.5, %v4556_v34 }
 0x273   :  { %v3163_v29 = vpop.eup %3162  ;;  %v1853_v59 = vmul.f32 %v4662_v15, %v1789_v44  ;;  %v1438_v27 = vmul.f32 %v4696_v14, %v1374_v32  ;;  %v1342_v62 = vmul.f32 1.0614054, %v4709_v56  ;;  %v1151_v33 = vadd.f32 1.0, %v1087_v63 }
 0x274   :  { %vm2269_vm4 = vcmp.ge.f32.partialorder %v4572_v24, 0.0  ;;  %v1056_v15 = vmul.f32 0.3275911, %v992_v11  ;;  %v4728_v22 = vmul.f32 0.5, %v4596_v48  ;;  %v1951_v51 = vmul.f32 %v1887_v9, %v991_v6 }
 0x275   :  { %v2173_v25 = vmul.f32 %v3163_v29, %v1853_v59  ;;  %v1502_v16 = vadd.f32 1.4214138, %v1438_v27  ;;  %v1406_v60 = vadd.f32 -1.4531521, %v1342_v62  ;;  %3168 = vrcp.f32 %v1151_v33 }
 0x276   :  { %v2397_v4 = vsel %vm2269_vm4, %v2205_v58, %v2333_v21  ;;  %vm2301_vm5 = vcmp.ge.f32.partialorder %v4606_v13, 0.0  ;;  %3170 = vpow2.f32 %v2105_v53  ;;  %v1120_v26 = vadd.f32 1.0, %v1056_v15 }
 0x277   :  { %v1566_v3 = vmul.f32 %v4696_v14, %v1502_v16  ;;  %v1470_v41 = vmul.f32 %v4709_v56, %v1406_v60  ;;  %v4736_v34 = vmul.f32 0.70710677, %v4723_v49  ;;  %v2237_v24 = vsub.f32 1.0, %v2173_v25 }
 0x278   :  { %v4732_v35 = vpop.eup %3164  ;;  %v1983_v48 = vmul.f32 %v1919_v5, %v1023_v45  ;;  %3172 = vrcp.f32 %v1120_v26  ;;  %v4744_v6 = vadd.f32 %v3336_v38, %v4293_v10  ;;  %v2043_v0 = vmul.f32 1.442695, %v1951_v51 }
 0x279   :  { %v1630_v31 = vadd.f32 -0.28449672, %v1566_v3  ;;  %v1534_v57 = vadd.f32 1.4214138, %v1470_v41  ;;  %v1311_v36 = vmul.f32 1.0614054, %v4732_v35  ;;  %v3167_v50 = vpop.eup %3166  ;;  %v4769_v62 = vadd.f32 %v3336_v38, %v4312_v18 }
 0x27a   :  { %v4740_v19 = vand.u32 2147483647, %v4736_v34  ;;  %v1888_v12 = vsub.f32 0.0, %v992_v11  ;;  %v4749_v61 = vmul.f32 0.5, %v4626_v40  ;;  %v4752_v43 = vmul.f32 0.5, %v4646_v20 }
 0x27b   :  { %v1694_v55 = vmul.f32 %v4696_v14, %v1630_v31  ;;  %v1598_v8 = vmul.f32 %v4709_v56, %v1534_v57  ;;  %v1375_v30 = vadd.f32 -1.4531521, %v1311_v36  ;;  %v2461_v46 = vadd.f32 1.0, %v2397_v4 }
 0x27c   :  { %v1088_v42 = vmul.f32 0.3275911, %v4740_v19  ;;  %v2365_v45 = vsub.f32 0.0, %v2237_v24  ;;  %vm2270_vm6 = vcmp.ge.f32.partialorder %v4639_v28, 0.0  ;;  %v2107_v44 = vmul.f32 1.442695, %v1983_v48 }
 0x27d   :  { %v1758_v10 = vadd.f32 0.2548296, %v1694_v55  ;;  %v1662_v52 = vadd.f32 -0.28449672, %v1598_v8  ;;  %v1439_v58 = vmul.f32 %v4732_v35, %v1375_v30  ;;  %v4758_v63 = vmul.f32 0.70710677, %v4744_v6 }
 0x27e   :  { %v1152_v32 = vadd.f32 1.0, %v1088_v42  ;;  %3174 = vpow2.f32 %v2043_v0  ;;  %v1952_v53 = vmul.f32 %v1888_v12, %v992_v11  ;;  %v2429_v9 = vsel %vm2301_vm5, %v2237_v24, %v2365_v45 }
 0x27f   :  { %v1822_v40 = vmul.f32 %v4696_v14, %v1758_v10  ;;  %v1726_v20 = vmul.f32 %v4709_v56, %v1662_v52  ;;  %v4762_v29 = vpop.eup %3168  ;;  %v1503_v59 = vadd.f32 1.4214138, %v1439_v58  ;;  %v4765_v27 = vand.u32 2147483647, %v4758_v63 }
 0x280   :  { %3176 = vrcp.f32 %v1152_v32  ;;  %v1343_v33 = vmul.f32 1.0614054, %v4762_v29  ;;  %v3171_v25 = vpop.eup %3170  ;;  %v2525_v11 = vmul.f32 %v2461_v46, %v861_v7  ;;  %vm2302_vm7 = vcmp.ge.f32.partialorder %v4660_v23, 0.0 }
 0x281   :  { %v2142_v21 = vmul.f32 %v3167_v50, %v1822_v40  ;;  %v1790_v14 = vadd.f32 0.2548296, %v1726_v20  ;;  %v1567_v16 = vmul.f32 %v4732_v35, %v1503_v59  ;;  %3178 = vpow2.f32 %v2107_v44 }
 0x282   :  { %v1057_v60 = vmul.f32 0.3275911, %v4765_v27  ;;  %v1407_v18 = vadd.f32 -1.4531521, %v1343_v33  ;;  %v2045_v15 = vmul.f32 1.442695, %v1952_v53  ;;  %v4778_v13 = vpop.eup %3172 }
 0x283   :  { %v2206_v5 = vsub.f32 1.0, %v2142_v21  ;;  %v1854_v38 = vmul.f32 %v4709_v56, %v1790_v14  ;;  %v2493_v3 = vadd.f32 1.0, %v2429_v9  ;;  %v1631_v41 = vadd.f32 -0.28449672, %v1567_v16 }
 0x284   :  { %v1121_v51 = vadd.f32 1.0, %v1057_v60  ;;  %v4781_v4 = vmul.f32 0.70710677, %v4769_v62  ;;  %v1471_v24 = vmul.f32 %v4762_v29, %v1407_v18  ;;  %v1312_v31 = vmul.f32 1.0614054, %v4778_v13  ;;  %v4923_v60 = vld [vmem:[#allocation8_spill] sm:$0xff] }
 0x285   :  { %v2334_v7 = vsub.f32 0.0, %v2206_v5  ;;  %v2174_v26 = vmul.f32 %v3171_v25, %v1854_v38  ;;  %v1695_v57 = vmul.f32 %v4732_v35, %v1631_v41  ;;  %v1920_v56 = vsub.f32 0.0, %v4740_v19 }
 0x286   :  { %3180 = vrcp.f32 %v1121_v51  ;;  %v4788_v48 = vand.u32 2147483647, %v4781_v4  ;;  %v1535_v8 = vadd.f32 1.4214138, %v1471_v24  ;;  %v1376_v0 = vadd.f32 -1.4531521, %v1312_v31 }
 0x287   :  { %v2398_v36 = vsel %vm2270_vm6, %v2206_v5, %v2334_v7  ;;  %v2238_v55 = vsub.f32 1.0, %v2174_v26  ;;  %v1759_v50 = vadd.f32 0.2548296, %v1695_v57  ;;  %3182 = vpow2.f32 %v2045_v15 }
 0x288   :  { %v2462_v12 = vadd.f32 1.0, %v2398_v36  ;;  %v1089_v30 = vmul.f32 0.3275911, %v4788_v48  ;;  %v3175_v42 = vpop.eup %3174  ;;  %v2557_v46 = vmul.f32 %v2493_v3, %v4728_v22  ;;  %v1599_v10 = vmul.f32 %v4762_v29, %v1535_v8  ;;  %v4924_v36 = vld [vmem:[#allocation9_spill] sm:$0xff] }
 0x289   :  { %v2366_v45 = vsub.f32 0.0, %v2238_v55  ;;  %v1440_v52 = vmul.f32 %v4778_v13, %v1376_v0  ;;  %v1823_v44 = vmul.f32 %v4732_v35, %v1759_v50  ;;  %v1984_v32 = vmul.f32 %v1920_v56, %v4740_v19 }
 0x28a   :  { %v4796_v58 = vpop.eup %3176  ;;  %v2526_v28 = vmul.f32 %v2462_v12, %v4749_v61  ;;  %v1153_v40 = vadd.f32 1.0, %v1089_v30  ;;  %v1663_v53 = vadd.f32 -0.28449672, %v1599_v10  ;;  %v1889_v16 = vsub.f32 0.0, %v4765_v27 }
 0x28b   :  { %v2430_v20 = vsel %vm2302_vm7, %v2238_v55, %v2366_v45  ;;  %v1504_v59 = vadd.f32 1.4214138, %v1440_v52  ;;  %v1344_v22 = vmul.f32 1.0614054, %v4796_v58  ;;  %v3179_v9 = vpop.eup %3178  ;;  %v2143_v33 = vmul.f32 %v3175_v42, %v1823_v44 }
 0x28c   :  { %v2868_v21 = vpack.c.bf16 %v2526_v28, %v2525_v11  ;;  %v2494_v14 = vadd.f32 1.0, %v2430_v20  ;;  %3184 = vrcp.f32 %v1153_v40  ;;  %v1727_v25 = vmul.f32 %v4762_v29, %v1663_v53 }
 0x28d   :  { %v1568_v61 = vmul.f32 %v4778_v13, %v1504_v59  ;;  %v1408_v35 = vadd.f32 -1.4531521, %v1344_v22  ;;  %v2109_v19 = vmul.f32 1.442695, %v1984_v32  ;;  %v4813_v11 = vadd.f32 %v3338_v39, %v4923_v60 }
 0x28e   :  { %2768 = vst [vmem:[%s4892_s3 + $0x68] sm:$0xff] %v2868_v21  ;;  %v2558_v23 = vmul.f32 %v2494_v14, %v4752_v43  ;;  %v2207_v5 = vsub.f32 1.0, %v2143_v33  ;;  %v1791_v38 = vadd.f32 0.2548296, %v1727_v25  ;;  %v863_v51 = vmul.f32 0.5, %v4669_v2 }
 0x28f   :  { %v1632_v18 = vadd.f32 -0.28449672, %v1568_v61  ;;  %v1472_v15 = vmul.f32 %v4796_v58, %v1408_v35  ;;  %v4820_v7 = vmul.f32 0.70710677, %v4813_v11  ;;  %3186 = vpow2.f32 %v2109_v19 }
 0x290   :  { %v4816_v3 = vpop.eup %3180  ;;  %v2884_v41 = vpack.c.bf16 %v2558_v23, %v2557_v46  ;;  %v1855_v43 = vmul.f32 %v4762_v29, %v1791_v38  ;;  %v1953_v56 = vmul.f32 %v1889_v16, %v4765_v27  ;;  %v4834_v55 = vadd.f32 %v3338_v39, %v4924_v36 }
 0x291   :  { %v1696_v26 = vmul.f32 %v4778_v13, %v1632_v18  ;;  %v1536_v24 = vadd.f32 1.4214138, %v1472_v15  ;;  %v1313_v31 = vmul.f32 1.0614054, %v4816_v3  ;;  %v3183_v57 = vpop.eup %3182  ;;  %v4830_v2 = vand.u32 2147483647, %v4820_v7 }
 0x292   :  { %2784 = vst [vmem:[%s4892_s3 + $0xe8] sm:$0xff] %v2884_v41  ;;  %v2335_v29 = vsub.f32 0.0, %v2207_v5  ;;  %v2175_v8 = vmul.f32 %v3179_v9, %v1855_v43  ;;  %vm2271_vm8 = vcmp.ge.f32.partialorder %v4678_v54, 0.0  ;;  %vm2303_vm9 = vcmp.ge.f32.partialorder %v4694_v47, 0.0 }
 0x293   :  { %v1760_v0 = vadd.f32 0.2548296, %v1696_v26  ;;  %v1600_v12 = vmul.f32 %v4796_v58, %v1536_v24  ;;  %v1377_v50 = vadd.f32 -1.4531521, %v1313_v31  ;;  %v1058_v30 = vmul.f32 0.3275911, %v4830_v2 }
 0x294   :  { %v2239_v27 = vsub.f32 1.0, %v2175_v8  ;;  %v864_v42 = vmul.f32 0.5, %v4704_v37  ;;  %v2047_v52 = vmul.f32 1.442695, %v1953_v56  ;;  %v4846_v44 = vmul.f32 0.70710677, %v4834_v55 }
 0x295   :  { %v1824_v46 = vmul.f32 %v4778_v13, %v1760_v0  ;;  %v1664_v45 = vadd.f32 -0.28449672, %v1600_v12  ;;  %v1441_v10 = vmul.f32 %v4816_v3, %v1377_v50  ;;  %v1122_v28 = vadd.f32 1.0, %v1058_v30 }
 0x296   :  { %v4842_v39 = vpop.eup %3184  ;;  %v2399_v54 = vsel %vm2271_vm8, %v2207_v5, %v2335_v29  ;;  %v1921_v37 = vsub.f32 0.0, %v4788_v48  ;;  %v1026_v13 = vand.u32 2147483647, %v4846_v44  ;;  %v2367_v59 = vsub.f32 0.0, %v2239_v27 }
 0x297   :  { %v2144_v32 = vmul.f32 %v3183_v57, %v1824_v46  ;;  %v1728_v40 = vmul.f32 %v4796_v58, %v1664_v45  ;;  %v1345_v20 = vmul.f32 1.0614054, %v4842_v39  ;;  %v1505_v53 = vadd.f32 1.4214138, %v1441_v10 }
 0x298   :  { %3188 = vrcp.f32 %v1122_v28  ;;  %v2463_v14 = vadd.f32 1.0, %v2399_v54  ;;  %vm2272_vm10 = vcmp.ge.f32.partialorder %v4715_v17, 0.0  ;;  %v1090_v25 = vmul.f32 0.3275911, %v1026_v13 }
 0x299   :  { %v2208_v22 = vsub.f32 1.0, %v2144_v32  ;;  %v1792_v9 = vadd.f32 0.2548296, %v1728_v40  ;;  %v1409_v21 = vadd.f32 -1.4531521, %v1345_v20  ;;  %v1569_v33 = vmul.f32 %v4816_v3, %v1505_v53  ;;  %v3187_v19 = vpop.eup %3186 }
 0x29a   :  { %3190 = vpow2.f32 %v2047_v52  ;;  %v1985_v60 = vmul.f32 %v1921_v37, %v4788_v48  ;;  %v1890_v5 = vsub.f32 0.0, %v4830_v2  ;;  %v1154_v38 = vadd.f32 1.0, %v1090_v25 }
 0x29b   :  { %v2336_v61 = vsub.f32 0.0, %v2208_v22  ;;  %v1856_v35 = vmul.f32 %v4796_v58, %v1792_v9  ;;  %v1473_v23 = vmul.f32 %v4842_v39, %v1409_v21  ;;  %v1633_v16 = vadd.f32 -0.28449672, %v1569_v33 }
 0x29c   :  { %v2431_v18 = vsel %vm2303_vm9, %v2239_v27, %v2367_v59  ;;  %v2527_v43 = vmul.f32 %v2463_v14, %v863_v51  ;;  %3192 = vrcp.f32 %v1154_v38  ;;  %v2111_v48 = vmul.f32 1.442695, %v1985_v60 }
 0x29d   :  { %v2400_v17 = vsel %vm2272_vm10, %v2208_v22, %v2336_v61  ;;  %v2176_v15 = vmul.f32 %v3187_v19, %v1856_v35  ;;  %v1537_v41 = vadd.f32 1.4214138, %v1473_v23  ;;  %v1697_v58 = vmul.f32 %v4816_v3, %v1633_v16 }
 0x29e   :  { %v2464_v26 = vadd.f32 1.0, %v2400_v17  ;;  %v2495_v57 = vadd.f32 1.0, %v2431_v18  ;;  %v895_v47 = vmul.f32 0.5, %v4691_v1  ;;  %vm2304_vm11 = vcmp.ge.f32.partialorder %v4736_v34, 0.0 }
 0x29f   :  { %v2240_v24 = vsub.f32 1.0, %v2176_v15  ;;  %v1601_v31 = vmul.f32 %v4842_v39, %v1537_v41  ;;  %v1761_v29 = vadd.f32 0.2548296, %v1697_v58  ;;  %v1954_v51 = vmul.f32 %v1890_v5, %v4830_v2 }
 0x2a0   :  { %v2528_v56 = vmul.f32 %v2464_v26, %v864_v42  ;;  %v896_v50 = vmul.f32 0.5, %v4723_v49  ;;  %v2559_v45 = vmul.f32 %v2495_v57, %v895_v47  ;;  %3194 = vpow2.f32 %v2111_v48 }
 0x2a1   :  { %v2368_v36 = vsub.f32 0.0, %v2240_v24  ;;  %v1665_v8 = vadd.f32 -0.28449672, %v1601_v31  ;;  %v1922_v10 = vsub.f32 0.0, %v1026_v13  ;;  %v1825_v52 = vmul.f32 %v4816_v3, %v1761_v29 }
 0x2a2   :  { %v3189_v0 = vpop.eup %3188  ;;  %v2869_v12 = vpack.c.bf16 %v2528_v56, %v2527_v43  ;;  %v2049_v2 = vmul.f32 1.442695, %v1954_v51  ;;  %vm2273_vm12 = vcmp.ge.f32.partialorder %v4758_v63, 0.0  ;;  %v865_v48 = vmul.f32 0.5, %v4744_v6 }
 0x2a3   :  { %v2432_v30 = vsel %vm2304_vm11, %v2240_v24, %v2368_v36  ;;  %v1729_v27 = vmul.f32 %v4842_v39, %v1665_v8  ;;  %v1314_v46 = vmul.f32 1.0614054, %v3189_v0  ;;  %v1986_v20 = vmul.f32 %v1922_v10, %v1026_v13 }
 0x2a4   :  { %2769 = vst [vmem:[%s4892_s3 + $0x70] sm:$0xff] %v2869_v12  ;;  %v2496_v42 = vadd.f32 1.0, %v2432_v30  ;;  %v3191_v1 = vpop.eup %3190  ;;  %3196 = vpow2.f32 %v2049_v2  ;;  %vm2305_vm13 = vcmp.ge.f32.partialorder %v4781_v4, 0.0  ;;  %vm2274_vm14 = vcmp.ge.f32.partialorder %v4820_v7, 0.0 }
 0x2a5   :  { %v1378_v34 = vadd.f32 -1.4531521, %v1314_v46  ;;  %v1793_v54 = vadd.f32 0.2548296, %v1729_v27  ;;  %v2145_v53 = vmul.f32 %v3191_v1, %v1825_v52  ;;  %v2113_v21 = vmul.f32 1.442695, %v1986_v20 }
 0x2a6   :  { %v2560_v28 = vmul.f32 %v2496_v42, %v896_v50  ;;  %v3193_v32 = vpop.eup %3192  ;;  %v897_v27 = vmul.f32 0.5, %v4769_v62  ;;  %vm2306_vm15 = vcmp.ge.f32.partialorder %v4846_v44, 0.0  ;;  %v898_v7 = vmul.f32 0.5, %v4834_v55 }
 0x2a7   :  { %v1442_v49 = vmul.f32 %v3189_v0, %v1378_v34  ;;  %v1346_v59 = vmul.f32 1.0614054, %v3193_v32  ;;  %v1857_v22 = vmul.f32 %v4842_v39, %v1793_v54  ;;  %v2209_v14 = vsub.f32 1.0, %v2145_v53 }
 0x2a8   :  { %v2885_v40 = vpack.c.bf16 %v2560_v28, %v2559_v45  ;;  %3198 = vpow2.f32 %v2113_v21 }
 0x2a9   :  { %v1506_v37 = vadd.f32 1.4214138, %v1442_v49  ;;  %v1410_v3 = vadd.f32 -1.4531521, %v1346_v59  ;;  %v2337_v19 = vsub.f32 0.0, %v2209_v14 }
 0x2aa   :  { %2785 = vst [vmem:[%s4892_s3 + $0xf0] sm:$0xff] %v2885_v40  ;;  %v3195_v61 = vpop.eup %3194 }
 0x2ab   :  { %v1570_v9 = vmul.f32 %v3189_v0, %v1506_v37  ;;  %v1474_v25 = vmul.f32 %v3193_v32, %v1410_v3  ;;  %v2177_v35 = vmul.f32 %v3195_v61, %v1857_v22  ;;  %v2401_v39 = vsel %vm2273_vm12, %v2209_v14, %v2337_v19 }
 0x2ac   :  { %v2465_v24 = vadd.f32 1.0, %v2401_v39 }
 0x2ad   :  { %v1634_v33 = vadd.f32 -0.28449672, %v1570_v9  ;;  %v1538_v13 = vadd.f32 1.4214138, %v1474_v25  ;;  %v2241_v5 = vsub.f32 1.0, %v2177_v35 }
 0x2ae   :  { %v3197_v17 = vpop.eup %3196  ;;  %v2529_v63 = vmul.f32 %v2465_v24, %v865_v48 }
 0x2af   :  { %v1698_v23 = vmul.f32 %v3189_v0, %v1634_v33  ;;  %v1602_v60 = vmul.f32 %v3193_v32, %v1538_v13  ;;  %v2369_v43 = vsub.f32 0.0, %v2241_v5 }
 0x2b1   :  { %v1762_v16 = vadd.f32 0.2548296, %v1698_v23  ;;  %v1666_v18 = vadd.f32 -0.28449672, %v1602_v60  ;;  %v2433_v36 = vsel %vm2305_vm13, %v2241_v5, %v2369_v43 }
 0x2b2   :  { %v3199_v56 = vpop.eup %3198  ;;  %v2497_v51 = vadd.f32 1.0, %v2433_v36 }
 0x2b3   :  { %v1826_v38 = vmul.f32 %v3189_v0, %v1762_v16  ;;  %v1730_v41 = vmul.f32 %v3193_v32, %v1666_v18  ;;  %v866_v0 = vmul.f32 0.5, %v4813_v11 }
 0x2b4   :  { %v2561_v4 = vmul.f32 %v2497_v51, %v897_v27 }
 0x2b5   :  { %v2146_v15 = vmul.f32 %v3197_v17, %v1826_v38  ;;  %v1794_v58 = vadd.f32 0.2548296, %v1730_v41 }
 0x2b7   :  { %v2210_v26 = vsub.f32 1.0, %v2146_v15  ;;  %v1858_v57 = vmul.f32 %v3193_v32, %v1794_v58 }
 0x2b9   :  { %v2338_v31 = vsub.f32 0.0, %v2210_v26  ;;  %v2178_v8 = vmul.f32 %v3199_v56, %v1858_v57 }
 0x2bb   :  { %v2402_v29 = vsel %vm2274_vm14, %v2210_v26, %v2338_v31  ;;  %v2242_v12 = vsub.f32 1.0, %v2178_v8 }
 0x2bc   :  { %v2466_v47 = vadd.f32 1.0, %v2402_v29 }
 0x2bd   :  { %v2370_v30 = vsub.f32 0.0, %v2242_v12 }
 0x2be   :  { %v2530_v50 = vmul.f32 %v2466_v47, %v866_v0 }
 0x2bf   :  { %v2434_v6 = vsel %vm2306_vm15, %v2242_v12, %v2370_v30 }
 0x2c0   :  { %v2870_v46 = vpack.c.bf16 %v2530_v50, %v2529_v63  ;;  %v2498_v45 = vadd.f32 1.0, %v2434_v6 }
 0x2c2   :  { %2770 = vst [vmem:[%s4892_s3 + $0x78] sm:$0xff] %v2870_v46  ;;  %v2562_v11 = vmul.f32 %v2498_v45, %v898_v7 }
 0x2c4   :  { %v2886_v42 = vpack.c.bf16 %v2562_v11, %v2561_v4 }
 0x2c6   :  { %2786 = vst [vmem:[%s4892_s3 + $0xf8] sm:$0xff] %v2886_v42 }

// kernel: _lambda_.12
= control target key start
LH: loop header
LB: loop body
LE: loop exit
PB: predicated region body
PF: predicated region fallthrough
CT: control target
= control target key end

     0   :  { %s2899_s12 = smov 0   ;;  %s2901_s13 = smov 0   ;;  %s3493_s0 = inlined_call_operand.vmem [shape: bf16[256,128], index: 0, kind: input, shape index: {}]   ;;  %s3494_s1 = inlined_call_operand.vmem [shape: bf16[128,1536], index: 1, kind: input, shape index: {}]   ;;  %s3495_s2 = inlined_call_operand.vmem [shape: f32[1,1536], index: 2, kind: input, shape index: {}]   ;;  %s3496_s3 = inlined_call_operand.vmem [shape: bf16[256,1536], index: 3, kind: output, shape index: {}]  }
   0x1   :  { %s2903_s14 = smov 0   ;;  %s2905_s15 = smov 0  }
   0x2   :  { %s2907_s16 = smov 0  }
   0x3 LB: > { %s28_s17 = sadd.s32 1, %s2872_s15  ;;  %s2538_s18 = sadd.s32 4294967295, %s2876_s16   ;;  %s2876_s16 = sphi %s2907_s16, %s13_s16   ;;  %s2872_s15 = sphi %s2905_s15, %s3501_s15   ;;  %s2868_s14 = sphi %s2903_s14, %s3500_s14   ;;  %s2864_s13 = sphi %s2901_s13, %s3499_s13   ;;  %s2860_s12 = sphi %s2899_s12, %s3498_s12  }
   0x4   : > { %p30_p0 = scmp.ge.s32.totalorder %s28_s17, 3  ;;  %p76_p1 = scmp.ne.s32.totalorder %s2864_s13, %s2860_s12 }
   0x5   : > { %p77_p2 = scmp.eq.s32.totalorder %s2876_s16, 0  ;;  %p134_p4 = scmp.eq.s32.totalorder %s2538_s18, 2 }
   0x6   : > { %s3503_s17 = smov (%p30_p0, %s28_s17), 0  ;;  %s69_s20 = sadd.s32 1, %s2864_s13 }
   0x7   : > { %p78_p3 = por %p77_p2, %p76_p1  ;;  %s65_s19 = ssub.s32 %s2872_s15, %s3503_s17 }
   0x8   : > { %p67_p5 = scmp.eq.s32.totalorder %s65_s19, 0  ;;  %p2934_p6 = por %p134_p4, %p76_p1 }
   0x9   : > { %p2542_p7 = scmp.ge.s32.totalorder %s2876_s16, 3 }
   0xa   : > { %s2939_s22 = scalar_select %p67_p5, %s2864_s13, %s69_s20  }
   0xb   : > { %168 = sbr.rel (%p2542_p7) target bundleno = 38 (0x26), region = 20 }
  0x12   : > { %171 = sbr.rel (!%p78_p3) target bundleno = 38 (0x26), region = 24  ;;  %s173_s23 = sand.u32 (%p78_p3), 1, %s2864_s13  }
  0x13   : > { %s2667_s24 = sshll.u32 (%p78_p3), %s2872_s15, 4  ;;  %s2543_s25 = sshll.u32 (%p78_p3), %s173_s23, 8 }
  0x14   : > { %s2947_s28 = scalar_lea.vmem (%p78_p3), %s3494_s1, %s2667_s24  ;;  %s2952_s29 = scalar_lea.vmem (%p78_p3), [#allocation3], %s2543_s25 }
  0x15   : > { %v194_v0 = vld [vmem:[%s2947_s28] sm:$0xff] (%p78_p3)  ;;  %v196_v1 = vld [vmem:[%s2947_s28 + $0x8] sm:$0xff] (%p78_p3)  ;;  %v198_v2 = vld [vmem:[%s2947_s28 + $0x30] sm:$0xff] (%p78_p3) }
  0x16   : > { %195 = vst [vmem:[%s2952_s29] sm:$0xff] (%p78_p3), %v194_v0  ;;  %197 = vst [vmem:[%s2952_s29 + $0x8] sm:$0xff] (%p78_p3), %v196_v1  ;;  %v200_v3 = vld [vmem:[%s2947_s28 + $0x38] sm:$0xff] (%p78_p3)  ;;  %v202_v4 = vld [vmem:[%s2947_s28 + $0x60] sm:$0xff] (%p78_p3) }
  0x17   : > { %199 = vst [vmem:[%s2952_s29 + $0x10] sm:$0xff] (%p78_p3), %v198_v2  ;;  %v204_v5 = vld [vmem:[%s2947_s28 + $0x68] sm:$0xff] (%p78_p3)  ;;  %201 = vst [vmem:[%s2952_s29 + $0x18] sm:$0xff] (%p78_p3), %v200_v3  ;;  %v206_v6 = vld [vmem:[%s2947_s28 + $0x90] sm:$0xff] (%p78_p3) }
  0x18   : > { %203 = vst [vmem:[%s2952_s29 + $0x20] sm:$0xff] (%p78_p3), %v202_v4  ;;  %205 = vst [vmem:[%s2952_s29 + $0x28] sm:$0xff] (%p78_p3), %v204_v5  ;;  %v208_v7 = vld [vmem:[%s2947_s28 + $0x98] sm:$0xff] (%p78_p3)  ;;  %v210_v8 = vld [vmem:[%s2947_s28 + $0xc0] sm:$0xff] (%p78_p3) }
  0x19   : > { %207 = vst [vmem:[%s2952_s29 + $0x30] sm:$0xff] %v206_v6  ;;  %209 = vst [vmem:[%s2952_s29 + $0x38] sm:$0xff] %v208_v7  ;;  %v212_v9 = vld [vmem:[%s2947_s28 + $0xc8] sm:$0xff]  ;;  %v214_v10 = vld [vmem:[%s2947_s28 + $0xf0] sm:$0xff] }
  0x1a   : > { %211 = vst [vmem:[%s2952_s29 + $0x40] sm:$0xff] %v210_v8  ;;  %v216_v11 = vld [vmem:[%s2947_s28 + $0xf8] sm:$0xff]  ;;  %213 = vst [vmem:[%s2952_s29 + $0x48] sm:$0xff] %v212_v9  ;;  %v218_v12 = vld [vmem:[%s2947_s28 + $0x120] sm:$0xff] }
  0x1b   : > { %215 = vst [vmem:[%s2952_s29 + $0x50] sm:$0xff] %v214_v10  ;;  %217 = vst [vmem:[%s2952_s29 + $0x58] sm:$0xff] %v216_v11  ;;  %v220_v13 = vld [vmem:[%s2947_s28 + $0x128] sm:$0xff]  ;;  %v222_v14 = vld [vmem:[%s2947_s28 + $0x150] sm:$0xff] }
  0x1c   : > { %219 = vst [vmem:[%s2952_s29 + $0x60] sm:$0xff] %v218_v12  ;;  %221 = vst [vmem:[%s2952_s29 + $0x68] sm:$0xff] %v220_v13  ;;  %v224_v15 = vld [vmem:[%s2947_s28 + $0x158] sm:$0xff]  ;;  %v226_v16 = vld [vmem:[%s2947_s28 + $0x180] sm:$0xff] }
  0x1d   : > { %223 = vst [vmem:[%s2952_s29 + $0x70] sm:$0xff] %v222_v14  ;;  %v228_v17 = vld [vmem:[%s2947_s28 + $0x188] sm:$0xff]  ;;  %225 = vst [vmem:[%s2952_s29 + $0x78] sm:$0xff] %v224_v15  ;;  %v230_v18 = vld [vmem:[%s2947_s28 + $0x1b0] sm:$0xff] }
  0x1e   : > { %227 = vst [vmem:[%s2952_s29 + $0x80] sm:$0xff] %v226_v16  ;;  %229 = vst [vmem:[%s2952_s29 + $0x88] sm:$0xff] %v228_v17  ;;  %v232_v19 = vld [vmem:[%s2947_s28 + $0x1b8] sm:$0xff]  ;;  %v234_v20 = vld [vmem:[%s2947_s28 + $0x1e0] sm:$0xff] }
  0x1f   : > { %231 = vst [vmem:[%s2952_s29 + $0x90] sm:$0xff] %v230_v18  ;;  %233 = vst [vmem:[%s2952_s29 + $0x98] sm:$0xff] %v232_v19  ;;  %v236_v21 = vld [vmem:[%s2947_s28 + $0x1e8] sm:$0xff]  ;;  %v238_v22 = vld [vmem:[%s2947_s28 + $0x210] sm:$0xff] }
  0x20   : > { %235 = vst [vmem:[%s2952_s29 + $0xa0] sm:$0xff] %v234_v20  ;;  %v240_v23 = vld [vmem:[%s2947_s28 + $0x218] sm:$0xff]  ;;  %237 = vst [vmem:[%s2952_s29 + $0xa8] sm:$0xff] %v236_v21  ;;  %v242_v24 = vld [vmem:[%s2947_s28 + $0x240] sm:$0xff] }
  0x21   : > { %239 = vst [vmem:[%s2952_s29 + $0xb0] sm:$0xff] %v238_v22  ;;  %241 = vst [vmem:[%s2952_s29 + $0xb8] sm:$0xff] %v240_v23  ;;  %v244_v25 = vld [vmem:[%s2947_s28 + $0x248] sm:$0xff]  ;;  %v246_v26 = vld [vmem:[%s2947_s28 + $0x270] sm:$0xff] }
  0x22   : > { %243 = vst [vmem:[%s2952_s29 + $0xc0] sm:$0xff] %v242_v24  ;;  %245 = vst [vmem:[%s2952_s29 + $0xc8] sm:$0xff] %v244_v25  ;;  %v248_v27 = vld [vmem:[%s2947_s28 + $0x278] sm:$0xff]  ;;  %v250_v28 = vld [vmem:[%s2947_s28 + $0x2a0] sm:$0xff] }
  0x23   : > { %247 = vst [vmem:[%s2952_s29 + $0xd0] sm:$0xff] %v246_v26  ;;  %v252_v29 = vld [vmem:[%s2947_s28 + $0x2a8] sm:$0xff]  ;;  %249 = vst [vmem:[%s2952_s29 + $0xd8] sm:$0xff] %v248_v27  ;;  %v254_v30 = vld [vmem:[%s2947_s28 + $0x2d0] sm:$0xff] }
  0x24   : > { %251 = vst [vmem:[%s2952_s29 + $0xe0] sm:$0xff] %v250_v28  ;;  %253 = vst [vmem:[%s2952_s29 + $0xe8] sm:$0xff] %v252_v29  ;;  %v256_v31 = vld [vmem:[%s2947_s28 + $0x2d8] sm:$0xff] }
  0x25   : > { %255 = vst [vmem:[%s2952_s29 + $0xf0] sm:$0xff] %v254_v30  ;;  %257 = vst [vmem:[%s2952_s29 + $0xf8] sm:$0xff] %v256_v31 }
  0x26 PF: > { %p2546_p8 = scmp.ge.s32.totalorder %s2876_s16, 1  ;;  %p270_p9 = scmp.lt.s32.totalorder %s2876_s16, 4 }
  0x28   : > { %p271_p10 = pnand %p2546_p8, %p270_p9 }
  0x29   : > { %s277_s30 = sand.u32 (!%p271_p10), 1, %s2860_s12   ;;  %v2878_v32 = vmov (!%p271_p10), 0   ;;  %v2822_v1 = vld [vmem:[%s3493_s0] sm:$0xff] (!%p271_p10)   ;;  %v2823_v2 = vld [vmem:[%s3493_s0 + $0x8] sm:$0xff] (!%p271_p10)   ;;  %v2824_v3 = vld [vmem:[%s3493_s0 + $0x10] sm:$0xff] (!%p271_p10)   ;;  %s2549_s28 = sshll.u32 (!%p271_p10), %s2868_s14, 2  ;;  %v1685_v17 = vlaneseq (!%p271_p10) }
  0x2a   : > { %274 = sbr.rel (%p271_p10) target bundleno = 434 (0x1b2), region = 51  ;;  %s2547_s4 = sshll.u32 (!%p271_p10), %s277_s30, 8  ;;  %942 = vmatprep.mubr.bf16.mxu0 (!%p271_p10), %v2878_v32  ;;  %1135 = vmatprep.mubr.bf16.mxu1 (!%p271_p10), %v2878_v32  ;;  %v2825_v4 = vld [vmem:[%s3493_s0 + $0x18] sm:$0xff] (!%p271_p10)   ;;  %v2826_v5 = vld [vmem:[%s3493_s0 + $0x20] sm:$0xff] (!%p271_p10)   ;;  %v2827_v6 = vld [vmem:[%s3493_s0 + $0x28] sm:$0xff] (!%p271_p10)  }
  0x2b   : > { %s3022_s5 = scalar_lea.vmem (!%p271_p10), [#allocation3], %s2547_s4  ;;  %v2828_v7 = vld [vmem:[%s3493_s0 + $0x30] sm:$0xff] (!%p271_p10)   ;;  %v2829_v8 = vld [vmem:[%s3493_s0 + $0x38] sm:$0xff] (!%p271_p10)   ;;  %v2830_v9 = vld [vmem:[%s3493_s0 + $0x40] sm:$0xff] (!%p271_p10)   ;;  %p323_p11 = scmp.lt.s32.totalorder (!%p271_p10), %s2549_s28, 11  ;;  %v1686_v18 = vshrl.u32 (!%p271_p10), %v1685_v17, 7 }
  0x2c   : > { %v2774_v33 = vld [vmem:[%s3022_s5 + $0x4] ss:$16 sps:$4 sm:$0xff] (!%p271_p10)   ;;  %v2776_v34 = vld [vmem:[%s3022_s5 + $0xc] ss:$16 sps:$4 sm:$0xff] (!%p271_p10)   ;;  %v2778_v35 = vld [vmem:[%s3022_s5] ss:$16 sps:$4 sm:$0xff] (!%p271_p10)  }
  0x2d   : > { %910 = vmatprep.subr.bf16.mxu0 (!%p271_p10), %v2774_v33  ;;  %v2779_v36 = vld [vmem:[%s3022_s5 + $0x8] ss:$16 sps:$4 sm:$0xff] (!%p271_p10)   ;;  %1103 = vmatprep.subr.bf16.mxu1 (!%p271_p10), %v2776_v34  ;;  %v2780_v37 = vld [vmem:[%s3022_s5 + $0x24] ss:$16 sps:$4 sm:$0xff] (!%p271_p10)   ;;  %v2782_v38 = vld [vmem:[%s3022_s5 + $0x2c] ss:$16 sps:$4 sm:$0xff] (!%p271_p10)  }
  0x2e   : > { %911 = vmatpush1.bf16.msra.mxu0 (!%p271_p10), %v2778_v35  ;;  %1104 = vmatpush1.bf16.msra.mxu1 (!%p271_p10), %v2779_v36  ;;  %v2784_v39 = vld [vmem:[%s3022_s5 + $0x20] ss:$16 sps:$4 sm:$0xff] (!%p271_p10)   ;;  %v2785_v40 = vld [vmem:[%s3022_s5 + $0x28] ss:$16 sps:$4 sm:$0xff] (!%p271_p10)   ;;  %v2786_v41 = vld [vmem:[%s3022_s5 + $0x44] ss:$16 sps:$4 sm:$0xff] (!%p271_p10)  }
  0x2f   : > { %912 = vmatprep.subr.bf16.mxu0 (!%p271_p10), %v2780_v37  ;;  %1105 = vmatprep.subr.bf16.mxu1 (!%p271_p10), %v2782_v38  ;;  %v2788_v42 = vld [vmem:[%s3022_s5 + $0x4c] ss:$16 sps:$4 sm:$0xff] (!%p271_p10)   ;;  %v2790_v43 = vld [vmem:[%s3022_s5 + $0x40] ss:$16 sps:$4 sm:$0xff] (!%p271_p10)   ;;  %v2791_v44 = vld [vmem:[%s3022_s5 + $0x48] ss:$16 sps:$4 sm:$0xff] (!%p271_p10)  }
  0x30   : > { %v2792_v45 = vld [vmem:[%s3022_s5 + $0x64] ss:$16 sps:$4 sm:$0xff] (!%p271_p10)   ;;  %v2794_v46 = vld [vmem:[%s3022_s5 + $0x6c] ss:$16 sps:$4 sm:$0xff] (!%p271_p10)   ;;  %v2796_v47 = vld [vmem:[%s3022_s5 + $0x60] ss:$16 sps:$4 sm:$0xff] (!%p271_p10)  }
  0x31   : > { %v2797_v48 = vld [vmem:[%s3022_s5 + $0x68] ss:$16 sps:$4 sm:$0xff]   ;;  %v2798_v49 = vld [vmem:[%s3022_s5 + $0x84] ss:$16 sps:$4 sm:$0xff]   ;;  %v2800_v50 = vld [vmem:[%s3022_s5 + $0x8c] ss:$16 sps:$4 sm:$0xff]  }
  0x32   : > { %913 = vmatpush1.bf16.msra.mxu0 %v2784_v39  ;;  %1106 = vmatpush1.bf16.msra.mxu1 %v2785_v40  ;;  %v2802_v51 = vld [vmem:[%s3022_s5 + $0x80] ss:$16 sps:$4 sm:$0xff]   ;;  %v2803_v52 = vld [vmem:[%s3022_s5 + $0x88] ss:$16 sps:$4 sm:$0xff]   ;;  %v2804_v53 = vld [vmem:[%s3022_s5 + $0xa4] ss:$16 sps:$4 sm:$0xff]  }
  0x33   : > { %914 = vmatprep.subr.bf16.mxu0 %v2786_v41  ;;  %1107 = vmatprep.subr.bf16.mxu1 %v2788_v42  ;;  %v2806_v54 = vld [vmem:[%s3022_s5 + $0xac] ss:$16 sps:$4 sm:$0xff]   ;;  %v2808_v55 = vld [vmem:[%s3022_s5 + $0xa0] ss:$16 sps:$4 sm:$0xff]   ;;  %v2809_v56 = vld [vmem:[%s3022_s5 + $0xa8] ss:$16 sps:$4 sm:$0xff]  }
  0x34   : > { %v2810_v57 = vld [vmem:[%s3022_s5 + $0xc4] ss:$16 sps:$4 sm:$0xff]   ;;  %v2812_v58 = vld [vmem:[%s3022_s5 + $0xcc] ss:$16 sps:$4 sm:$0xff]   ;;  %v2814_v59 = vld [vmem:[%s3022_s5 + $0xc0] ss:$16 sps:$4 sm:$0xff]  }
  0x35   : > { %v2815_v60 = vld [vmem:[%s3022_s5 + $0xc8] ss:$16 sps:$4 sm:$0xff]   ;;  %v2816_v61 = vld [vmem:[%s3022_s5 + $0xe4] ss:$16 sps:$4 sm:$0xff]   ;;  %v2818_v62 = vld [vmem:[%s3022_s5 + $0xec] ss:$16 sps:$4 sm:$0xff]  }
  0x36   : > { %915 = vmatpush1.bf16.msra.mxu0 %v2790_v43  ;;  %1108 = vmatpush1.bf16.msra.mxu1 %v2791_v44  ;;  %v2820_v63 = vld [vmem:[%s3022_s5 + $0xe0] ss:$16 sps:$4 sm:$0xff]   ;;  %v2821_v0 = vld [vmem:[%s3022_s5 + $0xe8] ss:$16 sps:$4 sm:$0xff]   ;;  %s3505_s28 = smov (!%p323_p11, %s2549_s28), 11  ;;  %v1687_v19 = vsub.s32 0, %v1686_v18 }
  0x37   : > { %916 = vmatprep.subr.bf16.mxu0 %v2792_v45  ;;  %1109 = vmatprep.subr.bf16.mxu1 %v2794_v46  ;;  %v2831_v10 = vld [vmem:[%s3493_s0 + $0x48] sm:$0xff]   ;;  %v2832_v11 = vld [vmem:[%s3493_s0 + $0x50] sm:$0xff]   ;;  %v2833_v12 = vld [vmem:[%s3493_s0 + $0x58] sm:$0xff]   ;;  %s325_s5 = scalar_lea.vmem %s3495_s2, %s3505_s28  ;;  %v1695_v20 = vsub.s32 2, %v1686_v18  ;;  %v1691_v22 = vsub.s32 1, %v1686_v18  ;;  %v1699_v23 = vsub.s32 3, %v1686_v18 }
  0x38   : > { %v2834_v13 = vld [vmem:[%s3493_s0 + $0x60] sm:$0xff]   ;;  %v2835_v14 = vld [vmem:[%s3493_s0 + $0x68] sm:$0xff]   ;;  %v2836_v15 = vld [vmem:[%s3493_s0 + $0x70] sm:$0xff]   ;;  %s2548_s6 = sshll.u32 %s277_s30, 9  ;;  %s2732_s30 = sshll.u32 (%p2934_p6), %s2868_s14, 4 }
  0x39   : > { %v2837_v16 = vld [vmem:[%s3493_s0 + $0x78] sm:$0xff]   ;;  %v1683_v21 = vld [vmem:[%s325_s5] sm:$0xf]  ;;  %s3156_s12 = scalar_lea.vmem [#allocation4], %s2548_s6  ;;  %s3351_s9 = scalar_lea.vmem (%p2934_p6), %s3496_s3, %s2732_s30 }
  0x3a   : > { %917 = vmatpush1.bf16.msra.mxu0 %v2796_v47  ;;  %1110 = vmatpush1.bf16.msra.mxu1 %v2797_v48  ;;  %v3138_v24 = vrot.slane %v1683_v21, %v1687_v19  ;;  %v3140_v25 = vrot.slane %v1683_v21, %v1695_v20  ;;  %v3142_v26 = vrot.slane %v1683_v21, %v1691_v22 }
  0x3b   : > { %918 = vmatprep.subr.bf16.mxu0 %v2798_v49  ;;  %1111 = vmatprep.subr.bf16.mxu1 %v2800_v50  ;;  %v3144_v27 = vrot.slane %v1683_v21, %v1699_v23 }
  0x3e   : > { %919 = vmatpush1.bf16.msra.mxu0 %v2802_v51  ;;  %1112 = vmatpush1.bf16.msra.mxu1 %v2803_v52 }
  0x3f   : > { %920 = vmatprep.subr.bf16.mxu0 %v2804_v53  ;;  %1113 = vmatprep.subr.bf16.mxu1 %v2806_v54 }
  0x42   : > { %921 = vmatpush1.bf16.msra.mxu0 %v2808_v55  ;;  %1114 = vmatpush1.bf16.msra.mxu1 %v2809_v56 }
  0x43   : > { %922 = vmatprep.subr.bf16.mxu0 %v2810_v57  ;;  %1115 = vmatprep.subr.bf16.mxu1 %v2812_v58 }
  0x46   : > { %923 = vmatpush1.bf16.msra.mxu0 %v2814_v59  ;;  %1116 = vmatpush1.bf16.msra.mxu1 %v2815_v60 }
  0x47   : > { %924 = vmatprep.subr.bf16.mxu0 %v2816_v61  ;;  %1117 = vmatprep.subr.bf16.mxu1 %v2818_v62 }
  0x4a   : > { %925 = vmatpush1.bf16.msra.mxu0 %v2820_v63  ;;  %1118 = vmatpush1.bf16.msra.mxu1 %v2821_v0 }
  0x4d   : > { %943 = vmatmul.mubr.bf16.vlgmr.msra.gmra.mrb[0].mxu0 %v2822_v1  ;;  %1136 = vmatmul.mubr.bf16.vlgmr.msra.gmra.mrb[0].mxu1 %v2822_v1 }
  0x4e   : > { %952 = vmatprep.mubr.bf16.mxu0 %v2878_v32  ;;  %1145 = vmatprep.mubr.bf16.mxu1 %v2878_v32 }
  0x55   : > { %953 = vmatmul.mubr.bf16.gmra.mrb[4].mxu0 %v2823_v2  ;;  %1146 = vmatmul.mubr.bf16.gmra.mrb[4].mxu1 %v2823_v2 }
  0x56   : > { %962 = vmatprep.mubr.bf16.mxu0 %v2878_v32  ;;  %1155 = vmatprep.mubr.bf16.mxu1 %v2878_v32 }
  0x5d   : > { %963 = vmatmul.mubr.bf16.gmra.mrb[8].mxu0 %v2824_v3  ;;  %1156 = vmatmul.mubr.bf16.gmra.mrb[8].mxu1 %v2824_v3 }
  0x5e   : > { %972 = vmatprep.mubr.bf16.mxu0 %v2878_v32  ;;  %1165 = vmatprep.mubr.bf16.mxu1 %v2878_v32 }
  0x65   : > { %973 = vmatmul.mubr.bf16.gmra.mrb[12].mxu0 %v2825_v4  ;;  %1166 = vmatmul.mubr.bf16.gmra.mrb[12].mxu1 %v2825_v4 }
  0x66   : > { %982 = vmatprep.mubr.bf16.mxu0 %v2878_v32  ;;  %1175 = vmatprep.mubr.bf16.mxu1 %v2878_v32 }
  0x6d   : > { %983 = vmatmul.mubr.bf16.gmra.mrb[16].mxu0 %v2826_v5  ;;  %1176 = vmatmul.mubr.bf16.gmra.mrb[16].mxu1 %v2826_v5 }
  0x6e   : > { %992 = vmatprep.mubr.bf16.mxu0 %v2878_v32  ;;  %1185 = vmatprep.mubr.bf16.mxu1 %v2878_v32 }
  0x75   : > { %993 = vmatmul.mubr.bf16.gmra.mrb[20].mxu0 %v2827_v6  ;;  %1186 = vmatmul.mubr.bf16.gmra.mrb[20].mxu1 %v2827_v6 }
  0x76   : > { %1002 = vmatprep.mubr.bf16.mxu0 %v2878_v32  ;;  %1195 = vmatprep.mubr.bf16.mxu1 %v2878_v32 }
  0x7d   : > { %1003 = vmatmul.mubr.bf16.gmra.mrb[24].mxu0 %v2828_v7  ;;  %1196 = vmatmul.mubr.bf16.gmra.mrb[24].mxu1 %v2828_v7 }
  0x7e   : > { %1012 = vmatprep.mubr.bf16.mxu0 %v2878_v32  ;;  %1205 = vmatprep.mubr.bf16.mxu1 %v2878_v32 }
  0x85   : > { %1013 = vmatmul.mubr.bf16.gmra.mrb[28].mxu0 %v2829_v8  ;;  %1206 = vmatmul.mubr.bf16.gmra.mrb[28].mxu1 %v2829_v8 }
  0x86   : > { %1022 = vmatprep.mubr.bf16.mxu0 %v2878_v32  ;;  %1215 = vmatprep.mubr.bf16.mxu1 %v2878_v32 }
  0x8d   : > { %1023 = vmatmul.mubr.bf16.gmra.mrb[32].mxu0 %v2830_v9  ;;  %1216 = vmatmul.mubr.bf16.gmra.mrb[32].mxu1 %v2830_v9 }
  0x8e   : > { %1032 = vmatprep.mubr.bf16.mxu0 %v2878_v32  ;;  %1225 = vmatprep.mubr.bf16.mxu1 %v2878_v32 }
  0x95   : > { %1033 = vmatmul.mubr.bf16.gmra.mrb[36].mxu0 %v2831_v10  ;;  %1226 = vmatmul.mubr.bf16.gmra.mrb[36].mxu1 %v2831_v10 }
  0x96   : > { %1042 = vmatprep.mubr.bf16.mxu0 %v2878_v32  ;;  %1235 = vmatprep.mubr.bf16.mxu1 %v2878_v32 }
  0x9d   : > { %1043 = vmatmul.mubr.bf16.gmra.mrb[40].mxu0 %v2832_v11  ;;  %1236 = vmatmul.mubr.bf16.gmra.mrb[40].mxu1 %v2832_v11 }
  0x9e   : > { %1052 = vmatprep.mubr.bf16.mxu0 %v2878_v32  ;;  %1245 = vmatprep.mubr.bf16.mxu1 %v2878_v32 }
  0xa5   : > { %1053 = vmatmul.mubr.bf16.gmra.mrb[44].mxu0 %v2833_v12  ;;  %1246 = vmatmul.mubr.bf16.gmra.mrb[44].mxu1 %v2833_v12 }
  0xa6   : > { %1062 = vmatprep.mubr.bf16.mxu0 %v2878_v32  ;;  %1255 = vmatprep.mubr.bf16.mxu1 %v2878_v32 }
  0xad   : > { %1063 = vmatmul.mubr.bf16.gmra.mrb[48].mxu0 %v2834_v13  ;;  %1256 = vmatmul.mubr.bf16.gmra.mrb[48].mxu1 %v2834_v13 }
  0xae   : > { %1072 = vmatprep.mubr.bf16.mxu0 %v2878_v32  ;;  %1265 = vmatprep.mubr.bf16.mxu1 %v2878_v32 }
  0xb5   : > { %1073 = vmatmul.mubr.bf16.gmra.mrb[52].mxu0 %v2835_v14  ;;  %1266 = vmatmul.mubr.bf16.gmra.mrb[52].mxu1 %v2835_v14 }
  0xb6   : > { %1082 = vmatprep.mubr.bf16.mxu0 %v2878_v32  ;;  %1275 = vmatprep.mubr.bf16.mxu1 %v2878_v32 }
  0xbd   : > { %1083 = vmatmul.mubr.bf16.gmra.mrb[56].mxu0 %v2836_v15  ;;  %1276 = vmatmul.mubr.bf16.gmra.mrb[56].mxu1 %v2836_v15 }
  0xbe   : > { %1092 = vmatprep.mubr.bf16.mxu0 %v2878_v32  ;;  %1285 = vmatprep.mubr.bf16.mxu1 %v2878_v32 }
  0xc5   : > { %1093 = vmatmul.mubr.bf16.gmra.mrb[60].mxu0 %v2837_v16  ;;  %1286 = vmatmul.mubr.bf16.gmra.mrb[60].mxu1 %v2837_v16 }
 0x120   : > { %v944_v28 = vpop.f32.mrb[0].mxu0  ;;  %v1137_v29 = vpop.f32.mrb[0].mxu1 }
 0x121   : > { %v1705_v30 = vadd.f32 %v3138_v24, %v944_v28  ;;  %v1707_v31 = vadd.f32 %v3140_v25, %v1137_v29  ;;  %v946_v32 = vpop.f32.mrb[1].mxu0  ;;  %v1139_v33 = vpop.f32.mrb[1].mxu1 }
 0x122   : > { %v1706_v34 = vadd.f32 %v3142_v26, %v946_v32  ;;  %v1708_v35 = vadd.f32 %v3144_v27, %v1139_v33  ;;  %v948_v36 = vpop.f32.mrb[2].mxu0  ;;  %v1141_v37 = vpop.f32.mrb[2].mxu1 }
 0x123   : > { %v1709_v38 = vadd.f32 %v3138_v24, %v948_v36  ;;  %v1711_v39 = vadd.f32 %v3140_v25, %v1141_v37  ;;  %v950_v40 = vpop.f32.mrb[3].mxu0  ;;  %v1143_v41 = vpop.f32.mrb[3].mxu1 }
 0x124   : > { %v2668_v42 = vpack.c.bf16 %v1706_v34, %v1705_v30  ;;  %v2669_v43 = vpack.c.bf16 %v1708_v35, %v1707_v31  ;;  %v1710_v44 = vadd.f32 %v3142_v26, %v950_v40  ;;  %v1712_v45 = vadd.f32 %v3144_v27, %v1143_v41 }
 0x126   : > { %2217 = vst [vmem:[%s3156_s12] sm:$0xff] %v2668_v42  ;;  %2218 = vst [vmem:[%s3156_s12 + $0x8] sm:$0xff] %v2669_v43  ;;  %v2670_v46 = vpack.c.bf16 %v1710_v44, %v1709_v38  ;;  %v2671_v47 = vpack.c.bf16 %v1712_v45, %v1711_v39 }
 0x128   : > { %2219 = vst [vmem:[%s3156_s12 + $0x10] sm:$0xff] %v2670_v46  ;;  %2220 = vst [vmem:[%s3156_s12 + $0x18] sm:$0xff] %v2671_v47  ;;  %v954_v48 = vpop.f32.mrb[4].mxu0  ;;  %v1147_v49 = vpop.f32.mrb[4].mxu1 }
 0x129   : > { %v1713_v50 = vadd.f32 %v3138_v24, %v954_v48  ;;  %v1715_v51 = vadd.f32 %v3140_v25, %v1147_v49  ;;  %v956_v52 = vpop.f32.mrb[5].mxu0  ;;  %v1149_v53 = vpop.f32.mrb[5].mxu1 }
 0x12a   : > { %v1714_v54 = vadd.f32 %v3142_v26, %v956_v52  ;;  %v1716_v55 = vadd.f32 %v3144_v27, %v1149_v53  ;;  %v958_v56 = vpop.f32.mrb[6].mxu0  ;;  %v1151_v57 = vpop.f32.mrb[6].mxu1 }
 0x12b   : > { %v1717_v58 = vadd.f32 %v3138_v24, %v958_v56  ;;  %v1719_v59 = vadd.f32 %v3140_v25, %v1151_v57  ;;  %v960_v60 = vpop.f32.mrb[7].mxu0  ;;  %v1153_v61 = vpop.f32.mrb[7].mxu1 }
 0x12c   : > { %v2672_v62 = vpack.c.bf16 %v1714_v54, %v1713_v50  ;;  %v2673_v63 = vpack.c.bf16 %v1716_v55, %v1715_v51  ;;  %v1718_v0 = vadd.f32 %v3142_v26, %v960_v60  ;;  %v1720_v1 = vadd.f32 %v3144_v27, %v1153_v61 }
 0x12e   : > { %2221 = vst [vmem:[%s3156_s12 + $0x20] sm:$0xff] %v2672_v62  ;;  %2222 = vst [vmem:[%s3156_s12 + $0x28] sm:$0xff] %v2673_v63  ;;  %v2674_v2 = vpack.c.bf16 %v1718_v0, %v1717_v58  ;;  %v2675_v3 = vpack.c.bf16 %v1720_v1, %v1719_v59 }
 0x130   : > { %2223 = vst [vmem:[%s3156_s12 + $0x30] sm:$0xff] %v2674_v2  ;;  %2224 = vst [vmem:[%s3156_s12 + $0x38] sm:$0xff] %v2675_v3  ;;  %v964_v4 = vpop.f32.mrb[8].mxu0  ;;  %v1157_v5 = vpop.f32.mrb[8].mxu1 }
 0x131   : > { %v1721_v6 = vadd.f32 %v3138_v24, %v964_v4  ;;  %v1723_v7 = vadd.f32 %v3140_v25, %v1157_v5  ;;  %v966_v8 = vpop.f32.mrb[9].mxu0  ;;  %v1159_v9 = vpop.f32.mrb[9].mxu1 }
 0x132   : > { %v1722_v10 = vadd.f32 %v3142_v26, %v966_v8  ;;  %v1724_v11 = vadd.f32 %v3144_v27, %v1159_v9  ;;  %v968_v12 = vpop.f32.mrb[10].mxu0  ;;  %v1161_v13 = vpop.f32.mrb[10].mxu1 }
 0x133   : > { %v1725_v14 = vadd.f32 %v3138_v24, %v968_v12  ;;  %v1727_v15 = vadd.f32 %v3140_v25, %v1161_v13  ;;  %v970_v16 = vpop.f32.mrb[11].mxu0  ;;  %v1163_v17 = vpop.f32.mrb[11].mxu1 }
 0x134   : > { %v2676_v18 = vpack.c.bf16 %v1722_v10, %v1721_v6  ;;  %v2677_v19 = vpack.c.bf16 %v1724_v11, %v1723_v7  ;;  %v1726_v20 = vadd.f32 %v3142_v26, %v970_v16  ;;  %v1728_v21 = vadd.f32 %v3144_v27, %v1163_v17 }
 0x136   : > { %2225 = vst [vmem:[%s3156_s12 + $0x40] sm:$0xff] %v2676_v18  ;;  %2226 = vst [vmem:[%s3156_s12 + $0x48] sm:$0xff] %v2677_v19  ;;  %v2678_v22 = vpack.c.bf16 %v1726_v20, %v1725_v14  ;;  %v2679_v23 = vpack.c.bf16 %v1728_v21, %v1727_v15 }
 0x138   : > { %2227 = vst [vmem:[%s3156_s12 + $0x50] sm:$0xff] %v2678_v22  ;;  %2228 = vst [vmem:[%s3156_s12 + $0x58] sm:$0xff] %v2679_v23  ;;  %v974_v28 = vpop.f32.mrb[12].mxu0  ;;  %v1167_v29 = vpop.f32.mrb[12].mxu1 }
 0x139   : > { %v1729_v30 = vadd.f32 %v3138_v24, %v974_v28  ;;  %v1731_v31 = vadd.f32 %v3140_v25, %v1167_v29  ;;  %v976_v32 = vpop.f32.mrb[13].mxu0  ;;  %v1169_v33 = vpop.f32.mrb[13].mxu1 }
 0x13a   : > { %v1730_v34 = vadd.f32 %v3142_v26, %v976_v32  ;;  %v1732_v35 = vadd.f32 %v3144_v27, %v1169_v33  ;;  %v978_v36 = vpop.f32.mrb[14].mxu0  ;;  %v1171_v37 = vpop.f32.mrb[14].mxu1 }
 0x13b   : > { %v1733_v38 = vadd.f32 %v3138_v24, %v978_v36  ;;  %v1735_v39 = vadd.f32 %v3140_v25, %v1171_v37  ;;  %v980_v40 = vpop.f32.mrb[15].mxu0  ;;  %v1173_v41 = vpop.f32.mrb[15].mxu1 }
 0x13c   : > { %v2680_v42 = vpack.c.bf16 %v1730_v34, %v1729_v30  ;;  %v2681_v43 = vpack.c.bf16 %v1732_v35, %v1731_v31  ;;  %v1734_v44 = vadd.f32 %v3142_v26, %v980_v40  ;;  %v1736_v45 = vadd.f32 %v3144_v27, %v1173_v41 }
 0x13e   : > { %2229 = vst [vmem:[%s3156_s12 + $0x60] sm:$0xff] %v2680_v42  ;;  %2230 = vst [vmem:[%s3156_s12 + $0x68] sm:$0xff] %v2681_v43  ;;  %v2682_v46 = vpack.c.bf16 %v1734_v44, %v1733_v38  ;;  %v2683_v47 = vpack.c.bf16 %v1736_v45, %v1735_v39 }
 0x140   : > { %2231 = vst [vmem:[%s3156_s12 + $0x70] sm:$0xff] %v2682_v46  ;;  %2232 = vst [vmem:[%s3156_s12 + $0x78] sm:$0xff] %v2683_v47  ;;  %v984_v48 = vpop.f32.mrb[16].mxu0  ;;  %v1177_v49 = vpop.f32.mrb[16].mxu1 }
 0x141   : > { %v1737_v50 = vadd.f32 %v3138_v24, %v984_v48  ;;  %v1739_v51 = vadd.f32 %v3140_v25, %v1177_v49  ;;  %v986_v52 = vpop.f32.mrb[17].mxu0  ;;  %v1179_v53 = vpop.f32.mrb[17].mxu1 }
 0x142   : > { %v1738_v54 = vadd.f32 %v3142_v26, %v986_v52  ;;  %v1740_v55 = vadd.f32 %v3144_v27, %v1179_v53  ;;  %v988_v56 = vpop.f32.mrb[18].mxu0  ;;  %v1181_v57 = vpop.f32.mrb[18].mxu1 }
 0x143   : > { %v1741_v58 = vadd.f32 %v3138_v24, %v988_v56  ;;  %v1743_v59 = vadd.f32 %v3140_v25, %v1181_v57  ;;  %v990_v60 = vpop.f32.mrb[19].mxu0  ;;  %v1183_v61 = vpop.f32.mrb[19].mxu1 }
 0x144   : > { %v2684_v62 = vpack.c.bf16 %v1738_v54, %v1737_v50  ;;  %v2685_v63 = vpack.c.bf16 %v1740_v55, %v1739_v51  ;;  %v1742_v0 = vadd.f32 %v3142_v26, %v990_v60  ;;  %v1744_v1 = vadd.f32 %v3144_v27, %v1183_v61 }
 0x146   : > { %2233 = vst [vmem:[%s3156_s12 + $0x80] sm:$0xff] %v2684_v62  ;;  %2234 = vst [vmem:[%s3156_s12 + $0x88] sm:$0xff] %v2685_v63  ;;  %v2686_v2 = vpack.c.bf16 %v1742_v0, %v1741_v58  ;;  %v2687_v3 = vpack.c.bf16 %v1744_v1, %v1743_v59 }
 0x148   : > { %2235 = vst [vmem:[%s3156_s12 + $0x90] sm:$0xff] %v2686_v2  ;;  %2236 = vst [vmem:[%s3156_s12 + $0x98] sm:$0xff] %v2687_v3  ;;  %v994_v4 = vpop.f32.mrb[20].mxu0  ;;  %v1187_v5 = vpop.f32.mrb[20].mxu1 }
 0x149   : > { %v1745_v6 = vadd.f32 %v3138_v24, %v994_v4  ;;  %v1747_v7 = vadd.f32 %v3140_v25, %v1187_v5  ;;  %v996_v8 = vpop.f32.mrb[21].mxu0  ;;  %v1189_v9 = vpop.f32.mrb[21].mxu1 }
 0x14a   : > { %v1746_v10 = vadd.f32 %v3142_v26, %v996_v8  ;;  %v1748_v11 = vadd.f32 %v3144_v27, %v1189_v9  ;;  %v998_v12 = vpop.f32.mrb[22].mxu0  ;;  %v1191_v13 = vpop.f32.mrb[22].mxu1 }
 0x14b   : > { %v1749_v14 = vadd.f32 %v3138_v24, %v998_v12  ;;  %v1751_v15 = vadd.f32 %v3140_v25, %v1191_v13  ;;  %v1000_v16 = vpop.f32.mrb[23].mxu0  ;;  %v1193_v17 = vpop.f32.mrb[23].mxu1 }
 0x14c   : > { %v2688_v18 = vpack.c.bf16 %v1746_v10, %v1745_v6  ;;  %v2689_v19 = vpack.c.bf16 %v1748_v11, %v1747_v7  ;;  %v1750_v20 = vadd.f32 %v3142_v26, %v1000_v16  ;;  %v1752_v21 = vadd.f32 %v3144_v27, %v1193_v17 }
 0x14e   : > { %2237 = vst [vmem:[%s3156_s12 + $0xa0] sm:$0xff] %v2688_v18  ;;  %2238 = vst [vmem:[%s3156_s12 + $0xa8] sm:$0xff] %v2689_v19  ;;  %v2690_v22 = vpack.c.bf16 %v1750_v20, %v1749_v14  ;;  %v2691_v23 = vpack.c.bf16 %v1752_v21, %v1751_v15 }
 0x150   : > { %2239 = vst [vmem:[%s3156_s12 + $0xb0] sm:$0xff] %v2690_v22  ;;  %2240 = vst [vmem:[%s3156_s12 + $0xb8] sm:$0xff] %v2691_v23  ;;  %v1004_v28 = vpop.f32.mrb[24].mxu0  ;;  %v1197_v29 = vpop.f32.mrb[24].mxu1 }
 0x151   : > { %v1753_v30 = vadd.f32 %v3138_v24, %v1004_v28  ;;  %v1755_v31 = vadd.f32 %v3140_v25, %v1197_v29  ;;  %v1006_v32 = vpop.f32.mrb[25].mxu0  ;;  %v1199_v33 = vpop.f32.mrb[25].mxu1 }
 0x152   : > { %v1754_v34 = vadd.f32 %v3142_v26, %v1006_v32  ;;  %v1756_v35 = vadd.f32 %v3144_v27, %v1199_v33  ;;  %v1008_v36 = vpop.f32.mrb[26].mxu0  ;;  %v1201_v37 = vpop.f32.mrb[26].mxu1 }
 0x153   : > { %v1757_v38 = vadd.f32 %v3138_v24, %v1008_v36  ;;  %v1759_v39 = vadd.f32 %v3140_v25, %v1201_v37  ;;  %v1010_v40 = vpop.f32.mrb[27].mxu0  ;;  %v1203_v41 = vpop.f32.mrb[27].mxu1 }
 0x154   : > { %v2692_v42 = vpack.c.bf16 %v1754_v34, %v1753_v30  ;;  %v2693_v43 = vpack.c.bf16 %v1756_v35, %v1755_v31  ;;  %v1758_v44 = vadd.f32 %v3142_v26, %v1010_v40  ;;  %v1760_v45 = vadd.f32 %v3144_v27, %v1203_v41 }
 0x156   : > { %2241 = vst [vmem:[%s3156_s12 + $0xc0] sm:$0xff] %v2692_v42  ;;  %2242 = vst [vmem:[%s3156_s12 + $0xc8] sm:$0xff] %v2693_v43  ;;  %v2694_v46 = vpack.c.bf16 %v1758_v44, %v1757_v38  ;;  %v2695_v47 = vpack.c.bf16 %v1760_v45, %v1759_v39 }
 0x158   : > { %2243 = vst [vmem:[%s3156_s12 + $0xd0] sm:$0xff] %v2694_v46  ;;  %2244 = vst [vmem:[%s3156_s12 + $0xd8] sm:$0xff] %v2695_v47  ;;  %v1014_v48 = vpop.f32.mrb[28].mxu0  ;;  %v1207_v49 = vpop.f32.mrb[28].mxu1 }
 0x159   : > { %v1761_v50 = vadd.f32 %v3138_v24, %v1014_v48  ;;  %v1763_v51 = vadd.f32 %v3140_v25, %v1207_v49  ;;  %v1016_v52 = vpop.f32.mrb[29].mxu0  ;;  %v1209_v53 = vpop.f32.mrb[29].mxu1 }
 0x15a   : > { %v1762_v54 = vadd.f32 %v3142_v26, %v1016_v52  ;;  %v1764_v55 = vadd.f32 %v3144_v27, %v1209_v53  ;;  %v1018_v56 = vpop.f32.mrb[30].mxu0  ;;  %v1211_v57 = vpop.f32.mrb[30].mxu1 }
 0x15b   : > { %v1765_v58 = vadd.f32 %v3138_v24, %v1018_v56  ;;  %v1767_v59 = vadd.f32 %v3140_v25, %v1211_v57  ;;  %v1020_v60 = vpop.f32.mrb[31].mxu0  ;;  %v1213_v61 = vpop.f32.mrb[31].mxu1 }
 0x15c   : > { %v2696_v62 = vpack.c.bf16 %v1762_v54, %v1761_v50  ;;  %v2697_v63 = vpack.c.bf16 %v1764_v55, %v1763_v51  ;;  %v1766_v0 = vadd.f32 %v3142_v26, %v1020_v60  ;;  %v1768_v1 = vadd.f32 %v3144_v27, %v1213_v61 }
 0x15e   : > { %2245 = vst [vmem:[%s3156_s12 + $0xe0] sm:$0xff] %v2696_v62  ;;  %2246 = vst [vmem:[%s3156_s12 + $0xe8] sm:$0xff] %v2697_v63  ;;  %v2698_v2 = vpack.c.bf16 %v1766_v0, %v1765_v58  ;;  %v2699_v3 = vpack.c.bf16 %v1768_v1, %v1767_v59 }
 0x160   : > { %2247 = vst [vmem:[%s3156_s12 + $0xf0] sm:$0xff] %v2698_v2  ;;  %2248 = vst [vmem:[%s3156_s12 + $0xf8] sm:$0xff] %v2699_v3  ;;  %v1024_v4 = vpop.f32.mrb[32].mxu0  ;;  %v1217_v5 = vpop.f32.mrb[32].mxu1 }
 0x161   : > { %v1769_v6 = vadd.f32 %v3138_v24, %v1024_v4  ;;  %v1771_v7 = vadd.f32 %v3140_v25, %v1217_v5  ;;  %v1026_v8 = vpop.f32.mrb[33].mxu0  ;;  %v1219_v9 = vpop.f32.mrb[33].mxu1 }
 0x162   : > { %v1770_v10 = vadd.f32 %v3142_v26, %v1026_v8  ;;  %v1772_v11 = vadd.f32 %v3144_v27, %v1219_v9  ;;  %v1028_v12 = vpop.f32.mrb[34].mxu0  ;;  %v1221_v13 = vpop.f32.mrb[34].mxu1 }
 0x163   : > { %v1773_v14 = vadd.f32 %v3138_v24, %v1028_v12  ;;  %v1775_v15 = vadd.f32 %v3140_v25, %v1221_v13  ;;  %v1030_v16 = vpop.f32.mrb[35].mxu0  ;;  %v1223_v17 = vpop.f32.mrb[35].mxu1 }
 0x164   : > { %v2700_v18 = vpack.c.bf16 %v1770_v10, %v1769_v6  ;;  %v2701_v19 = vpack.c.bf16 %v1772_v11, %v1771_v7  ;;  %v1774_v20 = vadd.f32 %v3142_v26, %v1030_v16  ;;  %v1776_v21 = vadd.f32 %v3144_v27, %v1223_v17 }
 0x166   : > { %2249 = vst [vmem:[%s3156_s12 + $0x100] sm:$0xff] %v2700_v18  ;;  %2250 = vst [vmem:[%s3156_s12 + $0x108] sm:$0xff] %v2701_v19  ;;  %v2702_v22 = vpack.c.bf16 %v1774_v20, %v1773_v14  ;;  %v2703_v23 = vpack.c.bf16 %v1776_v21, %v1775_v15 }
 0x168   : > { %2251 = vst [vmem:[%s3156_s12 + $0x110] sm:$0xff] %v2702_v22  ;;  %2252 = vst [vmem:[%s3156_s12 + $0x118] sm:$0xff] %v2703_v23  ;;  %v1034_v28 = vpop.f32.mrb[36].mxu0  ;;  %v1227_v29 = vpop.f32.mrb[36].mxu1 }
 0x169   : > { %v1777_v30 = vadd.f32 %v3138_v24, %v1034_v28  ;;  %v1779_v31 = vadd.f32 %v3140_v25, %v1227_v29  ;;  %v1036_v32 = vpop.f32.mrb[37].mxu0  ;;  %v1229_v33 = vpop.f32.mrb[37].mxu1 }
 0x16a   : > { %v1778_v34 = vadd.f32 %v3142_v26, %v1036_v32  ;;  %v1780_v35 = vadd.f32 %v3144_v27, %v1229_v33  ;;  %v1038_v36 = vpop.f32.mrb[38].mxu0  ;;  %v1231_v37 = vpop.f32.mrb[38].mxu1 }
 0x16b   : > { %v1781_v38 = vadd.f32 %v3138_v24, %v1038_v36  ;;  %v1783_v39 = vadd.f32 %v3140_v25, %v1231_v37  ;;  %v1040_v40 = vpop.f32.mrb[39].mxu0  ;;  %v1233_v41 = vpop.f32.mrb[39].mxu1 }
 0x16c   : > { %v2704_v42 = vpack.c.bf16 %v1778_v34, %v1777_v30  ;;  %v2705_v43 = vpack.c.bf16 %v1780_v35, %v1779_v31  ;;  %v1782_v44 = vadd.f32 %v3142_v26, %v1040_v40  ;;  %v1784_v45 = vadd.f32 %v3144_v27, %v1233_v41 }
 0x16e   : > { %2253 = vst [vmem:[%s3156_s12 + $0x120] sm:$0xff] %v2704_v42  ;;  %2254 = vst [vmem:[%s3156_s12 + $0x128] sm:$0xff] %v2705_v43  ;;  %v2706_v46 = vpack.c.bf16 %v1782_v44, %v1781_v38  ;;  %v2707_v47 = vpack.c.bf16 %v1784_v45, %v1783_v39 }
 0x170   : > { %2255 = vst [vmem:[%s3156_s12 + $0x130] sm:$0xff] %v2706_v46  ;;  %2256 = vst [vmem:[%s3156_s12 + $0x138] sm:$0xff] %v2707_v47  ;;  %v1044_v48 = vpop.f32.mrb[40].mxu0  ;;  %v1237_v49 = vpop.f32.mrb[40].mxu1 }
 0x171   : > { %v1785_v50 = vadd.f32 %v3138_v24, %v1044_v48  ;;  %v1787_v51 = vadd.f32 %v3140_v25, %v1237_v49  ;;  %v1046_v52 = vpop.f32.mrb[41].mxu0  ;;  %v1239_v53 = vpop.f32.mrb[41].mxu1 }
 0x172   : > { %v1786_v54 = vadd.f32 %v3142_v26, %v1046_v52  ;;  %v1788_v55 = vadd.f32 %v3144_v27, %v1239_v53  ;;  %v1048_v56 = vpop.f32.mrb[42].mxu0  ;;  %v1241_v57 = vpop.f32.mrb[42].mxu1 }
 0x173   : > { %v1789_v58 = vadd.f32 %v3138_v24, %v1048_v56  ;;  %v1791_v59 = vadd.f32 %v3140_v25, %v1241_v57  ;;  %v1050_v60 = vpop.f32.mrb[43].mxu0  ;;  %v1243_v61 = vpop.f32.mrb[43].mxu1 }
 0x174   : > { %v2708_v62 = vpack.c.bf16 %v1786_v54, %v1785_v50  ;;  %v2709_v63 = vpack.c.bf16 %v1788_v55, %v1787_v51  ;;  %v1790_v0 = vadd.f32 %v3142_v26, %v1050_v60  ;;  %v1792_v1 = vadd.f32 %v3144_v27, %v1243_v61 }
 0x176   : > { %2257 = vst [vmem:[%s3156_s12 + $0x140] sm:$0xff] %v2708_v62  ;;  %2258 = vst [vmem:[%s3156_s12 + $0x148] sm:$0xff] %v2709_v63  ;;  %v2710_v2 = vpack.c.bf16 %v1790_v0, %v1789_v58  ;;  %v2711_v3 = vpack.c.bf16 %v1792_v1, %v1791_v59 }
 0x178   : > { %2259 = vst [vmem:[%s3156_s12 + $0x150] sm:$0xff] %v2710_v2  ;;  %2260 = vst [vmem:[%s3156_s12 + $0x158] sm:$0xff] %v2711_v3  ;;  %v1054_v4 = vpop.f32.mrb[44].mxu0  ;;  %v1247_v5 = vpop.f32.mrb[44].mxu1 }
 0x179   : > { %v1793_v6 = vadd.f32 %v3138_v24, %v1054_v4  ;;  %v1795_v7 = vadd.f32 %v3140_v25, %v1247_v5  ;;  %v1056_v8 = vpop.f32.mrb[45].mxu0  ;;  %v1249_v9 = vpop.f32.mrb[45].mxu1 }
 0x17a   : > { %v1794_v10 = vadd.f32 %v3142_v26, %v1056_v8  ;;  %v1796_v11 = vadd.f32 %v3144_v27, %v1249_v9  ;;  %v1058_v12 = vpop.f32.mrb[46].mxu0  ;;  %v1251_v13 = vpop.f32.mrb[46].mxu1 }
 0x17b   : > { %v1797_v14 = vadd.f32 %v3138_v24, %v1058_v12  ;;  %v1799_v15 = vadd.f32 %v3140_v25, %v1251_v13  ;;  %v1060_v16 = vpop.f32.mrb[47].mxu0  ;;  %v1253_v17 = vpop.f32.mrb[47].mxu1 }
 0x17c   : > { %v2712_v18 = vpack.c.bf16 %v1794_v10, %v1793_v6  ;;  %v2713_v19 = vpack.c.bf16 %v1796_v11, %v1795_v7  ;;  %v1798_v20 = vadd.f32 %v3142_v26, %v1060_v16  ;;  %v1800_v21 = vadd.f32 %v3144_v27, %v1253_v17 }
 0x17e   : > { %2261 = vst [vmem:[%s3156_s12 + $0x160] sm:$0xff] %v2712_v18  ;;  %2262 = vst [vmem:[%s3156_s12 + $0x168] sm:$0xff] %v2713_v19  ;;  %v2714_v22 = vpack.c.bf16 %v1798_v20, %v1797_v14  ;;  %v2715_v23 = vpack.c.bf16 %v1800_v21, %v1799_v15 }
 0x180   : > { %2263 = vst [vmem:[%s3156_s12 + $0x170] sm:$0xff] %v2714_v22  ;;  %2264 = vst [vmem:[%s3156_s12 + $0x178] sm:$0xff] %v2715_v23  ;;  %v1064_v28 = vpop.f32.mrb[48].mxu0  ;;  %v1257_v29 = vpop.f32.mrb[48].mxu1 }
 0x181   : > { %v1801_v30 = vadd.f32 %v3138_v24, %v1064_v28  ;;  %v1803_v31 = vadd.f32 %v3140_v25, %v1257_v29  ;;  %v1066_v32 = vpop.f32.mrb[49].mxu0  ;;  %v1259_v33 = vpop.f32.mrb[49].mxu1 }
 0x182   : > { %v1802_v34 = vadd.f32 %v3142_v26, %v1066_v32  ;;  %v1804_v35 = vadd.f32 %v3144_v27, %v1259_v33  ;;  %v1068_v36 = vpop.f32.mrb[50].mxu0  ;;  %v1261_v37 = vpop.f32.mrb[50].mxu1 }
 0x183   : > { %v1805_v38 = vadd.f32 %v3138_v24, %v1068_v36  ;;  %v1807_v39 = vadd.f32 %v3140_v25, %v1261_v37  ;;  %v1070_v40 = vpop.f32.mrb[51].mxu0  ;;  %v1263_v41 = vpop.f32.mrb[51].mxu1 }
 0x184   : > { %v2716_v42 = vpack.c.bf16 %v1802_v34, %v1801_v30  ;;  %v2717_v43 = vpack.c.bf16 %v1804_v35, %v1803_v31  ;;  %v1806_v44 = vadd.f32 %v3142_v26, %v1070_v40  ;;  %v1808_v45 = vadd.f32 %v3144_v27, %v1263_v41 }
 0x186   : > { %2265 = vst [vmem:[%s3156_s12 + $0x180] sm:$0xff] %v2716_v42  ;;  %2266 = vst [vmem:[%s3156_s12 + $0x188] sm:$0xff] %v2717_v43  ;;  %v2718_v46 = vpack.c.bf16 %v1806_v44, %v1805_v38  ;;  %v2719_v47 = vpack.c.bf16 %v1808_v45, %v1807_v39 }
 0x188   : > { %2267 = vst [vmem:[%s3156_s12 + $0x190] sm:$0xff] %v2718_v46  ;;  %2268 = vst [vmem:[%s3156_s12 + $0x198] sm:$0xff] %v2719_v47  ;;  %v1074_v48 = vpop.f32.mrb[52].mxu0  ;;  %v1267_v49 = vpop.f32.mrb[52].mxu1 }
 0x189   : > { %v1809_v50 = vadd.f32 %v3138_v24, %v1074_v48  ;;  %v1811_v51 = vadd.f32 %v3140_v25, %v1267_v49  ;;  %v1076_v52 = vpop.f32.mrb[53].mxu0  ;;  %v1269_v53 = vpop.f32.mrb[53].mxu1  ;;  %v2314_v48 = vld [vmem:[%s3156_s12 + $0x20] sm:$0xff] (%p2934_p6)  ;;  %v2316_v49 = vld [vmem:[%s3156_s12 + $0x28] sm:$0xff] (%p2934_p6) }
 0x18a   : > { %v1810_v54 = vadd.f32 %v3142_v26, %v1076_v52  ;;  %v1812_v55 = vadd.f32 %v3144_v27, %v1269_v53  ;;  %v1078_v56 = vpop.f32.mrb[54].mxu0  ;;  %v1271_v57 = vpop.f32.mrb[54].mxu1  ;;  %2315 = vst [vmem:[%s3351_s9 + $0x60] sm:$0xff] (%p2934_p6), %v2314_v48  ;;  %2317 = vst [vmem:[%s3351_s9 + $0x68] sm:$0xff] (%p2934_p6), %v2316_v49  ;;  %v2322_v52 = vld [vmem:[%s3156_s12 + $0x40] sm:$0xff] (%p2934_p6)  ;;  %v2324_v53 = vld [vmem:[%s3156_s12 + $0x48] sm:$0xff] (%p2934_p6) }
 0x18b   : > { %v1813_v58 = vadd.f32 %v3138_v24, %v1078_v56  ;;  %v1815_v59 = vadd.f32 %v3140_v25, %v1271_v57  ;;  %v1080_v60 = vpop.f32.mrb[55].mxu0  ;;  %v1273_v61 = vpop.f32.mrb[55].mxu1  ;;  %2323 = vst [vmem:[%s3351_s9 + $0xc0] sm:$0xff] (%p2934_p6), %v2322_v52  ;;  %2325 = vst [vmem:[%s3351_s9 + $0xc8] sm:$0xff] (%p2934_p6), %v2324_v53  ;;  %v2330_v56 = vld [vmem:[%s3156_s12 + $0x60] sm:$0xff] (%p2934_p6)  ;;  %v2332_v57 = vld [vmem:[%s3156_s12 + $0x68] sm:$0xff] (%p2934_p6) }
 0x18c   : > { %v2720_v62 = vpack.c.bf16 %v1810_v54, %v1809_v50  ;;  %v2721_v63 = vpack.c.bf16 %v1812_v55, %v1811_v51  ;;  %v1814_v0 = vadd.f32 %v3142_v26, %v1080_v60  ;;  %v1816_v1 = vadd.f32 %v3144_v27, %v1273_v61  ;;  %v2318_v50 = vld [vmem:[%s3156_s12 + $0x30] sm:$0xff] (%p2934_p6)  ;;  %v2320_v51 = vld [vmem:[%s3156_s12 + $0x38] sm:$0xff] (%p2934_p6)  ;;  %2331 = vst [vmem:[%s3351_s9 + $0x120] sm:$0xff] (%p2934_p6), %v2330_v56  ;;  %v2338_v60 = vld [vmem:[%s3156_s12 + $0x80] sm:$0xff] (%p2934_p6) }
 0x18d   : > { %2319 = vst [vmem:[%s3351_s9 + $0x90] sm:$0xff] (%p2934_p6), %v2318_v50  ;;  %2321 = vst [vmem:[%s3351_s9 + $0x98] sm:$0xff] (%p2934_p6), %v2320_v51  ;;  %v2326_v54 = vld [vmem:[%s3156_s12 + $0x50] sm:$0xff] (%p2934_p6)  ;;  %v2328_v55 = vld [vmem:[%s3156_s12 + $0x58] sm:$0xff] (%p2934_p6) }
 0x18e   : > { %2269 = vst [vmem:[%s3156_s12 + $0x1a0] sm:$0xff] %v2720_v62  ;;  %2270 = vst [vmem:[%s3156_s12 + $0x1a8] sm:$0xff] %v2721_v63  ;;  %v2722_v2 = vpack.c.bf16 %v1814_v0, %v1813_v58  ;;  %v2723_v3 = vpack.c.bf16 %v1816_v1, %v1815_v59  ;;  %v2334_v58 = vld [vmem:[%s3156_s12 + $0x70] sm:$0xff] (%p2934_p6)  ;;  %v2336_v59 = vld [vmem:[%s3156_s12 + $0x78] sm:$0xff] (%p2934_p6) }
 0x18f   : > { %2327 = vst [vmem:[%s3351_s9 + $0xf0] sm:$0xff] (%p2934_p6), %v2326_v54  ;;  %2329 = vst [vmem:[%s3351_s9 + $0xf8] sm:$0xff] (%p2934_p6), %v2328_v55  ;;  %v2340_v61 = vld [vmem:[%s3156_s12 + $0x88] sm:$0xff] (%p2934_p6)  ;;  %v2342_v62 = vld [vmem:[%s3156_s12 + $0x90] sm:$0xff] (%p2934_p6) }
 0x190   : > { %2271 = vst [vmem:[%s3156_s12 + $0x1b0] sm:$0xff] %v2722_v2  ;;  %2272 = vst [vmem:[%s3156_s12 + $0x1b8] sm:$0xff] %v2723_v3  ;;  %v1084_v4 = vpop.f32.mrb[56].mxu0  ;;  %v1277_v5 = vpop.f32.mrb[56].mxu1  ;;  %v2344_v63 = vld [vmem:[%s3156_s12 + $0x98] sm:$0xff] (%p2934_p6)  ;;  %v2346_v0 = vld [vmem:[%s3156_s12 + $0xa0] sm:$0xff] (%p2934_p6) }
 0x191   : > { %v1817_v6 = vadd.f32 %v3138_v24, %v1084_v4  ;;  %v1819_v7 = vadd.f32 %v3140_v25, %v1277_v5  ;;  %v1086_v8 = vpop.f32.mrb[57].mxu0  ;;  %v1279_v9 = vpop.f32.mrb[57].mxu1  ;;  %2333 = vst [vmem:[%s3351_s9 + $0x128] sm:$0xff] (%p2934_p6), %v2332_v57  ;;  %2335 = vst [vmem:[%s3351_s9 + $0x150] sm:$0xff] (%p2934_p6), %v2334_v58  ;;  %v2348_v1 = vld [vmem:[%s3156_s12 + $0xa8] sm:$0xff] (%p2934_p6)  ;;  %v2350_v2 = vld [vmem:[%s3156_s12 + $0xb0] sm:$0xff] (%p2934_p6) }
 0x192   : > { %v1818_v10 = vadd.f32 %v3142_v26, %v1086_v8  ;;  %v1820_v11 = vadd.f32 %v3144_v27, %v1279_v9  ;;  %v1088_v12 = vpop.f32.mrb[58].mxu0  ;;  %v1281_v13 = vpop.f32.mrb[58].mxu1  ;;  %2337 = vst [vmem:[%s3351_s9 + $0x158] sm:$0xff] (%p2934_p6), %v2336_v59  ;;  %2339 = vst [vmem:[%s3351_s9 + $0x180] sm:$0xff] (%p2934_p6), %v2338_v60  ;;  %v2352_v3 = vld [vmem:[%s3156_s12 + $0xb8] sm:$0xff] (%p2934_p6)  ;;  %v2354_v4 = vld [vmem:[%s3156_s12 + $0xc0] sm:$0xff] (%p2934_p6) }
 0x193   : > { %v1821_v14 = vadd.f32 %v3138_v24, %v1088_v12  ;;  %v1823_v15 = vadd.f32 %v3140_v25, %v1281_v13  ;;  %v1090_v16 = vpop.f32.mrb[59].mxu0  ;;  %v1283_v17 = vpop.f32.mrb[59].mxu1  ;;  %2341 = vst [vmem:[%s3351_s9 + $0x188] sm:$0xff] (%p2934_p6), %v2340_v61  ;;  %2343 = vst [vmem:[%s3351_s9 + $0x1b0] sm:$0xff] (%p2934_p6), %v2342_v62  ;;  %v2356_v5 = vld [vmem:[%s3156_s12 + $0xc8] sm:$0xff] (%p2934_p6)  ;;  %v2362_v8 = vld [vmem:[%s3156_s12 + $0xe0] sm:$0xff] (%p2934_p6) }
 0x194   : > { %v2724_v18 = vpack.c.bf16 %v1818_v10, %v1817_v6  ;;  %v2725_v19 = vpack.c.bf16 %v1820_v11, %v1819_v7  ;;  %v1822_v20 = vadd.f32 %v3142_v26, %v1090_v16  ;;  %v1824_v21 = vadd.f32 %v3144_v27, %v1283_v17  ;;  %2345 = vst [vmem:[%s3351_s9 + $0x1b8] sm:$0xff] (%p2934_p6), %v2344_v63  ;;  %v2358_v6 = vld [vmem:[%s3156_s12 + $0xd0] sm:$0xff] (%p2934_p6)  ;;  %v2360_v7 = vld [vmem:[%s3156_s12 + $0xd8] sm:$0xff] (%p2934_p6)  ;;  %v2364_v9 = vld [vmem:[%s3156_s12 + $0xe8] sm:$0xff] (%p2934_p6) }
 0x195   : > { %2347 = vst [vmem:[%s3351_s9 + $0x1e0] sm:$0xff] (%p2934_p6), %v2346_v0  ;;  %2349 = vst [vmem:[%s3351_s9 + $0x1e8] sm:$0xff] (%p2934_p6), %v2348_v1  ;;  %v2366_v10 = vld [vmem:[%s3156_s12 + $0xf0] sm:$0xff] (%p2934_p6)  ;;  %v2368_v11 = vld [vmem:[%s3156_s12 + $0xf8] sm:$0xff] (%p2934_p6) }
 0x196   : > { %2273 = vst [vmem:[%s3156_s12 + $0x1c0] sm:$0xff] %v2724_v18  ;;  %2274 = vst [vmem:[%s3156_s12 + $0x1c8] sm:$0xff] %v2725_v19  ;;  %v2726_v22 = vpack.c.bf16 %v1822_v20, %v1821_v14  ;;  %v2727_v23 = vpack.c.bf16 %v1824_v21, %v1823_v15  ;;  %v2370_v12 = vld [vmem:[%s3156_s12 + $0x100] sm:$0xff] (%p2934_p6)  ;;  %v2372_v13 = vld [vmem:[%s3156_s12 + $0x108] sm:$0xff] (%p2934_p6) }
 0x197   : > { %2351 = vst [vmem:[%s3351_s9 + $0x210] sm:$0xff] (%p2934_p6), %v2350_v2  ;;  %2353 = vst [vmem:[%s3351_s9 + $0x218] sm:$0xff] (%p2934_p6), %v2352_v3  ;;  %v2374_v14 = vld [vmem:[%s3156_s12 + $0x110] sm:$0xff] (%p2934_p6)  ;;  %v2376_v15 = vld [vmem:[%s3156_s12 + $0x118] sm:$0xff] (%p2934_p6) }
 0x198   : > { %2275 = vst [vmem:[%s3156_s12 + $0x1d0] sm:$0xff] %v2726_v22  ;;  %2276 = vst [vmem:[%s3156_s12 + $0x1d8] sm:$0xff] %v2727_v23  ;;  %v1094_v28 = vpop.f32.mrb[60].mxu0  ;;  %v1287_v29 = vpop.f32.mrb[60].mxu1  ;;  %v2378_v16 = vld [vmem:[%s3156_s12 + $0x120] sm:$0xff] (%p2934_p6)  ;;  %v2380_v17 = vld [vmem:[%s3156_s12 + $0x128] sm:$0xff] (%p2934_p6) }
 0x199   : > { %v1825_v30 = vadd.f32 %v3138_v24, %v1094_v28  ;;  %v1827_v31 = vadd.f32 %v3140_v25, %v1287_v29  ;;  %v1096_v32 = vpop.f32.mrb[61].mxu0  ;;  %v1289_v33 = vpop.f32.mrb[61].mxu1  ;;  %2355 = vst [vmem:[%s3351_s9 + $0x240] sm:$0xff] (%p2934_p6), %v2354_v4  ;;  %2357 = vst [vmem:[%s3351_s9 + $0x248] sm:$0xff] (%p2934_p6), %v2356_v5  ;;  %v2382_v18 = vld [vmem:[%s3156_s12 + $0x130] sm:$0xff] (%p2934_p6)  ;;  %v2384_v19 = vld [vmem:[%s3156_s12 + $0x138] sm:$0xff] (%p2934_p6) }
 0x19a   : > { %v1826_v34 = vadd.f32 %v3142_v26, %v1096_v32  ;;  %v1828_v35 = vadd.f32 %v3144_v27, %v1289_v33  ;;  %v1098_v36 = vpop.f32.mrb[62].mxu0  ;;  %v1291_v37 = vpop.f32.mrb[62].mxu1  ;;  %2287 = sbr.rel (!%p2934_p6) target bundleno = 434 (0x1b2), region = 67  ;;  %2359 = vst [vmem:[%s3351_s9 + $0x270] sm:$0xff] (%p2934_p6), %v2358_v6  ;;  %2361 = vst [vmem:[%s3351_s9 + $0x278] sm:$0xff] (%p2934_p6), %v2360_v7  ;;  %v2386_v20 = vld [vmem:[%s3156_s12 + $0x140] sm:$0xff] (%p2934_p6) }
 0x19b   : > { %v1829_v38 = vadd.f32 %v3138_v24, %v1098_v36  ;;  %v1831_v39 = vadd.f32 %v3140_v25, %v1291_v37  ;;  %v1100_v40 = vpop.f32.mrb[63].mxu0  ;;  %v1293_v41 = vpop.f32.mrb[63].mxu1  ;;  %v2306_v24 = vld [vmem:[%s3156_s12] sm:$0xff] (%p2934_p6)  ;;  %v2308_v25 = vld [vmem:[%s3156_s12 + $0x8] sm:$0xff] (%p2934_p6)  ;;  %2363 = vst [vmem:[%s3351_s9 + $0x2a0] sm:$0xff] (%p2934_p6), %v2362_v8  ;;  %2365 = vst [vmem:[%s3351_s9 + $0x2a8] sm:$0xff] (%p2934_p6), %v2364_v9 }
 0x19c   : > { %v2728_v42 = vpack.c.bf16 %v1826_v34, %v1825_v30  ;;  %v2729_v43 = vpack.c.bf16 %v1828_v35, %v1827_v31  ;;  %v1830_v44 = vadd.f32 %v3142_v26, %v1100_v40  ;;  %v1832_v45 = vadd.f32 %v3144_v27, %v1293_v41  ;;  %v2310_v26 = vld [vmem:[%s3156_s12 + $0x10] sm:$0xff] (%p2934_p6)  ;;  %v2312_v27 = vld [vmem:[%s3156_s12 + $0x18] sm:$0xff] (%p2934_p6)  ;;  %2307 = vst [vmem:[%s3351_s9] sm:$0xff] (%p2934_p6), %v2306_v24  ;;  %v2388_v21 = vld [vmem:[%s3156_s12 + $0x148] sm:$0xff] (%p2934_p6) }
 0x19d   : > { %2309 = vst [vmem:[%s3351_s9 + $0x8] sm:$0xff] (%p2934_p6), %v2308_v25  ;;  %2311 = vst [vmem:[%s3351_s9 + $0x30] sm:$0xff] (%p2934_p6), %v2310_v26  ;;  %v2390_v22 = vld [vmem:[%s3156_s12 + $0x150] sm:$0xff] (%p2934_p6)  ;;  %v2392_v23 = vld [vmem:[%s3156_s12 + $0x158] sm:$0xff] (%p2934_p6) }
 0x19e   : > { %2277 = vst [vmem:[%s3156_s12 + $0x1e0] sm:$0xff] %v2728_v42  ;;  %2278 = vst [vmem:[%s3156_s12 + $0x1e8] sm:$0xff] %v2729_v43  ;;  %v2730_v46 = vpack.c.bf16 %v1830_v44, %v1829_v38  ;;  %v2731_v47 = vpack.c.bf16 %v1832_v45, %v1831_v39  ;;  %v2394_v28 = vld [vmem:[%s3156_s12 + $0x160] sm:$0xff] (%p2934_p6)  ;;  %v2396_v29 = vld [vmem:[%s3156_s12 + $0x168] sm:$0xff] (%p2934_p6) }
 0x19f   : > { %2313 = vst [vmem:[%s3351_s9 + $0x38] sm:$0xff] (%p2934_p6), %v2312_v27  ;;  %2367 = vst [vmem:[%s3351_s9 + $0x2d0] sm:$0xff] (%p2934_p6), %v2366_v10  ;;  %v2398_v30 = vld [vmem:[%s3156_s12 + $0x170] sm:$0xff] (%p2934_p6)  ;;  %v2400_v31 = vld [vmem:[%s3156_s12 + $0x178] sm:$0xff] (%p2934_p6) }
 0x1a0   : > { %2279 = vst [vmem:[%s3156_s12 + $0x1f0] sm:$0xff] %v2730_v46  ;;  %2280 = vst [vmem:[%s3156_s12 + $0x1f8] sm:$0xff] %v2731_v47  ;;  %v2402_v32 = vld [vmem:[%s3156_s12 + $0x180] sm:$0xff] (%p2934_p6)  ;;  %v2404_v33 = vld [vmem:[%s3156_s12 + $0x188] sm:$0xff] (%p2934_p6) }
 0x1a1   : > { %2369 = vst [vmem:[%s3351_s9 + $0x2d8] sm:$0xff] %v2368_v11  ;;  %2371 = vst [vmem:[%s3351_s9 + $0x300] sm:$0xff] %v2370_v12  ;;  %v2406_v34 = vld [vmem:[%s3156_s12 + $0x190] sm:$0xff]  ;;  %v2408_v35 = vld [vmem:[%s3156_s12 + $0x198] sm:$0xff] }
 0x1a2   : > { %2373 = vst [vmem:[%s3351_s9 + $0x308] sm:$0xff] %v2372_v13  ;;  %2375 = vst [vmem:[%s3351_s9 + $0x330] sm:$0xff] %v2374_v14  ;;  %v2410_v36 = vld [vmem:[%s3156_s12 + $0x1a0] sm:$0xff]  ;;  %v2412_v37 = vld [vmem:[%s3156_s12 + $0x1a8] sm:$0xff] }
 0x1a3   : > { %2377 = vst [vmem:[%s3351_s9 + $0x338] sm:$0xff] %v2376_v15  ;;  %2379 = vst [vmem:[%s3351_s9 + $0x360] sm:$0xff] %v2378_v16  ;;  %v2414_v38 = vld [vmem:[%s3156_s12 + $0x1b0] sm:$0xff]  ;;  %v2416_v39 = vld [vmem:[%s3156_s12 + $0x1b8] sm:$0xff] }
 0x1a4   : > { %2381 = vst [vmem:[%s3351_s9 + $0x368] sm:$0xff] %v2380_v17  ;;  %2383 = vst [vmem:[%s3351_s9 + $0x390] sm:$0xff] %v2382_v18  ;;  %v2418_v40 = vld [vmem:[%s3156_s12 + $0x1c0] sm:$0xff]  ;;  %v2420_v41 = vld [vmem:[%s3156_s12 + $0x1c8] sm:$0xff] }
 0x1a5   : > { %2385 = vst [vmem:[%s3351_s9 + $0x398] sm:$0xff] %v2384_v19  ;;  %2387 = vst [vmem:[%s3351_s9 + $0x3c0] sm:$0xff] %v2386_v20  ;;  %v2422_v42 = vld [vmem:[%s3156_s12 + $0x1d0] sm:$0xff]  ;;  %v2424_v43 = vld [vmem:[%s3156_s12 + $0x1d8] sm:$0xff] }
 0x1a6   : > { %2389 = vst [vmem:[%s3351_s9 + $0x3c8] sm:$0xff] %v2388_v21  ;;  %2391 = vst [vmem:[%s3351_s9 + $0x3f0] sm:$0xff] %v2390_v22  ;;  %v2426_v44 = vld [vmem:[%s3156_s12 + $0x1e0] sm:$0xff]  ;;  %v2428_v45 = vld [vmem:[%s3156_s12 + $0x1e8] sm:$0xff] }
 0x1a7   : > { %2393 = vst [vmem:[%s3351_s9 + $0x3f8] sm:$0xff] %v2392_v23  ;;  %2395 = vst [vmem:[%s3351_s9 + $0x420] sm:$0xff] %v2394_v28  ;;  %v2430_v46 = vld [vmem:[%s3156_s12 + $0x1f0] sm:$0xff]  ;;  %v2432_v47 = vld [vmem:[%s3156_s12 + $0x1f8] sm:$0xff] }
 0x1a8   : > { %2397 = vst [vmem:[%s3351_s9 + $0x428] sm:$0xff] %v2396_v29  ;;  %2399 = vst [vmem:[%s3351_s9 + $0x450] sm:$0xff] %v2398_v30 }
 0x1a9   : > { %2401 = vst [vmem:[%s3351_s9 + $0x458] sm:$0xff] %v2400_v31  ;;  %2403 = vst [vmem:[%s3351_s9 + $0x480] sm:$0xff] %v2402_v32 }
 0x1aa   : > { %2405 = vst [vmem:[%s3351_s9 + $0x488] sm:$0xff] %v2404_v33  ;;  %2407 = vst [vmem:[%s3351_s9 + $0x4b0] sm:$0xff] %v2406_v34 }
 0x1ab   : > { %2409 = vst [vmem:[%s3351_s9 + $0x4b8] sm:$0xff] %v2408_v35  ;;  %2411 = vst [vmem:[%s3351_s9 + $0x4e0] sm:$0xff] %v2410_v36 }
 0x1ac   : > { %2413 = vst [vmem:[%s3351_s9 + $0x4e8] sm:$0xff] %v2412_v37  ;;  %2415 = vst [vmem:[%s3351_s9 + $0x510] sm:$0xff] %v2414_v38 }
 0x1ad   : > { %2417 = vst [vmem:[%s3351_s9 + $0x518] sm:$0xff] %v2416_v39  ;;  %2419 = vst [vmem:[%s3351_s9 + $0x540] sm:$0xff] %v2418_v40 }
 0x1ae   : > { %2421 = vst [vmem:[%s3351_s9 + $0x548] sm:$0xff] %v2420_v41  ;;  %2423 = vst [vmem:[%s3351_s9 + $0x570] sm:$0xff] %v2422_v42 }
 0x1af   : > { %2425 = vst [vmem:[%s3351_s9 + $0x578] sm:$0xff] %v2424_v43  ;;  %2427 = vst [vmem:[%s3351_s9 + $0x5a0] sm:$0xff] %v2426_v44 }
 0x1b0   : > { %2429 = vst [vmem:[%s3351_s9 + $0x5a8] sm:$0xff] %v2428_v45  ;;  %2431 = vst [vmem:[%s3351_s9 + $0x5d0] sm:$0xff] %v2430_v46 }
 0x1b1   : > { %2433 = vst [vmem:[%s3351_s9 + $0x5d8] sm:$0xff] %v2432_v47 }
 0x1b2 PF: > { %s13_s16 = sadd.s32 1, %s2876_s16   ;;  %s3498_s12 = smov %s2864_s13 }
 0x1b3   : > { %p10_p12 = scmp.ge.s32.totalorder %s13_s16, 5   ;;  %s3499_s13 = smov %s2939_s22 }
 0x1b4   : > { %s3500_s14 = smov %s2872_s15  ;;  %s3501_s15 = smov %s3503_s17 }
 0x1b5   :  { %12 = sbr.rel (!%p10_p12) target bundleno = 3 (0x3), region = 127 }

// kernel: _lambda_.22
= control target key start
LH: loop header
LB: loop body
LE: loop exit
PB: predicated region body
PF: predicated region fallthrough
CT: control target
= control target key end

     0   :  { %s1519_s0 = inlined_call_operand.vmem [shape: bf16[256,128], index: 0, kind: input, shape index: {}]   ;;  %s1520_s1 = inlined_call_operand.vmem [shape: f32[1,128], index: 1, kind: input, shape index: {}]   ;;  %s1521_s2 = inlined_call_operand.vmem [shape: f32[1,128], index: 2, kind: input, shape index: {}]   ;;  %s1522_s3 = inlined_call_operand.vmem [shape: bf16[256,128], index: 3, kind: output, shape index: {}]  }
   0x1   :  { %v1000_v0 = vld [vmem:[%s1519_s0] sm:$0xff]   ;;  %v1005_v1 = vld [vmem:[%s1519_s0 + $0x8] sm:$0xff]   ;;  %v1018_v6 = vld [vmem:[%s1519_s0 + $0x10] sm:$0xff]  }
   0x2   :  { %v741_v2 = vunpack.c.l.bf16 %v1000_v0  ;;  %v745_v3 = vunpack.c.l.bf16 %v1005_v1  ;;  %v742_v4 = vunpack.c.h.bf16 %v1000_v0  ;;  %v746_v5 = vunpack.c.h.bf16 %v1005_v1  ;;  %v1029_v9 = vld [vmem:[%s1519_s0 + $0x18] sm:$0xff]   ;;  %v1040_v12 = vld [vmem:[%s1519_s0 + $0x20] sm:$0xff]   ;;  %v1051_v15 = vld [vmem:[%s1519_s0 + $0x28] sm:$0xff]  }
   0x3   :  { %v749_v7 = vunpack.c.l.bf16 %v1018_v6  ;;  %v750_v8 = vunpack.c.h.bf16 %v1018_v6  ;;  %v753_v10 = vunpack.c.l.bf16 %v1029_v9  ;;  %v754_v11 = vunpack.c.h.bf16 %v1029_v9  ;;  %v1062_v18 = vld [vmem:[%s1519_s0 + $0x30] sm:$0xff]   ;;  %v1073_v21 = vld [vmem:[%s1519_s0 + $0x38] sm:$0xff]   ;;  %v1084_v24 = vld [vmem:[%s1519_s0 + $0x40] sm:$0xff]  }
   0x4   :  { %80 = vadd.xlane.f32.xlu0 %v741_v2  ;;  %84 = vadd.xlane.f32.xlu1 %v745_v3  ;;  %v757_v13 = vunpack.c.l.bf16 %v1040_v12  ;;  %v758_v14 = vunpack.c.h.bf16 %v1040_v12  ;;  %v761_v16 = vunpack.c.l.bf16 %v1051_v15  ;;  %v762_v17 = vunpack.c.h.bf16 %v1051_v15  ;;  %v1095_v27 = vld [vmem:[%s1519_s0 + $0x48] sm:$0xff]   ;;  %v1106_v30 = vld [vmem:[%s1519_s0 + $0x50] sm:$0xff]   ;;  %v1117_v33 = vld [vmem:[%s1519_s0 + $0x58] sm:$0xff]  }
   0x5   :  { %v765_v19 = vunpack.c.l.bf16 %v1062_v18  ;;  %v766_v20 = vunpack.c.h.bf16 %v1062_v18  ;;  %v769_v22 = vunpack.c.l.bf16 %v1073_v21  ;;  %v770_v23 = vunpack.c.h.bf16 %v1073_v21  ;;  %v1128_v36 = vld [vmem:[%s1519_s0 + $0x60] sm:$0xff]   ;;  %v1139_v39 = vld [vmem:[%s1519_s0 + $0x68] sm:$0xff]   ;;  %v1150_v42 = vld [vmem:[%s1519_s0 + $0x70] sm:$0xff]  }
   0x6   :  { %v773_v25 = vunpack.c.l.bf16 %v1084_v24  ;;  %v774_v26 = vunpack.c.h.bf16 %v1084_v24  ;;  %v777_v28 = vunpack.c.l.bf16 %v1095_v27  ;;  %v778_v29 = vunpack.c.h.bf16 %v1095_v27  ;;  %v1161_v45 = vld [vmem:[%s1519_s0 + $0x78] sm:$0xff]  }
   0x7   :  { %v781_v31 = vunpack.c.l.bf16 %v1106_v30  ;;  %v782_v32 = vunpack.c.h.bf16 %v1106_v30  ;;  %v785_v34 = vunpack.c.l.bf16 %v1117_v33  ;;  %v786_v35 = vunpack.c.h.bf16 %v1117_v33 }
   0x8   :  { %82 = vadd.xlane.f32.xlu0 %v742_v4  ;;  %86 = vadd.xlane.f32.xlu1 %v746_v5  ;;  %v789_v37 = vunpack.c.l.bf16 %v1128_v36  ;;  %v790_v38 = vunpack.c.h.bf16 %v1128_v36  ;;  %v793_v40 = vunpack.c.l.bf16 %v1139_v39  ;;  %v794_v41 = vunpack.c.h.bf16 %v1139_v39 }
   0x9   :  { %v797_v43 = vunpack.c.l.bf16 %v1150_v42  ;;  %v798_v44 = vunpack.c.h.bf16 %v1150_v42  ;;  %v801_v46 = vunpack.c.l.bf16 %v1161_v45  ;;  %v802_v47 = vunpack.c.h.bf16 %v1161_v45 }
   0xc   :  { %88 = vadd.xlane.f32.xlu0 %v749_v7  ;;  %90 = vadd.xlane.f32.xlu1 %v750_v8 }
  0x10   :  { %92 = vadd.xlane.f32.xlu0 %v753_v10  ;;  %94 = vadd.xlane.f32.xlu1 %v754_v11 }
  0x14   :  { %96 = vadd.xlane.f32.xlu0 %v757_v13  ;;  %98 = vadd.xlane.f32.xlu1 %v758_v14 }
  0x18   :  { %100 = vadd.xlane.f32.xlu0 %v761_v16  ;;  %102 = vadd.xlane.f32.xlu1 %v762_v17 }
  0x1c   :  { %104 = vadd.xlane.f32.xlu0 %v765_v19  ;;  %106 = vadd.xlane.f32.xlu1 %v766_v20 }
  0x20   :  { %108 = vadd.xlane.f32.xlu0 %v769_v22  ;;  %110 = vadd.xlane.f32.xlu1 %v770_v23 }
  0x24   :  { %112 = vadd.xlane.f32.xlu0 %v773_v25  ;;  %114 = vadd.xlane.f32.xlu1 %v774_v26 }
  0x28   :  { %116 = vadd.xlane.f32.xlu0 %v777_v28  ;;  %118 = vadd.xlane.f32.xlu1 %v778_v29 }
  0x2c   :  { %120 = vadd.xlane.f32.xlu0 %v781_v31  ;;  %122 = vadd.xlane.f32.xlu1 %v782_v32 }
  0x30   :  { %124 = vadd.xlane.f32.xlu0 %v785_v34  ;;  %126 = vadd.xlane.f32.xlu1 %v786_v35 }
  0x34   :  { %128 = vadd.xlane.f32.xlu0 %v789_v37  ;;  %130 = vadd.xlane.f32.xlu1 %v790_v38 }
  0x38   :  { %132 = vadd.xlane.f32.xlu0 %v793_v40  ;;  %134 = vadd.xlane.f32.xlu1 %v794_v41 }
  0x3c   :  { %136 = vadd.xlane.f32.xlu0 %v797_v43  ;;  %138 = vadd.xlane.f32.xlu1 %v798_v44 }
  0x40   :  { %140 = vadd.xlane.f32.xlu0 %v801_v46  ;;  %142 = vadd.xlane.f32.xlu1 %v802_v47 }
  0x91   :  { %v81_v48 = vpop.xlane.xlu0 %80  ;;  %v85_v49 = vpop.xlane.xlu1 %84 }
  0x92   :  { %v145_v50 = vmul.f32 0.0078125, %v81_v48  ;;  %v147_v51 = vmul.f32 0.0078125, %v85_v49 }
  0x94   :  { %v1175_v52 = vsub.f32 %v741_v2, %v145_v50  ;;  %v1179_v53 = vsub.f32 %v745_v3, %v147_v51 }
  0x95   :  { %v83_v54 = vpop.xlane.xlu0 %82  ;;  %v87_v55 = vpop.xlane.xlu1 %86 }
  0x96   :  { %v146_v56 = vmul.f32 0.0078125, %v83_v54  ;;  %v209_v57 = vmul.f32 %v1175_v52, %v1175_v52  ;;  %v148_v58 = vmul.f32 0.0078125, %v87_v55  ;;  %v211_v61 = vmul.f32 %v1179_v53, %v1179_v53 }
  0x98   :  { %v1185_v59 = vsub.f32 %v742_v4, %v146_v56  ;;  %241 = vadd.xlane.f32.xlu0 %v209_v57  ;;  %v1189_v60 = vsub.f32 %v746_v5, %v148_v58 }
  0x99   :  { %v89_v62 = vpop.xlane.xlu0 %88  ;;  %v91_v63 = vpop.xlane.xlu1 %90 }
  0x9a   :  { %v149_v2 = vmul.f32 0.0078125, %v89_v62  ;;  %v210_v3 = vmul.f32 %v1185_v59, %v1185_v59  ;;  %v150_v48 = vmul.f32 0.0078125, %v91_v63  ;;  %v212_v4 = vmul.f32 %v1189_v60, %v1189_v60 }
  0x9c   :  { %v1197_v0 = vsub.f32 %v749_v7, %v149_v2  ;;  %245 = vadd.xlane.f32.xlu0 %v211_v61  ;;  %243 = vadd.xlane.f32.xlu1 %v210_v3  ;;  %v1201_v1 = vsub.f32 %v750_v8, %v150_v48 }
  0x9d   :  { %v93_v5 = vpop.xlane.xlu0 %92  ;;  %v95_v49 = vpop.xlane.xlu1 %94 }
  0x9e   :  { %v151_v50 = vmul.f32 0.0078125, %v93_v5  ;;  %v213_v51 = vmul.f32 %v1197_v0, %v1197_v0  ;;  %v152_v54 = vmul.f32 0.0078125, %v95_v49  ;;  %v214_v8 = vmul.f32 %v1201_v1, %v1201_v1 }
  0xa0   :  { %v1209_v7 = vsub.f32 %v753_v10, %v151_v50  ;;  %247 = vadd.xlane.f32.xlu1 %v212_v4  ;;  %249 = vadd.xlane.f32.xlu0 %v213_v51  ;;  %v1213_v6 = vsub.f32 %v754_v11, %v152_v54 }
  0xa1   :  { %v97_v55 = vpop.xlane.xlu0 %96  ;;  %v99_v56 = vpop.xlane.xlu1 %98 }
  0xa2   :  { %v153_v57 = vmul.f32 0.0078125, %v97_v55  ;;  %v215_v58 = vmul.f32 %v1209_v7, %v1209_v7  ;;  %v154_v61 = vmul.f32 0.0078125, %v99_v56  ;;  %v216_v11 = vmul.f32 %v1213_v6, %v1213_v6 }
  0xa4   :  { %v1221_v10 = vsub.f32 %v757_v13, %v153_v57  ;;  %251 = vadd.xlane.f32.xlu1 %v214_v8  ;;  %253 = vadd.xlane.f32.xlu0 %v215_v58  ;;  %v1225_v9 = vsub.f32 %v758_v14, %v154_v61 }
  0xa5   :  { %v101_v62 = vpop.xlane.xlu0 %100  ;;  %v103_v63 = vpop.xlane.xlu1 %102 }
  0xa6   :  { %v155_v2 = vmul.f32 0.0078125, %v101_v62  ;;  %v217_v3 = vmul.f32 %v1221_v10, %v1221_v10  ;;  %v156_v48 = vmul.f32 0.0078125, %v103_v63  ;;  %v218_v14 = vmul.f32 %v1225_v9, %v1225_v9 }
  0xa8   :  { %v1233_v13 = vsub.f32 %v761_v16, %v155_v2  ;;  %255 = vadd.xlane.f32.xlu1 %v216_v11  ;;  %257 = vadd.xlane.f32.xlu0 %v217_v3  ;;  %v1237_v12 = vsub.f32 %v762_v17, %v156_v48 }
  0xa9   :  { %v105_v4 = vpop.xlane.xlu0 %104  ;;  %v107_v5 = vpop.xlane.xlu1 %106 }
  0xaa   :  { %v157_v49 = vmul.f32 0.0078125, %v105_v4  ;;  %v219_v50 = vmul.f32 %v1233_v13, %v1233_v13  ;;  %v158_v51 = vmul.f32 0.0078125, %v107_v5  ;;  %v220_v17 = vmul.f32 %v1237_v12, %v1237_v12 }
  0xac   :  { %v1245_v16 = vsub.f32 %v765_v19, %v157_v49  ;;  %259 = vadd.xlane.f32.xlu1 %v218_v14  ;;  %261 = vadd.xlane.f32.xlu0 %v219_v50  ;;  %v1249_v15 = vsub.f32 %v766_v20, %v158_v51 }
  0xad   :  { %v109_v54 = vpop.xlane.xlu0 %108  ;;  %v111_v8 = vpop.xlane.xlu1 %110 }
  0xae   :  { %v159_v55 = vmul.f32 0.0078125, %v109_v54  ;;  %v221_v56 = vmul.f32 %v1245_v16, %v1245_v16  ;;  %v160_v57 = vmul.f32 0.0078125, %v111_v8  ;;  %v222_v20 = vmul.f32 %v1249_v15, %v1249_v15 }
  0xb0   :  { %v1257_v19 = vsub.f32 %v769_v22, %v159_v55  ;;  %263 = vadd.xlane.f32.xlu1 %v220_v17  ;;  %265 = vadd.xlane.f32.xlu0 %v221_v56  ;;  %v1261_v18 = vsub.f32 %v770_v23, %v160_v57 }
  0xb1   :  { %v113_v58 = vpop.xlane.xlu0 %112  ;;  %v115_v61 = vpop.xlane.xlu1 %114 }
  0xb2   :  { %v161_v11 = vmul.f32 0.0078125, %v113_v58  ;;  %v223_v62 = vmul.f32 %v1257_v19, %v1257_v19  ;;  %v162_v63 = vmul.f32 0.0078125, %v115_v61  ;;  %v224_v23 = vmul.f32 %v1261_v18, %v1261_v18 }
  0xb4   :  { %v1269_v22 = vsub.f32 %v773_v25, %v161_v11  ;;  %267 = vadd.xlane.f32.xlu1 %v222_v20  ;;  %269 = vadd.xlane.f32.xlu0 %v223_v62  ;;  %v1273_v21 = vsub.f32 %v774_v26, %v162_v63 }
  0xb5   :  { %v117_v2 = vpop.xlane.xlu0 %116  ;;  %v119_v3 = vpop.xlane.xlu1 %118 }
  0xb6   :  { %v163_v48 = vmul.f32 0.0078125, %v117_v2  ;;  %v225_v14 = vmul.f32 %v1269_v22, %v1269_v22  ;;  %v164_v4 = vmul.f32 0.0078125, %v119_v3  ;;  %v226_v26 = vmul.f32 %v1273_v21, %v1273_v21 }
  0xb8   :  { %v1281_v25 = vsub.f32 %v777_v28, %v163_v48  ;;  %271 = vadd.xlane.f32.xlu1 %v224_v23  ;;  %273 = vadd.xlane.f32.xlu0 %v225_v14  ;;  %v1285_v24 = vsub.f32 %v778_v29, %v164_v4 }
  0xb9   :  { %v121_v5 = vpop.xlane.xlu0 %120  ;;  %v123_v49 = vpop.xlane.xlu1 %122 }
  0xba   :  { %v165_v50 = vmul.f32 0.0078125, %v121_v5  ;;  %v227_v51 = vmul.f32 %v1281_v25, %v1281_v25  ;;  %v166_v17 = vmul.f32 0.0078125, %v123_v49  ;;  %v228_v29 = vmul.f32 %v1285_v24, %v1285_v24 }
  0xbc   :  { %v1293_v28 = vsub.f32 %v781_v31, %v165_v50  ;;  %275 = vadd.xlane.f32.xlu1 %v226_v26  ;;  %277 = vadd.xlane.f32.xlu0 %v227_v51  ;;  %v1297_v27 = vsub.f32 %v782_v32, %v166_v17 }
  0xbd   :  { %v125_v54 = vpop.xlane.xlu0 %124  ;;  %v127_v8 = vpop.xlane.xlu1 %126 }
  0xbe   :  { %v167_v55 = vmul.f32 0.0078125, %v125_v54  ;;  %v229_v56 = vmul.f32 %v1293_v28, %v1293_v28  ;;  %v168_v57 = vmul.f32 0.0078125, %v127_v8  ;;  %v230_v32 = vmul.f32 %v1297_v27, %v1297_v27 }
  0xc0   :  { %v1305_v31 = vsub.f32 %v785_v34, %v167_v55  ;;  %279 = vadd.xlane.f32.xlu1 %v228_v29  ;;  %281 = vadd.xlane.f32.xlu0 %v229_v56  ;;  %v1309_v30 = vsub.f32 %v786_v35, %v168_v57 }
  0xc1   :  { %v129_v20 = vpop.xlane.xlu0 %128  ;;  %v131_v58 = vpop.xlane.xlu1 %130 }
  0xc2   :  { %v169_v61 = vmul.f32 0.0078125, %v129_v20  ;;  %v231_v11 = vmul.f32 %v1305_v31, %v1305_v31  ;;  %v170_v62 = vmul.f32 0.0078125, %v131_v58  ;;  %v232_v35 = vmul.f32 %v1309_v30, %v1309_v30 }
  0xc4   :  { %v1317_v34 = vsub.f32 %v789_v37, %v169_v61  ;;  %283 = vadd.xlane.f32.xlu1 %v230_v32  ;;  %285 = vadd.xlane.f32.xlu0 %v231_v11  ;;  %v1321_v33 = vsub.f32 %v790_v38, %v170_v62 }
  0xc5   :  { %v133_v63 = vpop.xlane.xlu0 %132  ;;  %v135_v23 = vpop.xlane.xlu1 %134 }
  0xc6   :  { %v171_v2 = vmul.f32 0.0078125, %v133_v63  ;;  %v233_v3 = vmul.f32 %v1317_v34, %v1317_v34  ;;  %v172_v48 = vmul.f32 0.0078125, %v135_v23  ;;  %v234_v38 = vmul.f32 %v1321_v33, %v1321_v33 }
  0xc8   :  { %v1329_v37 = vsub.f32 %v793_v40, %v171_v2  ;;  %287 = vadd.xlane.f32.xlu1 %v232_v35  ;;  %289 = vadd.xlane.f32.xlu0 %v233_v3  ;;  %v1333_v36 = vsub.f32 %v794_v41, %v172_v48 }
  0xc9   :  { %v137_v14 = vpop.xlane.xlu0 %136  ;;  %v139_v4 = vpop.xlane.xlu1 %138 }
  0xca   :  { %v173_v26 = vmul.f32 0.0078125, %v137_v14  ;;  %v235_v5 = vmul.f32 %v1329_v37, %v1329_v37  ;;  %v174_v49 = vmul.f32 0.0078125, %v139_v4  ;;  %v236_v41 = vmul.f32 %v1333_v36, %v1333_v36 }
  0xcc   :  { %v1341_v40 = vsub.f32 %v797_v43, %v173_v26  ;;  %291 = vadd.xlane.f32.xlu1 %v234_v38  ;;  %293 = vadd.xlane.f32.xlu0 %v235_v5  ;;  %v1345_v39 = vsub.f32 %v798_v44, %v174_v49 }
  0xcd   :  { %v141_v50 = vpop.xlane.xlu0 %140  ;;  %v143_v51 = vpop.xlane.xlu1 %142 }
  0xce   :  { %v175_v17 = vmul.f32 0.0078125, %v141_v50  ;;  %v237_v29 = vmul.f32 %v1341_v40, %v1341_v40  ;;  %v176_v54 = vmul.f32 0.0078125, %v143_v51  ;;  %v238_v44 = vmul.f32 %v1345_v39, %v1345_v39  ;;  %v1369_v51 = vld [vmem:[%s1520_s1] ss:$0 sm:$0xff] }
  0xd0   :  { %v1353_v43 = vsub.f32 %v801_v46, %v175_v17  ;;  %295 = vadd.xlane.f32.xlu1 %v236_v41  ;;  %297 = vadd.xlane.f32.xlu0 %v237_v29  ;;  %v1357_v42 = vsub.f32 %v802_v47, %v176_v54 }
  0xd2   :  { %v239_v8 = vmul.f32 %v1353_v43, %v1353_v43  ;;  %v240_v55 = vmul.f32 %v1357_v42, %v1357_v42 }
  0xd4   :  { %299 = vadd.xlane.f32.xlu1 %v238_v44  ;;  %301 = vadd.xlane.f32.xlu0 %v239_v8 }
  0xd8   :  { %303 = vadd.xlane.f32.xlu1 %v240_v55 }
 0x125   :  { %v242_v46 = vpop.xlane.xlu0 %241 }
 0x126   :  { %v305_v56 = vmul.f32 0.0078125, %v242_v46 }
 0x128   :  { %v337_v57 = vadd.f32 1e-05, %v305_v56 }
 0x129   :  { %v244_v32 = vpop.xlane.xlu1 %243  ;;  %v246_v20 = vpop.xlane.xlu0 %245 }
 0x12a   :  { %913 = vrsqrt.f32 %v337_v57  ;;  %v306_v45 = vmul.f32 0.0078125, %v244_v32  ;;  %v307_v47 = vmul.f32 0.0078125, %v246_v20  ;;  %v1376_v32 = vld [vmem:[%s1521_s2] ss:$0 sm:$0xff] }
 0x12c   :  { %v338_v58 = vadd.f32 1e-05, %v306_v45  ;;  %v339_v61 = vadd.f32 1e-05, %v307_v47 }
 0x12d   :  { %v248_v11 = vpop.xlane.xlu1 %247  ;;  %v250_v62 = vpop.xlane.xlu0 %249 }
 0x12e   :  { %915 = vrsqrt.f32 %v338_v58  ;;  %v308_v35 = vmul.f32 0.0078125, %v248_v11  ;;  %v309_v63 = vmul.f32 0.0078125, %v250_v62 }
 0x12f   :  { %917 = vrsqrt.f32 %v339_v61 }
 0x130   :  { %v340_v23 = vadd.f32 1e-05, %v308_v35  ;;  %v341_v2 = vadd.f32 1e-05, %v309_v63 }
 0x131   :  { %v252_v3 = vpop.xlane.xlu1 %251  ;;  %v254_v48 = vpop.xlane.xlu0 %253 }
 0x132   :  { %919 = vrsqrt.f32 %v340_v23  ;;  %v310_v38 = vmul.f32 0.0078125, %v252_v3  ;;  %v311_v14 = vmul.f32 0.0078125, %v254_v48 }
 0x133   :  { %921 = vrsqrt.f32 %v341_v2 }
 0x134   :  { %v914_v4 = vpop.eup %913  ;;  %v342_v26 = vadd.f32 1e-05, %v310_v38  ;;  %v343_v5 = vadd.f32 1e-05, %v311_v14 }
 0x135   :  { %v401_v49 = vmul.f32 %v914_v4, %v1175_v52  ;;  %v256_v41 = vpop.xlane.xlu1 %255  ;;  %v258_v50 = vpop.xlane.xlu0 %257 }
 0x136   :  { %923 = vrsqrt.f32 %v342_v26  ;;  %v312_v17 = vmul.f32 0.0078125, %v256_v41  ;;  %v313_v29 = vmul.f32 0.0078125, %v258_v50 }
 0x137   :  { %925 = vrsqrt.f32 %v343_v5  ;;  %v439_v46 = vmul.f32 %v1369_v51, %v401_v49 }
 0x138   :  { %v916_v54 = vpop.eup %915  ;;  %v344_v44 = vadd.f32 1e-05, %v312_v17  ;;  %v345_v8 = vadd.f32 1e-05, %v313_v29 }
 0x139   :  { %v918_v55 = vpop.eup %917  ;;  %v402_v56 = vmul.f32 %v916_v54, %v1185_v59  ;;  %v260_v52 = vpop.xlane.xlu1 %259  ;;  %v477_v59 = vadd.f32 %v1376_v32, %v439_v46 }
 0x13a   :  { %v262_v57 = vpop.xlane.xlu0 %261  ;;  %v403_v20 = vmul.f32 %v918_v55, %v1179_v53  ;;  %927 = vrsqrt.f32 %v344_v44  ;;  %v314_v45 = vmul.f32 0.0078125, %v260_v52 }
 0x13b   :  { %v315_v47 = vmul.f32 0.0078125, %v262_v57  ;;  %v440_v58 = vmul.f32 %v1369_v51, %v402_v56  ;;  %929 = vrsqrt.f32 %v345_v8 }
 0x13c   :  { %v920_v61 = vpop.eup %919  ;;  %v346_v11 = vadd.f32 1e-05, %v314_v45  ;;  %v441_v23 = vmul.f32 %v1369_v51, %v403_v20 }
 0x13d   :  { %v347_v62 = vadd.f32 1e-05, %v315_v47  ;;  %v922_v35 = vpop.eup %921  ;;  %v478_v63 = vadd.f32 %v1376_v32, %v440_v58  ;;  %v404_v2 = vmul.f32 %v920_v61, %v1189_v60  ;;  %v264_v3 = vpop.xlane.xlu1 %263 }
 0x13e   :  { %v266_v53 = vpop.xlane.xlu0 %265  ;;  %v405_v48 = vmul.f32 %v922_v35, %v1197_v0  ;;  %931 = vrsqrt.f32 %v346_v11  ;;  %v316_v38 = vmul.f32 0.0078125, %v264_v3  ;;  %v479_v60 = vadd.f32 %v1376_v32, %v441_v23 }
 0x13f   :  { %v806_v14 = vpack.c.bf16 %v478_v63, %v477_v59  ;;  %v442_v4 = vmul.f32 %v1369_v51, %v404_v2  ;;  %933 = vrsqrt.f32 %v347_v62  ;;  %v317_v26 = vmul.f32 0.0078125, %v266_v53 }
 0x140   :  { %v924_v5 = vpop.eup %923  ;;  %v443_v49 = vmul.f32 %v1369_v51, %v405_v48  ;;  %v348_v41 = vadd.f32 1e-05, %v316_v38 }
 0x141   :  { %v926_v50 = vpop.eup %925  ;;  %807 = vst [vmem:[%s1522_s3] sm:$0xff] %v806_v14   ;;  %v480_v0 = vadd.f32 %v1376_v32, %v442_v4  ;;  %v406_v17 = vmul.f32 %v924_v5, %v1201_v1  ;;  %v349_v29 = vadd.f32 1e-05, %v317_v26  ;;  %v268_v54 = vpop.xlane.xlu1 %267 }
 0x142   :  { %v270_v44 = vpop.xlane.xlu0 %269  ;;  %v407_v8 = vmul.f32 %v926_v50, %v1209_v7  ;;  %935 = vrsqrt.f32 %v348_v41  ;;  %v318_v55 = vmul.f32 0.0078125, %v268_v54  ;;  %v481_v20 = vadd.f32 %v1376_v32, %v443_v49 }
 0x143   :  { %v811_v46 = vpack.c.bf16 %v480_v0, %v479_v60  ;;  %v444_v56 = vmul.f32 %v1369_v51, %v406_v17  ;;  %937 = vrsqrt.f32 %v349_v29  ;;  %v319_v52 = vmul.f32 0.0078125, %v270_v44 }
 0x144   :  { %v928_v57 = vpop.eup %927  ;;  %v350_v45 = vadd.f32 1e-05, %v318_v55  ;;  %v445_v7 = vmul.f32 %v1369_v51, %v407_v8 }
 0x145   :  { %v930_v47 = vpop.eup %929  ;;  %898 = vst [vmem:[%s1522_s3 + $0x8] sm:$0xff] %v811_v46   ;;  %v482_v1 = vadd.f32 %v1376_v32, %v444_v56  ;;  %v408_v58 = vmul.f32 %v928_v57, %v1213_v6  ;;  %v351_v61 = vadd.f32 1e-05, %v319_v52  ;;  %v272_v11 = vpop.xlane.xlu1 %271 }
 0x146   :  { %v274_v62 = vpop.xlane.xlu0 %273  ;;  %v409_v35 = vmul.f32 %v930_v47, %v1221_v10  ;;  %939 = vrsqrt.f32 %v350_v45  ;;  %v320_v59 = vmul.f32 0.0078125, %v272_v11  ;;  %v483_v6 = vadd.f32 %v1376_v32, %v445_v7 }
 0x147   :  { %v816_v63 = vpack.c.bf16 %v482_v1, %v481_v20  ;;  %v446_v23 = vmul.f32 %v1369_v51, %v408_v58  ;;  %941 = vrsqrt.f32 %v351_v61  ;;  %v321_v2 = vmul.f32 0.0078125, %v274_v62 }
 0x148   :  { %v932_v3 = vpop.eup %931  ;;  %v447_v53 = vmul.f32 %v1369_v51, %v409_v35  ;;  %v352_v48 = vadd.f32 1e-05, %v320_v59 }
 0x149   :  { %v934_v38 = vpop.eup %933  ;;  %899 = vst [vmem:[%s1522_s3 + $0x10] sm:$0xff] %v816_v63   ;;  %v484_v10 = vadd.f32 %v1376_v32, %v446_v23  ;;  %v410_v14 = vmul.f32 %v932_v3, %v1225_v9  ;;  %v353_v4 = vadd.f32 1e-05, %v321_v2  ;;  %v276_v26 = vpop.xlane.xlu1 %275 }
 0x14a   :  { %v278_v5 = vpop.xlane.xlu0 %277  ;;  %v411_v49 = vmul.f32 %v934_v38, %v1233_v13  ;;  %943 = vrsqrt.f32 %v352_v48  ;;  %v322_v41 = vmul.f32 0.0078125, %v276_v26  ;;  %v485_v29 = vadd.f32 %v1376_v32, %v447_v53 }
 0x14b   :  { %v821_v50 = vpack.c.bf16 %v484_v10, %v483_v6  ;;  %v448_v60 = vmul.f32 %v1369_v51, %v410_v14  ;;  %945 = vrsqrt.f32 %v353_v4  ;;  %v323_v0 = vmul.f32 0.0078125, %v278_v5 }
 0x14c   :  { %v936_v17 = vpop.eup %935  ;;  %v354_v54 = vadd.f32 1e-05, %v322_v41  ;;  %v449_v13 = vmul.f32 %v1369_v51, %v411_v49 }
 0x14d   :  { %v938_v44 = vpop.eup %937  ;;  %900 = vst [vmem:[%s1522_s3 + $0x18] sm:$0xff] %v821_v50   ;;  %v486_v9 = vadd.f32 %v1376_v32, %v448_v60  ;;  %v412_v8 = vmul.f32 %v936_v17, %v1237_v12  ;;  %v355_v55 = vadd.f32 1e-05, %v323_v0  ;;  %v280_v46 = vpop.xlane.xlu1 %279 }
 0x14e   :  { %v282_v56 = vpop.xlane.xlu0 %281  ;;  %v413_v52 = vmul.f32 %v938_v44, %v1245_v16  ;;  %947 = vrsqrt.f32 %v354_v54  ;;  %v324_v57 = vmul.f32 0.0078125, %v280_v46  ;;  %v487_v12 = vadd.f32 %v1376_v32, %v449_v13 }
 0x14f   :  { %v826_v20 = vpack.c.bf16 %v486_v9, %v485_v29  ;;  %v450_v45 = vmul.f32 %v1369_v51, %v412_v8  ;;  %949 = vrsqrt.f32 %v355_v55  ;;  %v325_v47 = vmul.f32 0.0078125, %v282_v56 }
 0x150   :  { %v940_v1 = vpop.eup %939  ;;  %v451_v7 = vmul.f32 %v1369_v51, %v413_v52  ;;  %v356_v58 = vadd.f32 1e-05, %v324_v57 }
 0x151   :  { %v942_v61 = vpop.eup %941  ;;  %901 = vst [vmem:[%s1522_s3 + $0x20] sm:$0xff] %v826_v20   ;;  %v488_v16 = vadd.f32 %v1376_v32, %v450_v45  ;;  %v414_v11 = vmul.f32 %v940_v1, %v1249_v15  ;;  %v357_v62 = vadd.f32 1e-05, %v325_v47  ;;  %v284_v35 = vpop.xlane.xlu1 %283 }
 0x152   :  { %v286_v59 = vpop.xlane.xlu0 %285  ;;  %v415_v63 = vmul.f32 %v942_v61, %v1257_v19  ;;  %951 = vrsqrt.f32 %v356_v58  ;;  %v326_v23 = vmul.f32 0.0078125, %v284_v35  ;;  %v489_v38 = vadd.f32 %v1376_v32, %v451_v7 }
 0x153   :  { %v831_v2 = vpack.c.bf16 %v488_v16, %v487_v12  ;;  %v452_v3 = vmul.f32 %v1369_v51, %v414_v11  ;;  %953 = vrsqrt.f32 %v357_v62  ;;  %v327_v53 = vmul.f32 0.0078125, %v286_v59 }
 0x154   :  { %v944_v48 = vpop.eup %943  ;;  %v358_v6 = vadd.f32 1e-05, %v326_v23  ;;  %v453_v19 = vmul.f32 %v1369_v51, %v415_v63 }
 0x155   :  { %v946_v10 = vpop.eup %945  ;;  %902 = vst [vmem:[%s1522_s3 + $0x28] sm:$0xff] %v831_v2   ;;  %v490_v15 = vadd.f32 %v1376_v32, %v452_v3  ;;  %v416_v14 = vmul.f32 %v944_v48, %v1261_v18  ;;  %v359_v4 = vadd.f32 1e-05, %v327_v53  ;;  %v288_v26 = vpop.xlane.xlu1 %287 }
 0x156   :  { %v290_v5 = vpop.xlane.xlu0 %289  ;;  %v417_v49 = vmul.f32 %v946_v10, %v1269_v22  ;;  %955 = vrsqrt.f32 %v358_v6  ;;  %v328_v41 = vmul.f32 0.0078125, %v288_v26  ;;  %v491_v18 = vadd.f32 %v1376_v32, %v453_v19 }
 0x157   :  { %v836_v50 = vpack.c.bf16 %v490_v15, %v489_v38  ;;  %v454_v60 = vmul.f32 %v1369_v51, %v416_v14  ;;  %957 = vrsqrt.f32 %v359_v4  ;;  %v329_v0 = vmul.f32 0.0078125, %v290_v5 }
 0x158   :  { %v948_v17 = vpop.eup %947  ;;  %v455_v29 = vmul.f32 %v1369_v51, %v417_v49  ;;  %v360_v54 = vadd.f32 1e-05, %v328_v41 }
 0x159   :  { %v950_v44 = vpop.eup %949  ;;  %903 = vst [vmem:[%s1522_s3 + $0x30] sm:$0xff] %v836_v50   ;;  %v492_v22 = vadd.f32 %v1376_v32, %v454_v60  ;;  %v418_v9 = vmul.f32 %v948_v17, %v1273_v21  ;;  %v361_v13 = vadd.f32 1e-05, %v329_v0  ;;  %v292_v8 = vpop.xlane.xlu1 %291 }
 0x15a   :  { %v294_v55 = vpop.xlane.xlu0 %293  ;;  %v419_v46 = vmul.f32 %v950_v44, %v1281_v25  ;;  %959 = vrsqrt.f32 %v360_v54  ;;  %v330_v56 = vmul.f32 0.0078125, %v292_v8  ;;  %v493_v47 = vadd.f32 %v1376_v32, %v455_v29 }
 0x15b   :  { %v841_v52 = vpack.c.bf16 %v492_v22, %v491_v18  ;;  %v456_v57 = vmul.f32 %v1369_v51, %v418_v9  ;;  %961 = vrsqrt.f32 %v361_v13  ;;  %v331_v20 = vmul.f32 0.0078125, %v294_v55 }
 0x15c   :  { %v952_v45 = vpop.eup %951  ;;  %v362_v1 = vadd.f32 1e-05, %v330_v56  ;;  %v457_v25 = vmul.f32 %v1369_v51, %v419_v46 }
 0x15d   :  { %v954_v7 = vpop.eup %953  ;;  %904 = vst [vmem:[%s1522_s3 + $0x38] sm:$0xff] %v841_v52   ;;  %v494_v21 = vadd.f32 %v1376_v32, %v456_v57  ;;  %v420_v58 = vmul.f32 %v952_v45, %v1285_v24  ;;  %v363_v61 = vadd.f32 1e-05, %v331_v20  ;;  %v296_v12 = vpop.xlane.xlu1 %295 }
 0x15e   :  { %v298_v16 = vpop.xlane.xlu0 %297  ;;  %v421_v11 = vmul.f32 %v954_v7, %v1293_v28  ;;  %963 = vrsqrt.f32 %v362_v1  ;;  %v332_v62 = vmul.f32 0.0078125, %v296_v12  ;;  %v495_v24 = vadd.f32 %v1376_v32, %v457_v25 }
 0x15f   :  { %v846_v35 = vpack.c.bf16 %v494_v21, %v493_v47  ;;  %v458_v59 = vmul.f32 %v1369_v51, %v420_v58  ;;  %965 = vrsqrt.f32 %v363_v61  ;;  %v333_v63 = vmul.f32 0.0078125, %v298_v16 }
 0x160   :  { %v956_v23 = vpop.eup %955  ;;  %v459_v2 = vmul.f32 %v1369_v51, %v421_v11  ;;  %v364_v3 = vadd.f32 1e-05, %v332_v62 }
 0x161   :  { %v958_v53 = vpop.eup %957  ;;  %905 = vst [vmem:[%s1522_s3 + $0x40] sm:$0xff] %v846_v35   ;;  %v496_v28 = vadd.f32 %v1376_v32, %v458_v59  ;;  %v422_v48 = vmul.f32 %v956_v23, %v1297_v27  ;;  %v365_v38 = vadd.f32 1e-05, %v333_v63  ;;  %v300_v6 = vpop.xlane.xlu1 %299 }
 0x162   :  { %v302_v10 = vpop.xlane.xlu0 %301  ;;  %v423_v15 = vmul.f32 %v958_v53, %v1305_v31  ;;  %967 = vrsqrt.f32 %v364_v3  ;;  %v334_v19 = vmul.f32 0.0078125, %v300_v6  ;;  %v497_v49 = vadd.f32 %v1376_v32, %v459_v2 }
 0x163   :  { %v851_v14 = vpack.c.bf16 %v496_v28, %v495_v24  ;;  %v460_v4 = vmul.f32 %v1369_v51, %v422_v48  ;;  %969 = vrsqrt.f32 %v365_v38  ;;  %v335_v26 = vmul.f32 0.0078125, %v302_v10 }
 0x164   :  { %v960_v5 = vpop.eup %959  ;;  %v366_v41 = vadd.f32 1e-05, %v334_v19  ;;  %v461_v31 = vmul.f32 %v1369_v51, %v423_v15 }
 0x165   :  { %v962_v50 = vpop.eup %961  ;;  %906 = vst [vmem:[%s1522_s3 + $0x48] sm:$0xff] %v851_v14   ;;  %v498_v27 = vadd.f32 %v1376_v32, %v460_v4  ;;  %v424_v60 = vmul.f32 %v960_v5, %v1309_v30  ;;  %v367_v0 = vadd.f32 1e-05, %v335_v26  ;;  %v304_v17 = vpop.xlane.xlu1 %303 }
 0x166   :  { %v425_v29 = vmul.f32 %v962_v50, %v1317_v34  ;;  %971 = vrsqrt.f32 %v366_v41  ;;  %v336_v54 = vmul.f32 0.0078125, %v304_v17  ;;  %v499_v8 = vadd.f32 %v1376_v32, %v461_v31 }
 0x167   :  { %v856_v44 = vpack.c.bf16 %v498_v27, %v497_v49  ;;  %v462_v18 = vmul.f32 %v1369_v51, %v424_v60  ;;  %973 = vrsqrt.f32 %v367_v0 }
 0x168   :  { %v964_v22 = vpop.eup %963  ;;  %v368_v9 = vadd.f32 1e-05, %v336_v54  ;;  %v463_v55 = vmul.f32 %v1369_v51, %v425_v29 }
 0x169   :  { %v966_v13 = vpop.eup %965  ;;  %907 = vst [vmem:[%s1522_s3 + $0x50] sm:$0xff] %v856_v44   ;;  %v500_v30 = vadd.f32 %v1376_v32, %v462_v18  ;;  %v426_v34 = vmul.f32 %v964_v22, %v1321_v33 }
 0x16a   :  { %v427_v46 = vmul.f32 %v966_v13, %v1329_v37  ;;  %975 = vrsqrt.f32 %v368_v9  ;;  %v501_v45 = vadd.f32 %v1376_v32, %v463_v55 }
 0x16b   :  { %v861_v56 = vpack.c.bf16 %v500_v30, %v499_v8  ;;  %v464_v52 = vmul.f32 %v1369_v51, %v426_v34 }
 0x16c   :  { %v968_v57 = vpop.eup %967  ;;  %v465_v1 = vmul.f32 %v1369_v51, %v427_v46 }
 0x16d   :  { %v970_v20 = vpop.eup %969  ;;  %908 = vst [vmem:[%s1522_s3 + $0x58] sm:$0xff] %v861_v56   ;;  %v502_v47 = vadd.f32 %v1376_v32, %v464_v52  ;;  %v428_v33 = vmul.f32 %v968_v57, %v1333_v36 }
 0x16e   :  { %v429_v37 = vmul.f32 %v970_v20, %v1341_v40  ;;  %v503_v61 = vadd.f32 %v1376_v32, %v465_v1 }
 0x16f   :  { %v866_v7 = vpack.c.bf16 %v502_v47, %v501_v45  ;;  %v466_v21 = vmul.f32 %v1369_v51, %v428_v33 }
 0x170   :  { %v972_v25 = vpop.eup %971  ;;  %v467_v16 = vmul.f32 %v1369_v51, %v429_v37 }
 0x171   :  { %v974_v58 = vpop.eup %973  ;;  %909 = vst [vmem:[%s1522_s3 + $0x60] sm:$0xff] %v866_v7   ;;  %v504_v12 = vadd.f32 %v1376_v32, %v466_v21  ;;  %v430_v11 = vmul.f32 %v972_v25, %v1345_v39 }
 0x172   :  { %v431_v36 = vmul.f32 %v974_v58, %v1353_v43  ;;  %v505_v59 = vadd.f32 %v1376_v32, %v467_v16 }
 0x173   :  { %v871_v40 = vpack.c.bf16 %v504_v12, %v503_v61  ;;  %v468_v62 = vmul.f32 %v1369_v51, %v430_v11 }
 0x174   :  { %v976_v35 = vpop.eup %975  ;;  %v469_v23 = vmul.f32 %v1369_v51, %v431_v36 }
 0x175   :  { %910 = vst [vmem:[%s1522_s3 + $0x68] sm:$0xff] %v871_v40   ;;  %v506_v63 = vadd.f32 %v1376_v32, %v468_v62  ;;  %v432_v2 = vmul.f32 %v976_v35, %v1357_v42 }
 0x176   :  { %v507_v43 = vadd.f32 %v1376_v32, %v469_v23 }
 0x177   :  { %v876_v3 = vpack.c.bf16 %v506_v63, %v505_v59  ;;  %v470_v39 = vmul.f32 %v1369_v51, %v432_v2 }
 0x179   :  { %911 = vst [vmem:[%s1522_s3 + $0x70] sm:$0xff] %v876_v3   ;;  %v508_v53 = vadd.f32 %v1376_v32, %v470_v39 }
 0x17b   :  { %v881_v24 = vpack.c.bf16 %v508_v53, %v507_v43 }
 0x17d   :  { %912 = vst [vmem:[%s1522_s3 + $0x78] sm:$0xff] %v881_v24  }

// kernel: _lambda_.16
= control target key start
LH: loop header
LB: loop body
LE: loop exit
PB: predicated region body
PF: predicated region fallthrough
CT: control target
= control target key end

     0   :  { %s2621_s1 = inlined_call_operand.vmem [shape: bf16[256,128], index: 1, kind: input, shape index: {}]   ;;  %s2622_s0 = inlined_call_operand.vmem [shape: bf16[256,256], index: 0, kind: input, shape index: {}]   ;;  %s2623_s3 = inlined_call_operand.vmem [shape: bf16[256,128], index: 3, kind: input, shape index: {}]   ;;  %s2624_s2 = inlined_call_operand.vmem [shape: f32[1,128], index: 2, kind: input, shape index: {}]   ;;  %s2625_s4 = inlined_call_operand.vmem [shape: f32[1,128], index: 4, kind: input, shape index: {}]   ;;  %s2626_s5 = inlined_call_operand.vmem [shape: f32[1,128], index: 5, kind: input, shape index: {}]   ;;  %s2627_s6 = inlined_call_operand.vmem [shape: bf16[256,128], index: 6, kind: output, shape index: {}]  }
   0x1   :  { %v1819_v0 = vld [vmem:[%s2621_s1 + $0x40] sm:$0xff]   ;;  %v1821_v2 = vld [vmem:[%s2621_s1 + $0x48] sm:$0xff]   ;;  %v1823_v4 = vld [vmem:[%s2621_s1 + $0x50] sm:$0xff]  }
   0x2   :  { %v1820_v1 = vld [vmem:[%s2621_s1] sm:$0xff]   ;;  %1691 = vmatprep.subr.bf16.mxu0 %v1819_v0  ;;  %1803 = vmatprep.subr.bf16.mxu1 %v1819_v0  ;;  %v1822_v3 = vld [vmem:[%s2621_s1 + $0x8] sm:$0xff]   ;;  %v1824_v5 = vld [vmem:[%s2621_s1 + $0x10] sm:$0xff]  }
   0x3   :  { %1692 = vmatpush3.bf16.msra.mxu0 %v1820_v1  ;;  %1811 = vmatpush3.bf16.msra.mxu1 %v1820_v1  ;;  %v1825_v6 = vld [vmem:[%s2621_s1 + $0x58] sm:$0xff]   ;;  %v1827_v8 = vld [vmem:[%s2621_s1 + $0x60] sm:$0xff]   ;;  %v1829_v10 = vld [vmem:[%s2621_s1 + $0x68] sm:$0xff]  }
   0x4   :  { %1693 = vmatprep.subr.bf16.mxu0 %v1821_v2  ;;  %1804 = vmatprep.subr.bf16.mxu1 %v1821_v2  ;;  %v1826_v7 = vld [vmem:[%s2621_s1 + $0x18] sm:$0xff]   ;;  %v1828_v9 = vld [vmem:[%s2621_s1 + $0x20] sm:$0xff]   ;;  %v1830_v13 = vld [vmem:[%s2621_s1 + $0x28] sm:$0xff]  }
   0x5   :  { %v1837_v11 = vld [vmem:[%s2622_s0 + $0x4] ss:$8 sps:$4 sm:$0xff]   ;;  %v1831_v14 = vld [vmem:[%s2621_s1 + $0x70] sm:$0xff]   ;;  %v1833_v16 = vld [vmem:[%s2621_s1 + $0x78] sm:$0xff]  }
   0x6   :  { %v1840_v12 = vld [vmem:[%s2622_s0 + $0x84] ss:$8 sps:$4 sm:$0xff]   ;;  %444 = vmatprep.mubr.bf16.mxu0 %v1837_v11  ;;  %v1832_v15 = vld [vmem:[%s2621_s1 + $0x30] sm:$0xff]   ;;  %v1834_v17 = vld [vmem:[%s2621_s1 + $0x38] sm:$0xff]  }
   0x7   :  { %1694 = vmatpush3.bf16.msra.mxu0 %v1822_v3  ;;  %1812 = vmatpush3.bf16.msra.mxu1 %v1822_v3  ;;  %v1835_v18 = vld [vmem:[%s2622_s0] ss:$8 sps:$4 sm:$0xff]   ;;  %v1841_v20 = vld [vmem:[%s2622_s0 + $0x14] ss:$8 sps:$4 sm:$0xff]   ;;  %v1843_v22 = vld [vmem:[%s2622_s0 + $0x10] ss:$8 sps:$4 sm:$0xff]  }
   0x8   :  { %1695 = vmatprep.subr.bf16.mxu0 %v1823_v4  ;;  %1805 = vmatprep.subr.bf16.mxu1 %v1823_v4  ;;  %v1838_v19 = vld [vmem:[%s2622_s0 + $0x80] ss:$8 sps:$4 sm:$0xff]   ;;  %v1844_v21 = vld [vmem:[%s2622_s0 + $0x94] ss:$8 sps:$4 sm:$0xff]   ;;  %v1846_v23 = vld [vmem:[%s2622_s0 + $0x90] ss:$8 sps:$4 sm:$0xff]  }
   0x9   :  { %508 = vmatprep.mubr.bf16.mxu1 %v1840_v12  ;;  %v1847_v24 = vld [vmem:[%s2622_s0 + $0x24] ss:$8 sps:$4 sm:$0xff]   ;;  %v1849_v26 = vld [vmem:[%s2622_s0 + $0x20] ss:$8 sps:$4 sm:$0xff]   ;;  %v1853_v28 = vld [vmem:[%s2622_s0 + $0x34] ss:$8 sps:$4 sm:$0xff]  }
   0xa   :  { %v1850_v25 = vld [vmem:[%s2622_s0 + $0xa4] ss:$8 sps:$4 sm:$0xff]   ;;  %v1852_v27 = vld [vmem:[%s2622_s0 + $0xa0] ss:$8 sps:$4 sm:$0xff]   ;;  %v1856_v29 = vld [vmem:[%s2622_s0 + $0xb4] ss:$8 sps:$4 sm:$0xff]  }
   0xb   :  { %1696 = vmatpush3.bf16.msra.mxu0 %v1824_v5  ;;  %1813 = vmatpush3.bf16.msra.mxu1 %v1824_v5  ;;  %v1855_v30 = vld [vmem:[%s2622_s0 + $0x30] ss:$8 sps:$4 sm:$0xff]   ;;  %v1859_v32 = vld [vmem:[%s2622_s0 + $0x44] ss:$8 sps:$4 sm:$0xff]   ;;  %v1861_v34 = vld [vmem:[%s2622_s0 + $0x40] ss:$8 sps:$4 sm:$0xff]  }
   0xc   :  { %1697 = vmatprep.subr.bf16.mxu0 %v1825_v6  ;;  %1806 = vmatprep.subr.bf16.mxu1 %v1825_v6  ;;  %v1858_v31 = vld [vmem:[%s2622_s0 + $0xb0] ss:$8 sps:$4 sm:$0xff]   ;;  %v1862_v33 = vld [vmem:[%s2622_s0 + $0xc4] ss:$8 sps:$4 sm:$0xff]   ;;  %v1864_v35 = vld [vmem:[%s2622_s0 + $0xc0] ss:$8 sps:$4 sm:$0xff]  }
   0xd   :  { %v1865_v36 = vld [vmem:[%s2622_s0 + $0x54] ss:$8 sps:$4 sm:$0xff]   ;;  %v1867_v38 = vld [vmem:[%s2622_s0 + $0x50] ss:$8 sps:$4 sm:$0xff]   ;;  %v1871_v40 = vld [vmem:[%s2622_s0 + $0x64] ss:$8 sps:$4 sm:$0xff]  }
   0xe   :  { %v1868_v37 = vld [vmem:[%s2622_s0 + $0xd4] ss:$8 sps:$4 sm:$0xff]   ;;  %v1870_v39 = vld [vmem:[%s2622_s0 + $0xd0] ss:$8 sps:$4 sm:$0xff]   ;;  %v1874_v41 = vld [vmem:[%s2622_s0 + $0xe4] ss:$8 sps:$4 sm:$0xff]  }
   0xf   :  { %1698 = vmatpush3.bf16.msra.mxu0 %v1826_v7  ;;  %1814 = vmatpush3.bf16.msra.mxu1 %v1826_v7  ;;  %v1873_v42 = vld [vmem:[%s2622_s0 + $0x60] ss:$8 sps:$4 sm:$0xff]   ;;  %v1877_v44 = vld [vmem:[%s2622_s0 + $0x74] ss:$8 sps:$4 sm:$0xff]   ;;  %v1879_v46 = vld [vmem:[%s2622_s0 + $0x70] ss:$8 sps:$4 sm:$0xff]  }
  0x10   :  { %1699 = vmatprep.subr.bf16.mxu0 %v1827_v8  ;;  %1807 = vmatprep.subr.bf16.mxu1 %v1827_v8  ;;  %v1876_v43 = vld [vmem:[%s2622_s0 + $0xe0] ss:$8 sps:$4 sm:$0xff]   ;;  %v1880_v45 = vld [vmem:[%s2622_s0 + $0xf4] ss:$8 sps:$4 sm:$0xff]   ;;  %v1882_v47 = vld [vmem:[%s2622_s0 + $0xf0] ss:$8 sps:$4 sm:$0xff]  }
  0x11   :  { %v1518_v48 = vld [vmem:[%s2623_s3] sm:$0xff]   ;;  %v1661_v6 = vld [vmem:[%s2623_s3 + $0x8] sm:$0xff]  }
  0x12   :  { %v1668_v51 = vld [vmem:[%s2623_s3 + $0x40] sm:$0xff]   ;;  %v1519_v59 = vunpack.c.l.bf16 %v1518_v48  ;;  %v1669_v11 = vld [vmem:[%s2623_s3 + $0x48] sm:$0xff]  }
  0x13   :  { %1700 = vmatpush3.bf16.msra.mxu0 %v1828_v9  ;;  %1815 = vmatpush3.bf16.msra.mxu1 %v1828_v9  ;;  %v2135_v53 = vld [vmem:[%s2624_s2] ss:$0 sm:$0xff]  ;;  %v1552_v62 = vunpack.c.h.bf16 %v1668_v51  ;;  %v1551_v63 = vunpack.c.l.bf16 %v1668_v51 }
  0x14   :  { %1701 = vmatprep.subr.bf16.mxu0 %v1829_v10  ;;  %1808 = vmatprep.subr.bf16.mxu1 %v1829_v10 }
  0x17   :  { %1702 = vmatpush3.bf16.msra.mxu0 %v1830_v13  ;;  %1816 = vmatpush3.bf16.msra.mxu1 %v1830_v13 }
  0x18   :  { %1703 = vmatprep.subr.bf16.mxu0 %v1831_v14  ;;  %1809 = vmatprep.subr.bf16.mxu1 %v1831_v14  ;;  %v1520_v14 = vunpack.c.h.bf16 %v1518_v48 }
  0x1b   :  { %1704 = vmatpush3.bf16.msra.mxu0 %v1832_v15  ;;  %1817 = vmatpush3.bf16.msra.mxu1 %v1832_v15 }
  0x1c   :  { %1705 = vmatprep.subr.bf16.mxu0 %v1833_v16  ;;  %1810 = vmatprep.subr.bf16.mxu1 %v1833_v16 }
  0x1f   :  { %1706 = vmatpush3.bf16.msra.mxu0 %v1834_v17  ;;  %1818 = vmatpush3.bf16.msra.mxu1 %v1834_v17 }
  0x22   :  { %445 = vmatmul.mubr.bf16.vlgmr.msra.gmra.mrb[0].mxu0 %v1835_v18  ;;  %509 = vmatmul.mubr.bf16.vlgmr.msra.gmra.mrb[0].mxu1 %v1838_v19 }
  0x23   :  { %452 = vmatprep.mubr.bf16.mxu0 %v1841_v20  ;;  %516 = vmatprep.mubr.bf16.mxu1 %v1844_v21  ;;  %v1523_v20 = vunpack.c.l.bf16 %v1661_v6 }
  0x2a   :  { %453 = vmatmul.mubr.bf16.gmra.mrb[4].mxu0 %v1843_v22  ;;  %517 = vmatmul.mubr.bf16.gmra.mrb[4].mxu1 %v1846_v23  ;;  %v1524_v23 = vunpack.c.h.bf16 %v1661_v6 }
  0x2b   :  { %460 = vmatprep.mubr.bf16.mxu0 %v1847_v24  ;;  %524 = vmatprep.mubr.bf16.mxu1 %v1850_v25  ;;  %v1555_v24 = vunpack.c.l.bf16 %v1669_v11 }
  0x32   :  { %461 = vmatmul.mubr.bf16.gmra.mrb[8].mxu0 %v1849_v26  ;;  %525 = vmatmul.mubr.bf16.gmra.mrb[8].mxu1 %v1852_v27 }
  0x33   :  { %468 = vmatprep.mubr.bf16.mxu0 %v1853_v28  ;;  %532 = vmatprep.mubr.bf16.mxu1 %v1856_v29 }
  0x3a   :  { %469 = vmatmul.mubr.bf16.gmra.mrb[12].mxu0 %v1855_v30  ;;  %533 = vmatmul.mubr.bf16.gmra.mrb[12].mxu1 %v1858_v31 }
  0x3b   :  { %476 = vmatprep.mubr.bf16.mxu0 %v1859_v32  ;;  %540 = vmatprep.mubr.bf16.mxu1 %v1862_v33  ;;  %v1556_v33 = vunpack.c.h.bf16 %v1669_v11 }
  0x42   :  { %477 = vmatmul.mubr.bf16.gmra.mrb[16].mxu0 %v1861_v34  ;;  %541 = vmatmul.mubr.bf16.gmra.mrb[16].mxu1 %v1864_v35  ;;  %v1662_v34 = vld [vmem:[%s2623_s3 + $0x10] sm:$0xff]  }
  0x43   :  { %484 = vmatprep.mubr.bf16.mxu0 %v1865_v36  ;;  %548 = vmatprep.mubr.bf16.mxu1 %v1868_v37 }
  0x4a   :  { %485 = vmatmul.mubr.bf16.gmra.mrb[20].mxu0 %v1867_v38  ;;  %549 = vmatmul.mubr.bf16.gmra.mrb[20].mxu1 %v1870_v39 }
  0x4b   :  { %492 = vmatprep.mubr.bf16.mxu0 %v1871_v40  ;;  %556 = vmatprep.mubr.bf16.mxu1 %v1874_v41  ;;  %v1670_v41 = vld [vmem:[%s2623_s3 + $0x50] sm:$0xff]  }
  0x52   :  { %493 = vmatmul.mubr.bf16.gmra.mrb[24].mxu0 %v1873_v42  ;;  %557 = vmatmul.mubr.bf16.gmra.mrb[24].mxu1 %v1876_v43 }
  0x53   :  { %500 = vmatprep.mubr.bf16.mxu0 %v1877_v44  ;;  %564 = vmatprep.mubr.bf16.mxu1 %v1880_v45 }
  0x5a   :  { %501 = vmatmul.mubr.bf16.gmra.mrb[28].mxu0 %v1879_v46  ;;  %565 = vmatmul.mubr.bf16.gmra.mrb[28].mxu1 %v1882_v47  ;;  %v1527_v46 = vunpack.c.l.bf16 %v1662_v34 }
  0xf5   :  { %v1707_v49 = vpop.f32.mrb[0].mxu0  ;;  %v1755_v50 = vpop.f32.mrb[0].mxu1 }
  0xf6   :  { %v1708_v52 = vpop.f32.mrb[1].mxu0  ;;  %v1756_v54 = vpop.f32.mrb[1].mxu1 }
  0xf7   :  { %v1709_v55 = vadd.f32 %v1708_v52, %v1707_v49  ;;  %v1757_v56 = vadd.f32 %v1756_v54, %v1755_v50  ;;  %v1710_v57 = vpop.f32.mrb[2].mxu0  ;;  %v1758_v58 = vpop.f32.mrb[2].mxu1  ;;  %v1528_v50 = vunpack.c.h.bf16 %v1662_v34 }
  0xf8   :  { %v1711_v60 = vpop.f32.mrb[3].mxu0  ;;  %v1759_v61 = vpop.f32.mrb[3].mxu1 }
  0xf9   :  { %v679_v0 = vadd.f32 %v1709_v55, %v2135_v53  ;;  %v695_v1 = vadd.f32 %v1757_v56, %v2135_v53  ;;  %v1712_v2 = vadd.f32 %v1711_v60, %v1710_v57  ;;  %v1760_v3 = vadd.f32 %v1759_v61, %v1758_v58  ;;  %v1663_v61 = vld [vmem:[%s2623_s3 + $0x18] sm:$0xff]  }
  0xfa   :  { %v1559_v55 = vunpack.c.l.bf16 %v1670_v41  ;;  %v1560_v60 = vunpack.c.h.bf16 %v1670_v41 }
  0xfb   :  { %v696_v4 = vadd.f32 %v1760_v3, %v2135_v53  ;;  %v2140_v5 = vadd.f32 %v1519_v59, %v679_v0  ;;  %v2148_v10 = vadd.f32 %v1551_v63, %v695_v1  ;;  %v680_v15 = vadd.f32 %v1712_v2, %v2135_v53 }
  0xfd   :  { %v1713_v7 = vpop.f32.mrb[4].mxu0  ;;  %809 = vadd.xlane.f32.xlu0 %v2140_v5  ;;  %v2146_v8 = vadd.f32 %v1552_v62, %v696_v4  ;;  %v1761_v9 = vpop.f32.mrb[4].mxu1  ;;  %v2161_v31 = vadd.f32 %v1520_v14, %v680_v15  ;;  %v1671_v4 = vld [vmem:[%s2623_s3 + $0x58] sm:$0xff]  }
  0xfe   :  { %v1714_v12 = vpop.f32.mrb[5].mxu0  ;;  %v1762_v13 = vpop.f32.mrb[5].mxu1 }
  0xff   :  { %v1715_v16 = vadd.f32 %v1714_v12, %v1713_v7  ;;  %843 = vadd.xlane.f32.xlu1 %v2146_v8  ;;  %v1716_v17 = vpop.f32.mrb[6].mxu0  ;;  %v1763_v18 = vadd.f32 %v1762_v13, %v1761_v9  ;;  %v1764_v19 = vpop.f32.mrb[6].mxu1  ;;  %v1531_v12 = vunpack.c.l.bf16 %v1663_v61 }
 0x100   :  { %v1717_v21 = vpop.f32.mrb[7].mxu0  ;;  %v1765_v22 = vpop.f32.mrb[7].mxu1 }
 0x101   :  { %v681_v25 = vadd.f32 %v1715_v16, %v2135_v53  ;;  %v1718_v26 = vadd.f32 %v1717_v21, %v1716_v17  ;;  %841 = vadd.xlane.f32.xlu0 %v2148_v10  ;;  %v697_v27 = vadd.f32 %v1763_v18, %v2135_v53  ;;  %v1766_v28 = vadd.f32 %v1765_v22, %v1764_v19 }
 0x102   :  { %v1532_v16 = vunpack.c.h.bf16 %v1663_v61 }
 0x103   :  { %v682_v29 = vadd.f32 %v1718_v26, %v2135_v53  ;;  %v2159_v30 = vadd.f32 %v1523_v20, %v681_v25  ;;  %v698_v32 = vadd.f32 %v1766_v28, %v2135_v53  ;;  %v2171_v38 = vadd.f32 %v1555_v24, %v697_v27  ;;  %v1664_v26 = vld [vmem:[%s2623_s3 + $0x20] sm:$0xff]  }
 0x104   :  { %v1563_v20 = vunpack.c.l.bf16 %v1671_v4  ;;  %v1564_v25 = vunpack.c.h.bf16 %v1671_v4  ;;  %v1673_v4 = vld [vmem:[%s2623_s3 + $0x68] sm:$0xff]  }
 0x105   :  { %v1719_v35 = vpop.f32.mrb[8].mxu0  ;;  %813 = vadd.xlane.f32.xlu1 %v2159_v30  ;;  %811 = vadd.xlane.f32.xlu0 %v2161_v31  ;;  %v1767_v36 = vpop.f32.mrb[8].mxu1  ;;  %v2169_v37 = vadd.f32 %v1524_v23, %v682_v29  ;;  %v2176_v48 = vadd.f32 %v1556_v33, %v698_v32 }
 0x106   :  { %v1720_v39 = vpop.f32.mrb[9].mxu0  ;;  %v1768_v40 = vpop.f32.mrb[9].mxu1 }
 0x107   :  { %v1721_v42 = vadd.f32 %v1720_v39, %v1719_v35  ;;  %v1722_v43 = vpop.f32.mrb[10].mxu0  ;;  %v1769_v44 = vadd.f32 %v1768_v40, %v1767_v36  ;;  %v1770_v45 = vpop.f32.mrb[10].mxu1  ;;  %v1672_v35 = vld [vmem:[%s2623_s3 + $0x60] sm:$0xff]  }
 0x108   :  { %v1723_v47 = vpop.f32.mrb[11].mxu0  ;;  %v1771_v49 = vpop.f32.mrb[11].mxu1 }
 0x109   :  { %v683_v51 = vadd.f32 %v1721_v42, %v2135_v53  ;;  %815 = vadd.xlane.f32.xlu1 %v2169_v37  ;;  %845 = vadd.xlane.f32.xlu0 %v2171_v38  ;;  %v1724_v52 = vadd.f32 %v1723_v47, %v1722_v43  ;;  %v699_v54 = vadd.f32 %v1769_v44, %v2135_v53  ;;  %v1535_v42 = vunpack.c.l.bf16 %v1664_v26 }
 0x10a   :  { %v1772_v56 = vadd.f32 %v1771_v49, %v1770_v45 }
 0x10b   :  { %v684_v57 = vadd.f32 %v1724_v52, %v2135_v53  ;;  %v2183_v58 = vadd.f32 %v1527_v46, %v683_v51  ;;  %v2193_v1 = vadd.f32 %v1559_v55, %v699_v54  ;;  %v1536_v46 = vunpack.c.h.bf16 %v1664_v26 }
 0x10c   :  { %v700_v59 = vadd.f32 %v1772_v56, %v2135_v53  ;;  %v1567_v51 = vunpack.c.l.bf16 %v1672_v35 }
 0x10d   :  { %v1725_v62 = vpop.f32.mrb[12].mxu0  ;;  %847 = vadd.xlane.f32.xlu1 %v2176_v48  ;;  %817 = vadd.xlane.f32.xlu0 %v2183_v58  ;;  %v1773_v63 = vpop.f32.mrb[12].mxu1  ;;  %v2191_v0 = vadd.f32 %v1528_v50, %v684_v57  ;;  %v1568_v57 = vunpack.c.h.bf16 %v1672_v35 }
 0x10e   :  { %v1726_v2 = vpop.f32.mrb[13].mxu0  ;;  %v1774_v3 = vpop.f32.mrb[13].mxu1  ;;  %v2198_v14 = vadd.f32 %v1560_v60, %v700_v59  ;;  %v1665_v59 = vld [vmem:[%s2623_s3 + $0x28] sm:$0xff]  }
 0x10f   :  { %v1727_v6 = vadd.f32 %v1726_v2, %v1725_v62  ;;  %v1728_v7 = vpop.f32.mrb[14].mxu0  ;;  %v1775_v9 = vadd.f32 %v1774_v3, %v1773_v63  ;;  %v1776_v11 = vpop.f32.mrb[14].mxu1 }
 0x110   :  { %v1729_v13 = vpop.f32.mrb[15].mxu0  ;;  %v1777_v15 = vpop.f32.mrb[15].mxu1 }
 0x111   :  { %v685_v17 = vadd.f32 %v1727_v6, %v2135_v53  ;;  %819 = vadd.xlane.f32.xlu1 %v2191_v0  ;;  %849 = vadd.xlane.f32.xlu0 %v2193_v1  ;;  %v1730_v18 = vadd.f32 %v1729_v13, %v1728_v7  ;;  %v701_v19 = vadd.f32 %v1775_v9, %v2135_v53 }
 0x112   :  { %v1778_v21 = vadd.f32 %v1777_v15, %v1776_v11 }
 0x113   :  { %v686_v22 = vadd.f32 %v1730_v18, %v2135_v53  ;;  %v2205_v23 = vadd.f32 %v1531_v12, %v685_v17  ;;  %v2215_v32 = vadd.f32 %v1563_v20, %v701_v19  ;;  %v1539_v12 = vunpack.c.l.bf16 %v1665_v59 }
 0x114   :  { %v702_v24 = vadd.f32 %v1778_v21, %v2135_v53  ;;  %v1540_v17 = vunpack.c.h.bf16 %v1665_v59  ;;  %v1571_v21 = vunpack.c.l.bf16 %v1673_v4 }
 0x115   :  { %v1731_v27 = vpop.f32.mrb[16].mxu0  ;;  %851 = vadd.xlane.f32.xlu1 %v2198_v14  ;;  %821 = vadd.xlane.f32.xlu0 %v2205_v23  ;;  %v1779_v28 = vpop.f32.mrb[16].mxu1  ;;  %v2213_v29 = vadd.f32 %v1532_v16, %v686_v22 }
 0x116   :  { %v1732_v33 = vpop.f32.mrb[17].mxu0  ;;  %v1780_v34 = vpop.f32.mrb[17].mxu1  ;;  %v2220_v44 = vadd.f32 %v1564_v25, %v702_v24 }
 0x117   :  { %v1733_v36 = vadd.f32 %v1732_v33, %v1731_v27  ;;  %v1734_v39 = vpop.f32.mrb[18].mxu0  ;;  %v1781_v40 = vadd.f32 %v1780_v34, %v1779_v28  ;;  %v1782_v41 = vpop.f32.mrb[18].mxu1  ;;  %v1572_v27 = vunpack.c.h.bf16 %v1673_v4  ;;  %v1666_v28 = vld [vmem:[%s2623_s3 + $0x30] sm:$0xff]  }
 0x118   :  { %v1735_v43 = vpop.f32.mrb[19].mxu0  ;;  %v1783_v45 = vpop.f32.mrb[19].mxu1 }
 0x119   :  { %v687_v47 = vadd.f32 %v1733_v36, %v2135_v53  ;;  %823 = vadd.xlane.f32.xlu1 %v2213_v29  ;;  %853 = vadd.xlane.f32.xlu0 %v2215_v32  ;;  %v1736_v49 = vadd.f32 %v1735_v43, %v1734_v39  ;;  %v703_v50 = vadd.f32 %v1781_v40, %v2135_v53 }
 0x11a   :  { %v1784_v52 = vadd.f32 %v1783_v45, %v1782_v41  ;;  %v1674_v41 = vld [vmem:[%s2623_s3 + $0x70] sm:$0xff]  }
 0x11b   :  { %v688_v54 = vadd.f32 %v1736_v49, %v2135_v53  ;;  %v2227_v55 = vadd.f32 %v1535_v42, %v687_v47  ;;  %v2237_v63 = vadd.f32 %v1567_v51, %v703_v50  ;;  %v1543_v47 = vunpack.c.l.bf16 %v1666_v28 }
 0x11c   :  { %v704_v56 = vadd.f32 %v1784_v52, %v2135_v53  ;;  %v1544_v52 = vunpack.c.h.bf16 %v1666_v28  ;;  %v1575_v59 = vunpack.c.l.bf16 %v1674_v41  ;;  %v1576_v4 = vunpack.c.h.bf16 %v1674_v41 }
 0x11d   :  { %v1737_v60 = vpop.f32.mrb[20].mxu0  ;;  %855 = vadd.xlane.f32.xlu1 %v2220_v44  ;;  %825 = vadd.xlane.f32.xlu0 %v2227_v55  ;;  %v1785_v61 = vpop.f32.mrb[20].mxu1  ;;  %v2235_v62 = vadd.f32 %v1536_v46, %v688_v54 }
 0x11e   :  { %v1738_v2 = vpop.f32.mrb[21].mxu0  ;;  %v1786_v3 = vpop.f32.mrb[21].mxu1  ;;  %v2242_v15 = vadd.f32 %v1568_v57, %v704_v56 }
 0x11f   :  { %v1739_v6 = vadd.f32 %v1738_v2, %v1737_v60  ;;  %v1740_v7 = vpop.f32.mrb[22].mxu0  ;;  %v1787_v9 = vadd.f32 %v1786_v3, %v1785_v61  ;;  %v1788_v11 = vpop.f32.mrb[22].mxu1 }
 0x120   :  { %v1741_v13 = vpop.f32.mrb[23].mxu0  ;;  %v1789_v16 = vpop.f32.mrb[23].mxu1 }
 0x121   :  { %v689_v18 = vadd.f32 %v1739_v6, %v2135_v53  ;;  %827 = vadd.xlane.f32.xlu1 %v2235_v62  ;;  %857 = vadd.xlane.f32.xlu0 %v2237_v63  ;;  %v1742_v19 = vadd.f32 %v1741_v13, %v1740_v7  ;;  %v705_v20 = vadd.f32 %v1787_v9, %v2135_v53  ;;  %v1667_v6 = vld [vmem:[%s2623_s3 + $0x38] sm:$0xff]  }
 0x122   :  { %v1790_v22 = vadd.f32 %v1789_v16, %v1788_v11  ;;  %v1548_v28 = vunpack.c.h.bf16 %v1667_v6 }
 0x123   :  { %v690_v24 = vadd.f32 %v1742_v19, %v2135_v53  ;;  %v2249_v25 = vadd.f32 %v1539_v12, %v689_v18  ;;  %v2259_v36 = vadd.f32 %v1571_v21, %v705_v20 }
 0x124   :  { %v706_v26 = vadd.f32 %v1790_v22, %v2135_v53  ;;  %v1547_v22 = vunpack.c.l.bf16 %v1667_v6 }
 0x125   :  { %v1743_v33 = vpop.f32.mrb[24].mxu0  ;;  %859 = vadd.xlane.f32.xlu1 %v2242_v15  ;;  %829 = vadd.xlane.f32.xlu0 %v2249_v25  ;;  %v1791_v34 = vpop.f32.mrb[24].mxu1  ;;  %v2257_v35 = vadd.f32 %v1540_v17, %v690_v24  ;;  %v1675_v17 = vld [vmem:[%s2623_s3 + $0x78] sm:$0xff]  }
 0x126   :  { %v1744_v39 = vpop.f32.mrb[25].mxu0  ;;  %v1792_v40 = vpop.f32.mrb[25].mxu1  ;;  %v2264_v50 = vadd.f32 %v1572_v27, %v706_v26 }
 0x127   :  { %v1745_v42 = vadd.f32 %v1744_v39, %v1743_v33  ;;  %v1746_v43 = vpop.f32.mrb[26].mxu0  ;;  %v1793_v45 = vadd.f32 %v1792_v40, %v1791_v34  ;;  %v1794_v46 = vpop.f32.mrb[26].mxu1  ;;  %v1579_v40 = vunpack.c.l.bf16 %v1675_v17 }
 0x128   :  { %v1747_v49 = vpop.f32.mrb[27].mxu0  ;;  %v1795_v51 = vpop.f32.mrb[27].mxu1 }
 0x129   :  { %v691_v54 = vadd.f32 %v1745_v42, %v2135_v53  ;;  %831 = vadd.xlane.f32.xlu1 %v2257_v35  ;;  %861 = vadd.xlane.f32.xlu0 %v2259_v36  ;;  %v1748_v56 = vadd.f32 %v1747_v49, %v1746_v43  ;;  %v707_v57 = vadd.f32 %v1793_v45, %v2135_v53  ;;  %v1580_v49 = vunpack.c.h.bf16 %v1675_v17 }
 0x12a   :  { %v1796_v60 = vadd.f32 %v1795_v51, %v1794_v46 }
 0x12b   :  { %v692_v61 = vadd.f32 %v1748_v56, %v2135_v53  ;;  %v2271_v2 = vadd.f32 %v1543_v47, %v691_v54  ;;  %v2281_v12 = vadd.f32 %v1575_v59, %v707_v57 }
 0x12c   :  { %v708_v3 = vadd.f32 %v1796_v60, %v2135_v53 }
 0x12d   :  { %v1749_v7 = vpop.f32.mrb[28].mxu0  ;;  %863 = vadd.xlane.f32.xlu1 %v2264_v50  ;;  %833 = vadd.xlane.f32.xlu0 %v2271_v2  ;;  %v1797_v9 = vpop.f32.mrb[28].mxu1  ;;  %v2279_v11 = vadd.f32 %v1544_v52, %v692_v61 }
 0x12e   :  { %v1750_v13 = vpop.f32.mrb[29].mxu0  ;;  %v1798_v16 = vpop.f32.mrb[29].mxu1  ;;  %v2286_v26 = vadd.f32 %v1576_v4, %v708_v3 }
 0x12f   :  { %v1751_v18 = vadd.f32 %v1750_v13, %v1749_v7  ;;  %v1752_v19 = vpop.f32.mrb[30].mxu0  ;;  %v1799_v20 = vadd.f32 %v1798_v16, %v1797_v9  ;;  %v1800_v21 = vpop.f32.mrb[30].mxu1 }
 0x130   :  { %v1753_v24 = vpop.f32.mrb[31].mxu0  ;;  %v1801_v27 = vpop.f32.mrb[31].mxu1 }
 0x131   :  { %v693_v33 = vadd.f32 %v1751_v18, %v2135_v53  ;;  %835 = vadd.xlane.f32.xlu1 %v2279_v11  ;;  %865 = vadd.xlane.f32.xlu0 %v2281_v12  ;;  %v1754_v34 = vadd.f32 %v1753_v24, %v1752_v19  ;;  %v709_v39 = vadd.f32 %v1799_v20, %v2135_v53 }
 0x132   :  { %v1802_v41 = vadd.f32 %v1801_v27, %v1800_v21 }
 0x133   :  { %v694_v42 = vadd.f32 %v1754_v34, %v2135_v53  ;;  %v2293_v43 = vadd.f32 %v1547_v22, %v693_v33  ;;  %v2300_v47 = vadd.f32 %v1579_v40, %v709_v39 }
 0x134   :  { %v710_v45 = vadd.f32 %v1802_v41, %v2135_v53 }
 0x135   :  { %867 = vadd.xlane.f32.xlu1 %v2286_v26  ;;  %837 = vadd.xlane.f32.xlu0 %v2293_v43  ;;  %v2298_v46 = vadd.f32 %v1548_v28, %v694_v42 }
 0x136   :  { %v2304_v51 = vadd.f32 %v1580_v49, %v710_v45 }
 0x139   :  { %839 = vadd.xlane.f32.xlu1 %v2298_v46  ;;  %869 = vadd.xlane.f32.xlu0 %v2300_v47 }
 0x13d   :  { %871 = vadd.xlane.f32.xlu1 %v2304_v51 }
 0x18a   :  { %v810_v52 = vpop.xlane.xlu0 %809 }
 0x18b   :  { %v874_v54 = vmul.f32 0.0078125, %v810_v52 }
 0x18c   :  { %v844_v56 = vpop.xlane.xlu1 %843 }
 0x18d   :  { %v2308_v53 = vsub.f32 %v2140_v5, %v874_v54  ;;  %v891_v3 = vmul.f32 0.0078125, %v844_v56 }
 0x18e   :  { %v842_v57 = vpop.xlane.xlu0 %841 }
 0x18f   :  { %v890_v59 = vmul.f32 0.0078125, %v842_v57  ;;  %v938_v60 = vmul.f32 %v2308_v53, %v2308_v53  ;;  %v2324_v17 = vsub.f32 %v2146_v8, %v891_v3 }
 0x191   :  { %v2313_v61 = vsub.f32 %v2148_v10, %v890_v59  ;;  %970 = vadd.xlane.f32.xlu0 %v938_v60  ;;  %v955_v33 = vmul.f32 %v2324_v17, %v2324_v17 }
 0x192   :  { %v814_v4 = vpop.xlane.xlu1 %813  ;;  %v812_v6 = vpop.xlane.xlu0 %811 }
 0x193   :  { %v876_v7 = vmul.f32 0.0078125, %v814_v4  ;;  %v875_v9 = vmul.f32 0.0078125, %v812_v6  ;;  %v954_v13 = vmul.f32 %v2313_v61, %v2313_v61 }
 0x195   :  { %v2318_v5 = vsub.f32 %v2159_v30, %v876_v7  ;;  %v2321_v16 = vsub.f32 %v2161_v31, %v875_v9  ;;  %1002 = vadd.xlane.f32.xlu0 %v954_v13 }
 0x196   :  { %v816_v10 = vpop.xlane.xlu1 %815  ;;  %v846_v18 = vpop.xlane.xlu0 %845 }
 0x197   :  { %v877_v19 = vmul.f32 0.0078125, %v816_v10  ;;  %v892_v20 = vmul.f32 0.0078125, %v846_v18  ;;  %v940_v21 = vmul.f32 %v2318_v5, %v2318_v5  ;;  %v939_v22 = vmul.f32 %v2321_v16, %v2321_v16 }
 0x199   :  { %v2331_v30 = vsub.f32 %v2171_v38, %v892_v20  ;;  %974 = vadd.xlane.f32.xlu0 %v940_v21  ;;  %972 = vadd.xlane.f32.xlu1 %v939_v22  ;;  %v2334_v31 = vsub.f32 %v2169_v37, %v877_v19 }
 0x19a   :  { %v848_v8 = vpop.xlane.xlu1 %847  ;;  %v818_v24 = vpop.xlane.xlu0 %817 }
 0x19b   :  { %v893_v27 = vmul.f32 0.0078125, %v848_v8  ;;  %v878_v28 = vmul.f32 0.0078125, %v818_v24  ;;  %v956_v34 = vmul.f32 %v2331_v30, %v2331_v30  ;;  %v941_v37 = vmul.f32 %v2334_v31, %v2334_v31 }
 0x19d   :  { %v2341_v39 = vsub.f32 %v2183_v58, %v878_v28  ;;  %1004 = vadd.xlane.f32.xlu1 %v955_v33  ;;  %1006 = vadd.xlane.f32.xlu0 %v956_v34  ;;  %v2346_v41 = vsub.f32 %v2176_v48, %v893_v27 }
 0x19e   :  { %v820_v38 = vpop.xlane.xlu1 %819  ;;  %v850_v40 = vpop.xlane.xlu0 %849 }
 0x19f   :  { %v879_v42 = vmul.f32 0.0078125, %v820_v38  ;;  %v894_v45 = vmul.f32 0.0078125, %v850_v40  ;;  %v942_v49 = vmul.f32 %v2341_v39, %v2341_v39  ;;  %v957_v48 = vmul.f32 %v2346_v41, %v2346_v41 }
 0x1a1   :  { %v2351_v52 = vsub.f32 %v2193_v1, %v894_v45  ;;  %976 = vadd.xlane.f32.xlu1 %v941_v37  ;;  %978 = vadd.xlane.f32.xlu0 %v942_v49  ;;  %v2354_v58 = vsub.f32 %v2191_v0, %v879_v42 }
 0x1a2   :  { %v852_v54 = vpop.xlane.xlu1 %851  ;;  %v822_v56 = vpop.xlane.xlu0 %821 }
 0x1a3   :  { %v895_v57 = vmul.f32 0.0078125, %v852_v54  ;;  %v880_v59 = vmul.f32 0.0078125, %v822_v56  ;;  %v958_v60 = vmul.f32 %v2351_v52, %v2351_v52  ;;  %v943_v0 = vmul.f32 %v2354_v58, %v2354_v58 }
 0x1a5   :  { %v2361_v3 = vsub.f32 %v2205_v23, %v880_v59  ;;  %1008 = vadd.xlane.f32.xlu1 %v957_v48  ;;  %1010 = vadd.xlane.f32.xlu0 %v958_v60  ;;  %v2366_v6 = vsub.f32 %v2198_v14, %v895_v57 }
 0x1a6   :  { %v824_v1 = vpop.xlane.xlu1 %823  ;;  %v854_v4 = vpop.xlane.xlu0 %853 }
 0x1a7   :  { %v881_v7 = vmul.f32 0.0078125, %v824_v1  ;;  %v896_v9 = vmul.f32 0.0078125, %v854_v4  ;;  %v944_v13 = vmul.f32 %v2361_v3, %v2361_v3  ;;  %v959_v14 = vmul.f32 %v2366_v6, %v2366_v6 }
 0x1a9   :  { %v2371_v10 = vsub.f32 %v2215_v32, %v896_v9  ;;  %980 = vadd.xlane.f32.xlu1 %v943_v0  ;;  %982 = vadd.xlane.f32.xlu0 %v944_v13  ;;  %v2374_v23 = vsub.f32 %v2213_v29, %v881_v7 }
 0x1aa   :  { %v856_v18 = vpop.xlane.xlu1 %855  ;;  %v826_v19 = vpop.xlane.xlu0 %825 }
 0x1ab   :  { %v897_v20 = vmul.f32 0.0078125, %v856_v18  ;;  %v882_v21 = vmul.f32 0.0078125, %v826_v19  ;;  %v960_v22 = vmul.f32 %v2371_v10, %v2371_v10  ;;  %v945_v29 = vmul.f32 %v2374_v23, %v2374_v23 }
 0x1ad   :  { %v2381_v8 = vsub.f32 %v2227_v55, %v882_v21  ;;  %1012 = vadd.xlane.f32.xlu1 %v959_v14  ;;  %1014 = vadd.xlane.f32.xlu0 %v960_v22  ;;  %v2386_v27 = vsub.f32 %v2220_v44, %v897_v20 }
 0x1ae   :  { %v828_v32 = vpop.xlane.xlu1 %827  ;;  %v858_v24 = vpop.xlane.xlu0 %857 }
 0x1af   :  { %v883_v28 = vmul.f32 0.0078125, %v828_v32  ;;  %v898_v33 = vmul.f32 0.0078125, %v858_v24  ;;  %v946_v34 = vmul.f32 %v2381_v8, %v2381_v8  ;;  %v961_v44 = vmul.f32 %v2386_v27, %v2386_v27 }
 0x1b1   :  { %v2391_v38 = vsub.f32 %v2237_v63, %v898_v33  ;;  %984 = vadd.xlane.f32.xlu1 %v945_v29  ;;  %986 = vadd.xlane.f32.xlu0 %v946_v34  ;;  %v2394_v55 = vsub.f32 %v2235_v62, %v883_v28 }
 0x1b2   :  { %v860_v40 = vpop.xlane.xlu1 %859  ;;  %v830_v37 = vpop.xlane.xlu0 %829 }
 0x1b3   :  { %v899_v42 = vmul.f32 0.0078125, %v860_v40  ;;  %v884_v45 = vmul.f32 0.0078125, %v830_v37  ;;  %v962_v49 = vmul.f32 %v2391_v38, %v2391_v38  ;;  %v947_v62 = vmul.f32 %v2394_v55, %v2394_v55 }
 0x1b5   :  { %v2401_v54 = vsub.f32 %v2249_v25, %v884_v45  ;;  %1016 = vadd.xlane.f32.xlu1 %v961_v44  ;;  %1018 = vadd.xlane.f32.xlu0 %v962_v49  ;;  %v2406_v57 = vsub.f32 %v2242_v15, %v899_v42 }
 0x1b6   :  { %v832_v63 = vpop.xlane.xlu1 %831  ;;  %v862_v56 = vpop.xlane.xlu0 %861 }
 0x1b7   :  { %v885_v59 = vmul.f32 0.0078125, %v832_v63  ;;  %v900_v48 = vmul.f32 0.0078125, %v862_v56  ;;  %v948_v60 = vmul.f32 %v2401_v54, %v2401_v54  ;;  %v963_v15 = vmul.f32 %v2406_v57, %v2406_v57 }
 0x1b9   :  { %v2411_v1 = vsub.f32 %v2259_v36, %v900_v48  ;;  %988 = vadd.xlane.f32.xlu1 %v947_v62  ;;  %990 = vadd.xlane.f32.xlu0 %v948_v60  ;;  %v2414_v25 = vsub.f32 %v2257_v35, %v885_v59 }
 0x1ba   :  { %v864_v4 = vpop.xlane.xlu1 %863  ;;  %v834_v0 = vpop.xlane.xlu0 %833 }
 0x1bb   :  { %v901_v7 = vmul.f32 0.0078125, %v864_v4  ;;  %v886_v9 = vmul.f32 0.0078125, %v834_v0  ;;  %v964_v13 = vmul.f32 %v2411_v1, %v2411_v1  ;;  %v949_v35 = vmul.f32 %v2414_v25, %v2414_v25 }
 0x1bd   :  { %v2421_v18 = vsub.f32 %v2271_v2, %v886_v9  ;;  %1020 = vadd.xlane.f32.xlu1 %v963_v15  ;;  %1022 = vadd.xlane.f32.xlu0 %v964_v13  ;;  %v2426_v20 = vsub.f32 %v2264_v50, %v901_v7 }
 0x1be   :  { %v836_v36 = vpop.xlane.xlu1 %835  ;;  %v866_v19 = vpop.xlane.xlu0 %865 }
 0x1bf   :  { %v887_v21 = vmul.f32 0.0078125, %v836_v36  ;;  %v902_v14 = vmul.f32 0.0078125, %v866_v19  ;;  %v950_v22 = vmul.f32 %v2421_v18, %v2421_v18  ;;  %v965_v50 = vmul.f32 %v2426_v20, %v2426_v20 }
 0x1c1   :  { %v2431_v32 = vsub.f32 %v2281_v12, %v902_v14  ;;  %992 = vadd.xlane.f32.xlu1 %v949_v35  ;;  %994 = vadd.xlane.f32.xlu0 %v950_v22  ;;  %v2434_v2 = vsub.f32 %v2279_v11, %v887_v21 }
 0x1c2   :  { %v868_v24 = vpop.xlane.xlu1 %867  ;;  %v838_v29 = vpop.xlane.xlu0 %837 }
 0x1c3   :  { %v903_v28 = vmul.f32 0.0078125, %v868_v24  ;;  %v888_v33 = vmul.f32 0.0078125, %v838_v29  ;;  %v966_v34 = vmul.f32 %v2431_v32, %v2431_v32  ;;  %v951_v11 = vmul.f32 %v2434_v2, %v2434_v2 }
 0x1c5   :  { %v2441_v40 = vsub.f32 %v2293_v43, %v888_v33  ;;  %1024 = vadd.xlane.f32.xlu1 %v965_v50  ;;  %1026 = vadd.xlane.f32.xlu0 %v966_v34  ;;  %v2446_v42 = vsub.f32 %v2286_v26, %v903_v28 }
 0x1c6   :  { %v840_v12 = vpop.xlane.xlu1 %839  ;;  %v870_v37 = vpop.xlane.xlu0 %869 }
 0x1c7   :  { %v889_v45 = vmul.f32 0.0078125, %v840_v12  ;;  %v904_v44 = vmul.f32 0.0078125, %v870_v37  ;;  %v952_v49 = vmul.f32 %v2441_v40, %v2441_v40  ;;  %v967_v59 = vmul.f32 %v2446_v42, %v2446_v42 }
 0x1c9   :  { %v2451_v63 = vsub.f32 %v2300_v47, %v904_v44  ;;  %996 = vadd.xlane.f32.xlu1 %v951_v11  ;;  %998 = vadd.xlane.f32.xlu0 %v952_v49  ;;  %v2454_v56 = vsub.f32 %v2298_v46, %v889_v45 }
 0x1ca   :  { %v872_v43 = vpop.xlane.xlu1 %871 }
 0x1cb   :  { %v905_v62 = vmul.f32 0.0078125, %v872_v43  ;;  %v968_v26 = vmul.f32 %v2451_v63, %v2451_v63  ;;  %v953_v47 = vmul.f32 %v2454_v56, %v2454_v56 }
 0x1cd   :  { %1028 = vadd.xlane.f32.xlu1 %v967_v59  ;;  %1030 = vadd.xlane.f32.xlu0 %v968_v26  ;;  %v2461_v48 = vsub.f32 %v2304_v51, %v905_v62  ;;  %v2471_v26 = vld [vmem:[%s2625_s4] ss:$0 sm:$0xff] }
 0x1cf   :  { %v969_v46 = vmul.f32 %v2461_v48, %v2461_v48 }
 0x1d1   :  { %1000 = vadd.xlane.f32.xlu1 %v953_v47 }
 0x1d5   :  { %1032 = vadd.xlane.f32.xlu1 %v969_v46 }
 0x21e   :  { %v971_v60 = vpop.xlane.xlu0 %970 }
 0x21f   :  { %v1034_v4 = vmul.f32 0.0078125, %v971_v60 }
 0x221   :  { %v1066_v0 = vadd.f32 1e-05, %v1034_v4 }
 0x222   :  { %v1003_v7 = vpop.xlane.xlu0 %1002 }
 0x223   :  { %v1050_v9 = vmul.f32 0.0078125, %v1003_v7  ;;  %1883 = vrsqrt.f32 %v1066_v0 }
 0x225   :  { %v1082_v15 = vadd.f32 1e-05, %v1050_v9 }
 0x226   :  { %v973_v13 = vpop.xlane.xlu1 %972  ;;  %v975_v36 = vpop.xlane.xlu0 %974 }
 0x227   :  { %v1035_v19 = vmul.f32 0.0078125, %v973_v13  ;;  %v1036_v51 = vmul.f32 0.0078125, %v975_v36  ;;  %1885 = vrsqrt.f32 %v1082_v15 }
 0x229   :  { %v1067_v35 = vadd.f32 1e-05, %v1035_v19  ;;  %v1068_v21 = vadd.f32 1e-05, %v1036_v51  ;;  %v2479_v19 = vld [vmem:[%s2626_s5] ss:$0 sm:$0xff] }
 0x22a   :  { %v1005_v14 = vpop.xlane.xlu1 %1004  ;;  %v1007_v22 = vpop.xlane.xlu0 %1006 }
 0x22b   :  { %1887 = vrsqrt.f32 %v1067_v35  ;;  %v1051_v24 = vmul.f32 0.0078125, %v1005_v14  ;;  %v1052_v29 = vmul.f32 0.0078125, %v1007_v22 }
 0x22c   :  { %1889 = vrsqrt.f32 %v1068_v21 }
 0x22d   :  { %v1083_v28 = vadd.f32 1e-05, %v1051_v24  ;;  %v1084_v33 = vadd.f32 1e-05, %v1052_v29  ;;  %v1884_v12 = vpop.eup %1883 }
 0x22e   :  { %v977_v50 = vpop.xlane.xlu1 %976  ;;  %v979_v34 = vpop.xlane.xlu0 %978  ;;  %v1130_v43 = vmul.f32 %v1884_v12, %v2308_v53 }
 0x22f   :  { %1891 = vrsqrt.f32 %v1083_v28  ;;  %v1037_v37 = vmul.f32 0.0078125, %v977_v50  ;;  %v1038_v11 = vmul.f32 0.0078125, %v979_v34 }
 0x230   :  { %1893 = vrsqrt.f32 %v1084_v33  ;;  %v1168_v9 = vmul.f32 %v2471_v26, %v1130_v43 }
 0x231   :  { %v1069_v45 = vadd.f32 1e-05, %v1037_v37  ;;  %v1070_v44 = vadd.f32 1e-05, %v1038_v11  ;;  %v1886_v49 = vpop.eup %1885 }
 0x232   :  { %v1009_v62 = vpop.xlane.xlu1 %1008  ;;  %v1011_v59 = vpop.xlane.xlu0 %1010  ;;  %v1146_v4 = vmul.f32 %v1886_v49, %v2313_v61  ;;  %v1206_v29 = vadd.f32 %v2479_v19, %v1168_v9 }
 0x233   :  { %1895 = vrsqrt.f32 %v1069_v45  ;;  %v1053_v47 = vmul.f32 0.0078125, %v1009_v62  ;;  %v1054_v46 = vmul.f32 0.0078125, %v1011_v59 }
 0x234   :  { %1897 = vrsqrt.f32 %v1070_v44  ;;  %v1184_v14 = vmul.f32 %v2471_v26, %v1146_v4 }
 0x235   :  { %v1888_v60 = vpop.eup %1887  ;;  %v1085_v0 = vadd.f32 1e-05, %v1053_v47  ;;  %v1086_v7 = vadd.f32 1e-05, %v1054_v46 }
 0x236   :  { %v1131_v53 = vmul.f32 %v1888_v60, %v2321_v16  ;;  %v981_v15 = vpop.xlane.xlu1 %980  ;;  %v983_v13 = vpop.xlane.xlu0 %982  ;;  %v1222_v43 = vadd.f32 %v2479_v19, %v1184_v14 }
 0x237   :  { %v1890_v36 = vpop.eup %1889  ;;  %1899 = vrsqrt.f32 %v1085_v0  ;;  %v1039_v51 = vmul.f32 0.0078125, %v981_v15  ;;  %v1040_v35 = vmul.f32 0.0078125, %v983_v13 }
 0x238   :  { %v1169_v21 = vmul.f32 %v2471_v26, %v1131_v53  ;;  %1901 = vrsqrt.f32 %v1086_v7  ;;  %v1132_v33 = vmul.f32 %v1890_v36, %v2318_v5 }
 0x239   :  { %v1892_v61 = vpop.eup %1891  ;;  %v1071_v22 = vadd.f32 1e-05, %v1039_v51  ;;  %v1072_v24 = vadd.f32 1e-05, %v1040_v35 }
 0x23a   :  { %v1894_v16 = vpop.eup %1893  ;;  %v1207_v28 = vadd.f32 %v2479_v19, %v1169_v21  ;;  %v1147_v50 = vmul.f32 %v1892_v61, %v2324_v17  ;;  %v1013_v34 = vpop.xlane.xlu1 %1012  ;;  %v1170_v5 = vmul.f32 %v2471_v26, %v1132_v33 }
 0x23b   :  { %v1015_v12 = vpop.xlane.xlu0 %1014  ;;  %1903 = vrsqrt.f32 %v1071_v22  ;;  %v1055_v37 = vmul.f32 0.0078125, %v1013_v34  ;;  %v1148_v62 = vmul.f32 %v1894_v16, %v2331_v30 }
 0x23c   :  { %v1584_v11 = vpack.c.bf16 %v1207_v28, %v1206_v29  ;;  %v1185_v45 = vmul.f32 %v2471_v26, %v1147_v50  ;;  %1905 = vrsqrt.f32 %v1072_v24  ;;  %v1056_v44 = vmul.f32 0.0078125, %v1015_v12 }
 0x23d   :  { %v1896_v49 = vpop.eup %1895  ;;  %v1087_v59 = vadd.f32 1e-05, %v1055_v37  ;;  %v1186_v13 = vmul.f32 %v2471_v26, %v1148_v62  ;;  %v1208_v35 = vadd.f32 %v2479_v19, %v1170_v5 }
 0x23e   :  { %v1898_v47 = vpop.eup %1897  ;;  %1585 = vst [vmem:[%s2627_s6] sm:$0xff] %v1584_v11   ;;  %v1223_v17 = vadd.f32 %v2479_v19, %v1185_v45  ;;  %v1133_v46 = vmul.f32 %v1896_v49, %v2334_v31  ;;  %v1088_v60 = vadd.f32 1e-05, %v1056_v44  ;;  %v985_v4 = vpop.xlane.xlu1 %984 }
 0x23f   :  { %v987_v0 = vpop.xlane.xlu0 %986  ;;  %1907 = vrsqrt.f32 %v1087_v59  ;;  %v1041_v7 = vmul.f32 0.0078125, %v985_v4  ;;  %v1134_v36 = vmul.f32 %v1898_v47, %v2341_v39  ;;  %v1224_v50 = vadd.f32 %v2479_v19, %v1186_v13 }
 0x240   :  { %v1624_v9 = vpack.c.bf16 %v1223_v17, %v1222_v43  ;;  %v1171_v30 = vmul.f32 %v2471_v26, %v1133_v46  ;;  %1909 = vrsqrt.f32 %v1088_v60  ;;  %v1042_v53 = vmul.f32 0.0078125, %v987_v0 }
 0x241   :  { %v1900_v15 = vpop.eup %1899  ;;  %v1073_v51 = vadd.f32 1e-05, %v1041_v7  ;;  %v1172_v34 = vmul.f32 %v2471_v26, %v1134_v36 }
 0x242   :  { %1683 = vst [vmem:[%s2627_s6 + $0x40] sm:$0xff] %v1624_v9   ;;  %v1209_v31 = vadd.f32 %v2479_v19, %v1171_v30  ;;  %v1149_v21 = vmul.f32 %v1900_v15, %v2346_v41  ;;  %v1074_v61 = vadd.f32 1e-05, %v1042_v53  ;;  %v1017_v14 = vpop.xlane.xlu1 %1016  ;;  %v1902_v24 = vpop.eup %1901 }
 0x243   :  { %v1019_v22 = vpop.xlane.xlu0 %1018  ;;  %1911 = vrsqrt.f32 %v1073_v51  ;;  %v1057_v16 = vmul.f32 0.0078125, %v1017_v14  ;;  %v1150_v11 = vmul.f32 %v1902_v24, %v2351_v52  ;;  %v1210_v46 = vadd.f32 %v2479_v19, %v1172_v34 }
 0x244   :  { %v1589_v29 = vpack.c.bf16 %v1209_v31, %v1208_v35  ;;  %v1187_v39 = vmul.f32 %v2471_v26, %v1149_v21  ;;  %v1058_v28 = vmul.f32 0.0078125, %v1019_v22  ;;  %1913 = vrsqrt.f32 %v1074_v61 }
 0x245   :  { %v1904_v33 = vpop.eup %1903  ;;  %v1089_v12 = vadd.f32 1e-05, %v1057_v16  ;;  %v1188_v52 = vmul.f32 %v2471_v26, %v1150_v11 }
 0x246   :  { %v1906_v37 = vpop.eup %1905  ;;  %1676 = vst [vmem:[%s2627_s6 + $0x8] sm:$0xff] %v1589_v29   ;;  %v1225_v41 = vadd.f32 %v2479_v19, %v1187_v39  ;;  %v1135_v45 = vmul.f32 %v1904_v33, %v2354_v58  ;;  %v1090_v44 = vadd.f32 1e-05, %v1058_v28  ;;  %v989_v49 = vpop.xlane.xlu1 %988 }
 0x247   :  { %v991_v43 = vpop.xlane.xlu0 %990  ;;  %1915 = vrsqrt.f32 %v1089_v12  ;;  %v1043_v62 = vmul.f32 0.0078125, %v989_v49  ;;  %v1136_v60 = vmul.f32 %v1906_v37, %v2361_v3  ;;  %v1226_v61 = vadd.f32 %v2479_v19, %v1188_v52 }
 0x248   :  { %v1629_v59 = vpack.c.bf16 %v1225_v41, %v1224_v50  ;;  %v1173_v47 = vmul.f32 %v2471_v26, %v1135_v45  ;;  %1917 = vrsqrt.f32 %v1090_v44  ;;  %v1044_v5 = vmul.f32 0.0078125, %v991_v43 }
 0x249   :  { %v1908_v17 = vpop.eup %1907  ;;  %v1075_v4 = vadd.f32 1e-05, %v1043_v62  ;;  %v1174_v35 = vmul.f32 %v2471_v26, %v1136_v60 }
 0x24a   :  { %v1910_v0 = vpop.eup %1909  ;;  %1684 = vst [vmem:[%s2627_s6 + $0x48] sm:$0xff] %v1629_v59   ;;  %v1211_v58 = vadd.f32 %v2479_v19, %v1173_v47  ;;  %v1151_v7 = vmul.f32 %v1908_v17, %v2366_v6  ;;  %v1076_v9 = vadd.f32 1e-05, %v1044_v5  ;;  %v1021_v30 = vpop.xlane.xlu1 %1020 }
 0x24b   :  { %v1023_v53 = vpop.xlane.xlu0 %1022  ;;  %1919 = vrsqrt.f32 %v1075_v4  ;;  %v1059_v15 = vmul.f32 0.0078125, %v1021_v30  ;;  %v1152_v31 = vmul.f32 %v1910_v0, %v2371_v10  ;;  %v1212_v34 = vadd.f32 %v2479_v19, %v1174_v35 }
 0x24c   :  { %v1594_v13 = vpack.c.bf16 %v1211_v58, %v1210_v46  ;;  %v1189_v3 = vmul.f32 %v2471_v26, %v1151_v7  ;;  %1921 = vrsqrt.f32 %v1076_v9  ;;  %v1060_v36 = vmul.f32 0.0078125, %v1023_v53 }
 0x24d   :  { %v1912_v51 = vpop.eup %1911  ;;  %v1091_v21 = vadd.f32 1e-05, %v1059_v15  ;;  %v1190_v12 = vmul.f32 %v2471_v26, %v1152_v31 }
 0x24e   :  { %1677 = vst [vmem:[%s2627_s6 + $0x10] sm:$0xff] %v1594_v13   ;;  %v1227_v6 = vadd.f32 %v2479_v19, %v1189_v3  ;;  %v1137_v14 = vmul.f32 %v1912_v51, %v2374_v23  ;;  %v1092_v22 = vadd.f32 1e-05, %v1060_v36  ;;  %v993_v24 = vpop.xlane.xlu1 %992  ;;  %v1914_v29 = vpop.eup %1913 }
 0x24f   :  { %v995_v16 = vpop.xlane.xlu0 %994  ;;  %1923 = vrsqrt.f32 %v1091_v21  ;;  %v1045_v39 = vmul.f32 0.0078125, %v993_v24  ;;  %v1138_v11 = vmul.f32 %v1914_v29, %v2381_v8  ;;  %v1228_v46 = vadd.f32 %v2479_v19, %v1190_v12 }
 0x250   :  { %v1634_v28 = vpack.c.bf16 %v1227_v6, %v1226_v61  ;;  %v1175_v10 = vmul.f32 %v2471_v26, %v1137_v14  ;;  %v1046_v33 = vmul.f32 0.0078125, %v995_v16  ;;  %1925 = vrsqrt.f32 %v1092_v22 }
 0x251   :  { %v1916_v50 = vpop.eup %1915  ;;  %v1077_v37 = vadd.f32 1e-05, %v1045_v39  ;;  %v1176_v8 = vmul.f32 %v2471_v26, %v1138_v11 }
 0x252   :  { %v1918_v41 = vpop.eup %1917  ;;  %1685 = vst [vmem:[%s2627_s6 + $0x50] sm:$0xff] %v1634_v28   ;;  %v1213_v23 = vadd.f32 %v2479_v19, %v1175_v10  ;;  %v1153_v45 = vmul.f32 %v1916_v50, %v2386_v27  ;;  %v1078_v44 = vadd.f32 1e-05, %v1046_v33  ;;  %v1025_v49 = vpop.xlane.xlu1 %1024 }
 0x253   :  { %v1027_v43 = vpop.xlane.xlu0 %1026  ;;  %1927 = vrsqrt.f32 %v1077_v37  ;;  %v1061_v62 = vmul.f32 0.0078125, %v1025_v49  ;;  %v1154_v60 = vmul.f32 %v1918_v41, %v2391_v38  ;;  %v1214_v35 = vadd.f32 %v2479_v19, %v1176_v8 }
 0x254   :  { %v1599_v59 = vpack.c.bf16 %v1213_v23, %v1212_v34  ;;  %v1191_v47 = vmul.f32 %v2471_v26, %v1153_v45  ;;  %v1062_v5 = vmul.f32 0.0078125, %v1027_v43  ;;  %1929 = vrsqrt.f32 %v1078_v44 }
 0x255   :  { %v1920_v17 = vpop.eup %1919  ;;  %v1093_v4 = vadd.f32 1e-05, %v1061_v62  ;;  %v1192_v3 = vmul.f32 %v2471_v26, %v1154_v60 }
 0x256   :  { %v1922_v0 = vpop.eup %1921  ;;  %1678 = vst [vmem:[%s2627_s6 + $0x18] sm:$0xff] %v1599_v59   ;;  %v1229_v27 = vadd.f32 %v2479_v19, %v1191_v47  ;;  %v1139_v52 = vmul.f32 %v1920_v17, %v2394_v55  ;;  %v1094_v58 = vadd.f32 1e-05, %v1062_v5  ;;  %v997_v7 = vpop.xlane.xlu1 %996 }
 0x257   :  { %v999_v9 = vpop.xlane.xlu0 %998  ;;  %1931 = vrsqrt.f32 %v1093_v4  ;;  %v1047_v30 = vmul.f32 0.0078125, %v997_v7  ;;  %v1140_v36 = vmul.f32 %v1922_v0, %v2401_v54  ;;  %v1230_v39 = vadd.f32 %v2479_v19, %v1192_v3 }
 0x258   :  { %v1639_v53 = vpack.c.bf16 %v1229_v27, %v1228_v46  ;;  %v1177_v38 = vmul.f32 %v2471_v26, %v1139_v52  ;;  %1933 = vrsqrt.f32 %v1094_v58  ;;  %v1048_v15 = vmul.f32 0.0078125, %v999_v9 }
 0x259   :  { %v1924_v13 = vpop.eup %1923  ;;  %v1079_v51 = vadd.f32 1e-05, %v1047_v30  ;;  %v1178_v28 = vmul.f32 %v2471_v26, %v1140_v36 }
 0x25a   :  { %1686 = vst [vmem:[%s2627_s6 + $0x58] sm:$0xff] %v1639_v53   ;;  %v1215_v55 = vadd.f32 %v2479_v19, %v1177_v38  ;;  %v1155_v31 = vmul.f32 %v1924_v13, %v2406_v57  ;;  %v1080_v21 = vadd.f32 1e-05, %v1048_v15  ;;  %v1029_v61 = vpop.xlane.xlu1 %1028  ;;  %v1926_v14 = vpop.eup %1925 }
 0x25b   :  { %v1031_v6 = vpop.xlane.xlu0 %1030  ;;  %1935 = vrsqrt.f32 %v1079_v51  ;;  %v1063_v22 = vmul.f32 0.0078125, %v1029_v61  ;;  %v1156_v33 = vmul.f32 %v1926_v14, %v2411_v1  ;;  %v1216_v44 = vadd.f32 %v2479_v19, %v1178_v28 }
 0x25c   :  { %v1604_v24 = vpack.c.bf16 %v1215_v55, %v1214_v35  ;;  %v1193_v54 = vmul.f32 %v2471_v26, %v1155_v31  ;;  %v1064_v16 = vmul.f32 0.0078125, %v1031_v6  ;;  %1937 = vrsqrt.f32 %v1080_v21 }
 0x25d   :  { %v1928_v29 = vpop.eup %1927  ;;  %v1095_v10 = vadd.f32 1e-05, %v1063_v22  ;;  %v1194_v1 = vmul.f32 %v2471_v26, %v1156_v33 }
 0x25e   :  { %1679 = vst [vmem:[%s2627_s6 + $0x20] sm:$0xff] %v1604_v24   ;;  %v1231_v57 = vadd.f32 %v2479_v19, %v1193_v54  ;;  %v1141_v50 = vmul.f32 %v1928_v29, %v2414_v25  ;;  %v1096_v34 = vadd.f32 1e-05, %v1064_v16  ;;  %v1001_v12 = vpop.xlane.xlu1 %1000  ;;  %v1930_v37 = vpop.eup %1929 }
 0x25f   :  { %1939 = vrsqrt.f32 %v1095_v10  ;;  %v1049_v41 = vmul.f32 0.0078125, %v1001_v12  ;;  %v1142_v62 = vmul.f32 %v1930_v37, %v2421_v18  ;;  %v1232_v8 = vadd.f32 %v2479_v19, %v1194_v1 }
 0x260   :  { %v1644_v23 = vpack.c.bf16 %v1231_v57, %v1230_v39  ;;  %v1179_v11 = vmul.f32 %v2471_v26, %v1141_v50  ;;  %1941 = vrsqrt.f32 %v1096_v34 }
 0x261   :  { %v1932_v45 = vpop.eup %1931  ;;  %v1081_v49 = vadd.f32 1e-05, %v1049_v41  ;;  %v1180_v18 = vmul.f32 %v2471_v26, %v1142_v62 }
 0x262   :  { %v1934_v43 = vpop.eup %1933  ;;  %1687 = vst [vmem:[%s2627_s6 + $0x60] sm:$0xff] %v1644_v23   ;;  %v1217_v25 = vadd.f32 %v2479_v19, %v1179_v11  ;;  %v1157_v59 = vmul.f32 %v1932_v45, %v2426_v20  ;;  %v1033_v47 = vpop.xlane.xlu1 %1032 }
 0x263   :  { %1943 = vrsqrt.f32 %v1081_v49  ;;  %v1065_v5 = vmul.f32 0.0078125, %v1033_v47  ;;  %v1158_v4 = vmul.f32 %v1934_v43, %v2431_v32  ;;  %v1218_v30 = vadd.f32 %v2479_v19, %v1180_v18 }
 0x264   :  { %v1609_v17 = vpack.c.bf16 %v1217_v25, %v1216_v44  ;;  %v1195_v46 = vmul.f32 %v2471_v26, %v1157_v59 }
 0x265   :  { %v1936_v60 = vpop.eup %1935  ;;  %v1097_v0 = vadd.f32 1e-05, %v1065_v5  ;;  %v1196_v32 = vmul.f32 %v2471_v26, %v1158_v4 }
 0x266   :  { %1680 = vst [vmem:[%s2627_s6 + $0x28] sm:$0xff] %v1609_v17   ;;  %v1233_v20 = vadd.f32 %v2479_v19, %v1195_v46  ;;  %v1143_v27 = vmul.f32 %v1936_v60, %v2434_v2  ;;  %v1938_v52 = vpop.eup %1937 }
 0x267   :  { %1945 = vrsqrt.f32 %v1097_v0  ;;  %v1144_v38 = vmul.f32 %v1938_v52, %v2441_v40  ;;  %v1234_v51 = vadd.f32 %v2479_v19, %v1196_v32 }
 0x268   :  { %v1649_v58 = vpack.c.bf16 %v1233_v20, %v1232_v8  ;;  %v1181_v7 = vmul.f32 %v2471_v26, %v1143_v27 }
 0x269   :  { %v1940_v9 = vpop.eup %1939  ;;  %v1182_v35 = vmul.f32 %v2471_v26, %v1144_v38 }
 0x26a   :  { %1688 = vst [vmem:[%s2627_s6 + $0x68] sm:$0xff] %v1649_v58   ;;  %v1219_v53 = vadd.f32 %v2479_v19, %v1181_v7  ;;  %v1159_v2 = vmul.f32 %v1940_v9, %v2446_v42  ;;  %v1942_v15 = vpop.eup %1941 }
 0x26b   :  { %v1160_v31 = vmul.f32 %v1942_v15, %v2451_v63  ;;  %v1220_v6 = vadd.f32 %v2479_v19, %v1182_v35 }
 0x26c   :  { %v1614_v13 = vpack.c.bf16 %v1219_v53, %v1218_v30  ;;  %v1197_v3 = vmul.f32 %v2471_v26, %v1159_v2 }
 0x26d   :  { %v1944_v36 = vpop.eup %1943  ;;  %v1198_v14 = vmul.f32 %v2471_v26, %v1160_v31 }
 0x26e   :  { %1681 = vst [vmem:[%s2627_s6 + $0x30] sm:$0xff] %v1614_v13   ;;  %v1235_v55 = vadd.f32 %v2479_v19, %v1197_v3  ;;  %v1145_v40 = vmul.f32 %v1944_v36, %v2454_v56 }
 0x26f   :  { %v1236_v56 = vadd.f32 %v2479_v19, %v1198_v14 }
 0x270   :  { %v1654_v42 = vpack.c.bf16 %v1235_v55, %v1234_v51  ;;  %v1183_v21 = vmul.f32 %v2471_v26, %v1145_v40 }
 0x271   :  { %v1946_v61 = vpop.eup %1945 }
 0x272   :  { %1689 = vst [vmem:[%s2627_s6 + $0x70] sm:$0xff] %v1654_v42   ;;  %v1221_v22 = vadd.f32 %v2479_v19, %v1183_v21  ;;  %v1161_v24 = vmul.f32 %v1946_v61, %v2461_v48 }
 0x274   :  { %v1619_v54 = vpack.c.bf16 %v1221_v22, %v1220_v6  ;;  %v1199_v63 = vmul.f32 %v2471_v26, %v1161_v24 }
 0x276   :  { %1682 = vst [vmem:[%s2627_s6 + $0x38] sm:$0xff] %v1619_v54   ;;  %v1237_v16 = vadd.f32 %v2479_v19, %v1199_v63 }
 0x278   :  { %v1659_v29 = vpack.c.bf16 %v1237_v16, %v1236_v56 }
 0x27a   :  { %1690 = vst [vmem:[%s2627_s6 + $0x78] sm:$0xff] %v1659_v29  }

// kernel: _lambda_.23
= control target key start
LH: loop header
LB: loop body
LE: loop exit
PB: predicated region body
PF: predicated region fallthrough
CT: control target
= control target key end

     0   :  { %v953_v2 = vmov 0   ;;  %s1096_s0 = inlined_call_operand.vmem [shape: bf16[256,128], index: 0, kind: input, shape index: {}]   ;;  %s1097_s1 = inlined_call_operand.vmem [shape: bf16[128,256], index: 1, kind: input, shape index: {}]   ;;  %s1098_s2 = inlined_call_operand.hbm [shape: f32[256,256], index: 2, kind: output, shape index: {}]  }
   0x1   :  { %v889_v0 = vld [vmem:[%s1097_s1 + $0x4] ss:$8 sps:$4 sm:$0xff]   ;;  %v891_v1 = vld [vmem:[%s1097_s1] ss:$8 sps:$4 sm:$0xff]   ;;  %401 = vmatprep.mubr.bf16.mxu0 %v953_v2  ;;  %481 = vmatprep.mubr.bf16.mxu1 %v953_v2  ;;  %v892_v3 = vld [vmem:[%s1097_s1 + $0x14] ss:$8 sps:$4 sm:$0xff]  }
   0x2   :  { %369 = vmatprep.subr.bf16.mxu0 %v889_v0  ;;  %869 = vmatprep.subr.bf16.mxu1 %v889_v0  ;;  %v894_v4 = vld [vmem:[%s1097_s1 + $0x10] ss:$8 sps:$4 sm:$0xff]   ;;  %v895_v5 = vld [vmem:[%s1097_s1 + $0x24] ss:$8 sps:$4 sm:$0xff]   ;;  %v897_v6 = vld [vmem:[%s1097_s1 + $0x20] ss:$8 sps:$4 sm:$0xff]  }
   0x3   :  { %370 = vmatpush1.bf16.msra.mxu0 %v891_v1  ;;  %877 = vmatpush1.bf16.msra.mxu1 %v891_v1  ;;  %v898_v7 = vld [vmem:[%s1097_s1 + $0x34] ss:$8 sps:$4 sm:$0xff]   ;;  %v900_v8 = vld [vmem:[%s1097_s1 + $0x30] ss:$8 sps:$4 sm:$0xff]   ;;  %v901_v9 = vld [vmem:[%s1097_s1 + $0x44] ss:$8 sps:$4 sm:$0xff]  }
   0x4   :  { %371 = vmatprep.subr.bf16.mxu0 %v892_v3  ;;  %870 = vmatprep.subr.bf16.mxu1 %v892_v3  ;;  %v903_v10 = vld [vmem:[%s1097_s1 + $0x40] ss:$8 sps:$4 sm:$0xff]   ;;  %v904_v11 = vld [vmem:[%s1097_s1 + $0x54] ss:$8 sps:$4 sm:$0xff]   ;;  %v906_v12 = vld [vmem:[%s1097_s1 + $0x50] ss:$8 sps:$4 sm:$0xff]  }
   0x5   :  { %v907_v13 = vld [vmem:[%s1097_s1 + $0x64] ss:$8 sps:$4 sm:$0xff]   ;;  %v909_v14 = vld [vmem:[%s1097_s1 + $0x60] ss:$8 sps:$4 sm:$0xff]   ;;  %v910_v15 = vld [vmem:[%s1097_s1 + $0x74] ss:$8 sps:$4 sm:$0xff]  }
   0x7   :  { %372 = vmatpush1.bf16.msra.mxu0 %v894_v4  ;;  %878 = vmatpush1.bf16.msra.mxu1 %v894_v4 }
   0x8   :  { %373 = vmatprep.subr.bf16.mxu0 %v895_v5  ;;  %871 = vmatprep.subr.bf16.mxu1 %v895_v5 }
   0xb   :  { %374 = vmatpush1.bf16.msra.mxu0 %v897_v6  ;;  %879 = vmatpush1.bf16.msra.mxu1 %v897_v6 }
   0xc   :  { %375 = vmatprep.subr.bf16.mxu0 %v898_v7  ;;  %872 = vmatprep.subr.bf16.mxu1 %v898_v7 }
   0xf   :  { %376 = vmatpush1.bf16.msra.mxu0 %v900_v8  ;;  %880 = vmatpush1.bf16.msra.mxu1 %v900_v8 }
  0x10   :  { %377 = vmatprep.subr.bf16.mxu0 %v901_v9  ;;  %873 = vmatprep.subr.bf16.mxu1 %v901_v9 }
  0x13   :  { %378 = vmatpush1.bf16.msra.mxu0 %v903_v10  ;;  %881 = vmatpush1.bf16.msra.mxu1 %v903_v10 }
  0x14   :  { %379 = vmatprep.subr.bf16.mxu0 %v904_v11  ;;  %874 = vmatprep.subr.bf16.mxu1 %v904_v11 }
  0x17   :  { %380 = vmatpush1.bf16.msra.mxu0 %v906_v12  ;;  %882 = vmatpush1.bf16.msra.mxu1 %v906_v12 }
  0x18   :  { %381 = vmatprep.subr.bf16.mxu0 %v907_v13  ;;  %875 = vmatprep.subr.bf16.mxu1 %v907_v13 }
  0x19   :  { %7 = vsyncpa [#allocation4], 0  ;;  %v912_v16 = vld [vmem:[%s1097_s1 + $0x70] ss:$8 sps:$4 sm:$0xff]   ;;  %v913_v17 = vld [vmem:[%s1096_s0] sm:$0xff]  }
  0x1a   :  { %v914_v18 = vld [vmem:[%s1096_s0 + $0x40] sm:$0xff]   ;;  %v915_v19 = vld [vmem:[%s1096_s0 + $0x8] sm:$0xff]   ;;  %v917_v21 = vld [vmem:[%s1096_s0 + $0x10] sm:$0xff]  }
  0x1b   :  { %382 = vmatpush1.bf16.msra.mxu0 %v909_v14  ;;  %883 = vmatpush1.bf16.msra.mxu1 %v909_v14  ;;  %v916_v20 = vld [vmem:[%s1096_s0 + $0x48] sm:$0xff]   ;;  %v918_v22 = vld [vmem:[%s1096_s0 + $0x50] sm:$0xff]   ;;  %v919_v23 = vld [vmem:[%s1096_s0 + $0x18] sm:$0xff]  }
  0x1c   :  { %383 = vmatprep.subr.bf16.mxu0 %v910_v15  ;;  %876 = vmatprep.subr.bf16.mxu1 %v910_v15  ;;  %v920_v24 = vld [vmem:[%s1096_s0 + $0x58] sm:$0xff]   ;;  %v921_v25 = vld [vmem:[%s1096_s0 + $0x20] sm:$0xff]   ;;  %v923_v27 = vld [vmem:[%s1096_s0 + $0x28] sm:$0xff]  }
  0x1d   :  { %v922_v26 = vld [vmem:[%s1096_s0 + $0x60] sm:$0xff]   ;;  %v924_v28 = vld [vmem:[%s1096_s0 + $0x68] sm:$0xff]   ;;  %v925_v29 = vld [vmem:[%s1096_s0 + $0x30] sm:$0xff]  }
  0x1e   :  { %v926_v30 = vld [vmem:[%s1096_s0 + $0x70] sm:$0xff]   ;;  %v927_v31 = vld [vmem:[%s1096_s0 + $0x38] sm:$0xff]  }
  0x1f   :  { %384 = vmatpush1.bf16.msra.mxu0 %v912_v16  ;;  %884 = vmatpush1.bf16.msra.mxu1 %v912_v16  ;;  %v928_v32 = vld [vmem:[%s1096_s0 + $0x78] sm:$0xff]   ;;  %s954_s0 = smov [#allocation3]  }
  0x20   :  { %s826_s16 = sshll.u32 %s954_s0, 4  ;;  %s827_s16 = int_to_ptr.vmem [resolvable:$true] %s826_s16 }
  0x21   :  { %s929_s17 = scalar_lea.vmem %s827_s16, 8192  ;;  %p934_p1 = scmp.lt.s32.totalorder %s827_s16, %s827_s16 }
  0x22   :  { %402 = vmatmul.mubr.bf16.vlgmr.msra.gmra.mrb[0].mxu0 %v913_v17  ;;  %482 = vmatmul.mubr.bf16.vlgmr.msra.gmra.mrb[0].mxu1 %v914_v18  ;;  %p930_p0 = scmp.ne.s32.totalorder %s827_s16, %s929_s17  ;;  %p935_p2 = scmp.lt.s32.totalorder %s929_s17, %s929_s17 }
  0x23   :  { %411 = vmatprep.mubr.bf16.mxu0 %v953_v2  ;;  %491 = vmatprep.mubr.bf16.mxu1 %v953_v2 }
  0x24   :  { %p936_p3 = por %p935_p2, %p934_p1 }
  0x26   :  { %p937_p4 = pnand %p936_p3, %p930_p0 }
  0x2a   :  { %412 = vmatmul.mubr.bf16.gmra.mrb[4].mxu0 %v915_v19  ;;  %492 = vmatmul.mubr.bf16.gmra.mrb[4].mxu1 %v916_v20 }
  0x2b   :  { %421 = vmatprep.mubr.bf16.mxu0 %v953_v2  ;;  %501 = vmatprep.mubr.bf16.mxu1 %v953_v2 }
  0x32   :  { %422 = vmatmul.mubr.bf16.gmra.mrb[8].mxu0 %v917_v21  ;;  %502 = vmatmul.mubr.bf16.gmra.mrb[8].mxu1 %v918_v22 }
  0x33   :  { %431 = vmatprep.mubr.bf16.mxu0 %v953_v2  ;;  %511 = vmatprep.mubr.bf16.mxu1 %v953_v2 }
  0x3a   :  { %432 = vmatmul.mubr.bf16.gmra.mrb[12].mxu0 %v919_v23  ;;  %512 = vmatmul.mubr.bf16.gmra.mrb[12].mxu1 %v920_v24 }
  0x3b   :  { %441 = vmatprep.mubr.bf16.mxu0 %v953_v2  ;;  %521 = vmatprep.mubr.bf16.mxu1 %v953_v2 }
  0x42   :  { %442 = vmatmul.mubr.bf16.gmra.mrb[16].mxu0 %v921_v25  ;;  %522 = vmatmul.mubr.bf16.gmra.mrb[16].mxu1 %v922_v26 }
  0x43   :  { %451 = vmatprep.mubr.bf16.mxu0 %v953_v2  ;;  %531 = vmatprep.mubr.bf16.mxu1 %v953_v2 }
  0x4a   :  { %452 = vmatmul.mubr.bf16.gmra.mrb[20].mxu0 %v923_v27  ;;  %532 = vmatmul.mubr.bf16.gmra.mrb[20].mxu1 %v924_v28 }
  0x4b   :  { %461 = vmatprep.mubr.bf16.mxu0 %v953_v2  ;;  %541 = vmatprep.mubr.bf16.mxu1 %v953_v2 }
  0x52   :  { %462 = vmatmul.mubr.bf16.gmra.mrb[24].mxu0 %v925_v29  ;;  %542 = vmatmul.mubr.bf16.gmra.mrb[24].mxu1 %v926_v30 }
  0x53   :  { %471 = vmatprep.mubr.bf16.mxu0 %v953_v2  ;;  %551 = vmatprep.mubr.bf16.mxu1 %v953_v2 }
  0x5a   :  { %472 = vmatmul.mubr.bf16.gmra.mrb[28].mxu0 %v927_v31  ;;  %552 = vmatmul.mubr.bf16.gmra.mrb[28].mxu1 %v928_v32 }
  0xf5   :  { %v403_v33 = vpop.f32.mrb[0].mxu0  ;;  %v483_v34 = vpop.f32.mrb[0].mxu1 }
  0xf6   :  { %757 = vst [vmem:[#allocation3] sm:$0xff] %v403_v33  ;;  %789 = vst [vmem:[#allocation3 + $0x100] sm:$0xff] %v483_v34  ;;  %v405_v35 = vpop.f32.mrb[1].mxu0  ;;  %v485_v36 = vpop.f32.mrb[1].mxu1 }
  0xf7   :  { %758 = vst [vmem:[#allocation3 + $0x8] sm:$0xff] %v405_v35  ;;  %790 = vst [vmem:[#allocation3 + $0x108] sm:$0xff] %v485_v36  ;;  %v407_v37 = vpop.f32.mrb[2].mxu0  ;;  %v487_v38 = vpop.f32.mrb[2].mxu1 }
  0xf8   :  { %759 = vst [vmem:[#allocation3 + $0x10] sm:$0xff] %v407_v37  ;;  %791 = vst [vmem:[#allocation3 + $0x110] sm:$0xff] %v487_v38  ;;  %v409_v39 = vpop.f32.mrb[3].mxu0  ;;  %v489_v40 = vpop.f32.mrb[3].mxu1 }
  0xf9   :  { %760 = vst [vmem:[#allocation3 + $0x18] sm:$0xff] %v409_v39  ;;  %792 = vst [vmem:[#allocation3 + $0x118] sm:$0xff] %v489_v40 }
  0xfd   :  { %v413_v41 = vpop.f32.mrb[4].mxu0  ;;  %v493_v42 = vpop.f32.mrb[4].mxu1 }
  0xfe   :  { %761 = vst [vmem:[#allocation3 + $0x20] sm:$0xff] %v413_v41  ;;  %793 = vst [vmem:[#allocation3 + $0x120] sm:$0xff] %v493_v42  ;;  %v415_v43 = vpop.f32.mrb[5].mxu0  ;;  %v495_v44 = vpop.f32.mrb[5].mxu1 }
  0xff   :  { %762 = vst [vmem:[#allocation3 + $0x28] sm:$0xff] %v415_v43  ;;  %794 = vst [vmem:[#allocation3 + $0x128] sm:$0xff] %v495_v44  ;;  %v417_v45 = vpop.f32.mrb[6].mxu0  ;;  %v497_v46 = vpop.f32.mrb[6].mxu1 }
 0x100   :  { %763 = vst [vmem:[#allocation3 + $0x30] sm:$0xff] %v417_v45  ;;  %795 = vst [vmem:[#allocation3 + $0x130] sm:$0xff] %v497_v46  ;;  %v419_v47 = vpop.f32.mrb[7].mxu0  ;;  %v499_v48 = vpop.f32.mrb[7].mxu1 }
 0x101   :  { %764 = vst [vmem:[#allocation3 + $0x38] sm:$0xff] %v419_v47  ;;  %796 = vst [vmem:[#allocation3 + $0x138] sm:$0xff] %v499_v48 }
 0x105   :  { %v423_v49 = vpop.f32.mrb[8].mxu0  ;;  %v503_v50 = vpop.f32.mrb[8].mxu1 }
 0x106   :  { %765 = vst [vmem:[#allocation3 + $0x40] sm:$0xff] %v423_v49  ;;  %797 = vst [vmem:[#allocation3 + $0x140] sm:$0xff] %v503_v50  ;;  %v425_v51 = vpop.f32.mrb[9].mxu0  ;;  %v505_v52 = vpop.f32.mrb[9].mxu1 }
 0x107   :  { %766 = vst [vmem:[#allocation3 + $0x48] sm:$0xff] %v425_v51  ;;  %798 = vst [vmem:[#allocation3 + $0x148] sm:$0xff] %v505_v52  ;;  %v427_v53 = vpop.f32.mrb[10].mxu0  ;;  %v507_v54 = vpop.f32.mrb[10].mxu1 }
 0x108   :  { %767 = vst [vmem:[#allocation3 + $0x50] sm:$0xff] %v427_v53  ;;  %799 = vst [vmem:[#allocation3 + $0x150] sm:$0xff] %v507_v54  ;;  %v429_v55 = vpop.f32.mrb[11].mxu0  ;;  %v509_v56 = vpop.f32.mrb[11].mxu1 }
 0x109   :  { %768 = vst [vmem:[#allocation3 + $0x58] sm:$0xff] %v429_v55  ;;  %800 = vst [vmem:[#allocation3 + $0x158] sm:$0xff] %v509_v56 }
 0x10d   :  { %v433_v57 = vpop.f32.mrb[12].mxu0  ;;  %v513_v58 = vpop.f32.mrb[12].mxu1 }
 0x10e   :  { %769 = vst [vmem:[#allocation3 + $0x60] sm:$0xff] %v433_v57  ;;  %801 = vst [vmem:[#allocation3 + $0x160] sm:$0xff] %v513_v58  ;;  %v435_v59 = vpop.f32.mrb[13].mxu0  ;;  %v515_v60 = vpop.f32.mrb[13].mxu1 }
 0x10f   :  { %770 = vst [vmem:[#allocation3 + $0x68] sm:$0xff] %v435_v59  ;;  %802 = vst [vmem:[#allocation3 + $0x168] sm:$0xff] %v515_v60  ;;  %v437_v61 = vpop.f32.mrb[14].mxu0  ;;  %v517_v62 = vpop.f32.mrb[14].mxu1 }
 0x110   :  { %771 = vst [vmem:[#allocation3 + $0x70] sm:$0xff] %v437_v61  ;;  %803 = vst [vmem:[#allocation3 + $0x170] sm:$0xff] %v517_v62  ;;  %v439_v63 = vpop.f32.mrb[15].mxu0  ;;  %v519_v0 = vpop.f32.mrb[15].mxu1 }
 0x111   :  { %772 = vst [vmem:[#allocation3 + $0x78] sm:$0xff] %v439_v63  ;;  %804 = vst [vmem:[#allocation3 + $0x178] sm:$0xff] %v519_v0 }
 0x115   :  { %v443_v1 = vpop.f32.mrb[16].mxu0  ;;  %v523_v2 = vpop.f32.mrb[16].mxu1 }
 0x116   :  { %773 = vst [vmem:[#allocation3 + $0x80] sm:$0xff] %v443_v1  ;;  %805 = vst [vmem:[#allocation3 + $0x180] sm:$0xff] %v523_v2  ;;  %v445_v3 = vpop.f32.mrb[17].mxu0  ;;  %v525_v4 = vpop.f32.mrb[17].mxu1 }
 0x117   :  { %774 = vst [vmem:[#allocation3 + $0x88] sm:$0xff] %v445_v3  ;;  %806 = vst [vmem:[#allocation3 + $0x188] sm:$0xff] %v525_v4  ;;  %v447_v5 = vpop.f32.mrb[18].mxu0  ;;  %v527_v6 = vpop.f32.mrb[18].mxu1 }
 0x118   :  { %775 = vst [vmem:[#allocation3 + $0x90] sm:$0xff] %v447_v5  ;;  %807 = vst [vmem:[#allocation3 + $0x190] sm:$0xff] %v527_v6  ;;  %v449_v7 = vpop.f32.mrb[19].mxu0  ;;  %v529_v8 = vpop.f32.mrb[19].mxu1 }
 0x119   :  { %776 = vst [vmem:[#allocation3 + $0x98] sm:$0xff] %v449_v7  ;;  %808 = vst [vmem:[#allocation3 + $0x198] sm:$0xff] %v529_v8 }
 0x11d   :  { %v453_v9 = vpop.f32.mrb[20].mxu0  ;;  %v533_v10 = vpop.f32.mrb[20].mxu1 }
 0x11e   :  { %777 = vst [vmem:[#allocation3 + $0xa0] sm:$0xff] %v453_v9  ;;  %809 = vst [vmem:[#allocation3 + $0x1a0] sm:$0xff] %v533_v10  ;;  %v455_v11 = vpop.f32.mrb[21].mxu0  ;;  %v535_v12 = vpop.f32.mrb[21].mxu1 }
 0x11f   :  { %778 = vst [vmem:[#allocation3 + $0xa8] sm:$0xff] %v455_v11  ;;  %810 = vst [vmem:[#allocation3 + $0x1a8] sm:$0xff] %v535_v12  ;;  %v457_v13 = vpop.f32.mrb[22].mxu0  ;;  %v537_v14 = vpop.f32.mrb[22].mxu1 }
 0x120   :  { %779 = vst [vmem:[#allocation3 + $0xb0] sm:$0xff] %v457_v13  ;;  %811 = vst [vmem:[#allocation3 + $0x1b0] sm:$0xff] %v537_v14  ;;  %v459_v15 = vpop.f32.mrb[23].mxu0  ;;  %v539_v16 = vpop.f32.mrb[23].mxu1 }
 0x121   :  { %780 = vst [vmem:[#allocation3 + $0xb8] sm:$0xff] %v459_v15  ;;  %812 = vst [vmem:[#allocation3 + $0x1b8] sm:$0xff] %v539_v16 }
 0x125   :  { %v463_v17 = vpop.f32.mrb[24].mxu0  ;;  %v543_v18 = vpop.f32.mrb[24].mxu1 }
 0x126   :  { %781 = vst [vmem:[#allocation3 + $0xc0] sm:$0xff] %v463_v17  ;;  %813 = vst [vmem:[#allocation3 + $0x1c0] sm:$0xff] %v543_v18  ;;  %v465_v19 = vpop.f32.mrb[25].mxu0  ;;  %v545_v20 = vpop.f32.mrb[25].mxu1 }
 0x127   :  { %782 = vst [vmem:[#allocation3 + $0xc8] sm:$0xff] %v465_v19  ;;  %814 = vst [vmem:[#allocation3 + $0x1c8] sm:$0xff] %v545_v20  ;;  %v467_v21 = vpop.f32.mrb[26].mxu0  ;;  %v547_v22 = vpop.f32.mrb[26].mxu1 }
 0x128   :  { %783 = vst [vmem:[#allocation3 + $0xd0] sm:$0xff] %v467_v21  ;;  %815 = vst [vmem:[#allocation3 + $0x1d0] sm:$0xff] %v547_v22  ;;  %v469_v23 = vpop.f32.mrb[27].mxu0  ;;  %v549_v24 = vpop.f32.mrb[27].mxu1 }
 0x129   :  { %784 = vst [vmem:[#allocation3 + $0xd8] sm:$0xff] %v469_v23  ;;  %816 = vst [vmem:[#allocation3 + $0x1d8] sm:$0xff] %v549_v24 }
 0x12d   :  { %v473_v25 = vpop.f32.mrb[28].mxu0  ;;  %v553_v26 = vpop.f32.mrb[28].mxu1 }
 0x12e   :  { %785 = vst [vmem:[#allocation3 + $0xe0] sm:$0xff] %v473_v25  ;;  %817 = vst [vmem:[#allocation3 + $0x1e0] sm:$0xff] %v553_v26  ;;  %v475_v27 = vpop.f32.mrb[29].mxu0  ;;  %v555_v28 = vpop.f32.mrb[29].mxu1 }
 0x12f   :  { %786 = vst [vmem:[#allocation3 + $0xe8] sm:$0xff] %v475_v27  ;;  %818 = vst [vmem:[#allocation3 + $0x1e8] sm:$0xff] %v555_v28  ;;  %v477_v29 = vpop.f32.mrb[30].mxu0  ;;  %v557_v30 = vpop.f32.mrb[30].mxu1 }
 0x130   :  { %787 = vst [vmem:[#allocation3 + $0xf0] sm:$0xff] %v477_v29  ;;  %819 = vst [vmem:[#allocation3 + $0x1f0] sm:$0xff] %v557_v30  ;;  %v479_v31 = vpop.f32.mrb[31].mxu0  ;;  %v559_v32 = vpop.f32.mrb[31].mxu1 }
 0x131   :  { %788 = vst [vmem:[#allocation3 + $0xf8] sm:$0xff] %v479_v31  ;;  %820 = vst [vmem:[#allocation3 + $0x1f8] sm:$0xff] %v559_v32 }
 0x132   :  { %940 = shalt.err (!%p937_p4)
}
 0x133   :  { %s941_s19 = scalar_lea.hbm %s1098_s2, 8192 }
 0x134   :  { %p942_p5 = scmp.ne.s32.totalorder %s1098_s2, %s941_s19  ;;  %p945_p6 = scmp.lt.u32.totalorder %s941_s19, %s1098_s2 }
 0x136   :  { %p947_p7 = pnand %p945_p6, %p942_p5 }
 0x138   :  { %950 = shalt.err (!%p947_p7)
}
 0x139   :  { %s955_s24 = smov 256   ;;  %s956_s25 = smov 16  }
 0x13a   :  { %832 = dma.vmem_to_hbm [thread:$0]  %s827_s16, 8192, %s1098_s2, [#allocation4], %s955_s24, %s955_s24, %s956_s25  }
 0x13b   :  { %951 = dma.done.wait [#allocation4], 8192  }
 0x13c   :  { %952 = vsyncadd [#allocation4], 4294959104 }
 0x13d   :  { %836 = vsyncpa [#allocation4], 1 }

</bundles_post_ra>
